<compile_context>
chip_gen: v7x
topology: tpu7x:2x2x1
jax: 0.10.0
libtpu: 0.0.40
codegen_flags: <defaults>
</compile_context>

<pallas_src>
import functools

import numpy as np
import jax
import jax.numpy as jnp
from jax.experimental import pallas as pl
from jax.experimental.pallas import tpu as pltpu


# ----------------------------- helpers (plain JAX) ---------------------------
def positional_encoding(positions, freqs):
    """Matches the PyTorch helper: sin/cos of positions * 2**k, k in [0, freqs)."""
    freq_bands = (2.0 ** jnp.arange(freqs)).astype(positions.dtype)
    pts = (positions[..., None] * freq_bands).reshape(
        positions.shape[:-1] + (freqs * positions.shape[-1],)
    )
    return jnp.concatenate([jnp.sin(pts), jnp.cos(pts)], axis=-1)


def _round_up(x, m):
    return (x + m - 1) // m * m


def _pe_lane_tables(in_ch, pospe, viewpe):
    """Static lane tables for the fused positional-encoding layout.

    Kernel activation lanes: [features(in_ch) | viewdirs(3) | pts(3) | R blocks
    of 6 PE lanes], R = 2*max(pospe, viewpe).  PE block j, channel c:
      c < 3  -> viewdirs channel c,  c >= 3 -> pts channel c-3
      j < pe        -> sin(x * 2^j)
      pe <= j < 2pe -> cos(x * 2^(j-pe))  (computed as sin(. + pi/2))
      otherwise     -> unused lane (its W1 row is zero).
    Returns (R, scale[6R], phase[6R], w1_src_row[6R], used[6R]).
    """
    R = 2 * max(pospe, viewpe)
    n_pe = 6 * R
    scale = np.zeros((n_pe,), np.float32)
    phase = np.zeros((n_pe,), np.float32)
    src = np.zeros((n_pe,), np.int32)
    used = np.zeros((n_pe,), np.float32)
    off_pe_pts = in_ch + 3
    off_pe_view = off_pe_pts + (6 * pospe if pospe > 0 else 0)
    for j in range(R):
        for c in range(6):
            pe = viewpe if c < 3 else pospe
            base = off_pe_view if c < 3 else off_pe_pts
            ch = c if c < 3 else c - 3
            if pe == 0 or j >= 2 * pe:
                continue
            k = j if j < pe else j - pe
            idx = 6 * j + c
            scale[idx] = 2.0 ** k
            phase[idx] = 0.0 if j < pe else np.pi / 2.0
            src[idx] = base + (0 if j < pe else 3 * pe) + ch * pe + k
            used[idx] = 1.0
    return R, scale, phase, src, used


def _pack_layer1(w1, in_ch, src, used, k_pad, dtype):
    """Row-permute & zero-pad W1 to match the kernel's activation lane layout."""
    feat_c = w1.shape[1]
    n_pe = int(src.shape[0])
    rows = [w1[:in_ch + 3],                                # features | viewdirs
            jnp.zeros((3, feat_c), w1.dtype)]              # raw pts lanes: unused
    if n_pe:
        rows.append(w1[jnp.asarray(src)] * jnp.asarray(used)[:, None])
    k_act = in_ch + 6 + n_pe
    if k_pad > k_act:
        rows.append(jnp.zeros((k_pad - k_act, feat_c), w1.dtype))
    return jnp.concatenate(rows, axis=0).astype(dtype)


# ------------------------------- Pallas kernel -------------------------------
def _make_mlp_pe_kernel(tile, n_row, in_ch, R, k_act, k_pad, compute_dtype):
    n_pe = 6 * R

    def kernel(*refs):
        if n_pe:
            (row_ref, scale_ref, phase_ref, w1_ref, b1_ref, w2_ref, b2_ref,
             w3_ref, b3_ref, o_ref, act_ref) = refs
        else:
            (row_ref, w1_ref, b1_ref, w2_ref, b2_ref,
             w3_ref, b3_ref, o_ref, act_ref) = refs

        row = row_ref[...]                                  # (tile, n_row) f32

        # Assemble the fused layer-1 activation in bf16 VMEM:
        #   [features | viewdirs | pts | sin(PE lanes) | zero pad]
        act_ref[:, 0:n_row] = row.astype(compute_dtype)
        if n_pe:
            # Exact 2^k scaling on the VPU (f32 * power-of-two is exact); cos is
            # folded into the single sin pass via a +pi/2 phase.  Lane
            # replication of the 6 raw lanes runs on the (otherwise idle) XLU.
            pv = row[:, in_ch:in_ch + 6]                    # [viewdirs | pts] f32
            rep = jnp.concatenate([pv] * R, axis=-1)        # (tile, 6R)
            ang = rep * scale_ref[...] + phase_ref[...]
            act_ref[:, n_row:n_row + n_pe] = jnp.sin(ang).astype(compute_dtype)
        if k_pad > k_act:
            # Zero the padding lanes every step (cheap; a once-per-call init via
            # pl.when(program_id==0) would be skipped on the second TensorCore
            # when the parallel grid axis is sharded across cores).
            act_ref[:, k_act:] = jnp.zeros((tile, k_pad - k_act), compute_dtype)

        def mm(a, w_ref):
            return jnp.dot(a, w_ref[...], preferred_element_type=jnp.float32)

        # Layer 1 is ONE K=k_pad matmul (W1 was row-permuted/padded to match).
        h = jnp.maximum(mm(act_ref[...], w1_ref) + b1_ref[...], 0.0)
        h = jnp.maximum(mm(h.astype(compute_dtype), w2_ref) + b2_ref[...], 0.0)
        out = mm(h.astype(compute_dtype), w3_ref) + b3_ref[...]
        o_ref[...] = jax.nn.sigmoid(out).astype(o_ref.dtype)

    return kernel


def _fused_mlp_pe(pts, viewdirs, features, params, *, pospe, viewpe,
                  tile_n=1024, matmul_dtype=jnp.bfloat16, vmem_limit_bytes=None):
    """Fused PE + concat + 3-layer MLP + sigmoid.  Returns (N, 3) f32."""
    w1, b1, w2, b2, w3, b3 = params
    n, in_ch = features.shape
    feat_c = w2.shape[0]
    out_dim = w3.shape[1]
    cd = matmul_dtype

    R, scale, phase, src, used = _pe_lane_tables(in_ch, pospe, viewpe)
    n_pe = 6 * R
    n_row = in_ch + 6                  # merged HBM row: [features|viewdirs|pts]
    k_act = n_row + n_pe               # live activation lanes
    k_pad = _round_up(k_act, 128)      # layer-1 contraction dim

    # Row tile: multiple of 16 (bf16 sublane packing of the activation scratch).
    # Large tiles amortize the ~0.35us per-grid-step pipeline overhead; see the
    # VMEM accounting in the header for per-generation sizing.
    tile = max(16, min(_round_up(tile_n, 16), _round_up(n, 16)))
    grid = (pl.cdiv(n, tile),)
    if vmem_limit_bytes is None and tile > 1024:
        vmem_limit_bytes = 48 << 20    # safe on v7x (64 MiB phys), ample elsewhere

    # Single merged row stream; kept f32 so the in-kernel PE scaling is exact.
    row = jnp.concatenate([features.astype(jnp.float32),
                           viewdirs.astype(jnp.float32),
                           pts.astype(jnp.float32)], axis=-1)

    w1_p = _pack_layer1(w1, in_ch, src, used, k_pad, cd)

    def full_spec(shape):              # parameters stay resident across the grid
        return pl.BlockSpec(shape, lambda i: (0, 0))

    inputs = [row]
    in_specs = [pl.BlockSpec((tile, n_row), lambda i: (i, 0))]
    if n_pe:
        inputs += [jnp.asarray(scale).reshape(1, n_pe),
                   jnp.asarray(phase).reshape(1, n_pe)]
        in_specs += [full_spec((1, n_pe)), full_spec((1, n_pe))]
    tail = [w1_p,
            b1.reshape(1, feat_c).astype(jnp.float32),
            w2.astype(cd),
            b2.reshape(1, feat_c).astype(jnp.float32),
            w3.astype(cd),
            b3.reshape(1, out_dim).astype(jnp.float32)]
    inputs += tail
    in_specs += [full_spec(t.shape) for t in tail]

    kernel = _make_mlp_pe_kernel(tile, n_row, in_ch, R, k_act, k_pad, cd)

    flops = 2 * n * (k_pad * feat_c + feat_c * feat_c + feat_c * out_dim)
    transcendentals = n * (n_pe + out_dim)
    param_bytes = sum(int(t.size) * t.dtype.itemsize for t in inputs[1:])
    bytes_accessed = n * 4 * (n_row + out_dim) + param_bytes

    return pl.pallas_call(
        kernel,
        out_shape=jax.ShapeDtypeStruct((n, out_dim), jnp.float32),
        grid_spec=pltpu.PrefetchScalarGridSpec(
            num_scalar_prefetch=0,
            grid=grid,
            in_specs=in_specs,
            out_specs=pl.BlockSpec((tile, out_dim), lambda i: (i, 0)),
            scratch_shapes=[pltpu.VMEM((tile, k_pad), cd)]),
        compiler_params=pltpu.CompilerParams(
            dimension_semantics=("parallel",),
            vmem_limit_bytes=vmem_limit_bytes),
        cost_estimate=pl.CostEstimate(flops=flops,
                                      transcendentals=transcendentals,
                                      bytes_accessed=bytes_accessed),
    )(*inputs)


# ------------------------------ module wrapper -------------------------------
class MLPRenderPE:
    """JAX/Pallas port of TensoRF's MLPRender_PE."""

    def __init__(self, key, in_chanel, viewpe=6, pospe=6, feature_c=128,
                 tile_n=1024, matmul_dtype=jnp.bfloat16, vmem_limit_bytes=None):
        self.viewpe = viewpe
        self.pospe = pospe
        # Actual concatenated input dim used by forward() (see NOTE at top).
        self.in_dim = in_chanel + 3 + 2 * pospe * 3 + 2 * viewpe * 3
        self.feature_c = feature_c

        ks = jax.random.split(key, 6)

        def linear_init(kw, kb, fan_in, fan_out):
            bound = 1.0 / jnp.sqrt(jnp.float32(fan_in))
            w = jax.random.uniform(kw, (fan_in, fan_out), jnp.float32, -bound, bound)
            b = jax.random.uniform(kb, (fan_out,), jnp.float32, -bound, bound)
            return w, b

        w1, b1 = linear_init(ks[0], ks[1], self.in_dim, feature_c)
        w2, b2 = linear_init(ks[2], ks[3], feature_c, feature_c)
        w3, _ = linear_init(ks[4], ks[5], feature_c, 3)
        b3 = jnp.zeros((3,), jnp.float32)   # torch.nn.init.constant_(bias, 0)
        self.params = (w1, b1, w2, b2, w3, b3)

        self._forward = jax.jit(functools.partial(
            _fused_mlp_pe, pospe=pospe, viewpe=viewpe, tile_n=tile_n,
            matmul_dtype=matmul_dtype, vmem_limit_bytes=vmem_limit_bytes))

    def __call__(self, pts, viewdirs, features):
        return self._forward(pts, viewdirs, features, self.params)

    def reference(self, pts, viewdirs, features):
        """Pure-JAX f32 reference for correctness checking."""
        indata = [features, viewdirs]
        if self.pospe > 0:
            indata.append(positional_encoding(pts, self.pospe))
        if self.viewpe > 0:
            indata.append(positional_encoding(viewdirs, self.viewpe))
        x = jnp.concatenate(indata, axis=-1)
        w1, b1, w2, b2, w3, b3 = self.params
        h = jnp.maximum(x @ w1 + b1, 0.0)
        h = jnp.maximum(h @ w2 + b2, 0.0)
        return jax.nn.sigmoid(h @ w3 + b3)


# ----------------------------------- main ------------------------------------
if __name__ == "__main__":
    key = jax.random.PRNGKey(0)
    k_pts, k_view, k_feat, k_params = jax.random.split(key, 4)

    N = 1000         # exercises a 4-step grid AND the ragged last block (no pad)
    IN_CHANEL = 27   # typical TensoRF appearance feature dim
    VIEWPE = 6
    POSPE = 6
    FEATURE_C = 128

    pts = jax.random.normal(k_pts, (N, 3), jnp.float32)
    viewdirs = jax.random.normal(k_view, (N, 3), jnp.float32)
    viewdirs = viewdirs / jnp.linalg.norm(viewdirs, axis=-1, keepdims=True)
    features = jax.random.normal(k_feat, (N, IN_CHANEL), jnp.float32)

    # tile_n=256 so this small demo runs a multi-step grid with a ragged tail;
    # production should keep tile_n=1024 (sweep 1024-4096 per TPU generation,
    # capping at ~2048 on v7x).
    model = MLPRenderPE(k_params, IN_CHANEL, VIEWPE, POSPE, FEATURE_C, tile_n=256)

    rgb = jax.block_until_ready(model(pts, viewdirs, features))
    rgb_ref = model.reference(pts, viewdirs, features)

    assert rgb.shape == (N, 3), rgb.shape
    # bf16 MXU operands with f32 accumulation -> relaxed tolerance vs f32 ref.
    max_err = float(jnp.max(jnp.abs(rgb - rgb_ref)))
    assert max_err < 2e-2, max_err
    print("KERNEL_OK")
</pallas_src>

<mosaic_0001>
module attributes {stable_mosaic.version = 11 : i64} {
  func.func @kernel(%arg0: i32, %arg1: memref<256x33xf32, #tpu.memory_space<vmem>>, %arg2: memref<1x72xf32, #tpu.memory_space<vmem>>, %arg3: memref<1x72xf32, #tpu.memory_space<vmem>>, %arg4: memref<128x128xbf16, #tpu.memory_space<vmem>>, %arg5: memref<1x128xf32, #tpu.memory_space<vmem>>, %arg6: memref<128x128xbf16, #tpu.memory_space<vmem>>, %arg7: memref<1x128xf32, #tpu.memory_space<vmem>>, %arg8: memref<128x3xbf16, #tpu.memory_space<vmem>>, %arg9: memref<1x3xf32, #tpu.memory_space<vmem>>, %arg10: memref<256x3xf32, #tpu.memory_space<vmem>>, %arg11: memref<256x128xbf16, #tpu.memory_space<vmem>>) attributes {dimension_semantics = [#tpu.dimension_semantics<parallel>], iteration_bounds = array<i64: 4>, scalar_prefetch = 0 : i64, scratch_operands = 1 : i64, tpu.core_type = #tpu.core_type<tc>, window_params = [{transform_indices = @transform_0, window_bounds = array<i64: 256, 33>}, {pipeline_mode = #tpu.pipeline_mode<synchronous>, transform_indices = @transform_1, window_bounds = array<i64: 1, 72>}, {pipeline_mode = #tpu.pipeline_mode<synchronous>, transform_indices = @transform_2, window_bounds = array<i64: 1, 72>}, {pipeline_mode = #tpu.pipeline_mode<synchronous>, transform_indices = @transform_3, window_bounds = array<i64: 128, 128>}, {pipeline_mode = #tpu.pipeline_mode<synchronous>, transform_indices = @transform_4, window_bounds = array<i64: 1, 128>}, {pipeline_mode = #tpu.pipeline_mode<synchronous>, transform_indices = @transform_5, window_bounds = array<i64: 128, 128>}, {pipeline_mode = #tpu.pipeline_mode<synchronous>, transform_indices = @transform_6, window_bounds = array<i64: 1, 128>}, {pipeline_mode = #tpu.pipeline_mode<synchronous>, transform_indices = @transform_7, window_bounds = array<i64: 128, 3>}, {pipeline_mode = #tpu.pipeline_mode<synchronous>, transform_indices = @transform_8, window_bounds = array<i64: 1, 3>}, {transform_indices = @transform_9, window_bounds = array<i64: 256, 3>}]} {
    %c0 = arith.constant 0 : index
    %c0_0 = arith.constant 0 : index
    %0 = vector.load %arg1[%c0, %c0_0] : memref<256x33xf32, #tpu.memory_space<vmem>>, vector<256x33xf32>
    %1 = arith.truncf %0 : vector<256x33xf32> to vector<256x33xbf16>
    %c0_1 = arith.constant 0 : index
    %c0_2 = arith.constant 0 : index
    %2 = vector.load %arg11[%c0_1, %c0_2] : memref<256x128xbf16, #tpu.memory_space<vmem>>, vector<256x33xbf16>
    tpu.vector_store %arg11[%c0_1, %c0_2], %1 {strides = array<i32>} : memref<256x128xbf16, #tpu.memory_space<vmem>>, vector<256x33xbf16>,
    %3 = vector.extract_strided_slice %0 {offsets = [0, 27], sizes = [256, 6], strides = [1, 1]} : vector<256x33xf32> to vector<256x6xf32>
    %4 = tpu.concatenate %3, %3, %3, %3, %3, %3, %3, %3, %3, %3, %3, %3 in 1 : vector<256x6xf32>, vector<256x6xf32>, vector<256x6xf32>, vector<256x6xf32>, vector<256x6xf32>, vector<256x6xf32>, vector<256x6xf32>, vector<256x6xf32>, vector<256x6xf32>, vector<256x6xf32>, vector<256x6xf32>, vector<256x6xf32> -> vector<256x72xf32>
    %c0_3 = arith.constant 0 : index
    %c0_4 = arith.constant 0 : index
    %5 = vector.load %arg2[%c0_3, %c0_4] : memref<1x72xf32, #tpu.memory_space<vmem>>, vector<1x72xf32>
    %6 = vector.broadcast %5 : vector<1x72xf32> to vector<256x72xf32>
    %7 = arith.mulf %4, %6 : vector<256x72xf32>
    %c0_5 = arith.constant 0 : index
    %c0_6 = arith.constant 0 : index
    %8 = vector.load %arg3[%c0_5, %c0_6] : memref<1x72xf32, #tpu.memory_space<vmem>>, vector<1x72xf32>
    %9 = vector.broadcast %8 : vector<1x72xf32> to vector<256x72xf32>
    %10 = arith.addf %7, %9 : vector<256x72xf32>
    %11 = math.sin %10 : vector<256x72xf32>
    %12 = arith.truncf %11 : vector<256x72xf32> to vector<256x72xbf16>
    %c0_7 = arith.constant 0 : index
    %c33 = arith.constant 33 : index
    %13 = vector.load %arg11[%c0_7, %c33] : memref<256x128xbf16, #tpu.memory_space<vmem>>, vector<256x72xbf16>
    tpu.vector_store %arg11[%c0_7, %c33], %12 {strides = array<i32>} : memref<256x128xbf16, #tpu.memory_space<vmem>>, vector<256x72xbf16>,
    %cst = arith.constant 0.000000e+00 : bf16
    %14 = vector.broadcast %cst : bf16 to vector<256x23xbf16>
    %c0_8 = arith.constant 0 : index
    %c105 = arith.constant 105 : index
    %15 = vector.load %arg11[%c0_8, %c105] : memref<256x128xbf16, #tpu.memory_space<vmem>>, vector<256x23xbf16>
    tpu.vector_store %arg11[%c0_8, %c105], %14 {strides = array<i32>} : memref<256x128xbf16, #tpu.memory_space<vmem>>, vector<256x23xbf16>,
    %c0_9 = arith.constant 0 : index
    %c0_10 = arith.constant 0 : index
    %16 = vector.load %arg11[%c0_9, %c0_10] : memref<256x128xbf16, #tpu.memory_space<vmem>>, vector<256x128xbf16>
    %c0_11 = arith.constant 0 : index
    %c0_12 = arith.constant 0 : index
    %17 = vector.load %arg4[%c0_11, %c0_12] : memref<128x128xbf16, #tpu.memory_space<vmem>>, vector<128x128xbf16>
    %cst_13 = arith.constant dense<0.000000e+00> : vector<256x128xf32>
    %18 = tpu.matmul %16, %17, %cst_13 {dimension_numbers = #tpu.dot_dimension_numbers<[1], [0], [0], [1], [0, 0, 1, 1], [], []>} : vector<256x128xbf16>, vector<128x128xbf16>, vector<256x128xf32> -> vector<256x128xf32>
    %c0_14 = arith.constant 0 : index
    %c0_15 = arith.constant 0 : index
    %19 = vector.load %arg5[%c0_14, %c0_15] : memref<1x128xf32, #tpu.memory_space<vmem>>, vector<1x128xf32>
    %20 = vector.broadcast %19 : vector<1x128xf32> to vector<256x128xf32>
    %21 = arith.addf %18, %20 : vector<256x128xf32>
    %cst_16 = arith.constant 0.000000e+00 : f32
    %22 = vector.broadcast %cst_16 : f32 to vector<256x128xf32>
    %23 = arith.maximumf %21, %22 : vector<256x128xf32>
    %24 = arith.truncf %23 : vector<256x128xf32> to vector<256x128xbf16>
    %c0_17 = arith.constant 0 : index
    %c0_18 = arith.constant 0 : index
    %25 = vector.load %arg6[%c0_17, %c0_18] : memref<128x128xbf16, #tpu.memory_space<vmem>>, vector<128x128xbf16>
    %cst_19 = arith.constant dense<0.000000e+00> : vector<256x128xf32>
    %26 = tpu.matmul %24, %25, %cst_19 {dimension_numbers = #tpu.dot_dimension_numbers<[1], [0], [0], [1], [0, 0, 1, 1], [], []>} : vector<256x128xbf16>, vector<128x128xbf16>, vector<256x128xf32> -> vector<256x128xf32>
    %c0_20 = arith.constant 0 : index
    %c0_21 = arith.constant 0 : index
    %27 = vector.load %arg7[%c0_20, %c0_21] : memref<1x128xf32, #tpu.memory_space<vmem>>, vector<1x128xf32>
    %28 = vector.broadcast %27 : vector<1x128xf32> to vector<256x128xf32>
    %29 = arith.addf %26, %28 : vector<256x128xf32>
    %cst_22 = arith.constant 0.000000e+00 : f32
    %30 = vector.broadcast %cst_22 : f32 to vector<256x128xf32>
    %31 = arith.maximumf %29, %30 : vector<256x128xf32>
    %32 = arith.truncf %31 : vector<256x128xf32> to vector<256x128xbf16>
    %c0_23 = arith.constant 0 : index
    %c0_24 = arith.constant 0 : index
    %33 = vector.load %arg8[%c0_23, %c0_24] : memref<128x3xbf16, #tpu.memory_space<vmem>>, vector<128x3xbf16>
    %cst_25 = arith.constant dense<0.000000e+00> : vector<256x3xf32>
    %34 = tpu.matmul %32, %33, %cst_25 {dimension_numbers = #tpu.dot_dimension_numbers<[1], [0], [0], [1], [0, 0, 1, 1], [], []>} : vector<256x128xbf16>, vector<128x3xbf16>, vector<256x3xf32> -> vector<256x3xf32>
    %c0_26 = arith.constant 0 : index
    %c0_27 = arith.constant 0 : index
    %35 = vector.load %arg9[%c0_26, %c0_27] : memref<1x3xf32, #tpu.memory_space<vmem>>, vector<1x3xf32>
    %36 = vector.broadcast %35 : vector<1x3xf32> to vector<256x3xf32>
    %37 = arith.addf %34, %36 : vector<256x3xf32>
    %38 = arith.negf %37 : vector<256x3xf32>
    %39 = math.exp %38 : vector<256x3xf32>
    %cst_28 = arith.constant 1.000000e+00 : f32
    %40 = vector.broadcast %cst_28 : f32 to vector<256x3xf32>
    %41 = arith.addf %40, %39 : vector<256x3xf32>
    %42 = arith.divf %40, %41 : vector<256x3xf32>
    %c0_29 = arith.constant 0 : index
    %c0_30 = arith.constant 0 : index
    %43 = vector.load %arg10[%c0_29, %c0_30] : memref<256x3xf32, #tpu.memory_space<vmem>>, vector<256x3xf32>
    tpu.vector_store %arg10[%c0_29, %c0_30], %42 {strides = array<i32>} : memref<256x3xf32, #tpu.memory_space<vmem>>, vector<256x3xf32>,
    return
  }
  func.func @transform_0(%arg0: i32) -> (i32, i32) {
    %c0_i32 = arith.constant 0 : i32
    %c0_i32_0 = arith.constant 0 : i32
    return %arg0, %c0_i32 : i32, i32
  }
  func.func @transform_1(%arg0: i32) -> (i32, i32) {
    %c0_i32 = arith.constant 0 : i32
    %c0_i32_0 = arith.constant 0 : i32
    %c0_i32_1 = arith.constant 0 : i32
    return %c0_i32, %c0_i32_0 : i32, i32
  }
  func.func @transform_2(%arg0: i32) -> (i32, i32) {
    %c0_i32 = arith.constant 0 : i32
    %c0_i32_0 = arith.constant 0 : i32
    %c0_i32_1 = arith.constant 0 : i32
    return %c0_i32, %c0_i32_0 : i32, i32
  }
  func.func @transform_3(%arg0: i32) -> (i32, i32) {
    %c0_i32 = arith.constant 0 : i32
    %c0_i32_0 = arith.constant 0 : i32
    %c0_i32_1 = arith.constant 0 : i32
    return %c0_i32, %c0_i32_0 : i32, i32
  }
  func.func @transform_4(%arg0: i32) -> (i32, i32) {
    %c0_i32 = arith.constant 0 : i32
    %c0_i32_0 = arith.constant 0 : i32
    %c0_i32_1 = arith.constant 0 : i32
    return %c0_i32, %c0_i32_0 : i32, i32
  }
  func.func @transform_5(%arg0: i32) -> (i32, i32) {
    %c0_i32 = arith.constant 0 : i32
    %c0_i32_0 = arith.constant 0 : i32
    %c0_i32_1 = arith.constant 0 : i32
    return %c0_i32, %c0_i32_0 : i32, i32
  }
  func.func @transform_6(%arg0: i32) -> (i32, i32) {
    %c0_i32 = arith.constant 0 : i32
    %c0_i32_0 = arith.constant 0 : i32
    %c0_i32_1 = arith.constant 0 : i32
    return %c0_i32, %c0_i32_0 : i32, i32
  }
  func.func @transform_7(%arg0: i32) -> (i32, i32) {
    %c0_i32 = arith.constant 0 : i32
    %c0_i32_0 = arith.constant 0 : i32
    %c0_i32_1 = arith.constant 0 : i32
    return %c0_i32, %c0_i32_0 : i32, i32
  }
  func.func @transform_8(%arg0: i32) -> (i32, i32) {
    %c0_i32 = arith.constant 0 : i32
    %c0_i32_0 = arith.constant 0 : i32
    %c0_i32_1 = arith.constant 0 : i32
    return %c0_i32, %c0_i32_0 : i32, i32
  }
  func.func @transform_9(%arg0: i32) -> (i32, i32) {
    %c0_i32 = arith.constant 0 : i32
    %c0_i32_0 = arith.constant 0 : i32
    return %arg0, %c0_i32 : i32, i32
  }
}

</mosaic_0001>

<bundles_post_ra>
// kernel: _fused_mlp_pe.1
= control target key start
LH: loop header
LB: loop body
LE: loop exit
PB: predicated region body
PF: predicated region fallthrough
CT: control target
= control target key end

     0   :  { %s8042_s30 = smov 0   ;;  %s8044_s10 = smov 0   ;;  %s14469_s0 = inlined_call_operand.vmem [shape: f32[1000,33], index: 0, kind: input, shape index: {}]   ;;  %s14470_s1 = inlined_call_operand.vmem [shape: f32[1,72], index: 1, kind: input, shape index: {}]   ;;  %s14471_s2 = inlined_call_operand.vmem [shape: f32[1,72], index: 2, kind: input, shape index: {}]   ;;  %s14472_s3 = inlined_call_operand.vmem [shape: bf16[128,128], index: 3, kind: input, shape index: {}]   ;;  %s14473_s4 = inlined_call_operand.vmem [shape: f32[1,128], index: 4, kind: input, shape index: {}]   ;;  %s14474_s5 = inlined_call_operand.vmem [shape: bf16[128,128], index: 5, kind: input, shape index: {}]   ;;  %s14475_s6 = inlined_call_operand.vmem [shape: f32[1,128], index: 6, kind: input, shape index: {}]   ;;  %s14476_s7 = inlined_call_operand.vmem [shape: bf16[128,3], index: 7, kind: input, shape index: {}]   ;;  %s14477_s8 = inlined_call_operand.vmem [shape: f32[1,3], index: 8, kind: input, shape index: {}]   ;;  %s14478_s9 = inlined_call_operand.vmem [shape: f32[1000,3], index: 9, kind: output, shape index: {}]  }
   0x1   :  { %s8046_s11 = smov 0  }
   0x2 LB: > { %s8055_s12 = sadd.s32 4294967295, %s7939_s11   ;;  %s8057_s13 = sadd.s32 1, %s7939_s11   ;;  %s7939_s11 = sphi %s8046_s11, %s15671_s11   ;;  %s7935_s10 = sphi %s8044_s10, %s15670_s10   ;;  %s7931_s30 = sphi %s8042_s30, %s15669_s30  }
   0x3   : > { %s217_s14 = ssub.s32 %s7939_s11, %s8057_s13  ;;  %s220_s15 = sadd.s32 1, %s7935_s10 }
   0x4   : > { %p218_p0 = scmp.eq.s32.totalorder %s217_s14, 0  ;;  %p230_p1 = scmp.ne.s32.totalorder %s7935_s10, %s7931_s30 }
   0x5   : > { %p231_p2 = scmp.eq.s32.totalorder %s8055_s12, 3  ;;  %p6862_p3 = scmp.ge.s32.totalorder %s7939_s11, 1 }
   0x6   : > { %s8065_s16 = scalar_select %p218_p0, %s7935_s10, %s220_s15  }
   0x7   : > { %p8067_p4 = por %p231_p2, %p230_p1  ;;  %p296_p5 = scmp.lt.s32.totalorder %s7939_s11, 5 }
   0x9   : > { %p297_p6 = pnand %p6862_p3, %p296_p5 }
   0xb   : > { %300 = sbr.rel (%p297_p6) target bundleno = 2100 (0x834), region = 56 }
  0x12   : > { %s8072_s18 = sshll.u32 %s8055_s12, 5  ;;  %s7973_s24 = smov 107   ;;  %vm14554_vm0 = vcmask 48128   ;;  %vm14553_vm1 = vcmask 97280   ;;  %vm14562_vm2 = vcmask 146432   ;;  %vm14650_vm3 = vcmask 195584  }
  0x13   : > { %p340_p7 = scmp.lt.s32.totalorder %s8072_s18, 124  ;;  %s7974_s25 = smov 101   ;;  %vm14613_vm4 = vcmask 244736   ;;  %vm14570_vm5 = vcmask 293888   ;;  %vm14563_vm6 = vcmask 343040   ;;  %vm14535_vm7 = vcmask 392192  }
  0x14   : > { %s7975_s26 = smov 113   ;;  %s14483_s27 = smov 119   ;;  %vm14534_vm8 = vcmask 441344   ;;  %vm14533_vm9 = vcmask 490496   ;;  %vm14614_vm10 = vcmask 539648  }
  0x15   : > { %s341_s19 = scalar_select %p340_p7, %s8072_s18, 124 }
  0x16   : > { %s14481_s28 = smov 125   ;;  %s7978_s29 = smov 3  }
  0x17   : > { %s6865_s20 = sshll.u32 %s341_s19, 3  ;;  %s14587_s11 = smov 9  }
  0x18   : > { %s8079_s23 = scalar_lea.vmem %s14469_s0, %s6865_s20  ;;  %s14536_s14 = smov 15  }
  0x19   : > { %v8082_v0 = vld [vmem:[%s8079_s23] sm:$0xff]  ;;  %v8089_v1 = vld [vmem:[%s8079_s23 + $0x8] sm:$0xff]  ;;  %v8092_v2 = vld [vmem:[%s8079_s23 + $0x18] sm:$0xff]  ;;  %s7981_s15 = smov 21   ;;  %s7982_s19 = smov 27  }
  0x1a   : > { %548 = vrot.lane.b32.xlu1 %v8082_v0, %s7973_s24  ;;  %452 = vrot.lane.b32.xlu0 %v8082_v0, %s7974_s25  ;;  %v8095_v3 = vld [vmem:[%s8079_s23 + $0x10] sm:$0xff]  ;;  %v8162_v4 = vld [vmem:[%s8079_s23 + $0x28] sm:$0xff]  ;;  %s14659_s20 = smov 33   ;;  %s14479_s21 = smov 39  }
  0x1b   : > { %v8165_v5 = vld [vmem:[%s8079_s23 + $0x20] sm:$0xff]  ;;  %v8184_v6 = vld [vmem:[%s8079_s23 + $0x38] sm:$0xff]  ;;  %v8187_v7 = vld [vmem:[%s8079_s23 + $0x30] sm:$0xff] }
  0x1c   : > { %v8318_v32 = vld [vmem:[%s8079_s23 + $0x48] sm:$0xff]  ;;  %v8321_v33 = vld [vmem:[%s8079_s23 + $0x40] sm:$0xff]  ;;  %v8356_v42 = vld [vmem:[%s8079_s23 + $0x58] sm:$0xff] }
  0x1d   : > { %v8359_v43 = vld [vmem:[%s8079_s23 + $0x50] sm:$0xff] }
  0x1e   : > { %550 = vrot.lane.b32.xlu1 %v8089_v1, %s7973_s24  ;;  %454 = vrot.lane.b32.xlu0 %v8089_v1, %s7974_s25 }
  0x22   : > { %458 = vrot.lane.b32.xlu1 %v8092_v2, %s7974_s25  ;;  %456 = vrot.lane.b32.xlu0 %v8095_v3, %s7974_s25 }
  0x26   : > { %554 = vrot.lane.b32.xlu1 %v8092_v2, %s7973_s24  ;;  %552 = vrot.lane.b32.xlu0 %v8095_v3, %s7973_s24 }
  0x2a   : > { %646 = vrot.lane.b32.xlu1 %v8089_v1, %s7975_s26  ;;  %644 = vrot.lane.b32.xlu0 %v8082_v0, %s7975_s26 }
  0x2e   : > { %650 = vrot.lane.b32.xlu1 %v8092_v2, %s7975_s26  ;;  %648 = vrot.lane.b32.xlu0 %v8095_v3, %s7975_s26 }
  0x32   : > { %742 = vrot.lane.b32.xlu1 %v8089_v1, %s14483_s27  ;;  %740 = vrot.lane.b32.xlu0 %v8082_v0, %s14483_s27 }
  0x36   : > { %746 = vrot.lane.b32.xlu1 %v8092_v2, %s14483_s27  ;;  %744 = vrot.lane.b32.xlu0 %v8095_v3, %s14483_s27 }
  0x3a   : > { %838 = vrot.lane.b32.xlu1 %v8089_v1, %s14481_s28  ;;  %836 = vrot.lane.b32.xlu0 %v8082_v0, %s14481_s28 }
  0x3e   : > { %842 = vrot.lane.b32.xlu1 %v8092_v2, %s14481_s28  ;;  %840 = vrot.lane.b32.xlu0 %v8095_v3, %s14481_s28 }
  0x42   : > { %934 = vrot.lane.b32.xlu1 %v8089_v1, %s7978_s29  ;;  %932 = vrot.lane.b32.xlu0 %v8082_v0, %s7978_s29 }
  0x46   : > { %938 = vrot.lane.b32.xlu1 %v8092_v2, %s7978_s29  ;;  %936 = vrot.lane.b32.xlu0 %v8095_v3, %s7978_s29 }
  0x4a   : > { %1030 = vrot.lane.b32.xlu1 %v8089_v1, %s14587_s11  ;;  %1028 = vrot.lane.b32.xlu0 %v8082_v0, %s14587_s11 }
  0x4e   : > { %1034 = vrot.lane.b32.xlu1 %v8092_v2, %s14587_s11  ;;  %1032 = vrot.lane.b32.xlu0 %v8095_v3, %s14587_s11 }
  0x52   : > { %1126 = vrot.lane.b32.xlu1 %v8089_v1, %s14536_s14  ;;  %1124 = vrot.lane.b32.xlu0 %v8082_v0, %s14536_s14 }
  0x56   : > { %1130 = vrot.lane.b32.xlu1 %v8092_v2, %s14536_s14  ;;  %1128 = vrot.lane.b32.xlu0 %v8095_v3, %s14536_s14 }
  0x5a   : > { %1222 = vrot.lane.b32.xlu1 %v8089_v1, %s7981_s15  ;;  %1220 = vrot.lane.b32.xlu0 %v8082_v0, %s7981_s15 }
  0x5e   : > { %462 = vrot.lane.b32.xlu1 %v8162_v4, %s7974_s25  ;;  %460 = vrot.lane.b32.xlu0 %v8165_v5, %s7974_s25 }
  0x62   : > { %558 = vrot.lane.b32.xlu1 %v8162_v4, %s7973_s24  ;;  %556 = vrot.lane.b32.xlu0 %v8165_v5, %s7973_s24 }
  0x66   : > { %1226 = vrot.lane.b32.xlu1 %v8092_v2, %s7981_s15  ;;  %1224 = vrot.lane.b32.xlu0 %v8095_v3, %s7981_s15 }
  0x6a   : > { %1318 = vrot.lane.b32.xlu1 %v8089_v1, %s7982_s19  ;;  %1316 = vrot.lane.b32.xlu0 %v8082_v0, %s7982_s19 }
  0x6e   : > { %466 = vrot.lane.b32.xlu1 %v8184_v6, %s7974_s25  ;;  %464 = vrot.lane.b32.xlu0 %v8187_v7, %s7974_s25 }
  0x72   : > { %562 = vrot.lane.b32.xlu1 %v8184_v6, %s7973_s24  ;;  %560 = vrot.lane.b32.xlu0 %v8187_v7, %s7973_s24 }
  0x76   : > { %654 = vrot.lane.b32.xlu1 %v8162_v4, %s7975_s26  ;;  %652 = vrot.lane.b32.xlu0 %v8165_v5, %s7975_s26 }
  0x7a   : > { %1322 = vrot.lane.b32.xlu1 %v8092_v2, %s7982_s19  ;;  %1320 = vrot.lane.b32.xlu0 %v8095_v3, %s7982_s19 }
  0x7e   : > { %1414 = vrot.lane.b32.xlu1 %v8089_v1, %s14659_s20  ;;  %1412 = vrot.lane.b32.xlu0 %v8082_v0, %s14659_s20 }
  0x82   : > { %658 = vrot.lane.b32.xlu1 %v8184_v6, %s7975_s26  ;;  %656 = vrot.lane.b32.xlu0 %v8187_v7, %s7975_s26 }
  0x86   : > { %750 = vrot.lane.b32.xlu1 %v8162_v4, %s14483_s27  ;;  %748 = vrot.lane.b32.xlu0 %v8165_v5, %s14483_s27 }
  0x8a   : > { %1418 = vrot.lane.b32.xlu1 %v8092_v2, %s14659_s20  ;;  %1416 = vrot.lane.b32.xlu0 %v8095_v3, %s14659_s20 }
  0x8c   : > { %v8221_v8 = vpop.permute.xlu1 %548  ;;  %v8223_v9 = vpop.permute.xlu0 %452 }
  0x8e   : > { %1510 = vrot.lane.b32.xlu1 %v8089_v1, %s14479_s21  ;;  %1508 = vrot.lane.b32.xlu0 %v8082_v0, %s14479_s21 }
  0x90   : > { %v8229_v10 = vpop.permute.xlu1 %550  ;;  %v8231_v11 = vpop.permute.xlu0 %454 }
  0x92   : > { %754 = vrot.lane.b32.xlu1 %v8184_v6, %s14483_s27  ;;  %752 = vrot.lane.b32.xlu0 %v8187_v7, %s14483_s27 }
  0x94   : > { %v8237_v12 = vpop.permute.xlu1 %458  ;;  %v8239_v13 = vpop.permute.xlu0 %456 }
  0x96   : > { %846 = vrot.lane.b32.xlu1 %v8162_v4, %s14481_s28  ;;  %844 = vrot.lane.b32.xlu0 %v8165_v5, %s14481_s28 }
  0x98   : > { %v8245_v14 = vpop.permute.xlu1 %554  ;;  %v8247_v15 = vpop.permute.xlu0 %552 }
  0x9a   : > { %1514 = vrot.lane.b32.xlu1 %v8092_v2, %s14479_s21  ;;  %1512 = vrot.lane.b32.xlu0 %v8095_v3, %s14479_s21  ;;  %v1605_v2 = vsel %vm14554_vm0, %v8223_v9, %v8221_v8  ;;  %v1606_v3 = vsel %vm14554_vm0, %v8231_v11, %v8229_v10 }
  0x9c   : > { %v8253_v16 = vpop.permute.xlu1 %646  ;;  %v8255_v17 = vpop.permute.xlu0 %644 }
  0x9e   : > { %850 = vrot.lane.b32.xlu1 %v8184_v6, %s14481_s28  ;;  %848 = vrot.lane.b32.xlu0 %v8187_v7, %s14481_s28 }
  0xa0   : > { %v8261_v18 = vpop.permute.xlu1 %650  ;;  %v8263_v19 = vpop.permute.xlu0 %648 }
  0xa2   : > { %942 = vrot.lane.b32.xlu1 %v8162_v4, %s7978_s29  ;;  %940 = vrot.lane.b32.xlu0 %v8165_v5, %s7978_s29 }
  0xa4   : > { %v8269_v20 = vpop.permute.xlu1 %742  ;;  %v8271_v21 = vpop.permute.xlu0 %740 }
  0xa6   : > { %946 = vrot.lane.b32.xlu1 %v8184_v6, %s7978_s29  ;;  %944 = vrot.lane.b32.xlu0 %v8187_v7, %s7978_s29 }
  0xa8   : > { %v8277_v22 = vpop.permute.xlu1 %746  ;;  %v8279_v23 = vpop.permute.xlu0 %744 }
  0xaa   : > { %1038 = vrot.lane.b32.xlu1 %v8162_v4, %s14587_s11  ;;  %1036 = vrot.lane.b32.xlu0 %v8165_v5, %s14587_s11 }
  0xac   : > { %v8285_v24 = vpop.permute.xlu1 %838  ;;  %v8287_v25 = vpop.permute.xlu0 %836 }
  0xae   : > { %1042 = vrot.lane.b32.xlu1 %v8184_v6, %s14587_s11  ;;  %1040 = vrot.lane.b32.xlu0 %v8187_v7, %s14587_s11 }
  0xb0   : > { %v8293_v26 = vpop.permute.xlu1 %842  ;;  %v8295_v27 = vpop.permute.xlu0 %840 }
  0xb2   : > { %1134 = vrot.lane.b32.xlu1 %v8162_v4, %s14536_s14  ;;  %1132 = vrot.lane.b32.xlu0 %v8165_v5, %s14536_s14 }
  0xb4   : > { %v8301_v28 = vpop.permute.xlu1 %934  ;;  %v8303_v29 = vpop.permute.xlu0 %932 }
  0xb6   : > { %1138 = vrot.lane.b32.xlu1 %v8184_v6, %s14536_s14  ;;  %1136 = vrot.lane.b32.xlu0 %v8187_v7, %s14536_s14 }
  0xb8   : > { %v8309_v30 = vpop.permute.xlu1 %938  ;;  %v8311_v31 = vpop.permute.xlu0 %936 }
  0xba   : > { %1230 = vrot.lane.b32.xlu1 %v8162_v4, %s7981_s15  ;;  %1228 = vrot.lane.b32.xlu0 %v8165_v5, %s7981_s15 }
  0xbc   : > { %v8323_v34 = vpop.permute.xlu1 %1030  ;;  %v8325_v35 = vpop.permute.xlu0 %1028 }
  0xbe   : > { %470 = vrot.lane.b32.xlu1 %v8318_v32, %s7974_s25  ;;  %468 = vrot.lane.b32.xlu0 %v8321_v33, %s7974_s25 }
  0xc0   : > { %v8331_v36 = vpop.permute.xlu1 %1034  ;;  %v8333_v37 = vpop.permute.xlu0 %1032 }
  0xc2   : > { %566 = vrot.lane.b32.xlu1 %v8318_v32, %s7973_s24  ;;  %564 = vrot.lane.b32.xlu0 %v8321_v33, %s7973_s24 }
  0xc4   : > { %v8339_v38 = vpop.permute.xlu1 %1126  ;;  %v8341_v39 = vpop.permute.xlu0 %1124 }
  0xc6   : > { %1234 = vrot.lane.b32.xlu1 %v8184_v6, %s7981_s15  ;;  %1232 = vrot.lane.b32.xlu0 %v8187_v7, %s7981_s15 }
  0xc8   : > { %v8347_v40 = vpop.permute.xlu1 %1130  ;;  %v8349_v41 = vpop.permute.xlu0 %1128 }
  0xca   : > { %1326 = vrot.lane.b32.xlu1 %v8162_v4, %s7982_s19  ;;  %1324 = vrot.lane.b32.xlu0 %v8165_v5, %s7982_s19 }
  0xcc   : > { %v8361_v44 = vpop.permute.xlu1 %1222  ;;  %v8363_v45 = vpop.permute.xlu0 %1220 }
  0xce   : > { %474 = vrot.lane.b32.xlu1 %v8356_v42, %s7974_s25  ;;  %472 = vrot.lane.b32.xlu0 %v8359_v43, %s7974_s25 }
  0xd0   : > { %v8369_v46 = vpop.permute.xlu1 %462  ;;  %v8371_v47 = vpop.permute.xlu0 %460 }
  0xd2   : > { %570 = vrot.lane.b32.xlu1 %v8356_v42, %s7973_s24  ;;  %568 = vrot.lane.b32.xlu0 %v8359_v43, %s7973_s24 }
  0xd4   : > { %v8377_v48 = vpop.permute.xlu1 %558  ;;  %v8379_v49 = vpop.permute.xlu0 %556 }
  0xd6   : > { %662 = vrot.lane.b32.xlu1 %v8318_v32, %s7975_s26  ;;  %660 = vrot.lane.b32.xlu0 %v8321_v33, %s7975_s26 }
  0xd8   : > { %v8385_v50 = vpop.permute.xlu1 %1226  ;;  %v8387_v51 = vpop.permute.xlu0 %1224 }
  0xda   : > { %1330 = vrot.lane.b32.xlu1 %v8184_v6, %s7982_s19  ;;  %1328 = vrot.lane.b32.xlu0 %v8187_v7, %s7982_s19 }
  0xdc   : > { %v8393_v52 = vpop.permute.xlu1 %1318  ;;  %v8395_v53 = vpop.permute.xlu0 %1316 }
  0xde   : > { %1422 = vrot.lane.b32.xlu1 %v8162_v4, %s14659_s20  ;;  %1420 = vrot.lane.b32.xlu0 %v8165_v5, %s14659_s20 }
  0xe0   : > { %v8401_v54 = vpop.permute.xlu1 %466  ;;  %v8403_v55 = vpop.permute.xlu0 %464 }
  0xe1   : > { %14752 = vst [vmem:[#allocation4_spill] sm:$0xff] %v8401_v54  ;;  %14753 = vst [vmem:[#allocation5_spill] sm:$0xff] %v8403_v55 }
  0xe2   : > { %666 = vrot.lane.b32.xlu1 %v8356_v42, %s7975_s26  ;;  %664 = vrot.lane.b32.xlu0 %v8359_v43, %s7975_s26 }
  0xe4   : > { %v8409_v56 = vpop.permute.xlu1 %562  ;;  %v8411_v57 = vpop.permute.xlu0 %560 }
  0xe5   : > { %14754 = vst [vmem:[#allocation6_spill] sm:$0xff] %v8409_v56  ;;  %14755 = vst [vmem:[#allocation7_spill] sm:$0xff] %v8411_v57 }
  0xe6   : > { %758 = vrot.lane.b32.xlu1 %v8318_v32, %s14483_s27  ;;  %756 = vrot.lane.b32.xlu0 %v8321_v33, %s14483_s27 }
  0xe8   : > { %v8417_v58 = vpop.permute.xlu1 %654  ;;  %v8419_v59 = vpop.permute.xlu0 %652 }
  0xea   : > { %1426 = vrot.lane.b32.xlu1 %v8184_v6, %s14659_s20  ;;  %1424 = vrot.lane.b32.xlu0 %v8187_v7, %s14659_s20 }
  0xec   : > { %v8425_v60 = vpop.permute.xlu1 %1322  ;;  %v8427_v61 = vpop.permute.xlu0 %1320 }
  0xee   : > { %1518 = vrot.lane.b32.xlu1 %v8162_v4, %s14479_s21  ;;  %1516 = vrot.lane.b32.xlu0 %v8165_v5, %s14479_s21  ;;  %v1639_v4 = vsel %vm14553_vm1, %v1606_v3, %v8253_v16  ;;  %v1638_v5 = vsel %vm14553_vm1, %v1605_v2, %v8255_v17 }
  0xef   : > { %v1672_v55 = vsel %vm14562_vm2, %v1639_v4, %v8269_v20  ;;  %v1671_v8 = vsel %vm14562_vm2, %v1638_v5, %v8271_v21 }
  0xf0   : > { %v1415_v62 = vpop.permute.xlu1 %1414  ;;  %v1413_v63 = vpop.permute.xlu0 %1412  ;;  %v1705_v9 = vsel %vm14650_vm3, %v1672_v55, %v8285_v24  ;;  %v1704_v10 = vsel %vm14650_vm3, %v1671_v8, %v8287_v25  ;;  %v1608_v55 = vsel %vm14554_vm0, %v8237_v12, %v8245_v14 }
  0xf1   : > { %v1738_v11 = vsel %vm14613_vm4, %v1705_v9, %v8301_v28  ;;  %v1737_v16 = vsel %vm14613_vm4, %v1704_v10, %v8303_v29  ;;  %v1641_v12 = vsel %vm14553_vm1, %v1608_v55, %v8261_v18 }
  0xf2   : > { %762 = vrot.lane.b32.xlu1 %v8356_v42, %s14483_s27  ;;  %760 = vrot.lane.b32.xlu0 %v8359_v43, %s14483_s27  ;;  %v1771_v17 = vsel %vm14570_vm5, %v1738_v11, %v8323_v34  ;;  %v1770_v20 = vsel %vm14570_vm5, %v1737_v16, %v8325_v35  ;;  %v8502_v35 = vld [vmem:[%s14470_s1] ss:$0 sm:$0xff]  ;;  %v1674_v4 = vsel %vm14562_vm2, %v1641_v12, %v8277_v22  ;;  %s14796_s27 = smov 119  }
  0xf3   : > { %v1803_v24 = vsel %vm14563_vm6, %v1770_v20, %v8341_v39  ;;  %14758 = vst [vmem:[#allocation10_spill] sm:$0xff] %v8502_v35  ;;  %v1707_v18 = vsel %vm14650_vm3, %v1674_v4, %v8293_v26 }
  0xf4   : > { %v8437_v0 = vpop.permute.xlu1 %658  ;;  %v8439_v1 = vpop.permute.xlu0 %656  ;;  %v1836_v28 = vsel %vm14535_vm7, %v1803_v24, %v8363_v45  ;;  %v1740_v22 = vsel %vm14613_vm4, %v1707_v18, %v8309_v30 }
  0xf5   : > { %14756 = vst [vmem:[#allocation8_spill] sm:$0xff] %v8437_v0  ;;  %14757 = vst [vmem:[#allocation9_spill] sm:$0xff] %v8439_v1  ;;  %v1869_v34 = vsel %vm14534_vm8, %v1836_v28, %v8395_v53 }
  0xf6   : > { %854 = vrot.lane.b32.xlu1 %v8318_v32, %s14481_s28  ;;  %852 = vrot.lane.b32.xlu0 %v8321_v33, %s14481_s28  ;;  %v1902_v39 = vsel %vm14533_vm9, %v1869_v34, %v1413_v63 }
  0xf8   : > { %v8455_v1 = vpop.permute.xlu1 %750  ;;  %v8457_v0 = vpop.permute.xlu0 %748 }
  0xfa   : > { %1522 = vrot.lane.b32.xlu1 %v8184_v6, %s14479_s21  ;;  %1520 = vrot.lane.b32.xlu0 %v8187_v7, %s14479_s21  ;;  %v1804_v7 = vsel %vm14563_vm6, %v1771_v17, %v8339_v38  ;;  %s14800_s21 = smov 125  }
  0xfb   : > { %v1837_v25 = vsel %vm14535_vm7, %v1804_v7, %v8361_v44 }
  0xfc   : > { %v8479_v21 = vpop.permute.xlu1 %1418  ;;  %v8481_v6 = vpop.permute.xlu0 %1416  ;;  %v1870_v29 = vsel %vm14534_vm8, %v1837_v25, %v8393_v52  ;;  %v8512_v52 = vld [vmem:[%s14471_s2] ss:$0 sm:$0xff] }
  0xfd   : > { %v1903_v38 = vsel %vm14533_vm9, %v1870_v29, %v1415_v62  ;;  %14759 = vst [vmem:[#allocation11_spill] sm:$0xff] %v8512_v52  ;;  %v1607_v62 = vsel %vm14554_vm0, %v8239_v13, %v8247_v15 }
  0xfe   : > { %858 = vrot.lane.b32.xlu1 %v8356_v42, %s14481_s28  ;;  %856 = vrot.lane.b32.xlu0 %v8359_v43, %s14481_s28  ;;  %v1640_v14 = vsel %vm14553_vm1, %v1607_v62, %v8263_v19  ;;  %s14799_s28 = smov 39  }
  0xff   : > { %v1673_v13 = vsel %vm14562_vm2, %v1640_v14, %v8279_v23 }
 0x100   : > { %v1511_v44 = vpop.permute.xlu1 %1510  ;;  %v1509_v45 = vpop.permute.xlu0 %1508  ;;  %v1706_v19 = vsel %vm14650_vm3, %v1673_v13, %v8295_v27  ;;  %v1773_v27 = vsel %vm14570_vm5, %v1740_v22, %v8331_v36 }
 0x101   : > { %v1936_v53 = vsel %vm14614_vm10, %v1903_v38, %v1511_v44  ;;  %v1935_v2 = vsel %vm14614_vm10, %v1902_v39, %v1509_v45  ;;  %v1739_v26 = vsel %vm14613_vm4, %v1706_v19, %v8311_v31  ;;  %v1806_v17 = vsel %vm14563_vm6, %v1773_v27, %v8347_v40 }
 0x102   : > { %v1975_v63 = vmul.f32 %v8502_v35, %v1936_v53  ;;  %v1974_v3 = vmul.f32 %v8502_v35, %v1935_v2  ;;  %950 = vrot.lane.b32.xlu1 %v8318_v32, %s7978_s29  ;;  %948 = vrot.lane.b32.xlu0 %v8321_v33, %s7978_s29  ;;  %v1772_v16 = vsel %vm14570_vm5, %v1739_v26, %v8333_v37 }
 0x103   : > { %v1805_v25 = vsel %vm14563_vm6, %v1772_v16, %v8349_v41  ;;  %v1839_v37 = vsel %vm14535_vm7, %v1806_v17, %v8385_v50  ;;  %v14495_v16 = vmov 2475754826  }
 0x104   : > { %v8534_v15 = vadd.f32 %v8512_v52, %v1975_v63  ;;  %v8537_v5 = vadd.f32 %v8512_v52, %v1974_v3  ;;  %v8539_v8 = vpop.permute.xlu1 %754  ;;  %v8541_v9 = vpop.permute.xlu0 %752  ;;  %v1838_v40 = vsel %vm14535_vm7, %v1805_v25, %v8387_v51  ;;  %v1872_v41 = vsel %vm14534_vm8, %v1839_v37, %v8425_v60 }
 0x105   : > { %14762 = vst [vmem:[#allocation14_spill] sm:$0xff] %v8539_v8  ;;  %14763 = vst [vmem:[#allocation15_spill] sm:$0xff] %v8541_v9  ;;  %v1871_v34 = vsel %vm14534_vm8, %v1838_v40, %v8427_v61  ;;  %v1905_v50 = vsel %vm14533_vm9, %v1872_v41, %v8479_v21 }
 0x106   : > { %14760 = vst [vmem:[#allocation12_spill] sm:$0xff] %v8534_v15  ;;  %14761 = vst [vmem:[#allocation13_spill] sm:$0xff] %v8537_v5  ;;  %v14486_v23 = vand.u32 2147483647, %v8534_v15  ;;  %v2152_v10 = vand.u32 2139095040, %v8534_v15  ;;  %954 = vrot.lane.b32.xlu1 %v8356_v42, %s7978_s29  ;;  %952 = vrot.lane.b32.xlu0 %v8359_v43, %s7978_s29  ;;  %v2048_v30 = vand.u32 2139095040, %v8537_v5  ;;  %v1904_v51 = vsel %vm14533_vm9, %v1871_v34, %v8481_v6 }
 0x107   : > { %v14485_v11 = vand.u32 2147483647, %v8537_v5 }
 0x108   : > { %v2153_v20 = vshrl.u32 %v2152_v10, 23  ;;  %v8565_v7 = vpop.permute.xlu1 %846  ;;  %v8567_v24 = vpop.permute.xlu0 %844  ;;  %v2156_v31 = vand.u32 8388607, %v14486_v23  ;;  %v2049_v36 = vshrl.u32 %v2048_v30, 23  ;;  %v14497_v10 = vmov 683565275  }
 0x109   : > { %v2052_v28 = vand.u32 8388607, %v14485_v11 }
 0x10a   : > { %v6872_v29 = vadd.s32 4294967169, %v2153_v20  ;;  %1046 = vrot.lane.b32.xlu1 %v8318_v32, %s14587_s11  ;;  %1044 = vrot.lane.b32.xlu0 %v8321_v33, %s14587_s11  ;;  %v6868_v38 = vadd.s32 4294967169, %v2049_v36  ;;  %v2157_v55 = vor.u32 8388608, %v2156_v31  ;;  %v14493_v20 = vmov 2131351028  }
 0x10b   : > { %v2053_v53 = vor.u32 8388608, %v2052_v28  ;;  %v14491_v31 = vmov 2102212464   ;;  %v14489_v28 = vmov 920167782  }
 0x10c   : > { %v2159_v39 = vadd.s32 1, %v6872_v29  ;;  %v1515_v44 = vpop.permute.xlu1 %1514  ;;  %v1513_v45 = vpop.permute.xlu0 %1512  ;;  %v2055_v2 = vadd.s32 1, %v6868_v38  ;;  %v8604_v4 = vshll.u32 %v2157_v55, 8 }
 0x10d   : > { %v1938_v62 = vsel %vm14614_vm10, %v1905_v50, %v1515_v44  ;;  %v1937_v61 = vsel %vm14614_vm10, %v1904_v51, %v1513_v45  ;;  %v8606_v13 = vshll.u32 %v2053_v53, 8 }
 0x10e   : > { %vm2160_vm11 = vcmp.gt.s32.totalorder %v2159_v39, 0  ;;  %v1977_v60 = vmul.f32 %v8502_v35, %v1938_v62  ;;  %1050 = vrot.lane.b32.xlu1 %v8356_v42, %s14587_s11  ;;  %1048 = vrot.lane.b32.xlu0 %v8359_v43, %s14587_s11  ;;  %vm2056_vm12 = vcmp.gt.s32.totalorder %v2055_v2, 0  ;;  %v8612_v19 = vmul.f32 %v8502_v35, %v1937_v61 }
 0x10f   : > { %v2161_v21 = vsel %vm2160_vm11, %v2159_v39, 0  ;;  %v2057_v3 = vsel %vm2056_vm12, %v2055_v2, 0  ;;  %v14487_v39 = vmov 1326507024  }
 0x110   : > { %v8598_v6 = vshrl.u32 %v2161_v21, 5  ;;  %v2163_v63 = vand.u32 31, %v2161_v21  ;;  %v8600_v12 = vpop.permute.xlu1 %850  ;;  %v8602_v14 = vpop.permute.xlu0 %848  ;;  %v8609_v18 = vadd.f32 %v8512_v52, %v1977_v60  ;;  %v8615_v27 = vshrl.u32 %v2057_v3, 5 }
 0x111   : > { %14764 = vst [vmem:[#allocation16_spill] sm:$0xff] %v8600_v12  ;;  %14765 = vst [vmem:[#allocation17_spill] sm:$0xff] %v8602_v14  ;;  %v8617_v30 = vand.u32 31, %v2057_v3  ;;  %v14786_v14 = vmov 2102212464  }
 0x112   : > { %14766 = vst [vmem:[#allocation18_spill] sm:$0xff] %v8609_v18  ;;  %v2164_v22 = vsub.s32 32, %v2163_v63  ;;  %v2166_v26 = vshll.u32 %v14497_v10, %v2163_v63  ;;  %1142 = vrot.lane.b32.xlu1 %v8318_v32, %s14536_s14  ;;  %1140 = vrot.lane.b32.xlu0 %v8321_v33, %s14536_s14  ;;  %v2169_v17 = vshll.u32 %v14495_v16, %v2163_v63  ;;  %vm2181_vm13 = vcmp.lt.s32.totalorder %v8598_v6, 1 }
 0x113   : > { %v2172_v25 = vshll.u32 %v14493_v20, %v2163_v63  ;;  %v2175_v36 = vshll.u32 %v14491_v31, %v2163_v63  ;;  %v2178_v37 = vshll.u32 %v14489_v28, %v2163_v63  ;;  %vm2182_vm14 = vcmp.lt.s32.totalorder %v8598_v6, 2 }
 0x114   : > { %v2167_v40 = vshrl.u32 %v14495_v16, %v2164_v22  ;;  %v2170_v29 = vshrl.u32 %v14493_v20, %v2164_v22  ;;  %v2173_v41 = vshrl.u32 %v14491_v31, %v2164_v22  ;;  %v8631_v34 = vpop.permute.xlu1 %942  ;;  %v8633_v38 = vpop.permute.xlu0 %940  ;;  %v2165_v50 = vshrl.u32 %v14497_v10, %v2164_v22 }
 0x115   : > { %v2176_v51 = vshrl.u32 %v14489_v28, %v2164_v22  ;;  %v2179_v44 = vshrl.u32 %v14487_v39, %v2164_v22  ;;  %v2060_v2 = vsub.s32 32, %v8617_v30  ;;  %vm2183_vm15 = vcmp.lt.s32.totalorder %v8598_v6, 3 }
 0x116   : > { %v2168_v45 = vor.u32 %v2167_v40, %v2166_v26  ;;  %v2171_v55 = vor.u32 %v2170_v29, %v2169_v17  ;;  %v2174_v53 = vor.u32 %v2173_v41, %v2172_v25  ;;  %1146 = vrot.lane.b32.xlu1 %v8356_v42, %s14536_s14  ;;  %1144 = vrot.lane.b32.xlu0 %v8359_v43, %s14536_s14  ;;  %vm2184_vm11 = vcmp.lt.s32.totalorder %v8598_v6, 4 }
 0x117   : > { %v2177_v62 = vor.u32 %v2176_v51, %v2175_v36  ;;  %v2180_v60 = vor.u32 %v2179_v44, %v2178_v37  ;;  %v2062_v37 = vshll.u32 %v14497_v10, %v8617_v30  ;;  %v2063_v41 = vshrl.u32 %v14495_v16, %v2060_v2 }
 0x118   : > { %v2185_v61 = vsel %vm2181_vm13, %v2165_v50, %v2168_v45  ;;  %v2186_v21 = vsel %vm2184_vm11, %v2174_v53, 2102212464  ;;  %v2189_v63 = vsel %vm2181_vm13, %v2168_v45, %v2171_v55  ;;  %v2193_v3 = vsel %vm2181_vm13, %v2171_v55, %v2174_v53  ;;  %v8652_v22 = vpop.permute.xlu1 %946  ;;  %v8654_v26 = vpop.permute.xlu0 %944 }
 0x119   : > { %14767 = vst [vmem:[#allocation19_spill] sm:$0xff] %v8652_v22  ;;  %14768 = vst [vmem:[#allocation20_spill] sm:$0xff] %v8654_v26  ;;  %v2187_v17 = vsel %vm2183_vm15, %v2171_v55, %v2186_v21  ;;  %v2190_v25 = vsel %vm2184_vm11, %v2177_v62, 920167782  ;;  %v2194_v36 = vsel %vm2184_vm11, %v2180_v60, 1326507024  ;;  %v2065_v50 = vshll.u32 %v14495_v16, %v8617_v30 }
 0x11a   : > { %v2191_v40 = vsel %vm2183_vm15, %v2174_v53, %v2190_v25  ;;  %v2195_v29 = vsel %vm2183_vm15, %v2177_v62, %v2194_v36  ;;  %1238 = vrot.lane.b32.xlu1 %v8318_v32, %s7981_s15  ;;  %v2188_v51 = vsel %vm2182_vm14, %v2185_v61, %v2187_v17  ;;  %v2066_v55 = vshrl.u32 %v14493_v20, %v2060_v2  ;;  %v8673_v53 = vld [vmem:[%s8079_s23 + $0x68] sm:$0xff] }
 0x11b   : > { %v2192_v44 = vsel %vm2182_vm14, %v2189_v63, %v2191_v40  ;;  %v2196_v45 = vsel %vm2182_vm14, %v2193_v3, %v2195_v29  ;;  %1236 = vrot.lane.b32.xlu0 %v8321_v33, %s7981_s15  ;;  %v8689_v3 = vld [vmem:[%s8079_s23 + $0x60] sm:$0xff]  ;;  %v2064_v17 = vor.u32 %v2063_v41, %v2062_v37  ;;  %v2068_v36 = vshll.u32 %v14493_v20, %v8617_v30 }
 0x11c   : > { %v8676_v62 = vmul.u32.u64.low %v8604_v4, %v2196_v45  ;;  %v8677_v60 = vmul.u32.u64.high %v8604_v4, %v2196_v45, %v8676_v62  ;;  %v8680_v21 = vmul.u32.u64.low %v8604_v4, %v2192_v44  ;;  %v8681_v61 = vmul.u32.u64.high %v8604_v4, %v2192_v44, %v8680_v21  ;;  %v8684_v63 = vpop.permute.xlu1 %1038  ;;  %v8686_v6 = vpop.permute.xlu0 %1036 }
 0x11d   : > { %v2067_v25 = vor.u32 %v2066_v55, %v2065_v50  ;;  %v2069_v40 = vshrl.u32 %v14491_v31, %v2060_v2  ;;  %v2071_v29 = vshll.u32 %v14491_v31, %v8617_v30  ;;  %v2072_v44 = vshrl.u32 %v14489_v28, %v2060_v2  ;;  %v8782_v31 = vld [vmem:[%s8079_s23 + $0x78] sm:$0xff] }
 0x11e   : > { %v2075_v45 = vshrl.u32 %v14487_v39, %v2060_v2  ;;  %v8700_v62 = vadd.f32 %v8512_v52, %v8612_v19  ;;  %478 = vrot.lane.b32.xlu1 %v8673_v53, %s7974_s25  ;;  %v2204_v37 = vmul.u32 %v8604_v4, %v2188_v51  ;;  %v2061_v41 = vshrl.u32 %v14497_v10, %v2060_v2 }
 0x11f   : > { %v2070_v50 = vor.u32 %v2069_v40, %v2068_v36  ;;  %v2074_v55 = vshll.u32 %v14489_v28, %v8617_v30  ;;  %476 = vrot.lane.b32.xlu0 %v8689_v3, %s7974_s25  ;;  %vm2206_vm12 = vc.u32 %v8677_v60, %v8680_v21  ;;  %v2207_v19 = vadd.s32 1, %v8681_v61 }
 0x120   : > { %14769 = vst [vmem:[#allocation21_spill] sm:$0xff] %v8700_v62  ;;  %v2073_v11 = vor.u32 %v2072_v44, %v2071_v29  ;;  %vm2077_vm13 = vcmp.lt.s32.totalorder %v8615_v27, 1  ;;  %v8714_v23 = vpop.permute.xlu1 %1042  ;;  %v8716_v4 = vpop.permute.xlu0 %1040  ;;  %vm2079_vm14 = vcmp.lt.s32.totalorder %v8615_v27, 3  ;;  %vm2080_vm15 = vcmp.lt.s32.totalorder %v8615_v27, 4 }
 0x121   : > { %14770 = vst [vmem:[#allocation22_spill] sm:$0xff] %v8714_v23  ;;  %14771 = vst [vmem:[#allocation23_spill] sm:$0xff] %v8716_v4  ;;  %v2076_v2 = vor.u32 %v2075_v45, %v2074_v55  ;;  %v2085_v30 = vsel %vm2077_vm13, %v2064_v17, %v2067_v25  ;;  %v2208_v51 = vsel %vm2206_vm12, %v2207_v19, %v8681_v61  ;;  %v2082_v36 = vsel %vm2080_vm15, %v2070_v50, 2102212464 }
 0x122   : > { %v2086_v40 = vsel %vm2080_vm15, %v2073_v11, 920167782  ;;  %v2089_v29 = vsel %vm2077_vm13, %v2067_v25, %v2070_v50  ;;  %574 = vrot.lane.b32.xlu1 %v8673_v53, %s7973_s24  ;;  %v2209_v44 = vadd.s32 %v2208_v51, %v2204_v37  ;;  %vm2078_vm11 = vcmp.lt.s32.totalorder %v8615_v27, 2 }
 0x123   : > { %v2087_v45 = vsel %vm2079_vm14, %v2070_v50, %v2086_v40  ;;  %v2090_v55 = vsel %vm2080_vm15, %v2076_v2, 1326507024  ;;  %572 = vrot.lane.b32.xlu0 %v8689_v3, %s7973_s24  ;;  %v2081_v61 = vsel %vm2077_vm13, %v2061_v41, %v2064_v17  ;;  %v2083_v19 = vsel %vm2079_vm14, %v2067_v25, %v2082_v36 }
 0x124   : > { %v2088_v39 = vsel %vm2078_vm11, %v2085_v30, %v2087_v45  ;;  %v2091_v37 = vsel %vm2079_vm14, %v2073_v11, %v2090_v55  ;;  %v8740_v51 = vpop.permute.xlu1 %1134  ;;  %v8742_v28 = vpop.permute.xlu0 %1132  ;;  %v2210_v50 = vadd.s32 536870912, %v2209_v44  ;;  %v2084_v30 = vsel %vm2078_vm11, %v2081_v61, %v2083_v19 }
 0x125   : > { %14772 = vst [vmem:[#allocation24_spill] sm:$0xff] %v8742_v28  ;;  %v2092_v2 = vsel %vm2078_vm11, %v2089_v29, %v2091_v37  ;;  %v8747_v40 = vmul.u32.u64.low %v8606_v13, %v2088_v39  ;;  %v8748_v17 = vmul.u32.u64.high %v8606_v13, %v2088_v39, %v8747_v40  ;;  %v2360_v36 = vand.u32 2139095040, %v8609_v18 }
 0x126   : > { %v8752_v25 = vmul.u32.u64.low %v8606_v13, %v2092_v2  ;;  %v8753_v41 = vmul.u32.u64.high %v8606_v13, %v2092_v2, %v8752_v25  ;;  %1242 = vrot.lane.b32.xlu1 %v8356_v42, %s7981_s15  ;;  %v8757_v11 = vshrl.u32 %v2210_v50, 30  ;;  %v2256_v39 = vand.u32 2139095040, %v8700_v62 }
 0x127   : > { %1240 = vrot.lane.b32.xlu0 %v8359_v43, %s7981_s15  ;;  %v2103_v37 = vadd.s32 1, %v8748_v17  ;;  %v2361_v50 = vshrl.u32 %v2360_v36, 23  ;;  %v2100_v27 = vmul.u32 %v8606_v13, %v2084_v30  ;;  %v8789_v30 = vld [vmem:[%s8079_s23 + $0x70] sm:$0xff]  ;;  %v14784_v4 = vmov 2475754826  }
 0x128   : > { %14773 = vst [vmem:[#allocation25_spill] sm:$0xff] %v8757_v11  ;;  %v8765_v29 = vpop.permute.xlu1 %1138  ;;  %v8767_v45 = vpop.permute.xlu0 %1136  ;;  %v2212_v55 = vshll.u32 %v8757_v11, 30  ;;  %vm2102_vm12 = vc.u32 %v8753_v41, %v8747_v40  ;;  %v2257_v25 = vshrl.u32 %v2256_v39, 23  ;;  %v14785_v26 = vmov 2131351028  }
 0x129   : > { %14774 = vst [vmem:[#allocation26_spill] sm:$0xff] %v8765_v29  ;;  %14775 = vst [vmem:[#allocation27_spill] sm:$0xff] %v8767_v45  ;;  %v2104_v19 = vsel %vm2102_vm12, %v2103_v37, %v8748_v17  ;;  %v6880_v2 = vadd.s32 4294967169, %v2361_v50  ;;  %v14505_v50 = vand.u32 2147483647, %v8609_v18 }
 0x12a   : > { %1334 = vrot.lane.b32.xlu1 %v8318_v32, %s7982_s19  ;;  %v8776_v61 = vsub.s32 %v2209_v44, %v2212_v55  ;;  %v2105_v36 = vadd.s32 %v2104_v19, %v2100_v27  ;;  %v6876_v39 = vadd.s32 4294967169, %v2257_v25  ;;  %v14783_v29 = vmov 683565275  }
 0x12b   : > { %1332 = vrot.lane.b32.xlu0 %v8321_v33, %s7982_s19  ;;  %v2367_v44 = vadd.s32 1, %v6880_v2  ;;  %v14787_v18 = vmov 920167782  }
 0x12c   : > { %v8784_v20 = vpop.permute.xlu1 %1230  ;;  %v8786_v13 = vpop.permute.xlu0 %1228  ;;  %v2215_v16 = vsub.s32 0, %v8776_v61  ;;  %v2106_v55 = vadd.s32 536870912, %v2105_v36  ;;  %v2263_v45 = vadd.s32 1, %v6876_v39 }
 0x12d   : > { %14776 = vst [vmem:[#allocation28_spill] sm:$0xff] %v8784_v20  ;;  %14777 = vst [vmem:[#allocation29_spill] sm:$0xff] %v8786_v13  ;;  %vm2368_vm13 = vcmp.gt.s32.totalorder %v2367_v44, 0 }
 0x12e   : > { %482 = vrot.lane.b32.xlu1 %v8782_v31, %s7974_s25  ;;  %v6873_v17 = vmin.u32 %v2215_v16, %v8776_v61  ;;  %v8797_v37 = vshrl.u32 %v2106_v55, 30  ;;  %v2369_v27 = vsel %vm2368_vm13, %v2367_v44, 0  ;;  %v2364_v44 = vand.u32 8388607, %v14505_v50 }
 0x12f   : > { %480 = vrot.lane.b32.xlu0 %v8789_v30, %s7974_s25  ;;  %v2371_v2 = vand.u32 31, %v2369_v27  ;;  %vm2264_vm14 = vcmp.gt.s32.totalorder %v2263_v45, 0 }
 0x130   : > { %14778 = vst [vmem:[#allocation30_spill] sm:$0xff] %v8797_v37  ;;  %v8800_v19 = vpop.permute.xlu1 %470  ;;  %v8802_v10 = vpop.permute.xlu0 %468  ;;  %v2108_v11 = vshll.u32 %v8797_v37, 30  ;;  %v2217_v16 = vclz %v6873_v17  ;;  %v2365_v15 = vor.u32 8388608, %v2364_v44  ;;  %v2265_v13 = vsel %vm2264_vm14, %v2263_v45, 0 }
 0x131   : > { %14779 = vst [vmem:[#allocation31_spill] sm:$0xff] %v8800_v19  ;;  %14780 = vst [vmem:[#allocation32_spill] sm:$0xff] %v8802_v10  ;;  %v2372_v25 = vsub.s32 32, %v2371_v2  ;;  %v2374_v37 = vshll.u32 %v14783_v29, %v2371_v2  ;;  %v2377_v17 = vshll.u32 %v14784_v4, %v2371_v2  ;;  %v2380_v12 = vshll.u32 %v14785_v26, %v2371_v2 }
 0x132   : > { %578 = vrot.lane.b32.xlu1 %v8782_v31, %s7973_s24  ;;  %v8809_v55 = vsub.s32 %v2105_v36, %v2108_v11  ;;  %v2383_v36 = vshll.u32 %v14786_v14, %v2371_v2  ;;  %v2386_v35 = vshll.u32 %v14787_v18, %v2371_v2 }
 0x133   : > { %576 = vrot.lane.b32.xlu0 %v8789_v30, %s7973_s24  ;;  %v2375_v23 = vshrl.u32 %v14784_v4, %v2372_v25  ;;  %v2378_v39 = vshrl.u32 %v14785_v26, %v2372_v25  ;;  %v2381_v11 = vshrl.u32 %v14786_v14, %v2372_v25  ;;  %v2384_v50 = vshrl.u32 %v14787_v18, %v2372_v25 }
 0x134   : > { %v8813_v19 = vpop.permute.xlu1 %566  ;;  %v8815_v10 = vpop.permute.xlu0 %564  ;;  %v2111_v22 = vsub.s32 0, %v8809_v55 }
 0x135   : > { %14781 = vst [vmem:[#allocation33_spill] sm:$0xff] %v8813_v19  ;;  %14782 = vst [vmem:[#allocation34_spill] sm:$0xff] %v8815_v10  ;;  %v6874_v10 = vadd.s32 4294967294, %v2217_v16  ;;  %v2370_v19 = vshrl.u32 %v2369_v27, 5  ;;  %v2376_v8 = vor.u32 %v2375_v23, %v2374_v37  ;;  %v2379_v5 = vor.u32 %v2378_v39, %v2377_v17 }
 0x136   : > { %670 = vrot.lane.b32.xlu1 %v8673_v53, %s7975_s26  ;;  %v6869_v9 = vmin.u32 %v2111_v22, %v8809_v55  ;;  %v2385_v52 = vor.u32 %v2384_v50, %v2383_v36  ;;  %v2382_v56 = vor.u32 %v2381_v11, %v2380_v12  ;;  %v14790_v16 = vmov 1326507024  }
 0x137   : > { %668 = vrot.lane.b32.xlu0 %v8689_v3, %s7975_s26  ;;  %v2387_v27 = vshrl.u32 %v14790_v16, %v2372_v25  ;;  %vm2389_vm15 = vcmp.lt.s32.totalorder %v2370_v19, 1  ;;  %vm2392_vm11 = vcmp.lt.s32.totalorder %v2370_v19, 4  ;;  %vm6875_vm12 = vcmp.lt.s32.totalorder %v6874_v10, 0 }
 0x138   : > { %v8831_v57 = vpop.permute.xlu1 %1234  ;;  %v8833_v54 = vpop.permute.xlu0 %1232  ;;  %v2113_v20 = vclz %v6869_v9  ;;  %vm2391_vm13 = vcmp.lt.s32.totalorder %v2370_v19, 3  ;;  %v2397_v23 = vsel %vm2389_vm15, %v2376_v8, %v2379_v5  ;;  %v2398_v12 = vsel %vm2392_vm11, %v2385_v52, 920167782 }
 0x139   : > { %14788 = vst [vmem:[#allocation35_spill] sm:$0xff] %v8831_v57  ;;  %14789 = vst [vmem:[#allocation36_spill] sm:$0xff] %v8833_v54  ;;  %v2388_v28 = vor.u32 %v2387_v27, %v2386_v35  ;;  %vm2390_vm14 = vcmp.lt.s32.totalorder %v2370_v19, 2  ;;  %v2394_v45 = vsel %vm2392_vm11, %v2382_v56, 2102212464  ;;  %v2399_v35 = vsel %vm2391_vm13, %v2382_v56, %v2398_v12 }
 0x13a   : > { %1338 = vrot.lane.b32.xlu1 %v8356_v42, %s7982_s19  ;;  %v14514_v9 = vand.u32 2147483647, %v8700_v62  ;;  %v2373_v50 = vshrl.u32 %v14783_v29, %v2372_v25  ;;  %v2400_v2 = vsel %vm2390_vm14, %v2397_v23, %v2399_v35  ;;  %v2401_v44 = vsel %vm2389_vm15, %v2379_v5, %v2382_v56 }
 0x13b   : > { %1336 = vrot.lane.b32.xlu0 %v8359_v43, %s7982_s19  ;;  %v2405_v17 = vshll.u32 %v2365_v15, 8  ;;  %v8855_v39 = vsel %vm6875_vm12, 0, %v6874_v10  ;;  %v6870_v11 = vadd.s32 4294967294, %v2113_v20  ;;  %v2402_v36 = vsel %vm2392_vm11, %v2388_v28, 1326507024 }
 0x13c   : > { %v8843_v22 = vpop.permute.xlu1 %1326  ;;  %v8845_v37 = vpop.permute.xlu0 %1324  ;;  %v2267_v27 = vand.u32 31, %v2265_v13  ;;  %v2393_v12 = vsel %vm2389_vm15, %v2373_v50, %v2376_v8  ;;  %v2395_v25 = vsel %vm2391_vm13, %v2379_v5, %v2394_v45  ;;  %v2403_v23 = vsel %vm2391_vm13, %v2385_v52, %v2402_v36 }
 0x13d   : > { %v2404_v10 = vsel %vm2390_vm14, %v2401_v44, %v2403_v23  ;;  %v8868_v35 = vmul.u32.u64.low %v2405_v17, %v2400_v2  ;;  %v8869_v20 = vmul.u32.u64.high %v2405_v17, %v2400_v2, %v8868_v35  ;;  %v2260_v28 = vand.u32 8388607, %v14514_v9 }
 0x13e   : > { %1430 = vrot.lane.b32.xlu1 %v8318_v32, %s14659_s20  ;;  %v2225_v54 = vsub.s32 4294967266, %v8855_v39  ;;  %v8875_v8 = vmul.u32.u64.low %v2405_v17, %v2404_v10  ;;  %v8876_v50 = vmul.u32.u64.high %v2405_v17, %v2404_v10, %v8875_v8  ;;  %vm6871_vm15 = vcmp.lt.s32.totalorder %v6870_v11, 0 }
 0x13f   : > { %1428 = vrot.lane.b32.xlu0 %v8321_v33, %s14659_s20  ;;  %14793 = vst [vmem:[#allocation39_spill] sm:$0xff] %v8868_v35  ;;  %v2396_v52 = vsel %vm2390_vm14, %v2393_v12, %v2395_v25  ;;  %v2268_v5 = vsub.s32 32, %v2267_v27  ;;  %v2205_v45 = vadd.s32 %v8680_v21, %v8677_v60  ;;  %v2415_v36 = vadd.s32 1, %v8869_v20 }
 0x140   : > { %v8863_v56 = vpop.permute.xlu1 %474  ;;  %v8865_v15 = vpop.permute.xlu0 %472  ;;  %v2261_v23 = vor.u32 8388608, %v2260_v28  ;;  %v8890_v10 = vshrl.u32 %v2265_v13, 5  ;;  %v2221_v19 = vsub.s32 32, %v8855_v39  ;;  %v8894_v12 = vadd.s32 127, %v2225_v54 }
 0x141   : > { %14791 = vst [vmem:[#allocation37_spill] sm:$0xff] %v8863_v56  ;;  %14792 = vst [vmem:[#allocation38_spill] sm:$0xff] %v8865_v15  ;;  %v2271_v8 = vshrl.u32 %v14784_v4, %v2268_v5  ;;  %v8896_v25 = vsel %vm6871_vm15, 0, %v6870_v11  ;;  %v2412_v9 = vmul.u32 %v2405_v17, %v2396_v52  ;;  %vm2414_vm11 = vc.u32 %v8876_v50, %v8868_v35 }
 0x142   : > { %674 = vrot.lane.b32.xlu1 %v8782_v31, %s7975_s26  ;;  %v2270_v60 = vshll.u32 %v14783_v29, %v2267_v27  ;;  %v2273_v21 = vshll.u32 %v14784_v4, %v2267_v27  ;;  %v2274_v13 = vshrl.u32 %v14785_v26, %v2268_v5  ;;  %v2416_v54 = vsel %vm2414_vm11, %v2415_v36, %v8869_v20 }
 0x143   : > { %672 = vrot.lane.b32.xlu0 %v8789_v30, %s7975_s26  ;;  %v2276_v11 = vshll.u32 %v14785_v26, %v2267_v27  ;;  %v2277_v17 = vshrl.u32 %v14786_v14, %v2268_v5  ;;  %v2279_v28 = vshll.u32 %v14786_v14, %v2267_v27  ;;  %v2417_v15 = vadd.s32 %v2416_v54, %v2412_v9 }
 0x144   : > { %v8885_v2 = vpop.permute.xlu1 %570  ;;  %v8887_v44 = vpop.permute.xlu0 %568  ;;  %v2275_v56 = vor.u32 %v2274_v13, %v2273_v21  ;;  %v2121_v4 = vsub.s32 4294967266, %v8896_v25  ;;  %v2282_v20 = vshll.u32 %v14787_v18, %v2267_v27  ;;  %v2283_v36 = vshrl.u32 %v14790_v16, %v2268_v5 }
 0x145   : > { %14794 = vst [vmem:[#allocation40_spill] sm:$0xff] %v8885_v2  ;;  %14795 = vst [vmem:[#allocation41_spill] sm:$0xff] %v8887_v44  ;;  %v2272_v44 = vor.u32 %v2271_v8, %v2270_v60  ;;  %v2280_v2 = vshrl.u32 %v14787_v18, %v2268_v5  ;;  %v2278_v57 = vor.u32 %v2277_v17, %v2276_v11  ;;  %v2418_v26 = vadd.s32 536870912, %v2417_v15 }
 0x146   : > { %766 = vrot.lane.b32.xlu1 %v8673_v53, %s14796_s27  ;;  %v2223_v14 = vshrl.u32 %v2205_v45, %v2221_v19  ;;  %v8921_v35 = vshll.u32 %v2261_v23, 8  ;;  %v2227_v9 = vshll.u32 %v8894_v12, 23  ;;  %v2284_v8 = vor.u32 %v2283_v36, %v2282_v20 }
 0x147   : > { %764 = vrot.lane.b32.xlu0 %v8689_v3, %s14796_s27  ;;  %vm2285_vm12 = vcmp.lt.s32.totalorder %v8890_v10, 1  ;;  %vm2288_vm13 = vcmp.lt.s32.totalorder %v8890_v10, 4  ;;  %v8932_v21 = vshrl.u32 %v2418_v26, 30  ;;  %vm2287_vm14 = vcmp.lt.s32.totalorder %v8890_v10, 3 }
 0x148   : > { %v8911_v52 = vpop.permute.xlu1 %662  ;;  %v8913_v62 = vpop.permute.xlu0 %660  ;;  %v2293_v45 = vsel %vm2285_vm12, %v2272_v44, %v2275_v56  ;;  %v2122_v23 = vadd.s32 127, %v2121_v4  ;;  %vm2286_vm15 = vcmp.lt.s32.totalorder %v8890_v10, 2  ;;  %v2290_v19 = vsel %vm2288_vm13, %v2278_v57, 2102212464 }
 0x149   : > { %14797 = vst [vmem:[#allocation42_spill] sm:$0xff] %v8911_v52  ;;  %v2281_v52 = vor.u32 %v2280_v2, %v2279_v28  ;;  %14798 = vst [vmem:[#allocation43_spill] sm:$0xff] %v8932_v21  ;;  %v2420_v26 = vshll.u32 %v8932_v21, 30  ;;  %v2269_v13 = vshrl.u32 %v14783_v29, %v2268_v5  ;;  %v2297_v4 = vsel %vm2285_vm12, %v2275_v56, %v2278_v57 }
 0x14a   : > { %1434 = vrot.lane.b32.xlu1 %v8356_v42, %s14659_s20  ;;  %v2117_v11 = vsub.s32 32, %v8896_v25  ;;  %v2298_v17 = vsel %vm2288_vm13, %v2284_v8, 1326507024  ;;  %v1609_v10 = vsel %vm14554_vm0, %v8371_v47, %v8379_v49 }
 0x14b   : > { %1432 = vrot.lane.b32.xlu0 %v8359_v43, %s14659_s20  ;;  %v2294_v2 = vsel %vm2288_vm13, %v2281_v52, 920167782  ;;  %v8966_v36 = vsub.s32 %v2417_v15, %v2420_v26  ;;  %v2299_v8 = vsel %vm2287_vm14, %v2281_v52, %v2298_v17  ;;  %v2222_v15 = vshll.u32 %v8776_v61, %v8855_v39 }
 0x14c   : > { %v8928_v27 = vpop.permute.xlu1 %1330  ;;  %v8930_v60 = vpop.permute.xlu0 %1328  ;;  %v2295_v12 = vsel %vm2287_vm14, %v2278_v57, %v2294_v2  ;;  %v2289_v57 = vsel %vm2285_vm12, %v2269_v13, %v2272_v44  ;;  %v2123_v2 = vshll.u32 %v2122_v23, 23  ;;  %v2228_v44 = vor.u32 4788187, %v2227_v9 }
 0x14d   : > { %v2296_v54 = vsel %vm2286_vm15, %v2293_v45, %v2295_v12  ;;  %v2101_v45 = vadd.s32 %v8747_v40, %v8753_v41  ;;  %v2300_v12 = vsel %vm2286_vm15, %v2297_v4, %v2299_v8  ;;  %v2423_v40 = vsub.s32 0, %v8966_v36 }
 0x14e   : > { %1526 = vrot.lane.b32.xlu1 %v8318_v32, %s14799_s28  ;;  %v8958_v32 = vmul.u32.u64.low %v8921_v35, %v2296_v54  ;;  %v8959_v28 = vmul.u32.u64.high %v8921_v35, %v2296_v54, %v8958_v32  ;;  %v2224_v61 = vor.u32 %v2223_v14, %v2222_v15  ;;  %v1610_v39 = vsel %vm14554_vm0, %v8369_v46, %v8377_v48 }
 0x14f   : > { %1524 = vrot.lane.b32.xlu0 %v8321_v33, %s14799_s28  ;;  %v2291_v33 = vsel %vm2287_vm14, %v2275_v56, %v2290_v19  ;;  %v8983_v26 = vmul.u32.u64.low %v8921_v35, %v2300_v12  ;;  %v8984_v56 = vmul.u32.u64.high %v8921_v35, %v2300_v12, %v8983_v26  ;;  %v2119_v52 = vshrl.u32 %v2101_v45, %v2117_v11 }
 0x150   : > { %v8962_v5 = vpop.permute.xlu1 %1422  ;;  %v8964_v20 = vpop.permute.xlu0 %1420  ;;  %v2292_v41 = vsel %vm2286_vm15, %v2289_v57, %v2291_v33  ;;  %v2311_v23 = vadd.s32 1, %v8959_v28  ;;  %v2118_v9 = vshll.u32 %v8809_v55, %v8896_v25  ;;  %v2124_v54 = vor.u32 4788187, %v2123_v2  ;;  %v14801_v26 = vld [vmem:[#allocation24_spill] sm:$0xff] }
 0x151   : > { %v2229_v4 = vand.u32 2147483647, %v2228_v44  ;;  %v2308_v11 = vmul.u32 %v8921_v35, %v2292_v41  ;;  %vm2310_vm11 = vc.u32 %v8984_v56, %v8958_v32  ;;  %v1643_v46 = vsel %vm14553_vm1, %v1610_v39, %v8417_v58 }
 0x152   : > { %770 = vrot.lane.b32.xlu1 %v8782_v31, %s14796_s27  ;;  %v2120_v48 = vor.u32 %v2119_v52, %v2118_v9  ;;  %v6881_v14 = vmin.u32 %v2423_v40, %v8966_v36  ;;  %v2312_v55 = vsel %vm2310_vm11, %v2311_v23, %v8959_v28  ;;  %v1642_v49 = vsel %vm14553_vm1, %v1609_v10, %v8419_v59  ;;  %v14803_v23 = vld [vmem:[#allocation29_spill] sm:$0xff] }
 0x153   : > { %768 = vrot.lane.b32.xlu0 %v8789_v30, %s14796_s27  ;;  %v1676_v35 = vsel %vm14562_vm2, %v1643_v46, %v8455_v1  ;;  %v2231_v17 = vcvt.s32.f32 %v2224_v61  ;;  %v2313_v57 = vadd.s32 %v2312_v55, %v2308_v11  ;;  %v1675_v58 = vsel %vm14562_vm2, %v1642_v49, %v8457_v0 }
 0x154   : > { %v8992_v19 = vpop.permute.xlu1 %666  ;;  %v8994_v13 = vpop.permute.xlu0 %664  ;;  %v2125_v33 = vand.u32 2147483647, %v2124_v54  ;;  %v1709_v8 = vsel %vm14650_vm3, %v1676_v35, %v8565_v7  ;;  %v1708_v45 = vsel %vm14650_vm3, %v1675_v58, %v8567_v24  ;;  %v2127_v2 = vcvt.s32.f32 %v2120_v48 }
 0x155   : > { %v2232_v28 = vmul.f32 %v2231_v17, %v2229_v4  ;;  %v2314_v59 = vadd.s32 536870912, %v2313_v57  ;;  %v1742_v1 = vsel %vm14613_vm4, %v1709_v8, %v8631_v34  ;;  %v2425_v0 = vclz %v6881_v14  ;;  %v14805_v14 = vld [vmem:[#allocation10_spill] sm:$0xff]  ;;  %v14808_v17 = vld [vmem:[#allocation7_spill] sm:$0xff]  ;;  %v14810_v8 = vld [vmem:[#allocation8_spill] sm:$0xff] }
 0x156   : > { %862 = vrot.lane.b32.xlu1 %v8673_v53, %s14800_s21  ;;  %v1741_v12 = vsel %vm14613_vm4, %v1708_v45, %v8633_v38  ;;  %v1775_v7 = vsel %vm14570_vm5, %v1742_v1, %v8684_v63  ;;  %v2128_v44 = vmul.f32 %v2127_v2, %v2125_v33  ;;  %v14802_v38 = vld [vmem:[#allocation28_spill] sm:$0xff]  ;;  %v14811_v1 = vld [vmem:[#allocation11_spill] sm:$0xff] }
 0x157   : > { %860 = vrot.lane.b32.xlu0 %v8689_v3, %s14800_s21  ;;  %v9043_v24 = vshrl.u32 %v2314_v59, 30  ;;  %v1774_v34 = vsel %vm14570_vm5, %v1741_v12, %v8686_v6  ;;  %v2233_v63 = vxor.u32 2147483648, %v2232_v28 }
 0x158   : > { %v9015_v25 = vpop.permute.xlu1 %758  ;;  %v9017_v47 = vpop.permute.xlu0 %756  ;;  %v1807_v52 = vsel %vm14563_vm6, %v1774_v34, %v14801_v26  ;;  %v2129_v48 = vxor.u32 2147483648, %v2128_v44  ;;  %v14818_v26 = vld [vmem:[#allocation13_spill] sm:$0xff] }
 0x159   : > { %v2316_v41 = vshll.u32 %v9043_v24, 30  ;;  %v1840_v61 = vsel %vm14535_vm7, %v1807_v52, %v14803_v23  ;;  %vm14532_vm15 = vcmp.lt.s32.totalorder %v14818_v26, 0  ;;  %v14820_v23 = vand.u32 2147483647, %v14818_v26 }
 0x15a   : > { %1530 = vrot.lane.b32.xlu1 %v8356_v42, %s14799_s28  ;;  %v1873_v39 = vsel %vm14534_vm8, %v1840_v61, %v8845_v37  ;;  %v14806_v37 = vld [vmem:[#allocation6_spill] sm:$0xff]  ;;  %v14821_v61 = vmov 0 }
 0x15b   : > { %1528 = vrot.lane.b32.xlu0 %v8359_v43, %s14799_s28  ;;  %v1808_v43 = vsel %vm14563_vm6, %v1775_v7, %v8740_v51  ;;  %v6882_v51 = vadd.s32 4294967294, %v2425_v0  ;;  %v9066_v4 = vsub.s32 %v2313_v57, %v2316_v41  ;;  %v1906_v11 = vsel %vm14533_vm9, %v1873_v39, %v8964_v20  ;;  %v14809_v57 = vld [vmem:[#allocation5_spill] sm:$0xff] }
 0x15c   : > { %v9039_v42 = vpop.permute.xlu1 %1426  ;;  %v9041_v15 = vpop.permute.xlu0 %1424  ;;  %v1841_v40 = vsel %vm14535_vm7, %v1808_v43, %v14802_v38  ;;  %v1611_v20 = vsel %vm14554_vm0, %v14809_v57, %v14808_v17  ;;  %v14813_v7 = vld [vmem:[#allocation9_spill] sm:$0xff]  ;;  %v14815_v43 = vmov 0  ;;  %vm9120_vm11 = vcmp.le.f32.partialorder %v14820_v23, 0.7853982 }
 0x15d   : > { %v1874_v6 = vsel %vm14534_vm8, %v1841_v40, %v8843_v22  ;;  %v14804_v22 = vld [vmem:[#allocation12_spill] sm:$0xff]  ;;  %vm6883_vm13 = vcmp.lt.s32.totalorder %v6882_v51, 0  ;;  %v2319_v59 = vsub.s32 0, %v9066_v4  ;;  %v2130_v40 = vsel %vm14532_vm15, %v2129_v48, %v2128_v44 }
 0x15e   : > { %866 = vrot.lane.b32.xlu1 %v8782_v31, %s14800_s21  ;;  %v1907_v9 = vsel %vm14533_vm9, %v1874_v6, %v8962_v5  ;;  %vm14529_vm12 = vcmp.lt.s32.totalorder %v14804_v22, 0  ;;  %v14807_v5 = vld [vmem:[#allocation4_spill] sm:$0xff]  ;;  %v14814_v34 = vand.u32 2147483647, %v14804_v22  ;;  %v14822_v61 = vsel %vm9120_vm11, 4294967295, %v14821_v61  ;;  %v14824_v6 = vld [vmem:[#allocation14_spill] sm:$0xff] }
 0x15f   : > { %864 = vrot.lane.b32.xlu0 %v8789_v30, %s14800_s21  ;;  %v1612_v35 = vsel %vm14554_vm0, %v14807_v5, %v14806_v37  ;;  %v2234_v58 = vsel %vm14529_vm12, %v2233_v63, %v2232_v28  ;;  %v1644_v28 = vsel %vm14553_vm1, %v1611_v20, %v14813_v7  ;;  %14823 = vst [vmem:[#allocation10_spill] sm:$0xff] %v14822_v61  ;;  %v9129_v44 = vsel %vm6883_vm13, 0, %v6882_v51  ;;  %v14827_v37 = vld [vmem:[#allocation17_spill] sm:$0xff] }
 0x160   : > { %v1519_v54 = vpop.permute.xlu1 %1518  ;;  %v1517_v10 = vpop.permute.xlu0 %1516  ;;  %v1645_v45 = vsel %vm14553_vm1, %v1612_v35, %v14810_v8  ;;  %vm9101_vm14 = vcmp.le.f32.partialorder %v14814_v34, 0.7853982  ;;  %v2133_v51 = vsel %vm9120_vm11, %v14818_v26, %v2130_v40  ;;  %v14828_v35 = vld [vmem:[#allocation19_spill] sm:$0xff]  ;;  %v2433_v57 = vsub.s32 4294967266, %v9129_v44  ;;  %v14829_v8 = vld [vmem:[#allocation20_spill] sm:$0xff] }
 0x161   : > { %v1940_v46 = vsel %vm14614_vm10, %v1907_v9, %v1519_v54  ;;  %v1939_v49 = vsel %vm14614_vm10, %v1906_v11, %v1517_v10  ;;  %v14816_v43 = vsel %vm9101_vm14, 4294967295, %v14815_v43  ;;  %v2237_v38 = vsel %vm9101_vm14, %v14804_v22, %v2234_v58  ;;  %v14825_v9 = vld [vmem:[#allocation15_spill] sm:$0xff]  ;;  %v14826_v11 = vld [vmem:[#allocation16_spill] sm:$0xff] }
 0x162   : > { %v1979_v55 = vmul.f32 %v14805_v14, %v1940_v46  ;;  %958 = vrot.lane.b32.xlu1 %v8673_v53, %s7978_s29  ;;  %v1978_v33 = vmul.f32 %v14805_v14, %v1939_v49  ;;  %14817 = vst [vmem:[#allocation28_spill] sm:$0xff] %v14816_v43  ;;  %v1678_v39 = vsel %vm14562_vm2, %v1645_v45, %v14824_v6  ;;  %7566 = vcosq.f32 %v2237_v38  ;;  %v14831_v34 = vld [vmem:[#allocation23_spill] sm:$0xff] }
 0x163   : > { %956 = vrot.lane.b32.xlu0 %v8689_v3, %s7978_s29  ;;  %v1677_v54 = vsel %vm14562_vm2, %v1644_v28, %v14825_v9  ;;  %v6877_v10 = vmin.u32 %v2319_v59, %v9066_v4  ;;  %v1711_v46 = vsel %vm14650_vm3, %v1678_v39, %v14826_v11  ;;  %7568 = vsinq.f32 %v2237_v38  ;;  %v14830_v59 = vld [vmem:[#allocation22_spill] sm:$0xff]  ;;  %v14832_v38 = vld [vmem:[#allocation39_spill] sm:$0xff] }
 0x164   : > { %v9091_v2 = vadd.f32 %v14811_v1, %v1979_v55  ;;  %v9093_v0 = vpop.permute.xlu1 %762  ;;  %v9095_v12 = vpop.permute.xlu0 %760  ;;  %v9107_v52 = vadd.f32 %v14811_v1, %v1978_v33  ;;  %v1710_v5 = vsel %vm14650_vm3, %v1677_v54, %v14827_v37  ;;  %v1744_v17 = vsel %vm14613_vm4, %v1711_v46, %v14828_v35  ;;  %v14833_v9 = vld [vmem:[#allocation26_spill] sm:$0xff]  ;;  %v14834_v11 = vld [vmem:[#allocation27_spill] sm:$0xff]  ;;  %v14836_v37 = vld [vmem:[#allocation36_spill] sm:$0xff] }
 0x165   : > { %v1743_v45 = vsel %vm14613_vm4, %v1710_v5, %v14829_v8  ;;  %v1777_v1 = vsel %vm14570_vm5, %v1744_v17, %v14830_v59  ;;  %7570 = vcosq.f32 %v2133_v51  ;;  %v2321_v28 = vclz %v6877_v10 }
 0x166   : > { %14812 = vst [vmem:[#allocation24_spill] sm:$0xff] %v9091_v2  ;;  %14819 = vst [vmem:[#allocation29_spill] sm:$0xff] %v9107_v52  ;;  %v14522_v63 = vand.u32 2147483647, %v9091_v2  ;;  %v2568_v41 = vand.u32 2139095040, %v9091_v2  ;;  %962 = vrot.lane.b32.xlu1 %v8782_v31, %s7978_s29  ;;  %v2464_v14 = vand.u32 2139095040, %v9107_v52  ;;  %v1776_v40 = vsel %vm14570_vm5, %v1743_v45, %v14831_v34 }
 0x167   : > { %960 = vrot.lane.b32.xlu0 %v8789_v30, %s7978_s29  ;;  %v14521_v33 = vand.u32 2147483647, %v9107_v52  ;;  %7572 = vsinq.f32 %v2133_v51  ;;  %v9166_v39 = vadd.s32 %v14832_v38, %v8876_v50  ;;  %v1810_v54 = vsel %vm14563_vm6, %v1777_v1, %v14833_v9  ;;  %v14835_v51 = vld [vmem:[#allocation35_spill] sm:$0xff]  ;;  %v14839_v34 = vld [vmem:[#allocation33_spill] sm:$0xff] }
 0x168   : > { %v2569_v48 = vshrl.u32 %v2568_v41, 23  ;;  %v9137_v55 = vpop.permute.xlu1 %854  ;;  %v9139_v49 = vpop.permute.xlu0 %852  ;;  %v2572_v58 = vand.u32 8388607, %v14522_v63  ;;  %v2465_v7 = vshrl.u32 %v2464_v14, 23  ;;  %v1809_v46 = vsel %vm14563_vm6, %v1776_v40, %v14834_v11 }
 0x169   : > { %v9176_v14 = vand.u32 8388607, %v14521_v33  ;;  %v1843_v50 = vsel %vm14535_vm7, %v1810_v54, %v14835_v51  ;;  %v1842_v5 = vsel %vm14535_vm7, %v1809_v46, %v14836_v37 }
 0x16a   : > { %v6888_v20 = vadd.s32 4294967169, %v2569_v48  ;;  %1054 = vrot.lane.b32.xlu1 %v8673_v53, %s14587_s11  ;;  %v9172_v48 = vadd.s32 127, %v2433_v57  ;;  %v2573_v10 = vor.u32 8388608, %v2572_v58  ;;  %v6884_v17 = vadd.s32 4294967169, %v2465_v7  ;;  %v14840_v7 = vld [vmem:[#allocation31_spill] sm:$0xff] }
 0x16b   : > { %1052 = vrot.lane.b32.xlu0 %v8689_v3, %s14587_s11  ;;  %v9186_v57 = vadd.s32 4294967294, %v2321_v28  ;;  %v1875_v58 = vsel %vm14534_vm8, %v1842_v5, %v8930_v60  ;;  %v9200_v40 = vsel %vm14554_vm0, %v14840_v7, %v14839_v34 }
 0x16c   : > { %v2575_v41 = vadd.s32 1, %v6888_v20  ;;  %v1523_v23 = vpop.permute.xlu1 %1522  ;;  %v9162_v6 = vpop.permute.xlu0 %1520  ;;  %v1876_v20 = vsel %vm14534_vm8, %v1843_v50, %v8928_v27  ;;  %v9206_v27 = vsel %vm14533_vm9, %v1875_v58, %v9041_v15  ;;  %v9209_v38 = vshll.u32 %v2573_v10, 8 }
 0x16d   : > { %v1909_v28 = vsel %vm14533_vm9, %v1876_v20, %v9039_v42  ;;  %v9214_v54 = vpop.eup %7566  ;;  %v14842_v42 = vmov 2475754826   ;;  %v2471_v50 = vadd.s32 1, %v6884_v17  ;;  %v14843_v10 = vmov 2131351028  }
 0x16e   : > { %vm2576_vm13 = vcmp.gt.s32.totalorder %v2575_v41, 0  ;;  %1058 = vrot.lane.b32.xlu1 %v8782_v31, %s14587_s11  ;;  %14841 = vst [vmem:[#allocation7_spill] sm:$0xff] %v9214_v54  ;;  %v14844_v20 = vmov 2102212464   ;;  %v9229_v7 = vpop.eup %7568  ;;  %v1942_v21 = vsel %vm14614_vm10, %v1909_v28, %v1523_v23 }
 0x16f   : > { %v2577_v35 = vsel %vm2576_vm13, %v2575_v41, 0  ;;  %1056 = vrot.lane.b32.xlu0 %v8789_v30, %s14587_s11  ;;  %vm6879_vm13 = vcmp.lt.s32.totalorder %v9186_v57, 0  ;;  %14846 = vst [vmem:[#allocation8_spill] sm:$0xff] %v9229_v7  ;;  %v9235_v60 = vpop.eup %7570  ;;  %vm2472_vm8 = vcmp.gt.s32.totalorder %v2471_v50, 0 }
 0x170   : > { %v2579_v8 = vand.u32 31, %v2577_v35  ;;  %v9192_v45 = vpop.permute.xlu1 %858  ;;  %v9194_v59 = vpop.permute.xlu0 %856  ;;  %v2578_v11 = vshrl.u32 %v2577_v35, 5  ;;  %14847 = vst [vmem:[#allocation11_spill] sm:$0xff] %v9235_v60 }
 0x171   : > { %14837 = vst [vmem:[#allocation6_spill] sm:$0xff] %v9192_v45  ;;  %14838 = vst [vmem:[#allocation4_spill] sm:$0xff] %v9194_v59  ;;  %v9240_v61 = vpop.eup %7572 }
 0x172   : > { %v2580_v41 = vsub.s32 32, %v2579_v8  ;;  %1150 = vrot.lane.b32.xlu1 %v8673_v53, %s14536_s14  ;;  %v2582_v46 = vshll.u32 %v14783_v29, %v2579_v8  ;;  %v2585_v51 = vshll.u32 %v14842_v42, %v2579_v8  ;;  %v2588_v5 = vshll.u32 %v14843_v10, %v2579_v8  ;;  %14848 = vst [vmem:[#allocation9_spill] sm:$0xff] %v9240_v61 }
 0x173   : > { %1148 = vrot.lane.b32.xlu0 %v8689_v3, %s14536_s14  ;;  %v2591_v17 = vshll.u32 %v14844_v20, %v2579_v8  ;;  %v2594_v63 = vshll.u32 %v14787_v18, %v2579_v8  ;;  %vm2597_vm12 = vcmp.lt.s32.totalorder %v2578_v11, 1  ;;  %vm2599_vm15 = vcmp.lt.s32.totalorder %v2578_v11, 3 }
 0x174   : > { %v2583_v15 = vshrl.u32 %v14842_v42, %v2580_v41  ;;  %v2586_v37 = vshrl.u32 %v14843_v10, %v2580_v41  ;;  %v2589_v58 = vshrl.u32 %v14844_v20, %v2580_v41  ;;  %v9225_v34 = vpop.permute.xlu1 %950  ;;  %v9227_v35 = vpop.permute.xlu0 %948  ;;  %v2592_v33 = vshrl.u32 %v14787_v18, %v2580_v41 }
 0x175   : > { %14845 = vst [vmem:[#allocation5_spill] sm:$0xff] %v9227_v35  ;;  %v2595_v9 = vshrl.u32 %v14790_v16, %v2580_v41  ;;  %v2581_v1 = vshrl.u32 %v14783_v29, %v2580_v41  ;;  %vm2600_vm9 = vcmp.lt.s32.totalorder %v2578_v11, 4  ;;  %vm2598_vm7 = vcmp.lt.s32.totalorder %v2578_v11, 2 }
 0x176   : > { %v2584_v54 = vor.u32 %v2583_v15, %v2582_v46  ;;  %v2587_v43 = vor.u32 %v2586_v37, %v2585_v51  ;;  %v2590_v22 = vor.u32 %v2589_v58, %v2588_v5  ;;  %1154 = vrot.lane.b32.xlu1 %v8782_v31, %s14536_s14  ;;  %v2593_v7 = vor.u32 %v2592_v33, %v2591_v17 }
 0x177   : > { %v2596_v26 = vor.u32 %v2595_v9, %v2594_v63  ;;  %1152 = vrot.lane.b32.xlu0 %v8789_v30, %s14536_s14  ;;  %v2473_v9 = vsel %vm2472_vm8, %v2471_v50, 0  ;;  %s14968_s14 = smov 15  }
 0x178   : > { %v2601_v8 = vsel %vm2597_vm12, %v2581_v1, %v2584_v54  ;;  %v2605_v41 = vsel %vm2597_vm12, %v2584_v54, %v2587_v43  ;;  %v9245_v46 = vpop.permute.xlu1 %954  ;;  %v9247_v51 = vpop.permute.xlu0 %952  ;;  %v2602_v15 = vsel %vm2600_vm9, %v2590_v22, 2102212464  ;;  %v2606_v37 = vsel %vm2600_vm9, %v2593_v7, 920167782  ;;  %v9257_v54 = vld [vmem:[%s14470_s1] ss:$0 sm:$0xff] }
 0x179   : > { %14849 = vst [vmem:[#allocation14_spill] sm:$0xff] %v9245_v46  ;;  %14850 = vst [vmem:[#allocation15_spill] sm:$0xff] %v9247_v51  ;;  %v2609_v5 = vsel %vm2597_vm12, %v2587_v43, %v2590_v22  ;;  %v2603_v63 = vsel %vm2599_vm15, %v2587_v43, %v2602_v15  ;;  %v2607_v33 = vsel %vm2599_vm15, %v2590_v22, %v2606_v37  ;;  %v2610_v23 = vsel %vm2600_vm9, %v2596_v26, 1326507024  ;;  %v9263_v43 = vld [vmem:[%s8079_s23 + $0x88] sm:$0xff] }
 0x17a   : > { %1246 = vrot.lane.b32.xlu1 %v8673_v53, %s7981_s15  ;;  %v2608_v1 = vsel %vm2598_vm7, %v2605_v41, %v2607_v33  ;;  %v2611_v28 = vsel %vm2599_vm15, %v2593_v7, %v2610_v23  ;;  %14851 = vst [vmem:[#allocation16_spill] sm:$0xff] %v9257_v54  ;;  %v1981_v58 = vmul.f32 %v9257_v54, %v1942_v21  ;;  %v9275_v7 = vld [vmem:[%s8079_s23 + $0x80] sm:$0xff]  ;;  %v14854_v41 = vld [vmem:[#allocation34_spill] sm:$0xff]  ;;  %v14857_v23 = vshll.u32 %v9172_v48, 23 }
 0x17b   : > { %1244 = vrot.lane.b32.xlu0 %v8689_v3, %s7981_s15  ;;  %v2604_v22 = vsel %vm2598_vm7, %v2601_v8, %v2603_v63  ;;  %v2612_v26 = vsel %vm2598_vm7, %v2609_v5, %v2611_v28  ;;  %v9266_v53 = vmul.u32.u64.low %v9209_v38, %v2608_v1  ;;  %v9267_v17 = vmul.u32.u64.high %v9209_v38, %v2608_v1, %v9266_v53  ;;  %v14855_v21 = vld [vmem:[#allocation32_spill] sm:$0xff] }
 0x17c   : > { %v9270_v11 = vpop.permute.xlu1 %1046  ;;  %v9272_v50 = vpop.permute.xlu0 %1044  ;;  %v9280_v15 = vsel %vm14554_vm0, %v14855_v21, %v14854_v41  ;;  %v9283_v3 = vmul.u32.u64.low %v9209_v38, %v2612_v26  ;;  %v9284_v8 = vmul.u32.u64.high %v9209_v38, %v2612_v26, %v9283_v3  ;;  %v1941_v37 = vsel %vm14614_vm10, %v9206_v27, %v9162_v6 }
 0x17d   : > { %14852 = vst [vmem:[#allocation17_spill] sm:$0xff] %v9270_v11  ;;  %14853 = vst [vmem:[#allocation19_spill] sm:$0xff] %v9272_v50  ;;  %v14856_v63 = vsub.s32 32, %v9129_v44  ;;  %v9298_v1 = vor.u32 4788187, %v14857_v23  ;;  %v2475_v28 = vand.u32 31, %v2473_v9  ;;  %v2620_v27 = vmul.u32 %v9209_v38, %v2604_v22 }
 0x17e   : > { %486 = vrot.lane.b32.xlu1 %v9263_v43, %s7974_s25  ;;  %v9305_v6 = vsel %vm6879_vm13, 0, %v9186_v57  ;;  %v9308_v26 = vshrl.u32 %v2473_v9, 5  ;;  %v2623_v48 = vadd.s32 1, %v9267_v17  ;;  %v9320_v3 = vld [vmem:[%s14471_s2] ss:$0 sm:$0xff]  ;;  %v1980_v38 = vmul.f32 %v9257_v54, %v1941_v37 }
 0x17f   : > { %v9294_v33 = vshrl.u32 %v9166_v39, %v14856_v63  ;;  %v14858_v39 = vor.u32 8388608, %v9176_v14  ;;  %484 = vrot.lane.b32.xlu0 %v9275_v7, %s7974_s25  ;;  %v2476_v21 = vsub.s32 32, %v2475_v28  ;;  %14859 = vst [vmem:[#allocation20_spill] sm:$0xff] %v9320_v3  ;;  %v9323_v57 = vadd.f32 %v9320_v3, %v1981_v58 }
 0x180   : > { %v9326_v9 = vpop.permute.xlu1 %1050  ;;  %v9328_v14 = vpop.permute.xlu0 %1048  ;;  %vm2622_vm7 = vc.u32 %v9284_v8, %v9266_v53  ;;  %v2478_v22 = vshll.u32 %v14783_v29, %v2475_v28  ;;  %v2481_v63 = vshll.u32 %v14842_v42, %v2475_v28  ;;  %v2484_v23 = vshll.u32 %v14843_v10, %v2475_v28 }
 0x181   : > { %v9312_v41 = vshll.u32 %v14858_v39, 8  ;;  %14860 = vst [vmem:[#allocation22_spill] sm:$0xff] %v9323_v57  ;;  %14861 = vst [vmem:[#allocation23_spill] sm:$0xff] %v9326_v9  ;;  %v2624_v39 = vsel %vm2622_vm7, %v2623_v48, %v9267_v17  ;;  %v2479_v58 = vshrl.u32 %v14842_v42, %v2476_v21  ;;  %v2482_v5 = vshrl.u32 %v14843_v10, %v2476_v21 }
 0x182   : > { %14862 = vst [vmem:[#allocation39_spill] sm:$0xff] %v9328_v14  ;;  %v2487_v37 = vshll.u32 %v14844_v20, %v2475_v28  ;;  %582 = vrot.lane.b32.xlu1 %v9263_v43, %s7973_s24  ;;  %v2625_v60 = vadd.s32 %v2624_v39, %v2620_v27  ;;  %v2477_v61 = vshrl.u32 %v14783_v29, %v2476_v21  ;;  %vm2493_vm8 = vcmp.lt.s32.totalorder %v9308_v26, 1 }
 0x183   : > { %v2485_v14 = vshrl.u32 %v14844_v20, %v2476_v21  ;;  %v2488_v9 = vshrl.u32 %v14787_v18, %v2476_v21  ;;  %580 = vrot.lane.b32.xlu0 %v9275_v7, %s7973_s24  ;;  %v2480_v17 = vor.u32 %v2479_v58, %v2478_v22  ;;  %v2483_v48 = vor.u32 %v2482_v5, %v2481_v63 }
 0x184   : > { %v2490_v51 = vshll.u32 %v14787_v18, %v2475_v28  ;;  %v2491_v46 = vshrl.u32 %v14790_v16, %v2476_v21  ;;  %v9348_v59 = vpop.permute.xlu1 %1142  ;;  %v9350_v45 = vpop.permute.xlu0 %1140  ;;  %v2626_v27 = vadd.s32 536870912, %v2625_v60  ;;  %vm2494_vm9 = vcmp.lt.s32.totalorder %v9308_v26, 2 }
 0x185   : > { %14863 = vst [vmem:[#allocation26_spill] sm:$0xff] %v9348_v59  ;;  %14864 = vst [vmem:[#allocation27_spill] sm:$0xff] %v9350_v45  ;;  %v2486_v39 = vor.u32 %v2485_v14, %v2484_v23  ;;  %v2489_v54 = vor.u32 %v2488_v9, %v2487_v37  ;;  %vm2495_vm12 = vcmp.lt.s32.totalorder %v9308_v26, 3  ;;  %vm2496_vm15 = vcmp.lt.s32.totalorder %v9308_v26, 4  ;;  %v14874_v26 = vld [vmem:[#allocation38_spill] sm:$0xff] }
 0x186   : > { %v2492_v50 = vor.u32 %v2491_v46, %v2490_v51  ;;  %1250 = vrot.lane.b32.xlu1 %v8782_v31, %s7981_s15  ;;  %v9358_v5 = vshrl.u32 %v2626_v27, 30  ;;  %v2501_v21 = vsel %vm2493_vm8, %v2480_v17, %v2483_v48  ;;  %v2497_v9 = vsel %vm2493_vm8, %v2477_v61, %v2480_v17 }
 0x187   : > { %v2498_v28 = vsel %vm2496_vm15, %v2486_v39, 2102212464  ;;  %v2502_v22 = vsel %vm2496_vm15, %v2489_v54, 920167782  ;;  %1248 = vrot.lane.b32.xlu0 %v8789_v30, %s7981_s15  ;;  %v2505_v51 = vsel %vm2493_vm8, %v2483_v48, %v2486_v39  ;;  %v2325_v37 = vsub.s32 32, %v9305_v6 }
 0x188   : > { %14865 = vst [vmem:[#allocation35_spill] sm:$0xff] %v9358_v5  ;;  %v2503_v46 = vsel %vm2495_vm12, %v2486_v39, %v2502_v22  ;;  %v2506_v14 = vsel %vm2496_vm15, %v2492_v50, 1326507024  ;;  %v9364_v63 = vpop.permute.xlu1 %1146  ;;  %v9366_v31 = vpop.permute.xlu0 %1144  ;;  %v2628_v23 = vshll.u32 %v9358_v5, 30  ;;  %v2499_v58 = vsel %vm2495_vm12, %v2483_v48, %v2498_v28  ;;  %v9384_v39 = vld [vmem:[%s8079_s23 + $0x68] sm:$0xff]  ;;  %v9396_v22 = vld [vmem:[%s8079_s23 + $0x60] sm:$0xff] }
 0x189   : > { %14866 = vst [vmem:[#allocation36_spill] sm:$0xff] %v9364_v63  ;;  %14867 = vst [vmem:[#allocation33_spill] sm:$0xff] %v9366_v31  ;;  %v2504_v30 = vsel %vm2494_vm9, %v2501_v21, %v2503_v46  ;;  %v2507_v61 = vsel %vm2495_vm12, %v2489_v54, %v2506_v14  ;;  %v2329_v48 = vsub.s32 4294967266, %v9305_v6  ;;  %v9401_v46 = vld [vmem:[%s8079_s23 + $0x98] sm:$0xff]  ;;  %v2500_v14 = vsel %vm2494_vm9, %v2497_v9, %v2499_v58  ;;  %v14871_v5 = vld [vmem:[#allocation40_spill] sm:$0xff] }
 0x18a   : > { %v2508_v50 = vsel %vm2494_vm9, %v2505_v51, %v2507_v61  ;;  %v9379_v17 = vmul.u32.u64.low %v9312_v41, %v2504_v30  ;;  %v9380_v27 = vmul.u32.u64.high %v9312_v41, %v2504_v30, %v9379_v17  ;;  %1342 = vrot.lane.b32.xlu1 %v9384_v39, %s7982_s19  ;;  %v9389_v28 = vsub.s32 %v2625_v60, %v2628_v23  ;;  %v9414_v61 = vld [vmem:[%s8079_s23 + $0x90] sm:$0xff]  ;;  %v14872_v31 = vld [vmem:[#allocation37_spill] sm:$0xff] }
 0x18b   : > { %v9392_v54 = vmul.u32.u64.low %v9312_v41, %v2508_v50  ;;  %v9393_v21 = vmul.u32.u64.high %v9312_v41, %v2508_v50, %v9392_v54  ;;  %1340 = vrot.lane.b32.xlu0 %v9396_v22, %s7982_s19  ;;  %v2309_v51 = vadd.s32 %v8958_v32, %v8984_v56  ;;  %v2776_v60 = vand.u32 2139095040, %v9323_v57  ;;  %v14873_v56 = vld [vmem:[#allocation41_spill] sm:$0xff] }
 0x18c   : > { %v9409_v23 = vadd.f32 %v9320_v3, %v1980_v38  ;;  %v9411_v30 = vpop.permute.xlu1 %1238  ;;  %v14870_v50 = vshll.u32 %v8966_v36, %v9129_v44  ;;  %v1616_v32 = vsel %vm14554_vm0, %v14872_v31, %v14871_v5  ;;  %v1615_v9 = vsel %vm14554_vm0, %v14874_v26, %v14873_v56  ;;  %v14876_v3 = vld [vmem:[#allocation21_spill] sm:$0xff]  ;;  %v14878_v56 = vld [vmem:[#allocation42_spill] sm:$0xff] }
 0x18d   : > { %14869 = vst [vmem:[#allocation34_spill] sm:$0xff] %v9411_v30  ;;  %v2631_v38 = vsub.s32 0, %v9389_v28  ;;  %v9427_v58 = vpop.permute.xlu0 %1236  ;;  %v2437_v63 = vand.u32 2147483647, %v9298_v1  ;;  %vm2255_vm13 = vcmp.lt.s32.totalorder %v14876_v3, 0  ;;  %v2327_v45 = vshrl.u32 %v2309_v51, %v2325_v37 }
 0x18e   : > { %14868 = vst [vmem:[#allocation31_spill] sm:$0xff] %v9409_v23  ;;  %v2432_v54 = vor.u32 %v9294_v33, %v14870_v50  ;;  %14875 = vst [vmem:[#allocation32_spill] sm:$0xff] %v9427_v58  ;;  %v2519_v36 = vadd.s32 1, %v9380_v27  ;;  %v2777_v44 = vshrl.u32 %v2776_v60, 23  ;;  %490 = vrot.lane.b32.xlu1 %v9401_v46, %s7974_s25  ;;  %v2330_v33 = vadd.s32 127, %v2329_v48 }
 0x18f   : > { %v6889_v5 = vmin.u32 %v2631_v38, %v9389_v28  ;;  %v2516_v31 = vmul.u32 %v9312_v41, %v2500_v14  ;;  %vm2518_vm7 = vc.u32 %v9393_v21, %v9379_v17  ;;  %488 = vrot.lane.b32.xlu0 %v9414_v61, %s7974_s25  ;;  %v14546_v37 = vand.u32 2147483647, %v9323_v57 }
 0x190   : > { %v2520_v1 = vsel %vm2518_vm7, %v2519_v36, %v9380_v27  ;;  %v6896_v51 = vadd.s32 4294967169, %v2777_v44  ;;  %v2672_v60 = vand.u32 2139095040, %v9409_v23  ;;  %v9443_v50 = vpop.permute.xlu1 %478  ;;  %v2439_v48 = vcvt.s32.f32 %v2432_v54 }
 0x191   : > { %14877 = vst [vmem:[#allocation40_spill] sm:$0xff] %v9443_v50  ;;  %v1647_v41 = vsel %vm14553_vm1, %v9200_v40, %v14878_v56  ;;  %v2633_v14 = vclz %v6889_v5  ;;  %v2521_v26 = vadd.s32 %v2520_v1, %v2516_v31  ;;  %v9448_v38 = vpop.permute.xlu0 %476  ;;  %v2326_v58 = vshll.u32 %v9066_v4, %v9305_v6 }
 0x192   : > { %14879 = vst [vmem:[#allocation37_spill] sm:$0xff] %v9448_v38  ;;  %v1646_v27 = vsel %vm14553_vm1, %v9280_v15, %v8913_v62  ;;  %v2783_v36 = vadd.s32 1, %v6896_v51  ;;  %586 = vrot.lane.b32.xlu1 %v9401_v46, %s7973_s24  ;;  %v2339_v54 = vsub.s32 4, %v9043_v24  ;;  %v9458_v44 = vmul.f32 %v2439_v48, %v2437_v63 }
 0x193   : > { %v2331_v40 = vshll.u32 %v2330_v33, 23  ;;  %v6890_v5 = vadd.s32 4294967294, %v2633_v14  ;;  %v2522_v31 = vadd.s32 536870912, %v2521_v26  ;;  %584 = vrot.lane.b32.xlu0 %v9414_v61, %s7973_s24  ;;  %v9462_v1 = vor.u32 %v2327_v45, %v2326_v58 }
 0x194   : > { %v2780_v4 = vand.u32 8388607, %v14546_v37  ;;  %vm2784_vm8 = vcmp.gt.s32.totalorder %v2783_v36, 0  ;;  %v2673_v62 = vshrl.u32 %v2672_v60, 23  ;;  %v9466_v15 = vpop.permute.xlu1 %574  ;;  %v9470_v6 = vsel %vm14553_vm1, %v1616_v32, %v8992_v19 }
 0x195   : > { %14880 = vst [vmem:[#allocation41_spill] sm:$0xff] %v9466_v15  ;;  %v9474_v63 = vsel %vm14553_vm1, %v1615_v9, %v8994_v13  ;;  %v9476_v33 = vshrl.u32 %v2522_v31, 30  ;;  %v2785_v51 = vsel %vm2784_vm8, %v2783_v36, 0  ;;  %v9478_v45 = vpop.permute.xlu0 %572  ;;  %v9482_v58 = vsel %vm14562_vm2, %v1647_v41, %v9015_v25  ;;  %v9517_v13 = vld [vmem:[%s8079_s23 + $0x78] sm:$0xff] }
 0x196   : > { %14882 = vst [vmem:[#allocation42_spill] sm:$0xff] %v9478_v45  ;;  %v9486_v60 = vsel %vm14562_vm2, %v1646_v27, %v9017_v47  ;;  %vm6891_vm9 = vcmp.lt.s32.totalorder %v6890_v5, 0  ;;  %v2787_v19 = vand.u32 31, %v2785_v51  ;;  %678 = vrot.lane.b32.xlu1 %v9263_v43, %s7975_s26  ;;  %v9491_v32 = vor.u32 4788187, %v2331_v40 }
 0x197   : > { %14881 = vst [vmem:[#allocation38_spill] sm:$0xff] %v9476_v33  ;;  %v2524_v9 = vshll.u32 %v9476_v33, 30  ;;  %676 = vrot.lane.b32.xlu0 %v9275_v7, %s7975_s26  ;;  %v9499_v25 = vsel %vm2255_vm13, %v2339_v54, %v9043_v24  ;;  %v2781_v48 = vor.u32 8388608, %v2780_v4  ;;  %v6892_v41 = vadd.s32 4294967169, %v2673_v62  ;;  %v9527_v33 = vld [vmem:[%s8079_s23 + $0x70] sm:$0xff] }
 0x198   : > { %14883 = vst [vmem:[#allocation44_spill] sm:$0xff] %v9499_v25  ;;  %v2788_v56 = vsub.s32 32, %v2787_v19  ;;  %v9502_v14 = vpop.permute.xlu1 %1242  ;;  %v9504_v27 = vsel %vm6891_vm9, 0, %v6890_v5  ;;  %v2790_v40 = vshll.u32 %v14783_v29, %v2787_v19  ;;  %v2793_v31 = vshll.u32 %v14842_v42, %v2787_v19 }
 0x199   : > { %14884 = vst [vmem:[#allocation45_spill] sm:$0xff] %v9502_v14  ;;  %v9506_v36 = vsub.s32 %v2521_v26, %v2524_v9  ;;  %v9510_v37 = vpop.permute.xlu0 %1240  ;;  %v2796_v4 = vshll.u32 %v14843_v10, %v2787_v19  ;;  %v9522_v5 = vshrl.u32 %v2785_v51, 5  ;;  %v2799_v9 = vshll.u32 %v14844_v20, %v2787_v19 }
 0x19a   : > { %14885 = vst [vmem:[#allocation46_spill] sm:$0xff] %v9510_v37  ;;  %v2791_v24 = vshrl.u32 %v14842_v42, %v2788_v56  ;;  %v2794_v54 = vshrl.u32 %v14843_v10, %v2788_v56  ;;  %v2797_v62 = vshrl.u32 %v14844_v20, %v2788_v56  ;;  %1346 = vrot.lane.b32.xlu1 %v9517_v13, %s7982_s19  ;;  %v14886_v57 = vand.u32 2147483647, %v14876_v3 }
 0x19b   : > { %v2527_v26 = vsub.s32 0, %v9506_v36  ;;  %v2800_v47 = vshrl.u32 %v14787_v18, %v2788_v56  ;;  %1344 = vrot.lane.b32.xlu0 %v9527_v33, %s7982_s19  ;;  %v2333_v14 = vand.u32 2147483647, %v9491_v32  ;;  %v9541_v59 = vshll.u32 %v2781_v48, 8 }
 0x19c   : > { %vm9533_vm12 = vcmp.le.f32.partialorder %v14886_v57, 0.7853982  ;;  %v2792_v38 = vor.u32 %v2791_v24, %v2790_v40  ;;  %v2795_v51 = vor.u32 %v2794_v54, %v2793_v31  ;;  %v2798_v45 = vor.u32 %v2797_v62, %v2796_v4  ;;  %v9538_v50 = vpop.permute.xlu1 %1334  ;;  %v14889_v31 = vld [vmem:[#allocation18_spill] sm:$0xff] }
 0x19d   : > { %v6885_v15 = vmin.u32 %v2527_v26, %v9506_v36  ;;  %v2801_v30 = vor.u32 %v2800_v47, %v2799_v9  ;;  %v9544_v11 = vpop.permute.xlu0 %1332  ;;  %v2641_v57 = vsub.s32 4294967266, %v9504_v27  ;;  %v2802_v52 = vshll.u32 %v14787_v18, %v2787_v19 }
 0x19e   : > { %v2803_v32 = vshrl.u32 %v14790_v16, %v2788_v56  ;;  %v2679_v40 = vadd.s32 1, %v6892_v41  ;;  %1438 = vrot.lane.b32.xlu1 %v9384_v39, %s14659_s20  ;;  %vm14561_vm15 = vcmp.lt.s32.totalorder %v14889_v31, 0  ;;  %vm2805_vm7 = vcmp.lt.s32.totalorder %v9522_v5, 1 }
 0x19f   : > { %v2529_v24 = vclz %v6885_v15  ;;  %vm2807_vm8 = vcmp.lt.s32.totalorder %v9522_v5, 3  ;;  %vm2808_vm9 = vcmp.lt.s32.totalorder %v9522_v5, 4  ;;  %1436 = vrot.lane.b32.xlu0 %v9396_v22, %s14659_s20  ;;  %v2813_v48 = vsel %vm2805_vm7, %v2792_v38, %v2795_v51 }
 0x1a0   : > { %v2804_v47 = vor.u32 %v2803_v32, %v2802_v52  ;;  %v2810_v19 = vsel %vm2808_vm9, %v2798_v45, 2102212464  ;;  %v2814_v41 = vsel %vm2808_vm9, %v2801_v30, 920167782  ;;  %v9559_v54 = vpop.permute.xlu1 %482  ;;  %v2789_v15 = vshrl.u32 %v14783_v29, %v2788_v56 }
 0x1a1   : > { %v6886_v4 = vadd.s32 4294967294, %v2529_v24  ;;  %vm2806_vm1 = vcmp.lt.s32.totalorder %v9522_v5, 2  ;;  %v2815_v62 = vsel %vm2807_vm8, %v2798_v45, %v2814_v41  ;;  %v9565_v26 = vpop.permute.xlu0 %480  ;;  %v2642_v9 = vadd.s32 127, %v2641_v57 }
 0x1a2   : > { %v2816_v52 = vsel %vm2806_vm1, %v2813_v48, %v2815_v62  ;;  %v2817_v32 = vsel %vm2805_vm7, %v2795_v51, %v2798_v45  ;;  %v2818_v35 = vsel %vm2808_vm9, %v2804_v47, 1326507024  ;;  %682 = vrot.lane.b32.xlu1 %v9401_v46, %s7975_s26  ;;  %v2809_v56 = vsel %vm2805_vm7, %v2789_v15, %v2792_v38 }
 0x1a3   : > { %vm6887_vm0 = vcmp.lt.s32.totalorder %v6886_v4, 0  ;;  %v2811_v24 = vsel %vm2807_vm8, %v2795_v51, %v2810_v19  ;;  %v2819_v57 = vsel %vm2807_vm8, %v2801_v30, %v2818_v35  ;;  %680 = vrot.lane.b32.xlu0 %v9414_v61, %s7975_s26  ;;  %v14890_v51 = vcvt.s32.f32 %v9462_v1 }
 0x1a4   : > { %v9581_v48 = vsel %vm6887_vm0, 0, %v6886_v4  ;;  %v2820_v45 = vsel %vm2806_vm1, %v2817_v32, %v2819_v57  ;;  %v9586_v47 = vmul.u32.u64.low %v9541_v59, %v2816_v52  ;;  %v9587_v41 = vmul.u32.u64.high %v9541_v59, %v2816_v52, %v9586_v47  ;;  %v9590_v38 = vpop.permute.xlu1 %578 }
 0x1a5   : > { %v9594_v19 = vmul.f32 %v14890_v51, %v2333_v14  ;;  %v2637_v35 = vsub.s32 32, %v9504_v27  ;;  %v14891_v30 = vand.u32 2147483647, %v9409_v23  ;;  %v9599_v15 = vpop.permute.xlu0 %576  ;;  %v2643_v52 = vshll.u32 %v2642_v9, 23 }
 0x1a6   : > { %v9605_v32 = vmul.u32.u64.low %v9541_v59, %v2820_v45  ;;  %v9606_v57 = vmul.u32.u64.high %v9541_v59, %v2820_v45, %v9605_v32  ;;  %vm2680_vm0 = vcmp.gt.s32.totalorder %v2679_v40, 0  ;;  %774 = vrot.lane.b32.xlu1 %v9263_v43, %s14796_s27  ;;  %v2621_v1 = vadd.s32 %v9266_v53, %v9284_v8 }
 0x1a7   : > { %v2676_v4 = vand.u32 8388607, %v14891_v30  ;;  %v2537_v14 = vsub.s32 4294967266, %v9581_v48  ;;  %v2812_v51 = vsel %vm2806_vm1, %v2809_v56, %v2811_v24  ;;  %v2681_v30 = vsel %vm2680_vm0, %v2679_v40, 0  ;;  %772 = vrot.lane.b32.xlu0 %v9275_v7, %s14796_s27 }
 0x1a8   : > { %v14892_v9 = vxor.u32 2147483648, %v9458_v44  ;;  %v9627_v53 = vsel %vm14562_vm2, %v9470_v6, %v9093_v0  ;;  %v2831_v8 = vadd.s32 1, %v9587_v41  ;;  %v2683_v5 = vand.u32 31, %v2681_v30  ;;  %v9630_v56 = vpop.permute.xlu1 %670 }
 0x1a9   : > { %14893 = vst [vmem:[#allocation47_spill] sm:$0xff] %v9630_v56  ;;  %v2638_v24 = vshll.u32 %v9389_v28, %v9504_v27  ;;  %v2639_v32 = vshrl.u32 %v2621_v1, %v2637_v35  ;;  %v2677_v62 = vor.u32 8388608, %v2676_v4  ;;  %v9635_v23 = vpop.permute.xlu0 %668  ;;  %vm2830_vm1 = vc.u32 %v9606_v57, %v9586_v47 }
 0x1aa   : > { %v9622_v45 = vsel %vm14561_vm15, %v14892_v9, %v9458_v44  ;;  %14894 = vst [vmem:[#allocation48_spill] sm:$0xff] %v9635_v23  ;;  %v9637_v44 = vor.u32 4788187, %v2643_v52  ;;  %v2828_v9 = vmul.u32 %v9541_v59, %v2812_v51  ;;  %v2684_v0 = vsub.s32 32, %v2683_v5  ;;  %1442 = vrot.lane.b32.xlu1 %v9517_v13, %s14659_s20 }
 0x1ab   : > { %v2533_v6 = vsub.s32 32, %v9581_v48  ;;  %v2538_v40 = vadd.s32 127, %v2537_v14  ;;  %v2832_v28 = vsel %vm2830_vm1, %v2831_v8, %v9587_v41  ;;  %v2686_v27 = vshll.u32 %v14783_v29, %v2683_v5  ;;  %1440 = vrot.lane.b32.xlu0 %v9527_v33, %s14659_s20 }
 0x1ac   : > { %v2833_v35 = vadd.s32 %v2832_v28, %v2828_v9  ;;  %v2687_v59 = vshrl.u32 %v14842_v42, %v2684_v0  ;;  %v2689_v4 = vshll.u32 %v14842_v42, %v2683_v5  ;;  %v2690_v52 = vshrl.u32 %v14843_v10, %v2684_v0  ;;  %v9652_v1 = vpop.permute.xlu1 %1338 }
 0x1ad   : > { %14895 = vst [vmem:[#allocation49_spill] sm:$0xff] %v9652_v1  ;;  %v9654_v51 = vshrl.u32 %v2681_v30, 5  ;;  %v2692_v14 = vshll.u32 %v14843_v10, %v2683_v5  ;;  %v2693_v41 = vshrl.u32 %v14844_v20, %v2684_v0  ;;  %v2695_v8 = vshll.u32 %v14844_v20, %v2683_v5  ;;  %v9659_v25 = vpop.permute.xlu0 %1336 }
 0x1ae   : > { %14896 = vst [vmem:[#allocation50_spill] sm:$0xff] %v9659_v25  ;;  %v2834_v23 = vadd.s32 536870912, %v2833_v35  ;;  %v2688_v9 = vor.u32 %v2687_v59, %v2686_v27  ;;  %v2691_v28 = vor.u32 %v2690_v52, %v2689_v4  ;;  %v2696_v56 = vshrl.u32 %v14787_v18, %v2684_v0  ;;  %1534 = vrot.lane.b32.xlu1 %v9384_v39, %s14799_s28 }
 0x1af   : > { %v2517_v30 = vadd.s32 %v9379_v17, %v9393_v21  ;;  %v2694_v42 = vor.u32 %v2693_v41, %v2692_v14  ;;  %v2698_v10 = vshll.u32 %v14787_v18, %v2683_v5  ;;  %v2699_v1 = vshrl.u32 %v14790_v16, %v2684_v0  ;;  %1532 = vrot.lane.b32.xlu0 %v9396_v22, %s14799_s28 }
 0x1b0   : > { %v2640_v20 = vor.u32 %v2639_v32, %v2638_v24  ;;  %v9670_v25 = vshrl.u32 %v2834_v23, 30  ;;  %v2697_v27 = vor.u32 %v2696_v56, %v2695_v8  ;;  %v9672_v59 = vshll.u32 %v2677_v62, 8  ;;  %v9674_v4 = vpop.permute.xlu1 %1430 }
 0x1b1   : > { %v14898_v39 = vand.u32 2147483647, %v14889_v31  ;;  %v14899_v17 = vmov 0  ;;  %v2645_v21 = vand.u32 2147483647, %v9637_v44  ;;  %v2539_v5 = vshll.u32 %v2538_v40, 23  ;;  %v9684_v22 = vpop.permute.xlu0 %1428 }
 0x1b2   : > { %14897 = vst [vmem:[#allocation51_spill] sm:$0xff] %v9670_v25  ;;  %v2700_v52 = vor.u32 %v2699_v1, %v2698_v10  ;;  %vm2701_vm8 = vcmp.lt.s32.totalorder %v9654_v51, 1  ;;  %v2535_v23 = vshrl.u32 %v2517_v30, %v2533_v6  ;;  %v2836_v62 = vshll.u32 %v9670_v25, 30  ;;  %778 = vrot.lane.b32.xlu1 %v9401_v46, %s14796_s27 }
 0x1b3   : > { %vm9678_vm7 = vcmp.le.f32.partialorder %v14898_v39, 0.7853982  ;;  %vm2704_vm9 = vcmp.lt.s32.totalorder %v9654_v51, 4  ;;  %v2709_v56 = vsel %vm2701_vm8, %v2688_v9, %v2691_v28  ;;  %v2685_v24 = vshrl.u32 %v14783_v29, %v2684_v0  ;;  %776 = vrot.lane.b32.xlu0 %v9414_v61, %s14796_s27 }
 0x1b4   : > { %v14900_v17 = vsel %vm9678_vm7, 4294967295, %v14899_v17  ;;  %vm2703_vm0 = vcmp.lt.s32.totalorder %v9654_v51, 3  ;;  %v2706_v10 = vsel %vm2704_vm9, %v2694_v42, 2102212464  ;;  %v2710_v40 = vsel %vm2704_vm9, %v2697_v27, 920167782  ;;  %v9707_v6 = vpop.permute.xlu1 %674 }
 0x1b5   : > { %14901 = vst [vmem:[#allocation52_spill] sm:$0xff] %v14900_v17  ;;  %v9700_v32 = vsub.s32 %v2833_v35, %v2836_v62  ;;  %vm2702_vm1 = vcmp.lt.s32.totalorder %v9654_v51, 2  ;;  %v2711_v44 = vsel %vm2703_vm0, %v2694_v42, %v2710_v40  ;;  %v2713_v0 = vsel %vm2701_vm8, %v2691_v28, %v2694_v42  ;;  %v9715_v8 = vpop.permute.xlu0 %672 }
 0x1b6   : > { %v2534_v1 = vshll.u32 %v9506_v36, %v9581_v48  ;;  %v2540_v14 = vor.u32 4788187, %v2539_v5  ;;  %v2712_v41 = vsel %vm2702_vm1, %v2709_v56, %v2711_v44  ;;  %v2714_v35 = vsel %vm2704_vm9, %v2700_v52, 1326507024  ;;  %870 = vrot.lane.b32.xlu1 %v9263_v43, %s14800_s21 }
 0x1b7   : > { %v2839_v30 = vsub.s32 0, %v9700_v32  ;;  %v2705_v39 = vsel %vm2701_vm8, %v2685_v24, %v2688_v9  ;;  %v2707_v42 = vsel %vm2703_vm0, %v2691_v28, %v2706_v10  ;;  %v2715_v36 = vsel %vm2703_vm0, %v2697_v27, %v2714_v35  ;;  %868 = vrot.lane.b32.xlu0 %v9275_v7, %s14800_s21 }
 0x1b8   : > { %v2536_v48 = vor.u32 %v2535_v23, %v2534_v1  ;;  %v2716_v5 = vsel %vm2702_vm1, %v2713_v0, %v2715_v36  ;;  %v9729_v52 = vmul.u32.u64.low %v9672_v59, %v2712_v41  ;;  %v9730_v62 = vmul.u32.u64.high %v9672_v59, %v2712_v41, %v9729_v52  ;;  %v9740_v24 = vpop.permute.xlu1 %766 }
 0x1b9   : > { %v2647_v9 = vcvt.s32.f32 %v2640_v20  ;;  %v6897_v28 = vmin.u32 %v2839_v30, %v9700_v32  ;;  %v9737_v27 = vmul.u32.u64.low %v9672_v59, %v2716_v5  ;;  %v9738_v56 = vmul.u32.u64.high %v9672_v59, %v2716_v5, %v9737_v27  ;;  %v9753_v44 = vpop.permute.xlu0 %764  ;;  %v14907_v5 = vld [vmem:[#allocation19_spill] sm:$0xff] }
 0x1ba   : > { %vm14566_vm8 = vcmp.lt.s32.totalorder %v9091_v2, 0  ;;  %v2541_v23 = vand.u32 2147483647, %v2540_v14  ;;  %v9746_v10 = vsel %vm14562_vm2, %v9474_v63, %v9095_v12  ;;  %v1713_v20 = vsel %vm14650_vm3, %v9482_v58, %v9137_v55  ;;  %1538 = vrot.lane.b32.xlu1 %v9517_v13, %s14799_s28 }
 0x1bb   : > { %v2708_v40 = vsel %vm2702_vm1, %v2705_v39, %v2707_v42  ;;  %v2445_v0 = vsel %vm9678_vm7, %v14889_v31, %v9622_v45  ;;  %v2648_v1 = vmul.f32 %v2647_v9, %v2645_v21  ;;  %v1712_v12 = vsel %vm14650_vm3, %v9486_v60, %v9139_v49  ;;  %1536 = vrot.lane.b32.xlu0 %v9527_v33, %s14799_s28  ;;  %v14903_v49 = vld [vmem:[#allocation29_spill] sm:$0xff]  ;;  %v14906_v33 = vld [vmem:[#allocation26_spill] sm:$0xff] }
 0x1bc   : > { %v2841_v63 = vclz %v6897_v28  ;;  %v14902_v55 = vxor.u32 2147483648, %v9594_v19  ;;  %v2543_v51 = vcvt.s32.f32 %v2536_v48  ;;  %v2727_v14 = vadd.s32 1, %v9730_v62  ;;  %v14904_v21 = vld [vmem:[#allocation17_spill] sm:$0xff]  ;;  %v9780_v41 = vpop.permute.xlu1 %1434  ;;  %v14908_v28 = vld [vmem:[#allocation34_spill] sm:$0xff] }
 0x1bd   : > { %v1746_v45 = vsel %vm14613_vm4, %v1713_v20, %v9225_v34  ;;  %vm14567_vm9 = vcmp.lt.s32.totalorder %v14903_v49, 0  ;;  %v2724_v13 = vmul.u32 %v9672_v59, %v2708_v40  ;;  %vm2726_vm0 = vc.u32 %v9738_v56, %v9729_v52  ;;  %v14905_v34 = vld [vmem:[#allocation5_spill] sm:$0xff]  ;;  %v9787_v36 = vpop.permute.xlu0 %1432  ;;  %v14914_v20 = vld [vmem:[#allocation27_spill] sm:$0xff] }
 0x1be   : > { %v2338_v58 = vsel %vm2255_vm13, %v14902_v55, %v9594_v19  ;;  %v6898_v60 = vadd.s32 4294967294, %v2841_v63  ;;  %v1779_v19 = vsel %vm14570_vm5, %v1746_v45, %v14904_v21  ;;  %v2544_v35 = vmul.f32 %v2543_v51, %v2541_v23  ;;  %874 = vrot.lane.b32.xlu1 %v9401_v46, %s14800_s21  ;;  %v14916_v55 = vld [vmem:[#allocation32_spill] sm:$0xff] }
 0x1bf   : > { %v2728_v30 = vsel %vm2726_vm0, %v2727_v14, %v9730_v62  ;;  %v1745_v39 = vsel %vm14613_vm4, %v1712_v12, %v14905_v34  ;;  %v1812_v42 = vsel %vm14563_vm6, %v1779_v19, %v14906_v33  ;;  %v2649_v59 = vxor.u32 2147483648, %v2648_v1  ;;  %872 = vrot.lane.b32.xlu0 %v9414_v61, %s14800_s21  ;;  %v14922_v33 = vld [vmem:[#allocation16_spill] sm:$0xff] }
 0x1c0   : > { %v2729_v48 = vadd.s32 %v2728_v30, %v2724_v13  ;;  %v1778_v9 = vsel %vm14570_vm5, %v1745_v39, %v14907_v5  ;;  %vm14909_vm13 = vcmask 392192   ;;  %7574 = vcosq.f32 %v2445_v0  ;;  %v1527_v45 = vpop.permute.xlu1 %1526 }
 0x1c1   : > { %v1845_v27 = vsel %vm14909_vm13, %v1812_v42, %v14908_v28  ;;  %v14910_v62 = vand.u32 2147483647, %v9091_v2  ;;  %v14911_v23 = vmov 0  ;;  %v1811_v40 = vsel %vm14563_vm6, %v1778_v9, %v14914_v20  ;;  %v1525_v30 = vpop.permute.xlu0 %1524  ;;  %v14928_v9 = vld [vmem:[#allocation20_spill] sm:$0xff] }
 0x1c2   : > { %vm14915_vm0 = vcmask 441344   ;;  %vm6899_vm13 = vcmp.lt.s32.totalorder %v6898_v60, 0  ;;  %v2730_v63 = vadd.s32 536870912, %v2729_v48  ;;  %vm14917_vm15 = vcmask 392192   ;;  %966 = vrot.lane.b32.xlu1 %v9263_v43, %s7978_s29 }
 0x1c3   : > { %vm9797_vm1 = vcmp.le.f32.partialorder %v14910_v62, 0.7853982  ;;  %v1878_v12 = vsel %vm14915_vm0, %v1845_v27, %v9538_v50  ;;  %v1844_v51 = vsel %vm14917_vm15, %v1811_v40, %v14916_v55  ;;  %vm14918_vm2 = vcmask 490496   ;;  %vm14919_vm6 = vmmov %vm14915_vm0  ;;  %964 = vrot.lane.b32.xlu0 %v9275_v7, %s7978_s29 }
 0x1c4   : > { %v14912_v23 = vsel %vm9797_vm1, 4294967295, %v14911_v23  ;;  %v1911_v14 = vsel %vm14918_vm2, %v1878_v12, %v9674_v4  ;;  %v2341_v13 = vsel %vm9533_vm12, %v14876_v3, %v2338_v58  ;;  %v2545_v21 = vxor.u32 2147483648, %v2544_v35  ;;  %vm14921_vm15 = vmmov %vm14918_vm2  ;;  %v9845_v27 = vpop.permute.xlu1 %770 }
 0x1c5   : > { %14913 = vst [vmem:[#allocation17_spill] sm:$0xff] %v14912_v23  ;;  %v1877_v50 = vsel %vm14919_vm6, %v1844_v51, %v9544_v11  ;;  %v1944_v19 = vsel %vm14614_vm10, %v1911_v14, %v1527_v45  ;;  %v2650_v34 = vsel %vm14566_vm8, %v2649_v59, %v2648_v1  ;;  %v9819_v39 = vshrl.u32 %v2730_v63, 30  ;;  %v14927_v59 = vld [vmem:[#allocation6_spill] sm:$0xff]  ;;  %v9853_v40 = vpop.permute.xlu0 %768  ;;  %v14930_v63 = vld [vmem:[#allocation4_spill] sm:$0xff]  ;;  %v14932_v45 = vld [vmem:[#allocation15_spill] sm:$0xff] }
 0x1c6   : > { %v1910_v4 = vsel %vm14921_vm15, %v1877_v50, %v9684_v22  ;;  %v1983_v42 = vmul.f32 %v14922_v33, %v1944_v19  ;;  %7576 = vsinq.f32 %v2445_v0  ;;  %v14923_v58 = vand.u32 2147483647, %v14903_v49  ;;  %v14931_v51 = vld [vmem:[#allocation14_spill] sm:$0xff]  ;;  %970 = vrot.lane.b32.xlu1 %v9401_v46, %s7978_s29  ;;  %v14934_v19 = vld [vmem:[#allocation23_spill] sm:$0xff] }
 0x1c7   : > { %14920 = vst [vmem:[#allocation5_spill] sm:$0xff] %v9819_v39  ;;  %v14924_v11 = vmov 0  ;;  %v9833_v5 = vsel %vm6899_vm13, 0, %v6898_v60  ;;  %v1943_v1 = vsel %vm14614_vm10, %v1910_v4, %v1525_v30  ;;  %7578 = vcosq.f32 %v2341_v13  ;;  %968 = vrot.lane.b32.xlu0 %v9414_v61, %s7978_s29  ;;  %v14953_v23 = vld [vmem:[#allocation46_spill] sm:$0xff] }
 0x1c8   : > { %vm9828_vm2 = vcmp.le.f32.partialorder %v14923_v58, 0.7853982  ;;  %v2732_v22 = vshll.u32 %v9819_v39, 30  ;;  %v1715_v0 = vsel %vm14650_vm3, %v9627_v53, %v14927_v59  ;;  %v9843_v28 = vadd.f32 %v14928_v9, %v1983_v42  ;;  %v14938_v58 = vld [vmem:[#allocation36_spill] sm:$0xff] }
 0x1c9   : > { %v14925_v11 = vsel %vm9828_vm2, 4294967295, %v14924_v11  ;;  %7580 = vsinq.f32 %v2341_v13  ;;  %v2653_v60 = vsel %vm9797_vm1, %v9091_v2, %v2650_v34  ;;  %v2546_v62 = vsel %vm14567_vm9, %v2545_v21, %v2544_v35  ;;  %v9880_v34 = vpop.permute.xlu1 %862  ;;  %v9888_v59 = vpop.permute.xlu0 %860  ;;  %v14963_v2 = vld [vmem:[#allocation50_spill] sm:$0xff] }
 0x1ca   : > { %14926 = vst [vmem:[#allocation26_spill] sm:$0xff] %v14925_v11  ;;  %14929 = vst [vmem:[#allocation19_spill] sm:$0xff] %v9843_v28  ;;  %v1982_v20 = vmul.f32 %v14922_v33, %v1943_v1  ;;  %v2849_v12 = vsub.s32 4294967266, %v9833_v5  ;;  %v9856_v53 = vsub.s32 %v2729_v48, %v2732_v22  ;;  %v1714_v55 = vsel %vm14650_vm3, %v9746_v10, %v14930_v63  ;;  %v9882_v4 = vpop.eup %7574  ;;  %v14937_v33 = vld [vmem:[#allocation39_spill] sm:$0xff] }
 0x1cb   : > { %v1748_v14 = vsel %vm14613_vm4, %v1715_v0, %v14931_v51  ;;  %v1747_v35 = vsel %vm14613_vm4, %v1714_v55, %v14932_v45  ;;  %v14564_v13 = vand.u32 2147483647, %v9843_v28  ;;  %v2984_v21 = vand.u32 2139095040, %v9843_v28  ;;  %14935 = vst [vmem:[#allocation27_spill] sm:$0xff] %v9880_v34  ;;  %14936 = vst [vmem:[#allocation32_spill] sm:$0xff] %v9882_v4  ;;  %1062 = vrot.lane.b32.xlu1 %v9263_v43, %s14587_s11 }
 0x1cc   : > { %v9870_v48 = vadd.f32 %v14928_v9, %v1982_v20  ;;  %7582 = vcosq.f32 %v2653_v60  ;;  %v2549_v10 = vsel %vm9828_vm2, %v14903_v49, %v2546_v62  ;;  %v2735_v50 = vsub.s32 0, %v9856_v53  ;;  %14940 = vst [vmem:[#allocation16_spill] sm:$0xff] %v9888_v59  ;;  %1060 = vrot.lane.b32.xlu0 %v9275_v7, %s14587_s11 }
 0x1cd   : > { %v1781_v30 = vsel %vm14570_vm5, %v1748_v14, %v14934_v19  ;;  %7584 = vsinq.f32 %v2653_v60  ;;  %v1780_v42 = vsel %vm14570_vm5, %v1747_v35, %v14937_v33  ;;  %vm14939_vm6 = vcmask 343040   ;;  %v1531_v45 = vpop.permute.xlu1 %1530  ;;  %v14948_v33 = vld [vmem:[#allocation37_spill] sm:$0xff] }
 0x1ce   : > { %14933 = vst [vmem:[#allocation34_spill] sm:$0xff] %v9870_v48  ;;  %v1814_v1 = vsel %vm14939_vm6, %v1781_v30, %v14938_v58  ;;  %v2985_v22 = vshrl.u32 %v2984_v21, 23  ;;  %v2829_v0 = vadd.s32 %v9586_v47, %v9606_v57  ;;  %v2850_v62 = vadd.s32 127, %v2849_v12  ;;  %v14941_v57 = vld [vmem:[#allocation33_spill] sm:$0xff]  ;;  %vm14942_vm0 = vmmov %vm14939_vm6  ;;  %v14947_v30 = vld [vmem:[#allocation42_spill] sm:$0xff] }
 0x1cf   : > { %v6893_v20 = vmin.u32 %v2735_v50, %v9856_v53  ;;  %v2880_v63 = vand.u32 2139095040, %v9870_v48  ;;  %7586 = vcosq.f32 %v2549_v10  ;;  %v2988_v55 = vand.u32 8388607, %v14564_v13  ;;  %v14944_v21 = vld [vmem:[#allocation41_spill] sm:$0xff]  ;;  %v14945_v50 = vld [vmem:[#allocation40_spill] sm:$0xff]  ;;  %v9915_v13 = vpop.permute.xlu0 %1528  ;;  %1066 = vrot.lane.b32.xlu1 %v9401_v46, %s14587_s11 }
 0x1d0   : > { %v6904_v60 = vadd.s32 4294967169, %v2985_v22  ;;  %7588 = vsinq.f32 %v2549_v10  ;;  %v1813_v12 = vsel %vm14942_vm0, %v1780_v42, %v14941_v57  ;;  %v9903_v35 = vpop.eup %7576  ;;  %vm14946_vm13 = vcmask 48128   ;;  %v14950_v22 = vld [vmem:[#allocation45_spill] sm:$0xff]  ;;  %1064 = vrot.lane.b32.xlu0 %v9414_v61, %s14587_s11  ;;  %s15087_s11 = smov 9  }
 0x1d1   : > { %v2737_v47 = vclz %v6893_v20  ;;  %v2881_v14 = vshrl.u32 %v2880_v63, 23  ;;  %14943 = vst [vmem:[#allocation6_spill] sm:$0xff] %v9903_v35  ;;  %v1618_v19 = vsel %vm14946_vm13, %v14945_v50, %v14944_v21  ;;  %vm14949_vm15 = vmmov %vm14946_vm13  ;;  %vm14951_vm6 = vcmask 392192   ;;  %v9917_v42 = vpop.eup %7578 }
 0x1d2   : > { %v9911_v58 = vsel %vm14949_vm15, %v14948_v33, %v14947_v30  ;;  %v1847_v10 = vsel %vm14951_vm6, %v1814_v1, %v14950_v22  ;;  %v2991_v20 = vadd.s32 1, %v6904_v60  ;;  %14952 = vst [vmem:[#allocation20_spill] sm:$0xff] %v9917_v42  ;;  %v2845_v63 = vsub.s32 32, %v9833_v5  ;;  %vm14954_vm0 = vmmov %vm14951_vm6  ;;  %v14961_v22 = vld [vmem:[#allocation49_spill] sm:$0xff] }
 0x1d3   : > { %v2851_v57 = vshll.u32 %v2850_v62, 23  ;;  %v6894_v51 = vadd.s32 4294967294, %v2737_v47  ;;  %v1846_v21 = vsel %vm14954_vm0, %v1813_v12, %v14953_v23  ;;  %v9924_v50 = vpop.eup %7580  ;;  %v2989_v30 = vor.u32 8388608, %v2988_v55  ;;  %vm14957_vm6 = vmmov %vm14949_vm15  ;;  %v14958_v55 = vld [vmem:[#allocation47_spill] sm:$0xff]  ;;  %v9954_v11 = vpop.permute.xlu0 %864  ;;  %1158 = vrot.lane.b32.xlu1 %v9263_v43, %s14968_s14 }
 0x1d4   : > { %14955 = vst [vmem:[#allocation4_spill] sm:$0xff] %v9924_v50  ;;  %vm2992_vm13 = vcmp.gt.s32.totalorder %v2991_v20, 0  ;;  %v6900_v1 = vadd.s32 4294967169, %v2881_v14  ;;  %v14956_v60 = vand.u32 2147483647, %v9870_v48  ;;  %v9935_v62 = vsel %vm14949_vm15, %v9559_v54, %v9590_v38  ;;  %v9946_v14 = vpop.permute.xlu1 %866  ;;  %14965 = vst [vmem:[#allocation15_spill] sm:$0xff] %v9954_v11  ;;  %1156 = vrot.lane.b32.xlu0 %v9275_v7, %s14968_s14 }
 0x1d5   : > { %v9940_v23 = vsel %vm14957_vm6, %v9565_v26, %v9599_v15  ;;  %vm14959_vm0 = vcmask 97280   ;;  %v2993_v12 = vsel %vm2992_vm13, %v2991_v20, 0  ;;  %14960 = vst [vmem:[#allocation14_spill] sm:$0xff] %v9946_v14  ;;  %vm6895_vm8 = vcmp.lt.s32.totalorder %v6894_v51, 0 }
 0x1d6   : > { %v9928_v33 = vand.u32 8388607, %v14956_v60  ;;  %v9944_v47 = vsel %vm14959_vm0, %v1618_v19, %v14958_v55  ;;  %vm14962_vm9 = vcmask 441344   ;;  %v2995_v38 = vand.u32 31, %v2993_v12  ;;  %v9956_v26 = vpop.eup %7582 }
 0x1d7   : > { %v1880_v60 = vsel %vm14962_vm9, %v1847_v10, %v14961_v22  ;;  %vm14964_vm5 = vmmov %vm14962_vm9  ;;  %14966 = vst [vmem:[#allocation23_spill] sm:$0xff] %v9956_v26  ;;  %v9960_v19 = vshrl.u32 %v2829_v0, %v2845_v63  ;;  %v9962_v20 = vor.u32 4788187, %v2851_v57  ;;  %vm14967_vm13 = vcmask 490496   ;;  %v9988_v4 = vpop.permute.xlu0 %956  ;;  %1162 = vrot.lane.b32.xlu1 %v9401_v46, %s14968_s14 }
 0x1d8   : > { %v9952_v54 = vsel %vm14964_vm5, %v1846_v21, %v14963_v2  ;;  %v1913_v55 = vsel %vm14967_vm13, %v1880_v60, %v9780_v41  ;;  %v9968_v2 = vpop.eup %7584  ;;  %v2996_v10 = vsub.s32 32, %v2995_v38  ;;  %v9970_v21 = vshll.u32 %v2989_v30, 8  ;;  %v9980_v15 = vpop.permute.xlu1 %958  ;;  %14975 = vst [vmem:[#allocation41_spill] sm:$0xff] %v9988_v4  ;;  %1160 = vrot.lane.b32.xlu0 %v9414_v61, %s14968_s14  ;;  %vm14980_vm0 = vmmov %vm14967_vm13 }
 0x1d9   : > { %14969 = vst [vmem:[#allocation39_spill] sm:$0xff] %v9968_v2  ;;  %v2887_v26 = vadd.s32 1, %v6900_v1  ;;  %v9976_v0 = vsel %vm6895_vm8, 0, %v6894_v51  ;;  %v2994_v63 = vshrl.u32 %v2993_v12, 5  ;;  %v2998_v41 = vshll.u32 %v14783_v29, %v2995_v38  ;;  %14971 = vst [vmem:[#allocation36_spill] sm:$0xff] %v9980_v15  ;;  %v9982_v2 = vpop.eup %7586 }
 0x1da   : > { %v14970_v57 = vmov 2475754826   ;;  %14972 = vst [vmem:[#allocation33_spill] sm:$0xff] %v9982_v2  ;;  %v14973_v49 = vmov 2131351028   ;;  %v9990_v51 = vpop.eup %7588  ;;  %v3008_v35 = vshrl.u32 %v14787_v18, %v2996_v10  ;;  %v3010_v17 = vshll.u32 %v14787_v18, %v2995_v38 }
 0x1db   : > { %v3001_v60 = vshll.u32 %v14970_v57, %v2995_v38  ;;  %v2999_v30 = vshrl.u32 %v14970_v57, %v2996_v10  ;;  %v3002_v22 = vshrl.u32 %v14973_v49, %v2996_v10  ;;  %v3004_v1 = vshll.u32 %v14973_v49, %v2995_v38  ;;  %14976 = vst [vmem:[#allocation40_spill] sm:$0xff] %v9990_v51 }
 0x1dc   : > { %v14974_v25 = vmov 2102212464   ;;  %v3011_v2 = vshrl.u32 %v14790_v16, %v2996_v10  ;;  %v1946_v14 = vsel %vm14614_vm10, %v1913_v55, %v1531_v45  ;;  %v2741_v51 = vsub.s32 32, %v9976_v0  ;;  %1254 = vrot.lane.b32.xlu1 %v9263_v43, %s7981_s15  ;;  %1252 = vrot.lane.b32.xlu0 %v9275_v7, %s7981_s15 }
 0x1dd   : > { %v3005_v39 = vshrl.u32 %v14974_v25, %v2996_v10  ;;  %v3007_v12 = vshll.u32 %v14974_v25, %v2995_v38  ;;  %v3000_v3 = vor.u32 %v2999_v30, %v2998_v41  ;;  %v3003_v31 = vor.u32 %v3002_v22, %v3001_v60  ;;  %v10003_v38 = vpop.permute.xlu1 %962 }
 0x1de   : > { %v2745_v4 = vsub.s32 4294967266, %v9976_v0  ;;  %v3012_v59 = vor.u32 %v3011_v2, %v3010_v17  ;;  %14977 = vst [vmem:[#allocation42_spill] sm:$0xff] %v10003_v38  ;;  %v2997_v34 = vshrl.u32 %v14783_v29, %v2996_v10  ;;  %vm3013_vm5 = vcmp.lt.s32.totalorder %v2994_v63, 1  ;;  %v10013_v10 = vld [vmem:[%s8079_s23 + $0xa8] sm:$0xff] }
 0x1df   : > { %v3006_v11 = vor.u32 %v3005_v39, %v3004_v1  ;;  %v3009_v15 = vor.u32 %v3008_v35, %v3007_v12  ;;  %vm3016_vm8 = vcmp.lt.s32.totalorder %v2994_v63, 4  ;;  %vm2888_vm9 = vcmp.gt.s32.totalorder %v2887_v26, 0  ;;  %v10006_v39 = vpop.permute.xlu0 %960 }
 0x1e0   : > { %14978 = vst [vmem:[#allocation37_spill] sm:$0xff] %v10006_v39  ;;  %vm3015_vm15 = vcmp.lt.s32.totalorder %v2994_v63, 3  ;;  %v3021_v55 = vsel %vm3013_vm5, %v3000_v3, %v3003_v31  ;;  %vm3014_vm6 = vcmp.lt.s32.totalorder %v2994_v63, 2  ;;  %v3026_v2 = vsel %vm3016_vm8, %v3012_v59, 1326507024  ;;  %v10019_v39 = vld [vmem:[%s8079_s23 + $0xa0] sm:$0xff]  ;;  %494 = vrot.lane.b32.xlu1 %v10013_v10, %s7974_s25 }
 0x1e1   : > { %v3018_v45 = vsel %vm3016_vm8, %v3006_v11, 2102212464  ;;  %v3022_v22 = vsel %vm3016_vm8, %v3009_v15, 920167782  ;;  %v3025_v35 = vsel %vm3013_vm5, %v3003_v31, %v3006_v11  ;;  %v3017_v41 = vsel %vm3013_vm5, %v2997_v34, %v3000_v3  ;;  %v10016_v12 = vpop.permute.xlu1 %1054  ;;  %492 = vrot.lane.b32.xlu0 %v10019_v39, %s7974_s25 }
 0x1e2   : > { %v3023_v17 = vsel %vm3015_vm15, %v3006_v11, %v3022_v22  ;;  %v3019_v60 = vsel %vm3015_vm15, %v3003_v31, %v3018_v45  ;;  %v3027_v1 = vsel %vm3015_vm15, %v3009_v15, %v3026_v2  ;;  %v10021_v38 = vadd.s32 127, %v2745_v4  ;;  %v10039_v4 = vld [vmem:[%s14470_s1] ss:$0 sm:$0xff] }
 0x1e3   : > { %v3024_v30 = vsel %vm3014_vm6, %v3021_v55, %v3023_v17  ;;  %v3028_v43 = vsel %vm3014_vm6, %v3025_v35, %v3027_v1  ;;  %v10029_v7 = vpop.permute.xlu0 %1052  ;;  %v2889_v34 = vsel %vm2888_vm9, %v2887_v26, 0  ;;  %14979 = vst [vmem:[#allocation45_spill] sm:$0xff] %v10039_v4  ;;  %v1985_v15 = vmul.f32 %v10039_v4, %v1946_v14 }
 0x1e4   : > { %v10025_v11 = vmul.u32.u64.low %v9970_v21, %v3024_v30  ;;  %v10026_v59 = vmul.u32.u64.high %v9970_v21, %v3024_v30, %v10025_v11  ;;  %v10032_v3 = vmul.u32.u64.low %v9970_v21, %v3028_v43  ;;  %v10033_v31 = vmul.u32.u64.high %v9970_v21, %v3028_v43, %v10032_v3  ;;  %590 = vrot.lane.b32.xlu1 %v10013_v10, %s7973_s24 }
 0x1e5   : > { %v2725_v45 = vadd.s32 %v9729_v52, %v9738_v56  ;;  %v1912_v55 = vsel %vm14980_vm0, %v9952_v54, %v9787_v36  ;;  %v3020_v22 = vsel %vm3014_vm6, %v3017_v41, %v3019_v60  ;;  %v2891_v26 = vand.u32 31, %v2889_v34  ;;  %v10065_v54 = vpop.permute.xlu1 %1058  ;;  %588 = vrot.lane.b32.xlu0 %v10019_v39, %s7973_s24 }
 0x1e6   : > { %v14981_v17 = vshll.u32 %v9700_v32, %v9833_v5  ;;  %v14982_v52 = vor.u32 8388608, %v9928_v33  ;;  %v1945_v36 = vsel %vm14614_vm10, %v1912_v55, %v9915_v13  ;;  %14983 = vst [vmem:[#allocation46_spill] sm:$0xff] %v10065_v54  ;;  %v3039_v32 = vadd.s32 1, %v10026_v59 }
 0x1e7   : > { %v10067_v63 = vshrl.u32 %v2725_v45, %v2741_v51  ;;  %v2892_v5 = vsub.s32 32, %v2891_v26  ;;  %v3036_v41 = vmul.u32 %v9970_v21, %v3020_v22  ;;  %vm3038_vm13 = vc.u32 %v10033_v31, %v10025_v11 }
 0x1e8   : > { %v10056_v14 = vor.u32 %v9960_v19, %v14981_v17  ;;  %v10061_v56 = vshll.u32 %v14982_v52, 8  ;;  %v10071_v19 = vpop.permute.xlu0 %1056  ;;  %v10076_v33 = vshrl.u32 %v2889_v34, 5  ;;  %v10079_v13 = vadd.f32 %v14928_v9, %v1985_v15  ;;  %1258 = vrot.lane.b32.xlu1 %v9401_v46, %s7981_s15 }
 0x1e9   : > { %14984 = vst [vmem:[#allocation47_spill] sm:$0xff] %v10071_v19  ;;  %v3040_v51 = vsel %vm3038_vm13, %v3039_v32, %v10026_v59  ;;  %v2894_v60 = vshll.u32 %v14783_v29, %v2891_v26  ;;  %v2895_v30 = vshrl.u32 %v14970_v57, %v2892_v5  ;;  %v2897_v1 = vshll.u32 %v14970_v57, %v2891_v26  ;;  %v10092_v34 = vpop.permute.xlu1 %1150 }
 0x1ea   : > { %14985 = vst [vmem:[#allocation49_spill] sm:$0xff] %v10079_v13  ;;  %v3041_v21 = vadd.s32 %v3040_v51, %v3036_v41  ;;  %v2898_v43 = vshrl.u32 %v14973_v49, %v2892_v5  ;;  %v2900_v9 = vshll.u32 %v14973_v49, %v2891_v26  ;;  %v2901_v3 = vshrl.u32 %v14974_v25, %v2892_v5 }
 0x1eb   : > { %v2896_v15 = vor.u32 %v2895_v30, %v2894_v60  ;;  %v2903_v59 = vshll.u32 %v14974_v25, %v2891_v26  ;;  %v2904_v45 = vshrl.u32 %v14787_v18, %v2892_v5  ;;  %v2906_v55 = vshll.u32 %v14787_v18, %v2891_v26  ;;  %1256 = vrot.lane.b32.xlu0 %v9414_v61, %s7981_s15 }
 0x1ec   : > { %v10097_v22 = vpop.permute.xlu0 %1148  ;;  %v3042_v17 = vadd.s32 536870912, %v3041_v21  ;;  %v2899_v52 = vor.u32 %v2898_v43, %v2897_v1  ;;  %v2902_v32 = vor.u32 %v2901_v3, %v2900_v9  ;;  %v2907_v41 = vshrl.u32 %v14790_v16, %v2892_v5 }
 0x1ed   : > { %v2893_v51 = vshrl.u32 %v14783_v29, %v2892_v5  ;;  %v2905_v35 = vor.u32 %v2904_v45, %v2903_v59  ;;  %vm2909_vm5 = vcmp.lt.s32.totalorder %v10076_v33, 1  ;;  %v1984_v60 = vmul.f32 %v10039_v4, %v1945_v36  ;;  %v10111_v1 = vpop.permute.xlu1 %1154  ;;  %v10124_v45 = vld [vmem:[%s8079_s23 + $0x88] sm:$0xff] }
 0x1ee   : > { %v10107_v26 = vshrl.u32 %v3042_v17, 30  ;;  %v2908_v30 = vor.u32 %v2907_v41, %v2906_v55  ;;  %vm2911_vm8 = vcmp.lt.s32.totalorder %v10076_v33, 3  ;;  %vm2912_vm9 = vcmp.lt.s32.totalorder %v10076_v33, 4  ;;  %14987 = vst [vmem:[#allocation53_spill] sm:$0xff] %v10111_v1  ;;  %1350 = vrot.lane.b32.xlu1 %v10124_v45, %s7982_s19 }
 0x1ef   : > { %v2914_v46 = vsel %vm2912_vm9, %v2902_v32, 2102212464  ;;  %v2917_v5 = vsel %vm2909_vm5, %v2896_v15, %v2899_v52  ;;  %v2918_v36 = vsel %vm2912_vm9, %v2905_v35, 920167782  ;;  %v2921_v43 = vsel %vm2909_vm5, %v2899_v52, %v2902_v32 }
 0x1f0   : > { %14986 = vst [vmem:[#allocation50_spill] sm:$0xff] %v10107_v26  ;;  %v10117_v61 = vpop.permute.xlu0 %1152  ;;  %v3044_v9 = vshll.u32 %v10107_v26, 30  ;;  %vm2910_vm15 = vcmp.lt.s32.totalorder %v10076_v33, 2  ;;  %v2919_v3 = vsel %vm2911_vm8, %v2902_v32, %v2918_v36  ;;  %v2922_v59 = vsel %vm2912_vm9, %v2908_v30, 1326507024  ;;  %v10137_v26 = vld [vmem:[%s8079_s23 + $0x80] sm:$0xff] }
 0x1f1   : > { %14988 = vst [vmem:[#allocation54_spill] sm:$0xff] %v10117_v61  ;;  %v2913_v55 = vsel %vm2909_vm5, %v2893_v51, %v2896_v15  ;;  %v2915_v17 = vsel %vm2911_vm8, %v2899_v52, %v2914_v46  ;;  %v2920_v41 = vsel %vm2910_vm15, %v2917_v5, %v2919_v3  ;;  %v2923_v2 = vsel %vm2911_vm8, %v2905_v35, %v2922_v59  ;;  %v10142_v32 = vld [vmem:[%s8079_s23 + $0xb8] sm:$0xff]  ;;  %v10153_v46 = vpop.permute.xlu1 %1246  ;;  %v10156_v35 = vld [vmem:[%s8079_s23 + $0xb0] sm:$0xff]  ;;  %v10185_v33 = vld [vmem:[%s14471_s2] ss:$0 sm:$0xff] }
 0x1f2   : > { %1348 = vrot.lane.b32.xlu0 %v10137_v26, %s7982_s19  ;;  %v10144_v30 = vsub.s32 %v3041_v21, %v3044_v9  ;;  %v2924_v15 = vsel %vm2910_vm15, %v2921_v43, %v2923_v2  ;;  %v10149_v52 = vmul.u32.u64.low %v10061_v56, %v2920_v41  ;;  %v10150_v51 = vmul.u32.u64.high %v10061_v56, %v2920_v41, %v10149_v52  ;;  %498 = vrot.lane.b32.xlu1 %v10142_v32, %s7974_s25 }
 0x1f3   : > { %v2742_v5 = vshll.u32 %v9856_v53, %v9976_v0  ;;  %v14989_v36 = vshll.u32 %v10021_v38, 23  ;;  %v10163_v21 = vmul.u32.u64.low %v10061_v56, %v2924_v15  ;;  %v10164_v9 = vmul.u32.u64.high %v10061_v56, %v2924_v15, %v10163_v21  ;;  %v14990_v0 = vld [vmem:[#allocation48_spill] sm:$0xff] }
 0x1f4   : > { %v10166_v2 = vpop.permute.xlu0 %1244  ;;  %v3047_v43 = vsub.s32 0, %v10144_v30  ;;  %v2916_v59 = vsel %vm2910_vm15, %v2913_v55, %v2915_v17  ;;  %v3192_v61 = vand.u32 2139095040, %v10079_v13  ;;  %v2855_v53 = vcvt.s32.f32 %v10056_v14  ;;  %14993 = vst [vmem:[#allocation48_spill] sm:$0xff] %v10185_v33 }
 0x1f5   : > { %v2748_v3 = vor.u32 4788187, %v14989_v36  ;;  %vm14991_vm6 = vcmask 97280   ;;  %v10188_v55 = vadd.f32 %v10185_v33, %v1984_v60  ;;  %v2744_v14 = vor.u32 %v10067_v63, %v2742_v5  ;;  %v10195_v21 = vpop.permute.xlu1 %486 }
 0x1f6   : > { %v1650_v38 = vsel %vm14991_vm6, %v9911_v58, %v14990_v0  ;;  %vm14992_vm0 = vmmov %vm14991_vm6  ;;  %496 = vrot.lane.b32.xlu0 %v10156_v35, %s7974_s25  ;;  %v6905_v17 = vmin.u32 %v3047_v43, %v10144_v30  ;;  %v2935_v58 = vadd.s32 1, %v10150_v51  ;;  %v3193_v36 = vshrl.u32 %v3192_v61, 23  ;;  %14995 = vst [vmem:[#allocation56_spill] sm:$0xff] %v10195_v21  ;;  %594 = vrot.lane.b32.xlu1 %v10142_v32, %s7973_s24 }
 0x1f7   : > { %v1653_v15 = vsel %vm14992_vm0, %v9935_v62, %v9707_v6  ;;  %14994 = vst [vmem:[#allocation55_spill] sm:$0xff] %v10188_v55  ;;  %v14996_v6 = vld [vmem:[#allocation22_spill] sm:$0xff]  ;;  %v14997_v62 = vand.u32 2147483647, %v9962_v20  ;;  %v2749_v41 = vand.u32 2147483647, %v2748_v3  ;;  %v2932_v60 = vmul.u32 %v10061_v56, %v2916_v59  ;;  %vm15000_vm8 = vmmov %vm14992_vm0 }
 0x1f8   : > { %vm14602_vm13 = vcmp.lt.s32.totalorder %v14996_v6, 0  ;;  %vm2934_vm5 = vc.u32 %v10164_v9, %v10149_v52  ;;  %v10203_v1 = vpop.permute.xlu0 %484  ;;  %v3049_v63 = vclz %v6905_v17  ;;  %v6912_v43 = vadd.s32 4294967169, %v3193_v36  ;;  %v15002_v36 = vld [vmem:[#allocation44_spill] sm:$0xff] }
 0x1f9   : > { %v2856_v0 = vmul.f32 %v2855_v53, %v14997_v62  ;;  %14998 = vst [vmem:[#allocation57_spill] sm:$0xff] %v10203_v1  ;;  %v2936_v5 = vsel %vm2934_vm5, %v2935_v58, %v10150_v51  ;;  %v14999_v61 = vand.u32 2147483647, %v10079_v13  ;;  %v1652_v20 = vsel %vm15000_vm8, %v9940_v23, %v9715_v8  ;;  %v10217_v58 = vpop.permute.xlu1 %582 }
 0x1fa   : > { %v2937_v56 = vadd.s32 %v2936_v5, %v2932_v60  ;;  %v14593_v3 = vand.u32 2147483647, %v10188_v55  ;;  %v3088_v59 = vand.u32 2139095040, %v10188_v55  ;;  %592 = vrot.lane.b32.xlu0 %v10156_v35, %s7973_s24  ;;  %v2751_v51 = vcvt.s32.f32 %v2744_v14  ;;  %15001 = vst [vmem:[#allocation58_spill] sm:$0xff] %v10217_v58  ;;  %686 = vrot.lane.b32.xlu1 %v10013_v10, %s7975_s26 }
 0x1fb   : > { %v3196_v21 = vand.u32 8388607, %v14999_v61  ;;  %v6906_v53 = vadd.s32 4294967294, %v3049_v63  ;;  %v3199_v17 = vadd.s32 1, %v6912_v43  ;;  %v15003_v62 = vsel %vm9533_vm12, 0, %v15002_v36 }
 0x1fc   : > { %v2346_v61 = vadd.s32 3, %v15003_v62  ;;  %v2857_v13 = vxor.u32 2147483648, %v2856_v0  ;;  %vm15004_vm9 = vcmask 146432   ;;  %v2938_v14 = vadd.s32 536870912, %v2937_v56  ;;  %v10232_v60 = vpop.permute.xlu0 %580 }
 0x1fd   : > { %v10226_v8 = vsel %vm15004_vm9, %v9944_v47, %v9740_v24  ;;  %vm15005_vm15 = vmmov %vm15004_vm9  ;;  %15006 = vst [vmem:[#allocation44_spill] sm:$0xff] %v10232_v60  ;;  %v10234_v63 = vmul.f32 %v2751_v51, %v2749_v41  ;;  %vm6907_vm6 = vcmp.lt.s32.totalorder %v6906_v53, 0  ;;  %v3197_v37 = vor.u32 8388608, %v3196_v21  ;;  %v10250_v41 = vpop.permute.xlu1 %1250 }
 0x1fe   : > { %v10230_v23 = vsel %vm15005_vm15, %v1650_v38, %v9753_v44  ;;  %vm3200_vm0 = vcmp.gt.s32.totalorder %v3199_v17, 0  ;;  %v10238_v5 = vshrl.u32 %v2938_v14, 30  ;;  %v3089_v24 = vshrl.u32 %v3088_v59, 23  ;;  %684 = vrot.lane.b32.xlu0 %v10019_v39, %s7975_s26  ;;  %vm15008_vm12 = vmmov %vm15004_vm9  ;;  %15010 = vst [vmem:[#allocation61_spill] sm:$0xff] %v10250_v41 }
 0x1ff   : > { %v3201_v43 = vsel %vm3200_vm0, %v3199_v17, 0  ;;  %v10242_v47 = vand.u32 8388607, %v14593_v3  ;;  %v10248_v44 = vsel %vm15008_vm12, %v1653_v15, %v9845_v27  ;;  %v10252_v38 = vand.u32 3, %v2346_v61  ;;  %vm15012_vm5 = vmmov %vm15004_vm9  ;;  %v10275_v3 = vld [vmem:[%s8079_s23 + $0x98] sm:$0xff] }
 0x200   : > { %15007 = vst [vmem:[#allocation59_spill] sm:$0xff] %v10238_v5  ;;  %15009 = vst [vmem:[#allocation60_spill] sm:$0xff] %v10248_v44  ;;  %v10256_v51 = vsel %vm6907_vm6, 0, %v6906_v53  ;;  %v2940_v17 = vshll.u32 %v10238_v5, 30  ;;  %v10261_v36 = vsel %vm15012_vm5, %v1652_v20, %v9853_v40  ;;  %v3203_v62 = vand.u32 31, %v3201_v43  ;;  %v10263_v27 = vpop.permute.xlu0 %1248  ;;  %1354 = vrot.lane.b32.xlu1 %v10275_v3, %s7982_s19 }
 0x201   : > { %15011 = vst [vmem:[#allocation62_spill] sm:$0xff] %v10252_v38  ;;  %15013 = vst [vmem:[#allocation63_spill] sm:$0xff] %v10261_v36  ;;  %v10267_v15 = vsel %vm14602_vm13, %v2857_v13, %v2856_v0  ;;  %v3037_v14 = vadd.s32 %v10025_v11, %v10033_v31  ;;  %v10272_v53 = vshll.u32 %v3197_v37, 8  ;;  %v6908_v59 = vadd.s32 4294967169, %v3089_v24  ;;  %v10283_v13 = vld [vmem:[%s8079_s23 + $0x90] sm:$0xff]  ;;  %v10292_v61 = vpop.permute.xlu1 %1342 }
 0x202   : > { %15014 = vst [vmem:[#allocation64_spill] sm:$0xff] %v10263_v27  ;;  %v10279_v40 = vsub.s32 %v2937_v56, %v2940_v17  ;;  %v3204_v20 = vsub.s32 32, %v3203_v62  ;;  %1352 = vrot.lane.b32.xlu0 %v10283_v13, %s7982_s19  ;;  %v3053_v11 = vsub.s32 32, %v10256_v51  ;;  %v3057_v31 = vsub.s32 4294967266, %v10256_v51  ;;  %15015 = vst [vmem:[#allocation65_spill] sm:$0xff] %v10292_v61 }
 0x203   : > { %v10289_v0 = vshrl.u32 %v3201_v43, 5  ;;  %v3206_v37 = vshll.u32 %v14783_v29, %v3203_v62  ;;  %v3209_v17 = vshll.u32 %v14970_v57, %v3203_v62  ;;  %v3212_v55 = vshll.u32 %v14973_v49, %v3203_v62 }
 0x204   : > { %v2943_v56 = vsub.s32 0, %v10279_v40  ;;  %v3207_v24 = vshrl.u32 %v14970_v57, %v3204_v20  ;;  %v3210_v21 = vshrl.u32 %v14973_v49, %v3204_v20  ;;  %v10298_v5 = vpop.permute.xlu0 %1340  ;;  %v3213_v27 = vshrl.u32 %v14974_v25, %v3204_v20  ;;  %1446 = vrot.lane.b32.xlu1 %v10124_v45, %s14659_s20 }
 0x205   : > { %15016 = vst [vmem:[#allocation66_spill] sm:$0xff] %v10298_v5  ;;  %v3215_v43 = vshll.u32 %v14974_v25, %v3203_v62  ;;  %v3216_v41 = vshrl.u32 %v14787_v18, %v3204_v20  ;;  %v3095_v19 = vadd.s32 1, %v6908_v59  ;;  %v15017_v33 = vand.u32 2147483647, %v14996_v6  ;;  %v10317_v44 = vpop.permute.xlu1 %490 }
 0x206   : > { %v6901_v1 = vmin.u32 %v2943_v56, %v10279_v40  ;;  %v3208_v60 = vor.u32 %v3207_v24, %v3206_v37  ;;  %v3211_v58 = vor.u32 %v3210_v21, %v3209_v17  ;;  %1444 = vrot.lane.b32.xlu0 %v10137_v26, %s14659_s20  ;;  %v15018_v54 = vmov 0 }
 0x207   : > { %vm10311_vm8 = vcmp.le.f32.partialorder %v15017_v33, 0.7853982  ;;  %v3214_v36 = vor.u32 %v3213_v27, %v3212_v55  ;;  %v3217_v4 = vor.u32 %v3216_v41, %v3215_v43  ;;  %v3218_v5 = vshll.u32 %v14787_v18, %v3203_v62  ;;  %v15021_v33 = vld [vmem:[#allocation31_spill] sm:$0xff] }
 0x208   : > { %v15019_v54 = vsel %vm10311_vm8, 4294967295, %v15018_v54  ;;  %v3219_v61 = vshrl.u32 %v14790_v16, %v3204_v20  ;;  %vm2349_vm9 = vcmp.eq.s32.totalorder %v10252_v38, 0  ;;  %v3055_v21 = vshrl.u32 %v3037_v14, %v3053_v11  ;;  %v10321_v56 = vpop.permute.xlu0 %488  ;;  %690 = vrot.lane.b32.xlu1 %v10142_v32, %s7975_s26 }
 0x209   : > { %15020 = vst [vmem:[#allocation67_spill] sm:$0xff] %v15019_v54  ;;  %v3058_v59 = vadd.s32 127, %v3057_v31  ;;  %v2945_v37 = vclz %v6901_v1  ;;  %vm3221_vm15 = vcmp.lt.s32.totalorder %v10289_v0, 1  ;;  %vm14612_vm6 = vcmp.lt.s32.totalorder %v15021_v33, 0  ;;  %v10339_v31 = vpop.permute.xlu1 %586 }
 0x20a   : > { %v3205_v55 = vshrl.u32 %v14783_v29, %v3204_v20  ;;  %v3220_v41 = vor.u32 %v3219_v61, %v3218_v5  ;;  %vm3223_vm0 = vcmp.lt.s32.totalorder %v10289_v0, 3  ;;  %vm3224_vm12 = vcmp.lt.s32.totalorder %v10289_v0, 4  ;;  %688 = vrot.lane.b32.xlu0 %v10156_v35, %s7975_s26 }
 0x20b   : > { %v6902_v62 = vadd.s32 4294967294, %v2945_v37  ;;  %v3226_v27 = vsel %vm3224_vm12, %v3214_v36, 2102212464  ;;  %v3230_v14 = vsel %vm3224_vm12, %v3217_v4, 920167782  ;;  %v3233_v1 = vsel %vm3221_vm15, %v3211_v58, %v3214_v36 }
 0x20c   : > { %v3054_v20 = vshll.u32 %v10144_v30, %v10256_v51  ;;  %v3229_v5 = vsel %vm3221_vm15, %v3208_v60, %v3211_v58  ;;  %v3231_v61 = vsel %vm3223_vm0, %v3214_v36, %v3230_v14  ;;  %v3234_v11 = vsel %vm3224_vm12, %v3220_v41, 1326507024  ;;  %v10346_v43 = vpop.permute.xlu0 %584  ;;  %782 = vrot.lane.b32.xlu1 %v10013_v10, %s14796_s27 }
 0x20d   : > { %vm6903_vm5 = vcmp.lt.s32.totalorder %v6902_v62, 0  ;;  %vm3222_vm13 = vcmp.lt.s32.totalorder %v10289_v0, 2  ;;  %v3225_v24 = vsel %vm3221_vm15, %v3205_v55, %v3208_v60  ;;  %v3235_v17 = vsel %vm3223_vm0, %v3217_v4, %v3234_v11  ;;  %v10364_v14 = vpop.permute.xlu1 %678 }
 0x20e   : > { %v2948_v30 = vsel %vm6903_vm5, 0, %v6902_v62  ;;  %v3227_v51 = vsel %vm3223_vm0, %v3211_v58, %v3226_v27  ;;  %v3236_v36 = vsel %vm3222_vm13, %v3233_v1, %v3235_v17  ;;  %vm3096_vm12 = vcmp.gt.s32.totalorder %v3095_v19, 0  ;;  %780 = vrot.lane.b32.xlu0 %v10019_v39, %s14796_s27 }
 0x20f   : > { %v10354_v37 = vor.u32 %v3055_v21, %v3054_v20  ;;  %v3059_v41 = vshll.u32 %v3058_v59, 23  ;;  %v2953_v60 = vsub.s32 4294967266, %v2948_v30  ;;  %v3232_v4 = vsel %vm3222_vm13, %v3229_v5, %v3231_v61 }
 0x210   : > { %v2949_v55 = vsub.s32 32, %v2948_v30  ;;  %v10361_v58 = vmul.u32.u64.low %v10272_v53, %v3236_v36  ;;  %v10362_v62 = vmul.u32.u64.high %v10272_v53, %v3236_v36, %v10361_v58  ;;  %v3097_v27 = vsel %vm3096_vm12, %v3095_v19, 0  ;;  %v10374_v20 = vpop.permute.xlu0 %676  ;;  %1450 = vrot.lane.b32.xlu1 %v10275_v3, %s14659_s20 }
 0x211   : > { %v10370_v21 = vsel %vm10311_vm8, %v14996_v6, %v10267_v15  ;;  %v2954_v59 = vadd.s32 127, %v2953_v60  ;;  %v3228_v1 = vsel %vm3222_vm13, %v3225_v24, %v3227_v51  ;;  %v15022_v5 = vxor.u32 2147483648, %v9924_v50  ;;  %v10408_v54 = vpop.permute.xlu1 %1346 }
 0x212   : > { %v2933_v61 = vadd.s32 %v10149_v52, %v10164_v9  ;;  %v10386_v11 = vmul.u32.u64.low %v10272_v53, %v3232_v4  ;;  %v10387_v15 = vmul.u32.u64.high %v10272_v53, %v3232_v4, %v10386_v11  ;;  %v3099_v17 = vand.u32 31, %v3097_v27  ;;  %1448 = vrot.lane.b32.xlu0 %v10283_v13, %s14659_s20 }
 0x213   : > { %v10381_v19 = vsel %vm2349_vm9, %v9917_v42, %v15022_v5  ;;  %v15024_v0 = vxor.u32 2147483648, %v10234_v63  ;;  %v3060_v51 = vor.u32 4788187, %v3059_v41  ;;  %v3063_v36 = vcvt.s32.f32 %v10354_v37 }
 0x214   : > { %15023 = vst [vmem:[#allocation68_spill] sm:$0xff] %v10381_v19  ;;  %v15025_v52 = vor.u32 8388608, %v10242_v47  ;;  %v2950_v60 = vshll.u32 %v10279_v40, %v2948_v30  ;;  %v2951_v4 = vshrl.u32 %v2933_v61, %v2949_v55  ;;  %v3244_v58 = vmul.u32 %v10272_v53, %v3228_v1  ;;  %v10415_v41 = vpop.permute.xlu0 %1344  ;;  %1542 = vrot.lane.b32.xlu1 %v10124_v45, %s14799_s28 }
 0x215   : > { %v10397_v24 = vsel %vm14612_vm6, %v15024_v0, %v10234_v63  ;;  %v3100_v5 = vsub.s32 32, %v3099_v17  ;;  %v2955_v63 = vshll.u32 %v2954_v59, 23  ;;  %vm3246_vm13 = vc.u32 %v10362_v62, %v10386_v11  ;;  %15026 = vst [vmem:[#allocation69_spill] sm:$0xff] %v10415_v41  ;;  %v10430_v42 = vpop.permute.xlu1 %1438 }
 0x216   : > { %v10402_v9 = vshll.u32 %v15025_v52, 8  ;;  %v10412_v37 = vshrl.u32 %v3097_v27, 5  ;;  %v3102_v47 = vshll.u32 %v14783_v29, %v3099_v17  ;;  %v3247_v0 = vadd.s32 1, %v10387_v15  ;;  %1540 = vrot.lane.b32.xlu0 %v10137_v26, %s14799_s28 }
 0x217   : > { %v3103_v40 = vshrl.u32 %v14970_v57, %v3100_v5  ;;  %v3105_v30 = vshll.u32 %v14970_v57, %v3099_v17  ;;  %v3106_v53 = vshrl.u32 %v14973_v49, %v3100_v5  ;;  %v3108_v55 = vshll.u32 %v14973_v49, %v3099_v17 }
 0x218   : > { %v3109_v27 = vshrl.u32 %v14974_v25, %v3100_v5  ;;  %v3111_v59 = vshll.u32 %v14974_v25, %v3099_v17  ;;  %v3112_v1 = vshrl.u32 %v14787_v18, %v3100_v5  ;;  %v3061_v61 = vand.u32 2147483647, %v3060_v51  ;;  %v10432_v57 = vpop.permute.xlu0 %1436  ;;  %786 = vrot.lane.b32.xlu1 %v10142_v32, %s14796_s27 }
 0x219   : > { %v3248_v52 = vsel %vm3246_vm13, %v3247_v0, %v10387_v15  ;;  %v3104_v6 = vor.u32 %v3103_v40, %v3102_v47  ;;  %v3107_v19 = vor.u32 %v3106_v53, %v3105_v30  ;;  %v2952_v50 = vor.u32 %v2951_v4, %v2950_v60 }
 0x21a   : > { %v3249_v45 = vadd.s32 %v3248_v52, %v3244_v58  ;;  %v3110_v38 = vor.u32 %v3109_v27, %v3108_v55  ;;  %v3113_v49 = vor.u32 %v3112_v1, %v3111_v59  ;;  %v15027_v25 = vand.u32 2147483647, %v15021_v33  ;;  %784 = vrot.lane.b32.xlu0 %v10156_v35, %s14796_s27 }
 0x21b   : > { %v15028_v41 = vmov 0  ;;  %v2956_v26 = vor.u32 4788187, %v2955_v63  ;;  %v3114_v51 = vshll.u32 %v14787_v18, %v3099_v17  ;;  %v3115_v15 = vshrl.u32 %v14790_v16, %v3100_v5  ;;  %v10456_v63 = vpop.permute.xlu1 %682 }
 0x21c   : > { %vm10436_vm9 = vcmp.le.f32.partialorder %v15027_v25, 0.7853982  ;;  %vm3117_vm15 = vcmp.lt.s32.totalorder %v10412_v37, 1  ;;  %v3250_v60 = vadd.s32 536870912, %v3249_v45  ;;  %vm3118_vm0 = vcmp.lt.s32.totalorder %v10412_v37, 2  ;;  %v10465_v53 = vpop.permute.xlu0 %680  ;;  %878 = vrot.lane.b32.xlu1 %v10013_v10, %s14800_s21 }
 0x21d   : > { %v15029_v41 = vsel %vm10436_vm9, 4294967295, %v15028_v41  ;;  %vm3120_vm5 = vcmp.lt.s32.totalorder %v10412_v37, 4  ;;  %v3125_v25 = vsel %vm3117_vm15, %v3104_v6, %v3107_v19  ;;  %v3116_v4 = vor.u32 %v3115_v15, %v3114_v51 }
 0x21e   : > { %15030 = vst [vmem:[#allocation70_spill] sm:$0xff] %v15029_v41  ;;  %vm3119_vm12 = vcmp.lt.s32.totalorder %v10412_v37, 3  ;;  %v3122_v17 = vsel %vm3120_vm5, %v3110_v38, 2102212464  ;;  %v3126_v58 = vsel %vm3120_vm5, %v3113_v49, 920167782  ;;  %v3101_v0 = vshrl.u32 %v14783_v29, %v3100_v5  ;;  %876 = vrot.lane.b32.xlu0 %v10019_v39, %s14800_s21 }
 0x21f   : > { %v10458_v47 = vshrl.u32 %v3250_v60, 30  ;;  %v3127_v40 = vsel %vm3119_vm12, %v3110_v38, %v3126_v58  ;;  %v3129_v30 = vsel %vm3117_vm15, %v3107_v19, %v3110_v38  ;;  %v3064_v55 = vmul.f32 %v3063_v36, %v3061_v61  ;;  %v10490_v60 = vpop.permute.xlu1 %774 }
 0x220   : > { %v2957_v27 = vand.u32 2147483647, %v2956_v26  ;;  %v3128_v59 = vsel %vm3118_vm0, %v3125_v25, %v3127_v40  ;;  %v3130_v1 = vsel %vm3120_vm5, %v3116_v4, 1326507024  ;;  %vm14616_vm13 = vcmp.lt.s32.totalorder %v9843_v28, 0  ;;  %v10502_v4 = vpop.permute.xlu0 %772  ;;  %v15037_v40 = vld [vmem:[#allocation16_spill] sm:$0xff]  ;;  %1546 = vrot.lane.b32.xlu1 %v10275_v3, %s14799_s28 }
 0x221   : > { %15031 = vst [vmem:[#allocation71_spill] sm:$0xff] %v10458_v47  ;;  %v3252_v5 = vshll.u32 %v10458_v47, 30  ;;  %v3121_v38 = vsel %vm3117_vm15, %v3101_v0, %v3104_v6  ;;  %v3123_v36 = vsel %vm3119_vm12, %v3107_v19, %v3122_v17  ;;  %v3131_v61 = vsel %vm3119_vm12, %v3113_v49, %v3130_v1  ;;  %v15032_v6 = vld [vmem:[#allocation27_spill] sm:$0xff] }
 0x222   : > { %v2959_v52 = vcvt.s32.f32 %v2952_v50  ;;  %v3132_v26 = vsel %vm3118_vm0, %v3129_v30, %v3131_v61  ;;  %v10486_v51 = vmul.u32.u64.low %v10402_v9, %v3128_v59  ;;  %v10487_v15 = vmul.u32.u64.high %v10402_v9, %v3128_v59, %v10486_v51  ;;  %1544 = vrot.lane.b32.xlu0 %v10283_v13, %s14799_s28 }
 0x223   : > { %vm14649_vm15 = vcmp.lt.s32.totalorder %v9870_v48, 0  ;;  %v1717_v49 = vsel %vm14650_vm3, %v10226_v8, %v15032_v6  ;;  %v10496_v19 = vsub.s32 %v3249_v45, %v3252_v5  ;;  %7590 = vcosq.f32 %v10370_v21  ;;  %v15039_v5 = vld [vmem:[#allocation41_spill] sm:$0xff] }
 0x224   : > { %v10499_v50 = vmul.u32.u64.low %v10402_v9, %v3132_v26  ;;  %v10500_v25 = vmul.u32.u64.high %v10402_v9, %v3132_v26, %v10499_v50  ;;  %v15033_v17 = vand.u32 2147483647, %v9843_v28  ;;  %v15034_v58 = vmov 0  ;;  %v10541_v61 = vpop.permute.xlu0 %1440  ;;  %882 = vrot.lane.b32.xlu1 %v10142_v32, %s14800_s21 }
 0x225   : > { %v2960_v0 = vmul.f32 %v2959_v52, %v2957_v27  ;;  %v1716_v8 = vsel %vm14650_vm3, %v10230_v23, %v15037_v40  ;;  %v3124_v45 = vsel %vm3118_vm0, %v3121_v38, %v3123_v36  ;;  %7592 = vsinq.f32 %v10370_v21  ;;  %v15038_v27 = vld [vmem:[#allocation36_spill] sm:$0xff]  ;;  %v10533_v38 = vpop.permute.xlu1 %1442  ;;  %v15048_v40 = vld [vmem:[#allocation65_spill] sm:$0xff] }
 0x226   : > { %vm10507_vm5 = vcmp.le.f32.partialorder %v15033_v17, 0.7853982  ;;  %v2757_v30 = vsel %vm10436_vm9, %v15021_v33, %v10397_v24  ;;  %v3255_v59 = vsub.s32 0, %v10496_v19  ;;  %v1750_v1 = vsel %vm14613_vm4, %v1717_v49, %v15038_v27  ;;  %880 = vrot.lane.b32.xlu0 %v10156_v35, %s14800_s21  ;;  %v15047_v17 = vld [vmem:[#allocation60_spill] sm:$0xff] }
 0x227   : > { %v15035_v58 = vsel %vm10507_vm5, 4294967295, %v15034_v58  ;;  %v3065_v23 = vxor.u32 2147483648, %v3064_v55  ;;  %v3143_v37 = vadd.s32 1, %v10487_v15  ;;  %v1749_v3 = vsel %vm14613_vm4, %v1716_v8, %v15039_v5 }
 0x228   : > { %15036 = vst [vmem:[#allocation27_spill] sm:$0xff] %v15035_v58  ;;  %vm15040_vm0 = vcmask 293888   ;;  %v6913_v24 = vmin.u32 %v3255_v59, %v10496_v19  ;;  %v3140_v36 = vmul.u32 %v10402_v9, %v3124_v45  ;;  %vm3142_vm12 = vc.u32 %v10500_v25, %v10486_v51  ;;  %v15050_v45 = vld [vmem:[#allocation66_spill] sm:$0xff]  ;;  %974 = vrot.lane.b32.xlu1 %v10013_v10, %s7978_s29 }
 0x229   : > { %v1783_v21 = vsel %vm15040_vm0, %v1750_v1, %v10016_v12  ;;  %vm15041_vm6 = vmmov %vm15040_vm0  ;;  %v2961_v52 = vxor.u32 2147483648, %v2960_v0  ;;  %v3144_v26 = vsel %vm3142_vm12, %v3143_v37, %v10487_v15  ;;  %vm15042_vm4 = vcmask 343040   ;;  %v15046_v15 = vld [vmem:[#allocation14_spill] sm:$0xff] }
 0x22a   : > { %v1782_v13 = vsel %vm15041_vm6, %v1749_v3, %v10029_v7  ;;  %v1816_v12 = vsel %vm15042_vm4, %v1783_v21, %v10092_v34  ;;  %vm15043_vm0 = vmmov %vm15042_vm4  ;;  %v3257_v9 = vclz %v6913_v24  ;;  %v3145_v49 = vadd.s32 %v3144_v26, %v3140_v36  ;;  %v15057_v24 = vld [vmem:[#allocation45_spill] sm:$0xff]  ;;  %972 = vrot.lane.b32.xlu0 %v10019_v39, %s7978_s29  ;;  %v15063_v26 = vld [vmem:[#allocation15_spill] sm:$0xff] }
 0x22b   : > { %v1815_v6 = vsel %vm15043_vm0, %v1782_v13, %v10097_v22  ;;  %vm15044_vm10 = vcmask 392192   ;;  %v3066_v34 = vsel %vm14616_vm13, %v3065_v23, %v3064_v55  ;;  %v1719_v22 = vsel %vm14650_vm3, %v15047_v17, %v15046_v15  ;;  %v1533_v55 = vpop.permute.xlu0 %1532  ;;  %v15068_v17 = vld [vmem:[#allocation37_spill] sm:$0xff] }
 0x22c   : > { %v1849_v50 = vsel %vm15044_vm10, %v1816_v12, %v10153_v46  ;;  %vm15045_vm6 = vmmov %vm15044_vm10  ;;  %vm15049_vm4 = vcmask 441344   ;;  %v1535_v46 = vpop.permute.xlu1 %1534  ;;  %7594 = vcosq.f32 %v2757_v30  ;;  %v3146_v27 = vadd.s32 536870912, %v3145_v49  ;;  %v15064_v12 = vld [vmem:[#allocation63_spill] sm:$0xff]  ;;  %978 = vrot.lane.b32.xlu1 %v10142_v32, %s7978_s29 }
 0x22d   : > { %v1848_v7 = vsel %vm15045_vm6, %v1815_v6, %v10166_v2  ;;  %v1882_v8 = vsel %vm15049_vm4, %v1849_v50, %v15048_v40  ;;  %vm15051_vm12 = vmmov %vm15049_vm4  ;;  %vm15052_vm10 = vcmask 490496   ;;  %v2962_v23 = vsel %vm14649_vm15, %v2961_v52, %v2960_v0  ;;  %v10584_v0 = vpop.eup %7590 }
 0x22e   : > { %v1881_v59 = vsel %vm15051_vm12, %v1848_v7, %v15050_v45  ;;  %v1915_v2 = vsel %vm15052_vm10, %v1882_v8, %v10430_v42  ;;  %vm15053_vm0 = vmmov %vm15052_vm10  ;;  %v6914_v37 = vadd.s32 4294967294, %v3257_v9  ;;  %vm15054_vm6 = vcmask 539648   ;;  %15058 = vst [vmem:[#allocation36_spill] sm:$0xff] %v10584_v0  ;;  %v15065_v9 = vld [vmem:[#allocation42_spill] sm:$0xff]  ;;  %976 = vrot.lane.b32.xlu0 %v10156_v35, %s7978_s29 }
 0x22f   : > { %v1914_v1 = vsel %vm15053_vm0, %v1881_v59, %v10432_v57  ;;  %v1948_v5 = vsel %vm15054_vm6, %v1915_v2, %v1535_v46  ;;  %vm15055_vm4 = vmmov %vm15054_vm6  ;;  %v3069_v21 = vsel %vm10507_vm5, %v9843_v28, %v3066_v34  ;;  %v10578_v42 = vshrl.u32 %v3146_v27, 30  ;;  %v10599_v34 = vpop.eup %7592  ;;  %v15070_v8 = vld [vmem:[#allocation46_spill] sm:$0xff]  ;;  %v10609_v59 = vpop.permute.xlu0 %776 }
 0x230   : > { %v1947_v3 = vsel %vm15055_vm4, %v1914_v1, %v1533_v55  ;;  %v1987_v57 = vmul.f32 %v15057_v24, %v1948_v5  ;;  %7596 = vsinq.f32 %v2757_v30  ;;  %v15059_v13 = vand.u32 2147483647, %v9870_v48  ;;  %v10597_v7 = vpop.permute.xlu1 %778  ;;  %15067 = vst [vmem:[#allocation14_spill] sm:$0xff] %v10599_v34  ;;  %v15075_v55 = vld [vmem:[#allocation47_spill] sm:$0xff]  ;;  %v15077_v5 = vld [vmem:[#allocation53_spill] sm:$0xff]  ;;  %1070 = vrot.lane.b32.xlu1 %v10013_v10, %s15087_s11 }
 0x231   : > { %15056 = vst [vmem:[#allocation16_spill] sm:$0xff] %v10578_v42  ;;  %v1986_v36 = vmul.f32 %v15057_v24, %v1947_v3  ;;  %v15060_v52 = vmov 0  ;;  %v1718_v6 = vsel %vm14650_vm3, %v15064_v12, %v15063_v26  ;;  %vm15066_vm10 = vcmask 244736   ;;  %v15081_v12 = vld [vmem:[#allocation58_spill] sm:$0xff] }
 0x232   : > { %vm10588_vm12 = vcmp.le.f32.partialorder %v15059_v13, 0.7853982  ;;  %v1752_v50 = vsel %vm15066_vm10, %v1719_v22, %v15065_v9  ;;  %v3148_v15 = vshll.u32 %v10578_v42, 30  ;;  %vm15069_vm0 = vmmov %vm15066_vm10  ;;  %vm15071_vm6 = vcmask 293888   ;;  %v15072_v22 = vld [vmem:[#allocation48_spill] sm:$0xff]  ;;  %1068 = vrot.lane.b32.xlu0 %v10019_v39, %s15087_s11 }
 0x233   : > { %v15061_v52 = vsel %vm10588_vm12, 4294967295, %v15060_v52  ;;  %v2965_v30 = vsel %vm10588_vm12, %v9870_v48, %v2962_v23  ;;  %v1751_v40 = vsel %vm15069_vm0, %v1718_v6, %v15068_v17  ;;  %v1785_v45 = vsel %vm15071_vm6, %v1752_v50, %v15070_v8  ;;  %vm15076_vm10 = vmmov %vm15071_vm6  ;;  %v10640_v26 = vpop.permute.xlu0 %868  ;;  %v15082_v6 = vld [vmem:[#allocation56_spill] sm:$0xff] }
 0x234   : > { %15062 = vst [vmem:[#allocation41_spill] sm:$0xff] %v15061_v52  ;;  %7598 = vcosq.f32 %v3069_v21  ;;  %vm6915_vm4 = vcmp.lt.s32.totalorder %v6914_v37, 0  ;;  %v10612_v46 = vadd.f32 %v15072_v22, %v1987_v57  ;;  %v10615_v27 = vadd.f32 %v15072_v22, %v1986_v36  ;;  %v10633_v36 = vpop.permute.xlu1 %870  ;;  %v15084_v50 = vld [vmem:[#allocation44_spill] sm:$0xff]  ;;  %1074 = vrot.lane.b32.xlu1 %v10142_v32, %s15087_s11 }
 0x235   : > { %7600 = vsinq.f32 %v3069_v21  ;;  %v10621_v2 = vadd.s32 %v10386_v11, %v10362_v62  ;;  %v10623_v1 = vsub.s32 %v3145_v49, %v3148_v15  ;;  %v1784_v23 = vsel %vm15076_vm10, %v1751_v40, %v15075_v55  ;;  %v15079_v49 = vld [vmem:[#allocation54_spill] sm:$0xff]  ;;  %v15085_v15 = vld [vmem:[#allocation57_spill] sm:$0xff] }
 0x236   : > { %15073 = vst [vmem:[#allocation60_spill] sm:$0xff] %v10612_v46  ;;  %15074 = vst [vmem:[#allocation65_spill] sm:$0xff] %v10615_v27  ;;  %7602 = vcosq.f32 %v2965_v30  ;;  %vm15078_vm0 = vcmask 343040   ;;  %v14615_v57 = vand.u32 2147483647, %v10612_v46  ;;  %v3400_v21 = vand.u32 2139095040, %v10612_v46  ;;  %1072 = vrot.lane.b32.xlu0 %v10156_v35, %s15087_s11 }
 0x237   : > { %v1818_v3 = vsel %vm15078_vm0, %v1785_v45, %v15077_v5  ;;  %7604 = vsinq.f32 %v2965_v30  ;;  %v10635_v62 = vsel %vm6915_vm4, 0, %v6914_v37  ;;  %v3151_v11 = vsub.s32 0, %v10623_v1  ;;  %vm15080_vm6 = vmmov %vm15078_vm0  ;;  %v10651_v37 = vpop.eup %7594  ;;  %v15089_v45 = vld [vmem:[#allocation61_spill] sm:$0xff] }
 0x238   : > { %v1817_v13 = vsel %vm15080_vm6, %v1784_v23, %v15079_v49  ;;  %vm15083_vm10 = vcmask 48128   ;;  %v3401_v40 = vshrl.u32 %v3400_v21, 23  ;;  %v3296_v30 = vand.u32 2139095040, %v10615_v27  ;;  %15088 = vst [vmem:[#allocation66_spill] sm:$0xff] %v10651_v37  ;;  %v15091_v23 = vld [vmem:[#allocation64_spill] sm:$0xff]  ;;  %1166 = vrot.lane.b32.xlu1 %v10013_v10, %s14968_s14 }
 0x239   : > { %v1622_v9 = vsel %vm15083_vm10, %v15082_v6, %v15081_v12  ;;  %vm15086_vm0 = vmmov %vm15083_vm10  ;;  %v6909_v8 = vmin.u32 %v3151_v11, %v10623_v1  ;;  %vm15090_vm4 = vcmask 392192   ;;  %v3265_v21 = vsub.s32 4294967266, %v10635_v62 }
 0x23a   : > { %v1621_v17 = vsel %vm15086_vm0, %v15085_v15, %v15084_v50  ;;  %v1851_v55 = vsel %vm15090_vm4, %v1818_v3, %v15089_v45  ;;  %vm15092_vm6 = vmmov %vm15090_vm4  ;;  %v6920_v12 = vadd.s32 4294967169, %v3401_v40  ;;  %v3404_v6 = vand.u32 8388607, %v14615_v57  ;;  %v1539_v50 = vpop.permute.xlu1 %1538  ;;  %v1537_v15 = vpop.permute.xlu0 %1536  ;;  %1164 = vrot.lane.b32.xlu0 %v10019_v39, %s14968_s14 }
 0x23b   : > { %v1850_v5 = vsel %vm15092_vm6, %v1817_v13, %v15091_v23  ;;  %vm15093_vm10 = vmmov %vm15086_vm0  ;;  %v3297_v11 = vshrl.u32 %v3296_v30, 23  ;;  %v10668_v3 = vadd.s32 %v10486_v51, %v10500_v25  ;;  %v3153_v13 = vclz %v6909_v8  ;;  %v10674_v45 = vpop.eup %7596  ;;  %v15098_v8 = vld [vmem:[#allocation69_spill] sm:$0xff] }
 0x23c   : > { %v1624_v49 = vsel %vm15093_vm10, %v10317_v44, %v10339_v31  ;;  %v1623_v44 = vsel %vm15086_vm0, %v10321_v56, %v10346_v43  ;;  %v14617_v31 = vand.u32 2147483647, %v10615_v27  ;;  %15094 = vst [vmem:[#allocation45_spill] sm:$0xff] %v10674_v45  ;;  %vm15095_vm4 = vcmask 97280   ;;  %1170 = vrot.lane.b32.xlu1 %v10142_v32, %s14968_s14 }
 0x23d   : > { %v10678_v40 = vsel %vm15095_vm4, %v1622_v9, %v10364_v14  ;;  %vm15096_vm6 = vmmov %vm15095_vm4  ;;  %vm15097_vm10 = vcmask 441344   ;;  %v3407_v25 = vadd.s32 1, %v6920_v12  ;;  %v3261_v56 = vsub.s32 32, %v10635_v62 }
 0x23e   : > { %v10682_v30 = vsel %vm15096_vm6, %v1621_v17, %v10374_v20  ;;  %v1884_v51 = vsel %vm15097_vm10, %v1851_v55, %v10408_v54  ;;  %v6910_v43 = vadd.s32 4294967294, %v3153_v13  ;;  %vm15099_vm0 = vmmov %vm15097_vm10  ;;  %v6916_v57 = vadd.s32 4294967169, %v3297_v11  ;;  %v10693_v14 = vpop.eup %7598  ;;  %v10701_v17 = vpop.permute.xlu1 %874  ;;  %1168 = vrot.lane.b32.xlu0 %v10156_v35, %s14968_s14 }
 0x23f   : > { %v1883_v23 = vsel %vm15099_vm0, %v1850_v5, %v15098_v8  ;;  %15100 = vst [vmem:[#allocation15_spill] sm:$0xff] %v10693_v14  ;;  %v10695_v20 = vadd.s32 127, %v3265_v21  ;;  %v10699_v54 = vsel %vm15095_vm4, %v1624_v49, %v10456_v63  ;;  %v3405_v9 = vor.u32 8388608, %v3404_v6  ;;  %v10703_v55 = vpop.eup %7600  ;;  %v10711_v21 = vpop.permute.xlu0 %872 }
 0x240   : > { %vm3408_vm6 = vcmp.gt.s32.totalorder %v3407_v25, 0  ;;  %15101 = vst [vmem:[#allocation63_spill] sm:$0xff] %v10703_v55  ;;  %vm6911_vm10 = vcmp.lt.s32.totalorder %v6910_v43, 0  ;;  %vm15102_vm0 = vcmask 490496   ;;  %v10709_v11 = vand.u32 8388607, %v14617_v31  ;;  %v10713_v13 = vpop.eup %7602  ;;  %1262 = vrot.lane.b32.xlu1 %v10013_v10, %s7981_s15 }
 0x241   : > { %v1917_v5 = vsel %vm15102_vm0, %v1884_v51, %v10533_v38  ;;  %v3409_v12 = vsel %vm3408_vm6, %v3407_v25, 0  ;;  %15103 = vst [vmem:[#allocation42_spill] sm:$0xff] %v10711_v21  ;;  %15104 = vst [vmem:[#allocation37_spill] sm:$0xff] %v10713_v13  ;;  %v10715_v63 = vsel %vm6911_vm10, 0, %v6910_v43  ;;  %v10719_v49 = vsel %vm15095_vm4, %v1623_v44, %v10465_v53  ;;  %v10724_v38 = vpop.eup %7604 }
 0x242   : > { %v3411_v6 = vand.u32 31, %v3409_v12  ;;  %vm15105_vm13 = vcmask 539648   ;;  %15106 = vst [vmem:[#allocation46_spill] sm:$0xff] %v10724_v38  ;;  %v10729_v25 = vshrl.u32 %v10621_v2, %v3261_v56  ;;  %vm15107_vm6 = vmmov %vm15102_vm0  ;;  %v3303_v31 = vadd.s32 1, %v6916_v57  ;;  %v10739_v14 = vpop.permute.xlu1 %966  ;;  %1260 = vrot.lane.b32.xlu0 %v10019_v39, %s7981_s15 }
 0x243   : > { %v1950_v8 = vsel %vm15105_vm13, %v1917_v5, %v1539_v50  ;;  %v1916_v43 = vsel %vm15107_vm6, %v1883_v23, %v10541_v61  ;;  %v10736_v44 = vshll.u32 %v3405_v9, 8  ;;  %v3161_v51 = vsub.s32 4294967266, %v10715_v63  ;;  %v10746_v57 = vpop.permute.xlu0 %964 }
 0x244   : > { %v3412_v50 = vsub.s32 32, %v3411_v6  ;;  %v1949_v5 = vsel %vm15105_vm13, %v1916_v43, %v1537_v15  ;;  %v3410_v2 = vshrl.u32 %v3409_v12, 5  ;;  %v10744_v61 = vmul.f32 %v15057_v24, %v1950_v8 }
 0x245   : > { %v3414_v23 = vshll.u32 %v14783_v29, %v3411_v6  ;;  %v15108_v53 = vmov 2475754826   ;;  %v15109_v58 = vmov 2131351028   ;;  %v15110_v43 = vmov 2102212464  }
 0x246   : > { %v3415_v55 = vshrl.u32 %v15108_v53, %v3412_v50  ;;  %v3417_v9 = vshll.u32 %v15108_v53, %v3411_v6  ;;  %v3418_v15 = vshrl.u32 %v15109_v58, %v3412_v50  ;;  %v3420_v12 = vshll.u32 %v15109_v58, %v3411_v6  ;;  %v10763_v48 = vpop.permute.xlu1 %970 }
 0x247   : > { %v3421_v56 = vshrl.u32 %v15110_v43, %v3412_v50  ;;  %vm3304_vm10 = vcmp.gt.s32.totalorder %v3303_v31, 0  ;;  %v10757_v8 = vmul.f32 %v15057_v24, %v1949_v5  ;;  %v3423_v38 = vshll.u32 %v15110_v43, %v3411_v6  ;;  %15111 = vst [vmem:[#allocation48_spill] sm:$0xff] %v10763_v48  ;;  %v10768_v5 = vpop.permute.xlu0 %968 }
 0x248   : > { %v3416_v28 = vor.u32 %v3415_v55, %v3414_v23  ;;  %v3419_v13 = vor.u32 %v3418_v15, %v3417_v9  ;;  %v3424_v52 = vshrl.u32 %v14787_v18, %v3412_v50  ;;  %v3157_v47 = vsub.s32 32, %v10715_v63  ;;  %15112 = vst [vmem:[#allocation47_spill] sm:$0xff] %v10768_v5 }
 0x249   : > { %v3422_v42 = vor.u32 %v3421_v56, %v3420_v12  ;;  %v3426_v0 = vshll.u32 %v14787_v18, %v3411_v6  ;;  %v3427_v24 = vshrl.u32 %v14790_v16, %v3412_v50  ;;  %v3162_v34 = vadd.s32 127, %v3161_v51  ;;  %v10776_v6 = vld [vmem:[%s8079_s23 + $0xc8] sm:$0xff] }
 0x24a   : > { %v3413_v55 = vshrl.u32 %v14783_v29, %v3412_v50  ;;  %v3425_v23 = vor.u32 %v3424_v52, %v3423_v38  ;;  %vm3429_vm0 = vcmp.lt.s32.totalorder %v3410_v2, 1  ;;  %vm3430_vm4 = vcmp.lt.s32.totalorder %v3410_v2, 2  ;;  %v10778_v37 = vpop.permute.xlu1 %1062  ;;  %v10781_v52 = vld [vmem:[%s8079_s23 + $0xc0] sm:$0xff]  ;;  %502 = vrot.lane.b32.xlu1 %v10776_v6, %s7974_s25 }
 0x24b   : > { %v3428_v9 = vor.u32 %v3427_v24, %v3426_v0  ;;  %vm3431_vm6 = vcmp.lt.s32.totalorder %v3410_v2, 3  ;;  %vm3432_vm13 = vcmp.lt.s32.totalorder %v3410_v2, 4  ;;  %v3437_v15 = vsel %vm3429_vm0, %v3416_v28, %v3419_v13  ;;  %v10785_v24 = vpop.permute.xlu0 %1060  ;;  %500 = vrot.lane.b32.xlu0 %v10781_v52, %s7974_s25 }
 0x24c   : > { %v3434_v56 = vsel %vm3432_vm13, %v3422_v42, 2102212464  ;;  %v3438_v51 = vsel %vm3432_vm13, %v3425_v23, 920167782  ;;  %v3441_v12 = vsel %vm3429_vm0, %v3419_v13, %v3422_v42  ;;  %v3433_v38 = vsel %vm3429_vm0, %v3413_v55, %v3416_v28  ;;  %15113 = vst [vmem:[#allocation53_spill] sm:$0xff] %v10785_v24 }
 0x24d   : > { %v3435_v10 = vsel %vm3431_vm6, %v3419_v13, %v3434_v56  ;;  %v3439_v0 = vsel %vm3431_vm6, %v3422_v42, %v3438_v51  ;;  %v3442_v50 = vsel %vm3432_vm13, %v3428_v9, 1326507024  ;;  %v3159_v39 = vshrl.u32 %v10668_v3, %v3157_v47 }
 0x24e   : > { %v3440_v45 = vsel %vm3430_vm4, %v3437_v15, %v3439_v0  ;;  %v3443_v41 = vsel %vm3431_vm6, %v3425_v23, %v3442_v50  ;;  %v3305_v33 = vsel %vm3304_vm10, %v3303_v31, 0  ;;  %v3163_v5 = vshll.u32 %v3162_v34, 23  ;;  %v10808_v34 = vpop.permute.xlu1 %1066  ;;  %598 = vrot.lane.b32.xlu1 %v10776_v6, %s7973_s24 }
 0x24f   : > { %v3444_v28 = vsel %vm3430_vm4, %v3441_v12, %v3443_v41  ;;  %v10795_v13 = vmul.u32.u64.low %v10736_v44, %v3440_v45  ;;  %v10796_v42 = vmul.u32.u64.high %v10736_v44, %v3440_v45, %v10795_v13  ;;  %v3158_v47 = vshll.u32 %v10623_v1, %v10715_v63  ;;  %15114 = vst [vmem:[#allocation54_spill] sm:$0xff] %v10808_v34  ;;  %v10826_v2 = vpop.permute.xlu0 %1064  ;;  %596 = vrot.lane.b32.xlu0 %v10781_v52, %s7973_s24 }
 0x250   : > { %v3436_v3 = vsel %vm3430_vm4, %v3433_v38, %v3435_v10  ;;  %v10805_v31 = vmul.u32.u64.low %v10736_v44, %v3444_v28  ;;  %v10806_v55 = vmul.u32.u64.high %v10736_v44, %v3444_v28, %v10805_v31  ;;  %v15115_v41 = vshll.u32 %v10496_v19, %v10635_v62  ;;  %15118 = vst [vmem:[#allocation58_spill] sm:$0xff] %v10826_v2 }
 0x251   : > { %vm15116_vm10 = vcmask 146432   ;;  %v3307_v63 = vand.u32 31, %v3305_v33  ;;  %v15119_v9 = vshll.u32 %v10695_v20, 23  ;;  %v10832_v19 = vor.u32 %v3159_v39, %v3158_v47 }
 0x252   : > { %v10814_v45 = vor.u32 %v10729_v25, %v15115_v41  ;;  %v10819_v23 = vsel %vm15116_vm10, %v10678_v40, %v10490_v60  ;;  %vm15117_vm0 = vmmov %vm15116_vm10  ;;  %v10834_v62 = vshrl.u32 %v3305_v33, 5  ;;  %v15120_v25 = vor.u32 8388608, %v10709_v11  ;;  %1266 = vrot.lane.b32.xlu1 %v10142_v32, %s7981_s15 }
 0x253   : > { %v10824_v1 = vsel %vm15117_vm0, %v10682_v30, %v10502_v4  ;;  %v10830_v56 = vor.u32 4788187, %v15119_v9  ;;  %v10842_v4 = vor.u32 4788187, %v3163_v5  ;;  %v3452_v40 = vmul.u32 %v10736_v44, %v3436_v3  ;;  %v10859_v44 = vpop.permute.xlu1 %1158  ;;  %v10865_v10 = vpop.permute.xlu0 %1156  ;;  %1264 = vrot.lane.b32.xlu0 %v10156_v35, %s7981_s15 }
 0x254   : > { %v10838_v60 = vshll.u32 %v15120_v25, 8  ;;  %v3455_v30 = vadd.s32 1, %v10796_v42  ;;  %v3308_v20 = vsub.s32 32, %v3307_v63  ;;  %vm3454_vm4 = vc.u32 %v10806_v55, %v10795_v13  ;;  %15123 = vst [vmem:[#allocation57_spill] sm:$0xff] %v10859_v44  ;;  %15124 = vst [vmem:[#allocation61_spill] sm:$0xff] %v10865_v10 }
 0x255   : > { %v3310_v33 = vshll.u32 %v14783_v29, %v3307_v63  ;;  %v10853_v11 = vadd.f32 %v15072_v22, %v10744_v61  ;;  %v10857_v5 = vadd.f32 %v15072_v22, %v10757_v8  ;;  %v3313_v12 = vshll.u32 %v15108_v53, %v3307_v63 }
 0x256   : > { %v3456_v15 = vsel %vm3454_vm4, %v3455_v30, %v10796_v42  ;;  %v3311_v51 = vshrl.u32 %v15108_v53, %v3308_v20  ;;  %v3314_v38 = vshrl.u32 %v15109_v58, %v3308_v20  ;;  %v3316_v61 = vshll.u32 %v15109_v58, %v3307_v63 }
 0x257   : > { %15121 = vst [vmem:[#allocation56_spill] sm:$0xff] %v10853_v11  ;;  %15122 = vst [vmem:[#allocation44_spill] sm:$0xff] %v10857_v5  ;;  %v3457_v0 = vadd.s32 %v3456_v15, %v3452_v40  ;;  %v3317_v50 = vshrl.u32 %v15110_v43, %v3308_v20  ;;  %vm3325_vm6 = vcmp.lt.s32.totalorder %v10834_v62, 1  ;;  %v3319_v39 = vshll.u32 %v15110_v43, %v3307_v63  ;;  %v10878_v41 = vpop.permute.xlu1 %1162  ;;  %v10883_v25 = vpop.permute.xlu0 %1160 }
 0x258   : > { %v3312_v22 = vor.u32 %v3311_v51, %v3310_v33  ;;  %v3315_v8 = vor.u32 %v3314_v38, %v3313_v12  ;;  %v3320_v28 = vshrl.u32 %v14787_v18, %v3308_v20  ;;  %v3322_v3 = vshll.u32 %v14787_v18, %v3307_v63  ;;  %15125 = vst [vmem:[#allocation64_spill] sm:$0xff] %v10878_v41  ;;  %v15128_v33 = vld [vmem:[#allocation62_spill] sm:$0xff]  ;;  %v10905_v38 = vld [vmem:[%s8079_s23 + $0xa0] sm:$0xff] }
 0x259   : > { %v3458_v42 = vadd.s32 536870912, %v3457_v0  ;;  %v3318_v47 = vor.u32 %v3317_v50, %v3316_v61  ;;  %v3323_v31 = vshrl.u32 %v14790_v16, %v3308_v20  ;;  %v3309_v32 = vshrl.u32 %v14783_v29, %v3308_v20  ;;  %15126 = vst [vmem:[#allocation69_spill] sm:$0xff] %v10883_v25  ;;  %v10892_v20 = vld [vmem:[%s8079_s23 + $0xa8] sm:$0xff]  ;;  %1356 = vrot.lane.b32.xlu0 %v10905_v38, %s7982_s19  ;;  %v10910_v61 = vld [vmem:[%s8079_s23 + $0xd8] sm:$0xff] }
 0x25a   : > { %v3321_v9 = vor.u32 %v3320_v28, %v3319_v39  ;;  %vm3326_vm13 = vcmp.lt.s32.totalorder %v10834_v62, 2  ;;  %vm3328_vm10 = vcmp.lt.s32.totalorder %v10834_v62, 4  ;;  %v3333_v30 = vsel %vm3325_vm6, %v3312_v22, %v3315_v8  ;;  %1358 = vrot.lane.b32.xlu1 %v10892_v20, %s7982_s19 }
 0x25b   : > { %v10885_v35 = vshrl.u32 %v3458_v42, 30  ;;  %v3324_v40 = vor.u32 %v3323_v31, %v3322_v3  ;;  %v3330_v63 = vsel %vm3328_vm10, %v3318_v47, 2102212464  ;;  %vm2352_vm0 = vcmp.eq.s32.totalorder %v15128_v33, 2  ;;  %v10916_v42 = vpop.permute.xlu1 %1254  ;;  %v10919_v3 = vld [vmem:[%s8079_s23 + $0xd0] sm:$0xff]  ;;  %v10924_v2 = vpop.permute.xlu0 %1252 }
 0x25c   : > { %vm3327_vm4 = vcmp.lt.s32.totalorder %v10834_v62, 3  ;;  %v3329_v15 = vsel %vm3325_vm6, %v3309_v32, %v3312_v22  ;;  %v3334_v51 = vsel %vm3328_vm10, %v3321_v9, 920167782  ;;  %v3337_v12 = vsel %vm3325_vm6, %v3315_v8, %v3318_v47  ;;  %15129 = vst [vmem:[#allocation62_spill] sm:$0xff] %v10916_v42  ;;  %15130 = vst [vmem:[#allocation73_spill] sm:$0xff] %v10924_v2 }
 0x25d   : > { %15127 = vst [vmem:[#allocation72_spill] sm:$0xff] %v10885_v35  ;;  %v3460_v50 = vshll.u32 %v10885_v35, 30  ;;  %v3335_v39 = vsel %vm3327_vm4, %v3318_v47, %v3334_v51  ;;  %v3338_v28 = vsel %vm3328_vm10, %v3324_v40, 1326507024  ;;  %v14640_v22 = vand.u32 2147483647, %v10853_v11  ;;  %504 = vrot.lane.b32.xlu0 %v10919_v3, %s7974_s25 }
 0x25e   : > { %v3331_v31 = vsel %vm3327_vm4, %v3315_v8, %v3330_v63  ;;  %v3336_v32 = vsel %vm3326_vm13, %v3333_v30, %v3335_v39  ;;  %v3339_v25 = vsel %vm3327_vm4, %v3321_v9, %v3338_v28  ;;  %v3608_v41 = vand.u32 2139095040, %v10853_v11  ;;  %506 = vrot.lane.b32.xlu1 %v10910_v61, %s7974_s25 }
 0x25f   : > { %v10926_v35 = vsub.s32 %v3457_v0, %v3460_v50  ;;  %v3340_v47 = vsel %vm3326_vm13, %v3337_v12, %v3339_v25  ;;  %v10931_v40 = vmul.u32.u64.low %v10838_v60, %v3336_v32  ;;  %v10932_v51 = vmul.u32.u64.high %v10838_v60, %v3336_v32, %v10931_v40  ;;  %v10949_v39 = vpop.permute.xlu1 %494  ;;  %v10954_v32 = vpop.permute.xlu0 %492 }
 0x260   : > { %v3269_v8 = vand.u32 2147483647, %v10830_v56  ;;  %v10939_v9 = vmul.u32.u64.low %v10838_v60, %v3340_v47  ;;  %v10940_v63 = vmul.u32.u64.high %v10838_v60, %v3340_v47, %v10939_v9  ;;  %v3609_v30 = vshrl.u32 %v3608_v41, 23  ;;  %15131 = vst [vmem:[#allocation74_spill] sm:$0xff] %v10949_v39  ;;  %15132 = vst [vmem:[#allocation75_spill] sm:$0xff] %v10954_v32  ;;  %v15133_v47 = vld [vmem:[#allocation43_spill] sm:$0xff] }
 0x261   : > { %v3165_v0 = vand.u32 2147483647, %v10842_v4  ;;  %v3463_v25 = vsub.s32 0, %v10926_v35  ;;  %v3332_v12 = vsel %vm3326_vm13, %v3329_v15, %v3331_v31  ;;  %v3504_v50 = vand.u32 2139095040, %v10857_v5  ;;  %600 = vrot.lane.b32.xlu0 %v10919_v3, %s7973_s24 }
 0x262   : > { %v3271_v56 = vcvt.s32.f32 %v10814_v45  ;;  %v6928_v28 = vadd.s32 4294967169, %v3609_v30  ;;  %v3612_v41 = vand.u32 8388607, %v14640_v22  ;;  %v2443_v9 = vsub.s32 4, %v15133_v47  ;;  %602 = vrot.lane.b32.xlu1 %v10910_v61, %s7973_s24  ;;  %v15134_v30 = vld [vmem:[#allocation4_spill] sm:$0xff] }
 0x263   : > { %v3167_v4 = vcvt.s32.f32 %v10832_v19  ;;  %v6921_v34 = vmin.u32 %v3463_v25, %v10926_v35  ;;  %v3351_v62 = vadd.s32 1, %v10932_v51  ;;  %v3505_v15 = vshrl.u32 %v3504_v50, 23  ;;  %v15135_v22 = vld [vmem:[#allocation20_spill] sm:$0xff]  ;;  %v10981_v2 = vpop.permute.xlu0 %588 }
 0x264   : > { %v3348_v45 = vmul.u32 %v10838_v60, %v3332_v12  ;;  %vm3350_vm6 = vc.u32 %v10940_v63, %v10931_v40  ;;  %v3615_v31 = vadd.s32 1, %v6928_v28  ;;  %v15136_v19 = vxor.u32 2147483648, %v15135_v22  ;;  %v10979_v12 = vpop.permute.xlu1 %590  ;;  %15138 = vst [vmem:[#allocation4_spill] sm:$0xff] %v10981_v2  ;;  %v15139_v22 = vld [vmem:[#allocation18_spill] sm:$0xff] }
 0x265   : > { %v10974_v50 = vmul.f32 %v3271_v56, %v3269_v8  ;;  %v10976_v11 = vmul.f32 %v3167_v4, %v3165_v0  ;;  %v3465_v32 = vclz %v6921_v34  ;;  %v3352_v60 = vsel %vm3350_vm6, %v3351_v62, %v10932_v51  ;;  %15137 = vst [vmem:[#allocation43_spill] sm:$0xff] %v10979_v12  ;;  %692 = vrot.lane.b32.xlu0 %v10781_v52, %s7975_s26 }
 0x266   : > { %v10972_v25 = vsel %vm2352_vm0, %v15136_v19, %v15134_v30  ;;  %v3353_v28 = vadd.s32 %v3352_v60, %v3348_v45  ;;  %v3613_v39 = vor.u32 8388608, %v3612_v41  ;;  %vm3616_vm13 = vcmp.gt.s32.totalorder %v3615_v31, 0  ;;  %694 = vrot.lane.b32.xlu1 %v10776_v6, %s7975_s26 }
 0x267   : > { %vm15140_vm10 = vcmp.lt.s32.totalorder %v15139_v22, 0  ;;  %v6922_v30 = vadd.s32 4294967294, %v3465_v32  ;;  %v3617_v8 = vsel %vm3616_vm13, %v3615_v31, 0  ;;  %v14643_v0 = vand.u32 2147483647, %v10857_v5 }
 0x268   : > { %v10986_v48 = vsel %vm15140_vm10, %v2443_v9, %v15133_v47  ;;  %v6924_v56 = vadd.s32 4294967169, %v3505_v15  ;;  %v3354_v34 = vadd.s32 536870912, %v3353_v28  ;;  %vm15142_vm0 = vcmask 146432   ;;  %v11013_v15 = vpop.permute.xlu0 %1256  ;;  %v11031_v9 = vld [vmem:[%s8079_s23 + $0xb0] sm:$0xff] }
 0x269   : > { %15141 = vst [vmem:[#allocation20_spill] sm:$0xff] %v10986_v48  ;;  %v10994_v51 = vsel %vm15142_vm0, %v10699_v54, %v10597_v7  ;;  %vm15143_vm4 = vmmov %vm15142_vm0  ;;  %v3619_v47 = vand.u32 31, %v3617_v8  ;;  %v3453_v4 = vadd.s32 %v10795_v13, %v10806_v55  ;;  %vm6923_vm6 = vcmp.lt.s32.totalorder %v6922_v30, 0  ;;  %v11007_v7 = vpop.permute.xlu1 %1258  ;;  %v11022_v13 = vld [vmem:[%s8079_s23 + $0xb8] sm:$0xff]  ;;  %1360 = vrot.lane.b32.xlu0 %v11031_v9, %s7982_s19 }
 0x26a   : > { %v10999_v41 = vsel %vm15143_vm4, %v10719_v49, %v10609_v59  ;;  %15145 = vst [vmem:[#allocation77_spill] sm:$0xff] %v11007_v7  ;;  %v3468_v54 = vsel %vm6923_vm6, 0, %v6922_v30  ;;  %v11009_v62 = vshrl.u32 %v3354_v34, 30  ;;  %v11011_v49 = vshll.u32 %v3613_v39, 8  ;;  %15147 = vst [vmem:[#allocation79_spill] sm:$0xff] %v11013_v15  ;;  %1362 = vrot.lane.b32.xlu1 %v11022_v13, %s7982_s19 }
 0x26b   : > { %15144 = vst [vmem:[#allocation76_spill] sm:$0xff] %v10999_v41  ;;  %v3620_v59 = vsub.s32 32, %v3619_v47  ;;  %v3469_v45 = vsub.s32 32, %v3468_v54  ;;  %v3473_v31 = vsub.s32 4294967266, %v3468_v54  ;;  %v11017_v19 = vand.u32 8388607, %v14643_v0 }
 0x26c   : > { %15146 = vst [vmem:[#allocation78_spill] sm:$0xff] %v11009_v62  ;;  %v11019_v60 = vadd.s32 1, %v6924_v56  ;;  %v3356_v55 = vshll.u32 %v11009_v62, 30  ;;  %v3622_v39 = vshll.u32 %v14783_v29, %v3619_v47  ;;  %v11035_v56 = vshrl.u32 %v3617_v8, 5  ;;  %v11044_v12 = vpop.permute.xlu0 %1348 }
 0x26d   : > { %v3623_v30 = vshrl.u32 %v15108_v53, %v3620_v59  ;;  %v3626_v34 = vshrl.u32 %v15109_v58, %v3620_v59  ;;  %v3625_v0 = vshll.u32 %v15108_v53, %v3619_v47  ;;  %v3628_v32 = vshll.u32 %v15109_v58, %v3619_v47  ;;  %v11040_v62 = vpop.permute.xlu1 %1350  ;;  %15149 = vst [vmem:[#allocation81_spill] sm:$0xff] %v11044_v12 }
 0x26e   : > { %v3629_v22 = vshrl.u32 %v15110_v43, %v3620_v59  ;;  %15148 = vst [vmem:[#allocation80_spill] sm:$0xff] %v11040_v62  ;;  %v3471_v48 = vshrl.u32 %v3453_v4, %v3469_v45  ;;  %v3474_v5 = vadd.s32 127, %v3473_v31  ;;  %v11042_v15 = vsub.s32 %v3353_v28, %v3356_v55  ;;  %1454 = vrot.lane.b32.xlu1 %v10892_v20, %s14659_s20 }
 0x26f   : > { %v3624_v2 = vor.u32 %v3623_v30, %v3622_v39  ;;  %v3627_v7 = vor.u32 %v3626_v34, %v3625_v0  ;;  %v3631_v8 = vshll.u32 %v15110_v43, %v3619_v47  ;;  %v3632_v10 = vshrl.u32 %v14787_v18, %v3620_v59  ;;  %1452 = vrot.lane.b32.xlu0 %v10905_v38, %s14659_s20  ;;  %v15151_v0 = vld [vmem:[#allocation55_spill] sm:$0xff] }
 0x270   : > { %v3630_v42 = vor.u32 %v3629_v22, %v3628_v32  ;;  %v3359_v41 = vsub.s32 0, %v11042_v15  ;;  %v3634_v62 = vshll.u32 %v14787_v18, %v3619_v47  ;;  %v3635_v4 = vshrl.u32 %v14790_v16, %v3620_v59  ;;  %v15150_v22 = vld [vmem:[#allocation49_spill] sm:$0xff]  ;;  %v11067_v39 = vpop.permute.xlu0 %496 }
 0x271   : > { %v3509_v28 = vor.u32 8388608, %v11017_v19  ;;  %vm2348_vm13 = vcmp.lt.s32.totalorder %v15128_v33, 2  ;;  %vm14654_vm10 = vcmp.lt.s32.totalorder %v15150_v22, 0  ;;  %v3470_v32 = vshll.u32 %v10926_v35, %v3468_v54  ;;  %v11062_v47 = vpop.permute.xlu1 %498  ;;  %15153 = vst [vmem:[#allocation83_spill] sm:$0xff] %v11067_v39 }
 0x272   : > { %v3621_v45 = vshrl.u32 %v14783_v29, %v3620_v59  ;;  %v3633_v31 = vor.u32 %v3632_v10, %v3631_v8  ;;  %vm3512_vm4 = vcmp.gt.s32.totalorder %v11019_v60, 0  ;;  %15152 = vst [vmem:[#allocation82_spill] sm:$0xff] %v11062_v47  ;;  %v6917_v19 = vmin.u32 %v3359_v41, %v11042_v15  ;;  %698 = vrot.lane.b32.xlu1 %v10910_v61, %s7975_s26 }
 0x273   : > { %v3636_v55 = vor.u32 %v3635_v4, %v3634_v62  ;;  %vm3637_vm6 = vcmp.lt.s32.totalorder %v11035_v56, 1  ;;  %vm3640_vm15 = vcmp.lt.s32.totalorder %v11035_v56, 4  ;;  %v11069_v30 = vor.u32 %v3471_v48, %v3470_v32  ;;  %696 = vrot.lane.b32.xlu0 %v10919_v3, %s7975_s26 }
 0x274   : > { %v3475_v34 = vshll.u32 %v3474_v5, 23  ;;  %v3642_v35 = vsel %vm3640_vm15, %v3630_v42, 2102212464  ;;  %v3645_v54 = vsel %vm3637_vm6, %v3624_v2, %v3627_v7  ;;  %v3361_v10 = vclz %v6917_v19  ;;  %v11081_v47 = vpop.permute.xlu0 %592 }
 0x275   : > { %vm3639_vm3 = vcmp.lt.s32.totalorder %v11035_v56, 3  ;;  %v3646_v59 = vsel %vm3640_vm15, %v3633_v31, 920167782  ;;  %v3649_v41 = vsel %vm3637_vm6, %v3627_v7, %v3630_v42  ;;  %vm3638_vm0 = vcmp.lt.s32.totalorder %v11035_v56, 2  ;;  %v11077_v4 = vpop.permute.xlu1 %594 }
 0x276   : > { %v3641_v62 = vsel %vm3637_vm6, %v3621_v45, %v3624_v2  ;;  %v3647_v8 = vsel %vm3639_vm3, %v3630_v42, %v3646_v59  ;;  %v3650_v48 = vsel %vm3640_vm15, %v3636_v55, 1326507024  ;;  %v6918_v5 = vadd.s32 4294967294, %v3361_v10  ;;  %790 = vrot.lane.b32.xlu1 %v10776_v6, %s14796_s27 }
 0x277   : > { %v3643_v32 = vsel %vm3639_vm3, %v3627_v7, %v3642_v35  ;;  %v3648_v39 = vsel %vm3638_vm0, %v3645_v54, %v3647_v8  ;;  %v3651_v19 = vsel %vm3639_vm3, %v3633_v31, %v3650_v48  ;;  %v3476_v12 = vor.u32 4788187, %v3475_v34  ;;  %788 = vrot.lane.b32.xlu0 %v10781_v52, %s14796_s27  ;;  %v15154_v34 = vld [vmem:[#allocation68_spill] sm:$0xff] }
 0x278   : > { %v3652_v21 = vsel %vm3638_vm0, %v3649_v41, %v3651_v19  ;;  %v11086_v44 = vmul.u32.u64.low %v11011_v49, %v3648_v39  ;;  %v11087_v24 = vmul.u32.u64.high %v11011_v49, %v3648_v39, %v11086_v44  ;;  %vm6919_vm15 = vcmp.lt.s32.totalorder %v6918_v5, 0  ;;  %v11125_v41 = vpop.permute.xlu0 %684 }
 0x279   : > { %v11093_v2 = vmul.u32.u64.low %v11011_v49, %v3652_v21  ;;  %v11094_v42 = vmul.u32.u64.high %v11011_v49, %v3652_v21, %v11093_v2  ;;  %v3513_v7 = vsel %vm3512_vm4, %v11019_v60, 0  ;;  %v3364_v45 = vsel %vm6919_vm15, 0, %v6918_v5  ;;  %v11103_v39 = vpop.permute.xlu1 %686 }
 0x27a   : > { %v3644_v31 = vsel %vm3638_vm0, %v3641_v62, %v3643_v32  ;;  %v3515_v55 = vand.u32 31, %v3513_v7  ;;  %v11109_v21 = vsel %vm2348_vm13, %v15154_v34, %v10972_v25  ;;  %v15156_v35 = vxor.u32 2147483648, %v10974_v50  ;;  %1458 = vrot.lane.b32.xlu1 %v11022_v13, %s14659_s20 }
 0x27b   : > { %15155 = vst [vmem:[#allocation68_spill] sm:$0xff] %v11109_v21  ;;  %v15157_v56 = vxor.u32 2147483648, %v10976_v11  ;;  %vm15158_vm3 = vcmp.lt.s32.totalorder %v15151_v0, 0  ;;  %v3365_v10 = vsub.s32 32, %v3364_v45  ;;  %v3369_v59 = vsub.s32 4294967266, %v3364_v45  ;;  %1456 = vrot.lane.b32.xlu0 %v11031_v9, %s14659_s20 }
 0x27c   : > { %v11116_v60 = vsel %vm14654_vm10, %v15156_v35, %v10974_v50  ;;  %v3349_v33 = vadd.s32 %v10931_v40, %v10940_v63  ;;  %v3663_v25 = vadd.s32 1, %v11087_v24  ;;  %v3516_v62 = vsub.s32 32, %v3515_v55  ;;  %v11147_v2 = vpop.permute.xlu0 %1352 }
 0x27d   : > { %v11123_v54 = vsel %vm15158_vm3, %v15157_v56, %v10976_v11  ;;  %v11130_v8 = vshll.u32 %v3509_v28, 8  ;;  %v3477_v50 = vand.u32 2147483647, %v3476_v12  ;;  %v3479_v48 = vcvt.s32.f32 %v11069_v30  ;;  %v11142_v28 = vpop.permute.xlu1 %1354 }
 0x27e   : > { %v3370_v11 = vadd.s32 127, %v3369_v59  ;;  %v3660_v5 = vmul.u32 %v11011_v49, %v3644_v31  ;;  %v3367_v32 = vshrl.u32 %v3349_v33, %v3365_v10  ;;  %vm3662_vm13 = vc.u32 %v11094_v42, %v11086_v44  ;;  %1550 = vrot.lane.b32.xlu1 %v10892_v20, %s14799_s28 }
 0x27f   : > { %v3518_v40 = vshll.u32 %v14783_v29, %v3515_v55  ;;  %v3519_v63 = vshrl.u32 %v15108_v53, %v3516_v62  ;;  %v3664_v12 = vsel %vm3662_vm13, %v3663_v25, %v11087_v24  ;;  %v3521_v30 = vshll.u32 %v15108_v53, %v3515_v55  ;;  %1548 = vrot.lane.b32.xlu0 %v10905_v38, %s14799_s28 }
 0x280   : > { %v3371_v19 = vshll.u32 %v3370_v11, 23  ;;  %v3522_v49 = vshrl.u32 %v15109_v58, %v3516_v62  ;;  %v3665_v31 = vadd.s32 %v3664_v12, %v3660_v5  ;;  %v11149_v34 = vshrl.u32 %v3513_v7, 5 }
 0x281   : > { %v3524_v35 = vshll.u32 %v15109_v58, %v3515_v55  ;;  %v3525_v56 = vshrl.u32 %v15110_v43, %v3516_v62  ;;  %v15159_v10 = vand.u32 2147483647, %v15150_v22  ;;  %v15160_v24 = vmov 0  ;;  %v11166_v21 = vpop.permute.xlu1 %1446 }
 0x282   : > { %v3366_v59 = vshll.u32 %v11042_v15, %v3364_v45  ;;  %v3372_v33 = vor.u32 4788187, %v3371_v19  ;;  %v3520_v25 = vor.u32 %v3519_v63, %v3518_v40  ;;  %v3523_v11 = vor.u32 %v3522_v49, %v3521_v30  ;;  %v11176_v63 = vpop.permute.xlu0 %1444  ;;  %794 = vrot.lane.b32.xlu1 %v10910_v61, %s14796_s27 }
 0x283   : > { %vm11157_vm0 = vcmp.le.f32.partialorder %v15159_v10, 0.7853982  ;;  %v3666_v7 = vadd.s32 536870912, %v3665_v31  ;;  %v3526_v5 = vor.u32 %v3525_v56, %v3524_v35  ;;  %v3527_v12 = vshll.u32 %v15110_v43, %v3515_v55  ;;  %792 = vrot.lane.b32.xlu0 %v10919_v3, %s14796_s27 }
 0x284   : > { %v15161_v24 = vsel %vm11157_vm0, 4294967295, %v15160_v24  ;;  %v3528_v20 = vshrl.u32 %v14787_v18, %v3516_v62  ;;  %v15163_v10 = vand.u32 2147483647, %v15151_v0  ;;  %v15164_v58 = vmov 0 }
 0x285   : > { %15162 = vst [vmem:[#allocation84_spill] sm:$0xff] %v15161_v24  ;;  %v3480_v15 = vmul.f32 %v3479_v48, %v3477_v50  ;;  %v3368_v45 = vor.u32 %v3367_v32, %v3366_v59  ;;  %v3530_v40 = vshll.u32 %v14787_v18, %v3515_v55  ;;  %v3531_v38 = vshrl.u32 %v14790_v16, %v3516_v62 }
 0x286   : > { %vm11170_vm4 = vcmp.le.f32.partialorder %v15163_v10, 0.7853982  ;;  %v3373_v19 = vand.u32 2147483647, %v3372_v33  ;;  %v11178_v30 = vshrl.u32 %v3666_v7, 30  ;;  %v3517_v49 = vshrl.u32 %v14783_v29, %v3516_v62  ;;  %v11189_v62 = vpop.permute.xlu1 %690  ;;  %886 = vrot.lane.b32.xlu1 %v10776_v6, %s14800_s21 }
 0x287   : > { %v15165_v58 = vsel %vm11170_vm4, 4294967295, %v15164_v58  ;;  %v3529_v35 = vor.u32 %v3528_v20, %v3527_v12  ;;  %v3532_v56 = vor.u32 %v3531_v38, %v3530_v40  ;;  %vm3533_vm6 = vcmp.lt.s32.totalorder %v11149_v34, 1  ;;  %v11194_v12 = vpop.permute.xlu0 %688  ;;  %884 = vrot.lane.b32.xlu0 %v10781_v52, %s14800_s21 }
 0x288   : > { %15166 = vst [vmem:[#allocation85_spill] sm:$0xff] %v15165_v58  ;;  %15167 = vst [vmem:[#allocation86_spill] sm:$0xff] %v11178_v30  ;;  %vm3535_vm15 = vcmp.lt.s32.totalorder %v11149_v34, 3  ;;  %vm3536_vm3 = vcmp.lt.s32.totalorder %v11149_v34, 4  ;;  %v3668_v55 = vshll.u32 %v11178_v30, 30  ;;  %v3541_v48 = vsel %vm3533_vm6, %v3520_v25, %v3523_v11 }
 0x289   : > { %v3538_v50 = vsel %vm3536_vm3, %v3526_v5, 2102212464  ;;  %v3542_v32 = vsel %vm3536_vm3, %v3529_v35, 920167782  ;;  %v3375_v59 = vcvt.s32.f32 %v3368_v45  ;;  %vm3534_vm13 = vcmp.lt.s32.totalorder %v11149_v34, 2 }
 0x28a   : > { %v3543_v33 = vsel %vm3535_vm15, %v3526_v5, %v3542_v32  ;;  %v3545_v7 = vsel %vm3533_vm6, %v3523_v11, %v3526_v5  ;;  %v11196_v20 = vsub.s32 %v3665_v31, %v3668_v55  ;;  %v3537_v10 = vsel %vm3533_vm6, %v3517_v49, %v3520_v25  ;;  %1554 = vrot.lane.b32.xlu1 %v11022_v13, %s14799_s28 }
 0x28b   : > { %v3544_v40 = vsel %vm3534_vm13, %v3541_v48, %v3543_v33  ;;  %v3546_v38 = vsel %vm3536_vm3, %v3532_v56, 1326507024  ;;  %v3539_v45 = vsel %vm3535_vm15, %v3523_v11, %v3538_v50  ;;  %v3277_v31 = vsel %vm11157_vm0, %v15150_v22, %v11116_v60  ;;  %v11227_v48 = vpop.permute.xlu0 %780  ;;  %1552 = vrot.lane.b32.xlu0 %v11031_v9, %s14799_s28 }
 0x28c   : > { %v3547_v30 = vsel %vm3535_vm15, %v3529_v35, %v3546_v38  ;;  %v11207_v5 = vmul.u32.u64.low %v11130_v8, %v3544_v40  ;;  %v11208_v32 = vmul.u32.u64.high %v11130_v8, %v3544_v40, %v11207_v5  ;;  %v3376_v25 = vmul.f32 %v3375_v59, %v3373_v19  ;;  %v11220_v35 = vpop.permute.xlu1 %782 }
 0x28d   : > { %v3671_v49 = vsub.s32 0, %v11196_v20  ;;  %v3548_v11 = vsel %vm3534_vm13, %v3545_v7, %v3547_v30  ;;  %vm14656_vm6 = vcmp.lt.s32.totalorder %v10612_v46, 0  ;;  %v3481_v56 = vxor.u32 2147483648, %v3480_v15 }
 0x28e   : > { %v11224_v55 = vmul.u32.u64.low %v11130_v8, %v3548_v11  ;;  %v11225_v50 = vmul.u32.u64.high %v11130_v8, %v3548_v11, %v11224_v55  ;;  %v3173_v60 = vsel %vm11170_vm4, %v15151_v0, %v11123_v54  ;;  %v3540_v30 = vsel %vm3534_vm13, %v3537_v10, %v3539_v45  ;;  %890 = vrot.lane.b32.xlu1 %v10910_v61, %s14800_s21 }
 0x28f   : > { %v6929_v19 = vmin.u32 %v3671_v49, %v11196_v20  ;;  %7606 = vcosq.f32 %v3277_v31  ;;  %v15168_v59 = vand.u32 2147483647, %v10612_v46  ;;  %v15169_v33 = vmov 0  ;;  %v11264_v11 = vpop.permute.xlu0 %1448  ;;  %888 = vrot.lane.b32.xlu0 %v10919_v3, %s14800_s21  ;;  %v15183_v55 = vld [vmem:[#allocation53_spill] sm:$0xff] }
 0x290   : > { %v15172_v7 = vand.u32 2147483647, %v10615_v27  ;;  %v15173_v54 = vmov 0  ;;  %v3559_v40 = vadd.s32 1, %v11208_v32  ;;  %7608 = vsinq.f32 %v3277_v31  ;;  %v11257_v38 = vpop.permute.xlu1 %1450 }
 0x291   : > { %vm11241_vm3 = vcmp.le.f32.partialorder %v15168_v59, 0.7853982  ;;  %v3377_v13 = vxor.u32 2147483648, %v3376_v25  ;;  %vm15176_vm13 = vcmask 195584   ;;  %v3673_v10 = vclz %v6929_v19 }
 0x292   : > { %v15170_v33 = vsel %vm11241_vm3, 4294967295, %v15169_v33  ;;  %vm11247_vm10 = vcmp.le.f32.partialorder %v15172_v7, 0.7853982  ;;  %v1721_v34 = vsel %vm15176_vm13, %v10819_v23, %v10633_v36  ;;  %7610 = vcosq.f32 %v3173_v60  ;;  %vm15177_vm5 = vmmov %vm15176_vm13  ;;  %v15187_v7 = vld [vmem:[#allocation42_spill] sm:$0xff]  ;;  %982 = vrot.lane.b32.xlu1 %v10776_v6, %s7978_s29 }
 0x293   : > { %15171 = vst [vmem:[#allocation87_spill] sm:$0xff] %v15170_v33  ;;  %v15174_v54 = vsel %vm11247_vm10, 4294967295, %v15173_v54  ;;  %v3482_v45 = vsel %vm14656_vm6, %v3481_v56, %v3480_v15  ;;  %v3556_v49 = vmul.u32 %v11130_v8, %v3540_v30  ;;  %vm3558_vm15 = vc.u32 %v11225_v50, %v11207_v5  ;;  %vm15178_vm13 = vmmov %vm15177_vm5  ;;  %v1541_v30 = vpop.permute.xlu0 %1540  ;;  %980 = vrot.lane.b32.xlu0 %v10781_v52, %s7978_s29 }
 0x294   : > { %15175 = vst [vmem:[#allocation88_spill] sm:$0xff] %v15174_v54  ;;  %7612 = vsinq.f32 %v3173_v60  ;;  %v1720_v9 = vsel %vm15177_vm5, %v10824_v1, %v10640_v26  ;;  %v6930_v36 = vadd.s32 4294967294, %v3673_v10  ;;  %v3560_v23 = vsel %vm3558_vm15, %v3559_v40, %v11208_v32  ;;  %v15185_v60 = vld [vmem:[#allocation57_spill] sm:$0xff]  ;;  %v15188_v40 = vld [vmem:[#allocation76_spill] sm:$0xff]  ;;  %v15228_v54 = vld [vmem:[#allocation74_spill] sm:$0xff] }
 0x295   : > { %v3561_v31 = vadd.s32 %v3560_v23, %v3556_v49  ;;  %v1723_v8 = vsel %vm15178_vm13, %v10994_v51, %v10701_v17  ;;  %vm15179_vm6 = vcmask 244736   ;;  %v3485_v26 = vsel %vm11241_vm3, %v10612_v46, %v3482_v45  ;;  %v1543_v51 = vpop.permute.xlu1 %1542  ;;  %v15194_v49 = vld [vmem:[#allocation48_spill] sm:$0xff]  ;;  %v15227_v46 = vld [vmem:[#allocation43_spill] sm:$0xff] }
 0x296   : > { %v1754_v15 = vsel %vm15179_vm6, %v1721_v34, %v10739_v14  ;;  %vm15180_vm12 = vmmov %vm15179_vm6  ;;  %vm15181_vm5 = vcmp.lt.s32.totalorder %v10615_v27, 0  ;;  %vm6931_vm15 = vcmp.lt.s32.totalorder %v6930_v36, 0  ;;  %vm15182_vm0 = vcmask 293888   ;;  %v15191_v34 = vld [vmem:[#allocation62_spill] sm:$0xff]  ;;  %986 = vrot.lane.b32.xlu1 %v10910_v61, %s7978_s29 }
 0x297   : > { %v1753_v56 = vsel %vm15180_vm12, %v1720_v9, %v10746_v57  ;;  %v3378_v1 = vsel %vm15181_vm5, %v3377_v13, %v3376_v25  ;;  %v1787_v17 = vsel %vm15182_vm0, %v1754_v15, %v10778_v37  ;;  %v11288_v32 = vsel %vm6931_vm15, 0, %v6930_v36  ;;  %vm15184_vm12 = vmmov %vm15182_vm0  ;;  %v15189_v13 = vld [vmem:[#allocation61_spill] sm:$0xff]  ;;  %v15198_v15 = vld [vmem:[#allocation80_spill] sm:$0xff]  ;;  %984 = vrot.lane.b32.xlu0 %v10919_v3, %s7978_s29 }
 0x298   : > { %v3562_v14 = vadd.s32 536870912, %v3561_v31  ;;  %v1786_v57 = vsel %vm15184_vm12, %v1753_v56, %v15183_v55  ;;  %vm15186_vm6 = vcmask 343040   ;;  %v3681_v59 = vsub.s32 4294967266, %v11288_v32  ;;  %v15196_v36 = vld [vmem:[#allocation73_spill] sm:$0xff] }
 0x299   : > { %v1820_v19 = vsel %vm15186_vm6, %v1787_v17, %v15185_v60  ;;  %v1722_v25 = vsel %vm15178_vm13, %v15188_v40, %v15187_v7  ;;  %vm15190_vm5 = vmmov %vm15186_vm6  ;;  %vm15192_vm0 = vcmask 392192   ;;  %vm15195_vm15 = vcmask 244736   ;;  %v15200_v55 = vld [vmem:[#allocation81_spill] sm:$0xff]  ;;  %v11323_v60 = vpop.eup %7606 }
 0x29a   : > { %v1819_v37 = vsel %vm15190_vm5, %v1786_v57, %v15189_v13  ;;  %v1853_v10 = vsel %vm15192_vm0, %v1820_v19, %v15191_v34  ;;  %v11304_v45 = vshrl.u32 %v3562_v14, 30  ;;  %v1756_v9 = vsel %vm15195_vm15, %v1723_v8, %v15194_v49  ;;  %vm15197_vm12 = vmmov %vm15192_vm0  ;;  %v11321_v57 = vpop.permute.xlu1 %786  ;;  %15203 = vst [vmem:[#allocation57_spill] sm:$0xff] %v11323_v60  ;;  %v15207_v34 = vld [vmem:[#allocation47_spill] sm:$0xff]  ;;  %1078 = vrot.lane.b32.xlu1 %v10776_v6, %s15087_s11 }
 0x29b   : > { %v1852_v23 = vsel %vm15197_vm12, %v1819_v37, %v15196_v36  ;;  %vm15199_vm6 = vcmask 441344   ;;  %7614 = vcosq.f32 %v3485_v26  ;;  %v3381_v17 = vsel %vm11247_vm10, %v10615_v27, %v3378_v1  ;;  %v11329_v37 = vpop.permute.xlu0 %784  ;;  %v11331_v1 = vpop.eup %7608  ;;  %1076 = vrot.lane.b32.xlu0 %v10781_v52, %s15087_s11 }
 0x29c   : > { %15193 = vst [vmem:[#allocation53_spill] sm:$0xff] %v11304_v45  ;;  %v1886_v56 = vsel %vm15199_vm6, %v1853_v10, %v15198_v15  ;;  %vm15201_vm13 = vmmov %vm15199_vm6  ;;  %vm15202_vm5 = vcmask 490496   ;;  %v3682_v19 = vadd.s32 127, %v3681_v59  ;;  %v3564_v7 = vshll.u32 %v11304_v45, 30  ;;  %v11338_v10 = vld [vmem:[%s14470_s1] ss:$0 sm:$0xff] }
 0x29d   : > { %v1885_v14 = vsel %vm15201_vm13, %v1852_v23, %v15200_v55  ;;  %v1919_v8 = vsel %vm15202_vm5, %v1886_v56, %v11166_v21  ;;  %vm15204_vm0 = vmmov %vm15202_vm5  ;;  %vm15205_vm15 = vcmask 539648   ;;  %15206 = vst [vmem:[#allocation42_spill] sm:$0xff] %v11331_v1  ;;  %7616 = vsinq.f32 %v3485_v26  ;;  %v15212_v23 = vld [vmem:[#allocation54_spill] sm:$0xff]  ;;  %v11361_v56 = vld [vmem:[%s14471_s2] ss:$0 sm:$0xff] }
 0x29e   : > { %v1918_v40 = vsel %vm15204_vm0, %v1885_v14, %v11176_v63  ;;  %v1952_v13 = vsel %vm15205_vm15, %v1919_v8, %v1543_v51  ;;  %vm15208_vm12 = vcmask 244736   ;;  %vm15209_vm6 = vmmov %vm15205_vm15  ;;  %v11344_v63 = vpop.eup %7610  ;;  %7618 = vcosq.f32 %v3381_v17  ;;  %15214 = vst [vmem:[#allocation62_spill] sm:$0xff] %v11361_v56  ;;  %v11366_v55 = vpop.permute.xlu1 %878  ;;  %1082 = vrot.lane.b32.xlu1 %v10910_v61, %s15087_s11 }
 0x29f   : > { %v1755_v21 = vsel %vm15208_vm12, %v1722_v25, %v15207_v34  ;;  %v1991_v59 = vmul.f32 %v11338_v10, %v1952_v13  ;;  %v1951_v49 = vsel %vm15209_vm6, %v1918_v40, %v1541_v30  ;;  %15210 = vst [vmem:[#allocation76_spill] sm:$0xff] %v11344_v63  ;;  %v3677_v26 = vsub.s32 32, %v11288_v32  ;;  %v11352_v36 = vpop.eup %7612  ;;  %v15221_v13 = vld [vmem:[#allocation69_spill] sm:$0xff]  ;;  %1080 = vrot.lane.b32.xlu0 %v10919_v3, %s15087_s11 }
 0x2a0   : > { %v11347_v51 = vsub.s32 %v3561_v31, %v3564_v7  ;;  %v1990_v25 = vmul.f32 %v11338_v10, %v1951_v49  ;;  %15211 = vst [vmem:[#allocation61_spill] sm:$0xff] %v11352_v36  ;;  %7620 = vsinq.f32 %v3381_v17  ;;  %v3661_v30 = vadd.s32 %v11086_v44, %v11094_v42  ;;  %v15216_v17 = vld [vmem:[#allocation58_spill] sm:$0xff]  ;;  %v11374_v42 = vpop.permute.xlu0 %876 }
 0x2a1   : > { %vm15213_vm13 = vcmask 293888   ;;  %v11364_v31 = vadd.f32 %v11361_v56, %v1991_v59  ;;  %v3683_v14 = vshll.u32 %v3682_v19, 23  ;;  %vm15220_vm0 = vcmask 343040  }
 0x2a2   : > { %v1789_v15 = vsel %vm15213_vm13, %v1756_v9, %v15212_v23  ;;  %v3567_v8 = vsub.s32 0, %v11347_v51  ;;  %vm15217_vm5 = vmmov %vm15213_vm13  ;;  %v11372_v44 = vadd.f32 %v11361_v56, %v1990_v25  ;;  %v15219_v9 = vld [vmem:[#allocation64_spill] sm:$0xff]  ;;  %v3679_v49 = vshrl.u32 %v3661_v30, %v3677_v26  ;;  %v15223_v25 = vld [vmem:[#allocation77_spill] sm:$0xff]  ;;  %v1547_v30 = vpop.permute.xlu1 %1546  ;;  %1174 = vrot.lane.b32.xlu1 %v10776_v6, %s14968_s14 }
 0x2a3   : > { %15215 = vst [vmem:[#allocation48_spill] sm:$0xff] %v11364_v31  ;;  %v1788_v7 = vsel %vm15217_vm5, %v1755_v21, %v15216_v17  ;;  %v1822_v40 = vsel %vm15220_vm0, %v1789_v15, %v15219_v9  ;;  %vm15222_vm15 = vmmov %vm15220_vm0  ;;  %v3816_v19 = vand.u32 2139095040, %v11364_v31  ;;  %vm15224_vm12 = vcmask 392192   ;;  %1172 = vrot.lane.b32.xlu0 %v10781_v52, %s14968_s14 }
 0x2a4   : > { %15218 = vst [vmem:[#allocation73_spill] sm:$0xff] %v11372_v44  ;;  %v1821_v34 = vsel %vm15222_vm15, %v1788_v7, %v15221_v13  ;;  %v6925_v21 = vmin.u32 %v3567_v8, %v11347_v51  ;;  %v1855_v23 = vsel %vm15224_vm12, %v1822_v40, %v15223_v25  ;;  %v3712_v17 = vand.u32 2139095040, %v11372_v44  ;;  %v11397_v59 = vpop.permute.xlu0 %1544 }
 0x2a5   : > { %v3678_v15 = vshll.u32 %v11196_v20, %v11288_v32  ;;  %v3557_v7 = vadd.s32 %v11207_v5, %v11225_v50  ;;  %vm15225_vm6 = vcmask 441344   ;;  %v3817_v26 = vshrl.u32 %v3816_v19, 23  ;;  %v11399_v33 = vpop.eup %7614 }
 0x2a6   : > { %v1888_v9 = vsel %vm15225_vm6, %v1855_v23, %v11142_v28  ;;  %v3684_v8 = vor.u32 4788187, %v3683_v14  ;;  %v3569_v13 = vclz %v6925_v21  ;;  %v3713_v25 = vshrl.u32 %v3712_v17, 23  ;;  %15226 = vst [vmem:[#allocation80_spill] sm:$0xff] %v11399_v33  ;;  %1178 = vrot.lane.b32.xlu1 %v10910_v61, %s14968_s14 }
 0x2a7   : > { %vm15229_vm13 = vcmask 48128   ;;  %vm15230_vm5 = vcmask 490496   ;;  %v6936_v50 = vadd.s32 4294967169, %v3817_v26  ;;  %v15231_v28 = vand.u32 2147483647, %v11364_v31  ;;  %v11413_v17 = vpop.eup %7616  ;;  %1176 = vrot.lane.b32.xlu0 %v10919_v3, %s14968_s14 }
 0x2a8   : > { %v1626_v20 = vsel %vm15229_vm13, %v15228_v54, %v15227_v46  ;;  %v1921_v5 = vsel %vm15230_vm5, %v1888_v9, %v11257_v38  ;;  %v3680_v14 = vor.u32 %v3679_v49, %v3678_v15  ;;  %v6926_v19 = vadd.s32 4294967294, %v3569_v13  ;;  %15233 = vst [vmem:[#allocation81_spill] sm:$0xff] %v11413_v17  ;;  %v15234_v46 = vld [vmem:[#allocation4_spill] sm:$0xff]  ;;  %v15235_v54 = vld [vmem:[#allocation75_spill] sm:$0xff]  ;;  %vm15236_vm15 = vmmov %vm15229_vm13  ;;  %v11421_v49 = vpop.permute.xlu1 %882  ;;  %v11423_v15 = vpop.eup %7618 }
 0x2a9   : > { %v3820_v32 = vand.u32 8388607, %v15231_v28  ;;  %v6932_v21 = vadd.s32 4294967169, %v3713_v25  ;;  %vm15232_vm0 = vcmask 539648   ;;  %v1625_v38 = vsel %vm15236_vm15, %v15235_v54, %v15234_v46  ;;  %v15237_v9 = vld [vmem:[#allocation79_spill] sm:$0xff]  ;;  %15238 = vst [vmem:[#allocation47_spill] sm:$0xff] %v11423_v15  ;;  %v11429_v33 = vpop.permute.xlu0 %880  ;;  %vm15243_vm5 = vmmov %vm15236_vm15 }
 0x2aa   : > { %v1954_v23 = vsel %vm15232_vm0, %v1921_v5, %v1547_v30  ;;  %v1854_v26 = vsel %vm15224_vm12, %v1821_v34, %v15237_v9  ;;  %v3823_v28 = vadd.s32 1, %v6936_v50  ;;  %v3685_v30 = vand.u32 2147483647, %v3684_v8  ;;  %v11431_v46 = vpop.eup %7620  ;;  %vm15245_vm0 = vmmov %vm15243_vm5  ;;  %1270 = vrot.lane.b32.xlu1 %v10776_v6, %s7981_s15 }
 0x2ab   : > { %v1993_v40 = vmul.f32 %v11338_v10, %v1954_v23  ;;  %vm6927_vm6 = vcmp.lt.s32.totalorder %v6926_v19, 0  ;;  %v15239_v13 = vand.u32 2147483647, %v11372_v44  ;;  %v3719_v5 = vadd.s32 1, %v6932_v21  ;;  %15240 = vst [vmem:[#allocation54_spill] sm:$0xff] %v11431_v46  ;;  %1268 = vrot.lane.b32.xlu0 %v10781_v52, %s7981_s15 }
 0x2ac   : > { %v3572_v54 = vsel %vm6927_vm6, 0, %v6926_v19  ;;  %v3821_v34 = vor.u32 8388608, %v3820_v32  ;;  %vm3824_vm13 = vcmp.gt.s32.totalorder %v3823_v28, 0  ;;  %v3687_v8 = vcvt.s32.f32 %v3680_v14  ;;  %v15244_v32 = vld [vmem:[#allocation83_spill] sm:$0xff]  ;;  %v11458_v15 = vpop.permute.xlu1 %974 }
 0x2ad   : > { %v11427_v25 = vand.u32 8388607, %v15239_v13  ;;  %v11434_v50 = vadd.f32 %v11361_v56, %v1993_v40  ;;  %v3573_v23 = vsub.s32 32, %v3572_v54  ;;  %v3577_v9 = vsub.s32 4294967266, %v3572_v54  ;;  %v15242_v13 = vld [vmem:[#allocation82_spill] sm:$0xff] }
 0x2ae   : > { %v11441_v21 = vsel %vm15243_vm5, %v15242_v13, %v11077_v4  ;;  %v11448_v19 = vsel %vm15245_vm0, %v15244_v32, %v11081_v47  ;;  %vm15246_vm15 = vcmask 97280   ;;  %v3825_v17 = vsel %vm3824_vm13, %v3823_v28, 0  ;;  %v11466_v47 = vpop.permute.xlu0 %972 }
 0x2af   : > { %15241 = vst [vmem:[#allocation58_spill] sm:$0xff] %v11434_v50  ;;  %v11452_v40 = vsel %vm15246_vm15, %v1626_v20, %v11103_v39  ;;  %vm15247_vm12 = vmmov %vm15246_vm15  ;;  %v11460_v4 = vmul.f32 %v3687_v8, %v3685_v30  ;;  %vm15248_vm6 = vcmask 441344   ;;  %v3827_v46 = vand.u32 31, %v3825_v17 }
 0x2b0   : > { %v11456_v14 = vsel %vm15247_vm12, %v1625_v38, %v11125_v41  ;;  %v11464_v13 = vsel %vm15248_vm6, %v1854_v26, %v11147_v2  ;;  %vm3720_vm5 = vcmp.gt.s32.totalorder %v3719_v5, 0  ;;  %v3574_v39 = vshll.u32 %v11347_v51, %v3572_v54  ;;  %v11480_v32 = vpop.permute.xlu1 %978 }
 0x2b1   : > { %v11469_v20 = vshll.u32 %v3821_v34, 8  ;;  %v3575_v28 = vshrl.u32 %v3557_v7, %v3573_v23  ;;  %v3578_v30 = vadd.s32 127, %v3577_v9  ;;  %v3826_v8 = vshrl.u32 %v3825_v17, 5  ;;  %15249 = vst [vmem:[#allocation64_spill] sm:$0xff] %v11480_v32 }
 0x2b2   : > { %v3828_v2 = vsub.s32 32, %v3827_v46  ;;  %v3830_v26 = vshll.u32 %v14783_v29, %v3827_v46  ;;  %v3833_v51 = vshll.u32 %v15108_v53, %v3827_v46  ;;  %v3721_v54 = vsel %vm3720_vm5, %v3719_v5, 0  ;;  %v11486_v9 = vpop.permute.xlu0 %976 }
 0x2b3   : > { %v15250_v41 = vmov 2131351028   ;;  %v3839_v17 = vshll.u32 %v15110_v43, %v3827_v46  ;;  %v3842_v23 = vshll.u32 %v14787_v18, %v3827_v46  ;;  %15251 = vst [vmem:[#allocation69_spill] sm:$0xff] %v11486_v9  ;;  %v3579_v60 = vshll.u32 %v3578_v30, 23  ;;  %v11503_v9 = vld [vmem:[%s8079_s23 + $0xe0] sm:$0xff] }
 0x2b4   : > { %v3831_v38 = vshrl.u32 %v15108_v53, %v3828_v2  ;;  %v3836_v7 = vshll.u32 %v15250_v41, %v3827_v46  ;;  %v3834_v27 = vshrl.u32 %v15250_v41, %v3828_v2  ;;  %v3837_v5 = vshrl.u32 %v15110_v43, %v3828_v2  ;;  %v11498_v46 = vld [vmem:[%s8079_s23 + $0xe8] sm:$0xff]  ;;  %v11500_v0 = vpop.permute.xlu1 %1070  ;;  %508 = vrot.lane.b32.xlu0 %v11503_v9, %s7974_s25 }
 0x2b5   : > { %v3840_v34 = vshrl.u32 %v14787_v18, %v3828_v2  ;;  %v3843_v45 = vshrl.u32 %v14790_v16, %v3828_v2  ;;  %v3829_v1 = vshrl.u32 %v14783_v29, %v3828_v2  ;;  %vm3845_vm13 = vcmp.lt.s32.totalorder %v3826_v8, 1  ;;  %510 = vrot.lane.b32.xlu1 %v11498_v46, %s7974_s25 }
 0x2b6   : > { %v3832_v24 = vor.u32 %v3831_v38, %v3830_v26  ;;  %v3835_v63 = vor.u32 %v3834_v27, %v3833_v51  ;;  %v3838_v36 = vor.u32 %v3837_v5, %v3836_v7  ;;  %v11505_v32 = vor.u32 %v3575_v28, %v3574_v39  ;;  %v11508_v38 = vpop.permute.xlu0 %1068 }
 0x2b7   : > { %v3841_v22 = vor.u32 %v3840_v34, %v3839_v17  ;;  %v3844_v58 = vor.u32 %v3843_v45, %v3842_v23  ;;  %vm3847_vm0 = vcmp.lt.s32.totalorder %v3826_v8, 3  ;;  %vm3848_vm15 = vcmp.lt.s32.totalorder %v3826_v8, 4  ;;  %15252 = vst [vmem:[#allocation77_spill] sm:$0xff] %v11508_v38 }
 0x2b8   : > { %v3849_v6 = vsel %vm3845_vm13, %v3829_v1, %v3832_v24  ;;  %v3850_v30 = vsel %vm3848_vm15, %v3838_v36, 2102212464  ;;  %v3853_v52 = vsel %vm3845_vm13, %v3832_v24, %v3835_v63  ;;  %v3857_v27 = vsel %vm3845_vm13, %v3835_v63, %v3838_v36  ;;  %v11523_v34 = vpop.permute.xlu1 %1074  ;;  %604 = vrot.lane.b32.xlu0 %v11503_v9, %s7973_s24 }
 0x2b9   : > { %v3854_v2 = vsel %vm3848_vm15, %v3841_v22, 920167782  ;;  %vm3846_vm12 = vcmp.lt.s32.totalorder %v3826_v8, 2  ;;  %v3851_v45 = vsel %vm3847_vm0, %v3835_v63, %v3850_v30  ;;  %v3858_v28 = vsel %vm3848_vm15, %v3844_v58, 1326507024  ;;  %15253 = vst [vmem:[#allocation43_spill] sm:$0xff] %v11523_v34  ;;  %606 = vrot.lane.b32.xlu1 %v11498_v46, %s7973_s24 }
 0x2ba   : > { %v3855_v39 = vsel %vm3847_vm0, %v3838_v36, %v3854_v2  ;;  %v11518_v1 = vor.u32 4788187, %v3579_v60  ;;  %v3859_v24 = vsel %vm3847_vm0, %v3841_v22, %v3858_v28  ;;  %v11521_v51 = vshrl.u32 %v3721_v54, 5  ;;  %v11530_v58 = vpop.permute.xlu0 %1072 }
 0x2bb   : > { %v3856_v26 = vsel %vm3846_vm12, %v3853_v52, %v3855_v39  ;;  %v3852_v7 = vsel %vm3846_vm12, %v3849_v6, %v3851_v45  ;;  %v3860_v17 = vsel %vm3846_vm12, %v3857_v27, %v3859_v24  ;;  %15254 = vst [vmem:[#allocation74_spill] sm:$0xff] %v11530_v58  ;;  %vm15255_vm6 = vcmask 97280  }
 0x2bc   : > { %v11526_v23 = vmul.u32.u64.low %v11469_v20, %v3856_v26  ;;  %v11527_v63 = vmul.u32.u64.high %v11469_v20, %v3856_v26, %v11526_v23  ;;  %v11535_v60 = vsel %vm15255_vm6, %v11441_v21, %v11189_v62  ;;  %vm15256_vm5 = vmmov %vm15255_vm6  ;;  %v3723_v6 = vand.u32 31, %v3721_v54  ;;  %v11563_v54 = vpop.permute.xlu1 %1166  ;;  %1272 = vrot.lane.b32.xlu0 %v10919_v3, %s7981_s15 }
 0x2bd   : > { %v11540_v22 = vsel %vm15256_vm5, %v11448_v19, %v11194_v12  ;;  %v11543_v36 = vmul.u32.u64.low %v11469_v20, %v3860_v17  ;;  %v11544_v8 = vmul.u32.u64.high %v11469_v20, %v3860_v17, %v11543_v36  ;;  %v15257_v30 = vor.u32 8388608, %v11427_v25  ;;  %15259 = vst [vmem:[#allocation4_spill] sm:$0xff] %v11563_v54  ;;  %1274 = vrot.lane.b32.xlu1 %v10910_v61, %s7981_s15 }
 0x2be   : > { %v15258_v62 = vand.u32 2147483647, %v11434_v50  ;;  %v3581_v12 = vand.u32 2147483647, %v11518_v1  ;;  %v3583_v19 = vcvt.s32.f32 %v11505_v32  ;;  %v3868_v2 = vmul.u32 %v11469_v20, %v3852_v7  ;;  %v11570_v28 = vpop.permute.xlu0 %1164 }
 0x2bf   : > { %v11551_v52 = vshll.u32 %v15257_v30, 8  ;;  %vm3741_vm13 = vcmp.lt.s32.totalorder %v11521_v51, 1  ;;  %v3871_v25 = vadd.s32 1, %v11527_v63  ;;  %v3724_v27 = vsub.s32 32, %v3723_v6  ;;  %15261 = vst [vmem:[#allocation75_spill] sm:$0xff] %v11570_v28 }
 0x2c0   : > { %v11555_v21 = vand.u32 8388607, %v15258_v62  ;;  %vm3742_vm0 = vcmp.lt.s32.totalorder %v11521_v51, 2  ;;  %vm3743_vm15 = vcmp.lt.s32.totalorder %v11521_v51, 3  ;;  %v15260_v45 = vand.u32 2139095040, %v11434_v50  ;;  %v11588_v61 = vpop.permute.xlu1 %1170 }
 0x2c1   : > { %vm3870_vm12 = vc.u32 %v11544_v8, %v11526_v23  ;;  %v3726_v20 = vshll.u32 %v14783_v29, %v3723_v6  ;;  %v3729_v32 = vshll.u32 %v15108_v53, %v3723_v6  ;;  %v3732_v1 = vshll.u32 %v15250_v41, %v3723_v6  ;;  %15262 = vst [vmem:[#allocation79_spill] sm:$0xff] %v11588_v61 }
 0x2c2   : > { %v4025_v39 = vshrl.u32 %v15260_v45, 23  ;;  %v3872_v26 = vsel %vm3870_vm12, %v3871_v25, %v11527_v63  ;;  %v3727_v24 = vshrl.u32 %v15108_v53, %v3724_v27  ;;  %v3730_v7 = vshrl.u32 %v15250_v41, %v3724_v27  ;;  %v15263_v63 = vld [vmem:[#allocation56_spill] sm:$0xff]  ;;  %v11592_v3 = vpop.permute.xlu0 %1168 }
 0x2c3   : > { %v3735_v17 = vshll.u32 %v15110_v43, %v3723_v6  ;;  %v3873_v36 = vadd.s32 %v3872_v26, %v3868_v2  ;;  %v3733_v30 = vshrl.u32 %v15110_v43, %v3724_v27  ;;  %v3736_v62 = vshrl.u32 %v14787_v18, %v3724_v27  ;;  %15264 = vst [vmem:[#allocation82_spill] sm:$0xff] %v11592_v3 }
 0x2c4   : > { %v3738_v45 = vshll.u32 %v14787_v18, %v3723_v6  ;;  %vm14685_vm6 = vcmp.lt.s32.totalorder %v15263_v63, 0  ;;  %v3728_v25 = vor.u32 %v3727_v24, %v3726_v20  ;;  %v3731_v5 = vor.u32 %v3730_v7, %v3729_v32  ;;  %v11596_v6 = vld [vmem:[%s8079_s23 + $0xc8] sm:$0xff]  ;;  %v11604_v7 = vld [vmem:[%s8079_s23 + $0xc0] sm:$0xff] }
 0x2c5   : > { %v3739_v50 = vshrl.u32 %v14790_v16, %v3724_v27  ;;  %v6944_v58 = vadd.s32 4294967169, %v4025_v39  ;;  %v3874_v2 = vadd.s32 536870912, %v3873_v36  ;;  %v3734_v26 = vor.u32 %v3733_v30, %v3732_v1  ;;  %1366 = vrot.lane.b32.xlu1 %v11596_v6, %s7982_s19  ;;  %1364 = vrot.lane.b32.xlu0 %v11604_v7, %s7982_s19  ;;  %v11609_v1 = vld [vmem:[%s8079_s23 + $0xf8] sm:$0xff] }
 0x2c6   : > { %v3737_v28 = vor.u32 %v3736_v62, %v3735_v17  ;;  %vm3744_vm5 = vcmp.lt.s32.totalorder %v11521_v51, 4  ;;  %v3725_v20 = vshrl.u32 %v14783_v29, %v3724_v27  ;;  %v3749_v24 = vsel %vm3741_vm13, %v3728_v25, %v3731_v5  ;;  %v11619_v62 = vpop.permute.xlu1 %1262  ;;  %v11630_v61 = vpop.permute.xlu0 %1260 }
 0x2c7   : > { %v3740_v32 = vor.u32 %v3739_v50, %v3738_v45  ;;  %v4031_v39 = vadd.s32 1, %v6944_v58  ;;  %v11611_v17 = vshrl.u32 %v3874_v2, 30  ;;  %v3746_v30 = vsel %vm3744_vm5, %v3734_v26, 2102212464  ;;  %15266 = vst [vmem:[#allocation89_spill] sm:$0xff] %v11619_v62  ;;  %v11622_v58 = vld [vmem:[%s8079_s23 + $0xf0] sm:$0xff] }
 0x2c8   : > { %v3750_v27 = vsel %vm3744_vm5, %v3737_v28, 920167782  ;;  %v3753_v50 = vsel %vm3741_vm13, %v3731_v5, %v3734_v26  ;;  %v3745_v45 = vsel %vm3741_vm13, %v3725_v20, %v3728_v25  ;;  %15267 = vst [vmem:[#allocation90_spill] sm:$0xff] %v11630_v61  ;;  %v3747_v34 = vsel %vm3743_vm15, %v3731_v5, %v3746_v30 }
 0x2c9   : > { %15265 = vst [vmem:[#allocation83_spill] sm:$0xff] %v11611_v17  ;;  %v3751_v2 = vsel %vm3743_vm15, %v3734_v26, %v3750_v27  ;;  %v3754_v3 = vsel %vm3744_vm5, %v3740_v32, 1326507024  ;;  %vm4032_vm12 = vcmp.gt.s32.totalorder %v4031_v39, 0  ;;  %v3876_v54 = vshll.u32 %v11611_v17, 30  ;;  %514 = vrot.lane.b32.xlu1 %v11609_v1, %s7974_s25  ;;  %512 = vrot.lane.b32.xlu0 %v11622_v58, %s7974_s25  ;;  %s6528_s25 = ssub.s32 (%p8067_p4), 125, %s8072_s18 }
 0x2ca   : > { %v3752_v62 = vsel %vm3742_vm0, %v3749_v24, %v3751_v2  ;;  %v3755_v25 = vsel %vm3743_vm15, %v3737_v28, %v3754_v3  ;;  %v11641_v26 = vmul.f32 %v3583_v19, %v3581_v12  ;;  %v4033_v24 = vsel %vm4032_vm12, %v4031_v39, 0  ;;  %v11658_v12 = vpop.permute.xlu1 %502  ;;  %p6529_p8 = scmp.lt.s32.totalorder (%p8067_p4), %s6528_s25, 32 }
 0x2cb   : > { %v3756_v20 = vsel %vm3742_vm0, %v3753_v50, %v3755_v25  ;;  %v11646_v32 = vmul.u32.u64.low %v11551_v52, %v3752_v62  ;;  %v11647_v27 = vmul.u32.u64.high %v11551_v52, %v3752_v62, %v11646_v32  ;;  %v11652_v5 = vsub.s32 %v3873_v36, %v3876_v54  ;;  %15268 = vst [vmem:[#allocation91_spill] sm:$0xff] %v11658_v12  ;;  %v11672_v50 = vpop.permute.xlu0 %500 }
 0x2cc   : > { %v11655_v28 = vmul.u32.u64.low %v11551_v52, %v3756_v20  ;;  %v11656_v3 = vmul.u32.u64.high %v11551_v52, %v3756_v20, %v11655_v28  ;;  %vm15269_vm13 = vcmask 146432   ;;  %v3748_v54 = vsel %vm3742_vm0, %v3745_v45, %v3747_v34  ;;  %15271 = vst [vmem:[#allocation92_spill] sm:$0xff] %v11672_v50 }
 0x2cd   : > { %v11663_v19 = vsel %vm15269_vm13, %v11452_v40, %v11220_v35  ;;  %vm15270_vm15 = vmmov %vm15269_vm13  ;;  %v4035_v36 = vand.u32 31, %v4033_v24  ;;  %v15272_v39 = vxor.u32 2147483648, %v11460_v4  ;;  %vm15273_vm5 = vcmask 490496   ;;  %610 = vrot.lane.b32.xlu1 %v11609_v1, %s7973_s24  ;;  %608 = vrot.lane.b32.xlu0 %v11622_v58, %s7973_s24  ;;  %s15289_s24 = smov 33  }
 0x2ce   : > { %v11668_v30 = vsel %vm15270_vm15, %v11456_v14, %v11227_v48  ;;  %v1920_v35 = vsel %vm15273_vm5, %v11464_v13, %v11264_v11  ;;  %v3879_v48 = vsub.s32 0, %v11652_v5  ;;  %vm15274_vm12 = vmmov %vm15269_vm13  ;;  %v3767_v51 = vadd.s32 1, %v11647_v27 }
 0x2cf   : > { %v11679_v62 = vsel %vm14685_vm6, %v15272_v39, %v11460_v4  ;;  %v11688_v40 = vsel %vm15274_vm12, %v11535_v60, %v11321_v57  ;;  %v4029_v4 = vor.u32 8388608, %v11555_v21  ;;  %v4036_v34 = vsub.s32 32, %v4035_v36  ;;  %v11703_v60 = vpop.permute.xlu1 %598  ;;  %v11710_v20 = vpop.permute.xlu0 %596 }
 0x2d0   : > { %v6937_v11 = vmin.u32 %v3879_v48, %v11652_v5  ;;  %v3764_v13 = vmul.u32 %v11551_v52, %v3748_v54  ;;  %vm3766_vm0 = vc.u32 %v11656_v3, %v11646_v32  ;;  %v11701_v57 = vshrl.u32 %v4033_v24, 5  ;;  %15275 = vst [vmem:[#allocation93_spill] sm:$0xff] %v11703_v60  ;;  %15277 = vst [vmem:[#allocation94_spill] sm:$0xff] %v11710_v20  ;;  %v15280_v60 = vld [vmem:[#allocation21_spill] sm:$0xff] }
 0x2d1   : > { %v3768_v45 = vsel %vm3766_vm0, %v3767_v51, %v11647_v27  ;;  %v4039_v2 = vshrl.u32 %v15108_v53, %v4036_v34  ;;  %v4042_v21 = vshrl.u32 %v15250_v41, %v4036_v34  ;;  %vm15276_vm13 = vcmask 539648   ;;  %702 = vrot.lane.b32.xlu1 %v11498_v46, %s7975_s26  ;;  %700 = vrot.lane.b32.xlu0 %v11503_v9, %s7975_s26 }
 0x2d2   : > { %v1953_v25 = vsel %vm15276_vm13, %v1920_v35, %v11397_v59  ;;  %v3881_v28 = vclz %v6937_v11  ;;  %v3769_v52 = vadd.s32 %v3768_v45, %v3764_v13  ;;  %v4038_v54 = vshll.u32 %v14783_v29, %v4035_v36 }
 0x2d3   : > { %v4045_v24 = vshrl.u32 %v15110_v43, %v4036_v34  ;;  %v4041_v27 = vshll.u32 %v15108_v53, %v4035_v36  ;;  %v4044_v39 = vshll.u32 %v15250_v41, %v4035_v36  ;;  %v4047_v48 = vshll.u32 %v15110_v43, %v4035_v36  ;;  %v11724_v45 = vpop.permute.xlu1 %1266  ;;  %v11728_v12 = vpop.permute.xlu0 %1264 }
 0x2d4   : > { %v4048_v51 = vshrl.u32 %v14787_v18, %v4036_v34  ;;  %v6938_v59 = vadd.s32 4294967294, %v3881_v28  ;;  %v3770_v35 = vadd.s32 536870912, %v3769_v52  ;;  %v4050_v11 = vshll.u32 %v14787_v18, %v4035_v36  ;;  %15278 = vst [vmem:[#allocation95_spill] sm:$0xff] %v11724_v45  ;;  %15279 = vst [vmem:[#allocation96_spill] sm:$0xff] %v11728_v12  ;;  %v11734_v36 = vld [vmem:[%s8079_s23 + $0xd8] sm:$0xff] }
 0x2d5   : > { %v4051_v13 = vshrl.u32 %v14790_v16, %v4036_v34  ;;  %v4040_v14 = vor.u32 %v4039_v2, %v4038_v54  ;;  %v4043_v17 = vor.u32 %v4042_v21, %v4041_v27  ;;  %v11726_v20 = vshll.u32 %v4029_v4, 8  ;;  %1370 = vrot.lane.b32.xlu1 %v11734_v36, %s7982_s19  ;;  %v11750_v27 = vld [vmem:[%s8079_s23 + $0xd0] sm:$0xff] }
 0x2d6   : > { %v4049_v50 = vor.u32 %v4048_v51, %v4047_v48  ;;  %vm6939_vm5 = vcmp.lt.s32.totalorder %v6938_v59, 0  ;;  %v11731_v61 = vshrl.u32 %v3770_v35, 30  ;;  %v4046_v28 = vor.u32 %v4045_v24, %v4044_v39  ;;  %1368 = vrot.lane.b32.xlu0 %v11750_v27, %s7982_s19  ;;  %v15286_v39 = vld [vmem:[#allocation44_spill] sm:$0xff] }
 0x2d7   : > { %v4052_v38 = vor.u32 %v4051_v13, %v4050_v11  ;;  %v15282_v2 = vand.u32 2147483647, %v15263_v63  ;;  %v15283_v21 = vmov 0  ;;  %v11744_v4 = vsel %vm6939_vm5, 0, %v6938_v59  ;;  %v11764_v35 = vpop.permute.xlu0 %1356 }
 0x2d8   : > { %15281 = vst [vmem:[#allocation21_spill] sm:$0xff] %v11731_v61  ;;  %v4037_v54 = vshrl.u32 %v14783_v29, %v4036_v34  ;;  %vm4053_vm0 = vcmp.lt.s32.totalorder %v11701_v57, 1  ;;  %v1992_v24 = vmul.f32 %v11338_v10, %v1953_v25  ;;  %v3889_v48 = vsub.s32 4294967266, %v11744_v4  ;;  %v11759_v34 = vpop.permute.xlu1 %1358  ;;  %15288 = vst [vmem:[#allocation99_spill] sm:$0xff] %v11764_v35 }
 0x2d9   : > { %vm11740_vm12 = vcmp.le.f32.partialorder %v15282_v2, 0.7853982  ;;  %v3772_v51 = vshll.u32 %v11731_v61, 30  ;;  %vm4054_vm5 = vcmp.lt.s32.totalorder %v11701_v57, 2  ;;  %vm4056_vm6 = vcmp.lt.s32.totalorder %v11701_v57, 4  ;;  %15287 = vst [vmem:[#allocation98_spill] sm:$0xff] %v11759_v34  ;;  %1462 = vrot.lane.b32.xlu1 %v11596_v6, %s15289_s24 }
 0x2da   : > { %v15284_v21 = vsel %vm11740_vm12, 4294967295, %v15283_v21  ;;  %vm4055_vm15 = vcmp.lt.s32.totalorder %v11701_v57, 3  ;;  %v4061_v10 = vsel %vm4053_vm0, %v4040_v14, %v4043_v17  ;;  %v4062_v25 = vsel %vm4056_vm6, %v4049_v50, 920167782  ;;  %1460 = vrot.lane.b32.xlu0 %v11604_v7, %s15289_s24 }
 0x2db   : > { %15285 = vst [vmem:[#allocation97_spill] sm:$0xff] %v15284_v21  ;;  %v4066_v59 = vsel %vm4056_vm6, %v4052_v38, 1326507024  ;;  %v3890_v11 = vadd.s32 127, %v3889_v48  ;;  %v11766_v13 = vsub.s32 %v3769_v52, %v3772_v51  ;;  %v4058_v2 = vsel %vm4056_vm6, %v4046_v28, 2102212464 }
 0x2dc   : > { %v4065_v61 = vsel %vm4053_vm0, %v4043_v17, %v4046_v28  ;;  %v15290_v12 = vand.u32 2147483647, %v15286_v39  ;;  %v15291_v45 = vmov 0  ;;  %v3885_v38 = vsub.s32 32, %v11744_v4 }
 0x2dd   : > { %v4063_v48 = vsel %vm4055_vm15, %v4046_v28, %v4062_v25  ;;  %v4067_v52 = vsel %vm4055_vm15, %v4049_v50, %v4066_v59  ;;  %v11784_v51 = vadd.f32 %v11361_v56, %v1992_v24  ;;  %v3775_v35 = vsub.s32 0, %v11766_v13  ;;  %v11795_v25 = vpop.permute.xlu1 %506  ;;  %706 = vrot.lane.b32.xlu1 %v11609_v1, %s7975_s26 }
 0x2de   : > { %vm11774_vm13 = vcmp.le.f32.partialorder %v15290_v12, 0.7853982  ;;  %v3869_v12 = vadd.s32 %v11526_v23, %v11544_v8  ;;  %v4057_v34 = vsel %vm4053_vm0, %v4037_v54, %v4040_v14  ;;  %v4064_v28 = vsel %vm4054_vm5, %v4061_v10, %v4063_v48  ;;  %v11806_v23 = vpop.permute.xlu0 %504  ;;  %704 = vrot.lane.b32.xlu0 %v11622_v58, %s7975_s26  ;;  %s7072_s26 = sshll.u32 (%p8067_p4), %s8055_s12, 8 }
 0x2df   : > { %v15292_v45 = vsel %vm11774_vm13, 4294967295, %v15291_v45  ;;  %15294 = vst [vmem:[#allocation101_spill] sm:$0xff] %v11784_v51  ;;  %v4059_v50 = vsel %vm4055_vm15, %v4043_v17, %v4058_v2  ;;  %v4068_v24 = vsel %vm4054_vm5, %v4065_v61, %v4067_v52  ;;  %v3891_v8 = vshll.u32 %v3890_v11, 23  ;;  %v15296_v17 = vld [vmem:[#allocation68_spill] sm:$0xff] }
 0x2e0   : > { %15293 = vst [vmem:[#allocation100_spill] sm:$0xff] %v15292_v45  ;;  %v11802_v59 = vmul.u32.u64.low %v11726_v20, %v4064_v28  ;;  %v11803_v56 = vmul.u32.u64.high %v11726_v20, %v4064_v28, %v11802_v59  ;;  %v6933_v14 = vmin.u32 %v3775_v35, %v11766_v13  ;;  %vm15295_vm6 = vcmask 146432  }
 0x2e1   : > { %v11812_v54 = vsel %vm15295_vm6, %v11540_v22, %v11329_v37  ;;  %vm15297_vm15 = vweird.f32 %v15280_v60  ;;  %v3887_v10 = vshrl.u32 %v3869_v12, %v3885_v38  ;;  %v3920_v35 = vand.u32 2139095040, %v11784_v51  ;;  %v11839_v38 = vpop.permute.xlu1 %602  ;;  %798 = vrot.lane.b32.xlu1 %v11498_v46, %s14796_s27 }
 0x2e2   : > { %v11819_v61 = vsel %vm15297_vm15, nan, %v15296_v17  ;;  %v11822_v2 = vmul.u32.u64.low %v11726_v20, %v4068_v24  ;;  %v11823_v48 = vmul.u32.u64.high %v11726_v20, %v4068_v24, %v11822_v2  ;;  %v3693_v37 = vsel %vm11740_vm12, %v15263_v63, %v11679_v62  ;;  %796 = vrot.lane.b32.xlu0 %v11503_v9, %s14796_s27 }
 0x2e3   : > { %15298 = vst [vmem:[#allocation68_spill] sm:$0xff] %v11819_v61  ;;  %v3777_v22 = vclz %v6933_v14  ;;  %vm15299_vm0 = vcmask 195584   ;;  %v4060_v11 = vsel %vm4054_vm5, %v4057_v34, %v4059_v50  ;;  %v15300_v52 = vxor.u32 2147483648, %v11641_v26  ;;  %v11849_v14 = vpop.permute.xlu0 %600  ;;  %v15302_v34 = vld [vmem:[#allocation20_spill] sm:$0xff] }
 0x2e4   : > { %v11835_v60 = vsel %vm15299_vm0, %v11663_v19, %v11366_v55  ;;  %vm15301_vm6 = vcmp.lt.s32.totalorder %v15286_v39, 0  ;;  %v3886_v62 = vshll.u32 %v11652_v5, %v11744_v4  ;;  %v4079_v28 = vadd.s32 1, %v11803_v56 }
 0x2e5   : > { %v3586_v12 = vsel %vm15301_vm6, %v15300_v52, %v11641_v26  ;;  %v3921_v24 = vshrl.u32 %v3920_v35, 23  ;;  %v3892_v55 = vor.u32 4788187, %v3891_v8  ;;  %v6934_v19 = vadd.s32 4294967294, %v3777_v22  ;;  %v11866_v35 = vpop.permute.xlu1 %694  ;;  %1466 = vrot.lane.b32.xlu1 %v11734_v36, %s15289_s24 }
 0x2e6   : > { %v14690_v57 = vand.u32 2147483647, %v11784_v51  ;;  %v3888_v26 = vor.u32 %v3887_v10, %v3886_v62  ;;  %v4076_v2 = vmul.u32 %v11726_v20, %v4060_v11  ;;  %vm4078_vm5 = vc.u32 %v11823_v48, %v11802_v59  ;;  %1464 = vrot.lane.b32.xlu0 %v11750_v27, %s15289_s24 }
 0x2e7   : > { %v6940_v5 = vadd.s32 4294967169, %v3921_v24  ;;  %7622 = vcosq.f32 %v3693_v37  ;;  %v3589_v4 = vsel %vm11774_vm13, %v15286_v39, %v3586_v12  ;;  %vm6935_vm15 = vcmp.lt.s32.totalorder %v6934_v19, 0  ;;  %v11870_v52 = vpop.permute.xlu0 %692 }
 0x2e8   : > { %v4080_v8 = vsel %vm4078_vm5, %v4079_v28, %v11803_v56  ;;  %v3765_v20 = vadd.s32 %v11646_v32, %v11656_v3  ;;  %v3780_v10 = vsel %vm6935_vm15, 0, %v6934_v19  ;;  %v3893_v62 = vand.u32 2147483647, %v3892_v55 }
 0x2e9   : > { %v4081_v22 = vadd.s32 %v4080_v8, %v4076_v2  ;;  %v3927_v11 = vadd.s32 1, %v6940_v5  ;;  %v3781_v24 = vsub.s32 32, %v3780_v10  ;;  %v3785_v17 = vsub.s32 4294967266, %v3780_v10  ;;  %v11881_v19 = vpop.permute.xlu1 %1362  ;;  %1558 = vrot.lane.b32.xlu1 %v11596_v6, %s14799_s28 }
 0x2ea   : > { %v11874_v21 = vand.u32 8388607, %v14690_v57  ;;  %7624 = vsinq.f32 %v3693_v37  ;;  %v3895_v56 = vcvt.s32.f32 %v3888_v26  ;;  %v3782_v32 = vshll.u32 %v11766_v13, %v3780_v10  ;;  %1556 = vrot.lane.b32.xlu0 %v11604_v7, %s14799_s28 }
 0x2eb   : > { %v4082_v12 = vadd.s32 536870912, %v4081_v22  ;;  %vm3928_vm0 = vcmp.gt.s32.totalorder %v3927_v11, 0  ;;  %v3783_v3 = vshrl.u32 %v3765_v20, %v3781_v24  ;;  %v3786_v28 = vadd.s32 127, %v3785_v17  ;;  %v11890_v5 = vpop.permute.xlu0 %1360 }
 0x2ec   : > { %v3929_v55 = vsel %vm3928_vm0, %v3927_v11, 0  ;;  %7626 = vcosq.f32 %v3589_v4  ;;  %vm15304_vm6 = vcmask 195584   ;;  %v11892_v8 = vmul.f32 %v3895_v56, %v3893_v62 }
 0x2ed   : > { %v11886_v2 = vsel %vm15304_vm6, %v11668_v30, %v11374_v42  ;;  %v11888_v37 = vshrl.u32 %v4082_v12, 30  ;;  %v3931_v26 = vand.u32 31, %v3929_v55  ;;  %v3784_v57 = vor.u32 %v3783_v3, %v3782_v32  ;;  %802 = vrot.lane.b32.xlu1 %v11609_v1, %s14796_s27 }
 0x2ee   : > { %v3787_v13 = vshll.u32 %v3786_v28, 23  ;;  %v3925_v17 = vor.u32 8388608, %v11874_v21  ;;  %v11898_v10 = vshrl.u32 %v3929_v55, 5  ;;  %v11905_v21 = vpop.permute.xlu1 %1454  ;;  %800 = vrot.lane.b32.xlu0 %v11622_v58, %s14796_s27  ;;  %7628 = vsinq.f32 %v3589_v4  ;;  %s14337_s27 = scalar_lea.vmem (%p8067_p4), %s14478_s9, %s7072_s26  }
 0x2ef   : > { %15305 = vst [vmem:[#allocation20_spill] sm:$0xff] %v11888_v37  ;;  %v4084_v20 = vshll.u32 %v11888_v37, 30  ;;  %v3932_v42 = vsub.s32 32, %v3931_v26  ;;  %v3934_v30 = vshll.u32 %v14783_v29, %v3931_v26  ;;  %v3791_v62 = vcvt.s32.f32 %v3784_v57  ;;  %v11912_v28 = vpop.permute.xlu0 %1452 }
 0x2f0   : > { %v3788_v11 = vor.u32 4788187, %v3787_v13  ;;  %v3937_v24 = vshll.u32 %v15108_v53, %v3931_v26  ;;  %v3940_v56 = vshll.u32 %v15250_v41, %v3931_v26  ;;  %v3943_v3 = vshll.u32 %v15110_v43, %v3931_v26 }
 0x2f1   : > { %v11907_v12 = vsub.s32 %v4081_v22, %v4084_v20  ;;  %v3935_v6 = vshrl.u32 %v15108_v53, %v3932_v42  ;;  %v3938_v32 = vshrl.u32 %v15250_v41, %v3932_v42  ;;  %v11914_v55 = vpop.eup %7622  ;;  %v3941_v57 = vshrl.u32 %v15110_v43, %v3932_v42  ;;  %894 = vrot.lane.b32.xlu1 %v11498_v46, %s14800_s21 }
 0x2f2   : > { %15306 = vst [vmem:[#allocation52_spill] sm:$0xff] %v11914_v55  ;;  %v3789_v7 = vand.u32 2147483647, %v3788_v11  ;;  %v3944_v13 = vshrl.u32 %v14787_v18, %v3932_v42  ;;  %v3946_v22 = vshll.u32 %v14787_v18, %v3931_v26  ;;  %v3947_v45 = vshrl.u32 %v14790_v16, %v3932_v42  ;;  %v11928_v26 = vpop.permute.xlu1 %698  ;;  %892 = vrot.lane.b32.xlu0 %v11503_v9, %s14800_s21 }
 0x2f3   : > { %v4087_v20 = vsub.s32 0, %v11907_v12  ;;  %v3936_v37 = vor.u32 %v3935_v6, %v3934_v30  ;;  %v3939_v63 = vor.u32 %v3938_v32, %v3937_v24  ;;  %v3897_v11 = vxor.u32 2147483648, %v11892_v8  ;;  %v11940_v32 = vpop.permute.xlu0 %696 }
 0x2f4   : > { %v3942_v55 = vor.u32 %v3941_v57, %v3940_v56  ;;  %v3945_v39 = vor.u32 %v3944_v13, %v3943_v3  ;;  %v11930_v61 = vpop.eup %7624  ;;  %v15308_v51 = vand.u32 2147483647, %v11364_v31  ;;  %v15309_v30 = vmov 0 }
 0x2f5   : > { %15307 = vst [vmem:[#allocation102_spill] sm:$0xff] %v11930_v61  ;;  %v3792_v24 = vmul.f32 %v3791_v62, %v3789_v7  ;;  %v6945_v6 = vmin.u32 %v4087_v20, %v11907_v12  ;;  %v3948_v4 = vor.u32 %v3947_v45, %v3946_v22  ;;  %vm14700_vm6 = vcmp.lt.s32.totalorder %v11898_v10, 1  ;;  %1562 = vrot.lane.b32.xlu1 %v11734_v36, %s14799_s28 }
 0x2f6   : > { %vm11934_vm0 = vcmp.le.f32.partialorder %v15308_v51, 0.7853982  ;;  %v3933_v56 = vshrl.u32 %v14783_v29, %v3932_v42  ;;  %vm3952_vm15 = vcmp.lt.s32.totalorder %v11898_v10, 4  ;;  %v3957_v3 = vsel %vm14700_vm6, %v3936_v37, %v3939_v63  ;;  %v11948_v51 = vpop.eup %7626  ;;  %v11962_v61 = vpop.permute.xlu1 %790  ;;  %1560 = vrot.lane.b32.xlu0 %v11750_v27, %s14799_s28 }
 0x2f7   : > { %v15310_v30 = vsel %vm11934_vm0, 4294967295, %v15309_v30  ;;  %v3965_v57 = vshll.u32 %v3925_v17, 8  ;;  %15312 = vst [vmem:[#allocation104_spill] sm:$0xff] %v11948_v51  ;;  %v15313_v62 = vand.u32 2147483647, %v11372_v44  ;;  %v15314_v45 = vmov 0  ;;  %v11968_v18 = vpop.permute.xlu0 %788 }
 0x2f8   : > { %15311 = vst [vmem:[#allocation103_spill] sm:$0xff] %v15310_v30  ;;  %v4089_v7 = vclz %v6945_v6  ;;  %vm3951_vm3 = vcmp.lt.s32.totalorder %v11898_v10, 3  ;;  %v3954_v42 = vsel %vm3952_vm15, %v3942_v55, 2102212464  ;;  %v3958_v13 = vsel %vm3952_vm15, %v3945_v39, 920167782 }
 0x2f9   : > { %vm11952_vm5 = vcmp.le.f32.partialorder %v15313_v62, 0.7853982  ;;  %vm3950_vm6 = vcmp.lt.s32.totalorder %v11898_v10, 2  ;;  %v3959_v17 = vsel %vm3951_vm3, %v3942_v55, %v3958_v13  ;;  %vm15317_vm10 = vcmp.lt.s32.totalorder %v11898_v10, 1  ;;  %898 = vrot.lane.b32.xlu1 %v11609_v1, %s14800_s21 }
 0x2fa   : > { %v15315_v45 = vsel %vm11952_vm5, 4294967295, %v15314_v45  ;;  %v3961_v22 = vsel %vm15317_vm10, %v3939_v63, %v3942_v55  ;;  %v3962_v20 = vsel %vm3952_vm15, %v3948_v4, 1326507024  ;;  %v3793_v62 = vxor.u32 2147483648, %v3792_v24  ;;  %vm15318_vm12 = vmmov %vm15317_vm10  ;;  %896 = vrot.lane.b32.xlu0 %v11622_v58, %s14800_s21 }
 0x2fb   : > { %15316 = vst [vmem:[#allocation105_spill] sm:$0xff] %v15315_v45  ;;  %v6946_v51 = vadd.s32 4294967294, %v4089_v7  ;;  %v3953_v6 = vsel %vm15318_vm12, %v3933_v56, %v3936_v37  ;;  %v3960_v16 = vsel %vm3950_vm6, %v3957_v3, %v3959_v17  ;;  %v3955_v43 = vsel %vm3951_vm3, %v3939_v63, %v3954_v42  ;;  %v12001_v27 = vpop.permute.xlu0 %1456  ;;  %v12003_v56 = vpop.eup %7628 }
 0x2fc   : > { %v3963_v41 = vsel %vm3951_vm3, %v3945_v39, %v3962_v20  ;;  %v11970_v53 = vmul.u32.u64.low %v3965_v57, %v3960_v16  ;;  %v11971_v13 = vmul.u32.u64.high %v3965_v57, %v3960_v16, %v11970_v53  ;;  %vm15319_vm10 = vcmp.lt.s32.totalorder %v11364_v31, 0 }
 0x2fd   : > { %v3898_v55 = vsel %vm15319_vm10, %v3897_v11, %v11892_v8  ;;  %vm6947_vm15 = vcmp.lt.s32.totalorder %v6946_v51, 0  ;;  %v3964_v37 = vsel %vm3950_vm6, %v3961_v22, %v3963_v41  ;;  %vm15320_vm12 = vcmask 195584   ;;  %v11992_v8 = vpop.permute.xlu1 %1458  ;;  %v15330_v22 = vld [vmem:[#allocation77_spill] sm:$0xff]  ;;  %990 = vrot.lane.b32.xlu1 %v11498_v46, %s7978_s29 }
 0x2fe   : > { %v1727_v63 = vsel %vm15320_vm12, %v11688_v40, %v11421_v49  ;;  %v4092_v16 = vsel %vm6947_vm15, 0, %v6946_v51  ;;  %v11986_v39 = vmul.u32.u64.low %v3965_v57, %v3964_v37  ;;  %v11987_v4 = vmul.u32.u64.high %v3965_v57, %v3964_v37, %v11986_v39  ;;  %vm15321_vm3 = vmmov %vm15320_vm12  ;;  %v15327_v51 = vld [vmem:[#allocation69_spill] sm:$0xff]  ;;  %988 = vrot.lane.b32.xlu0 %v11503_v9, %s7978_s29 }
 0x2ff   : > { %v1726_v36 = vsel %vm15321_vm3, %v11812_v54, %v11429_v33  ;;  %vm15322_vm10 = vcmp.lt.s32.totalorder %v11372_v44, 0  ;;  %v4097_v11 = vsub.s32 4294967266, %v4092_v16  ;;  %v3956_v49 = vsel %vm3950_vm6, %v3953_v6, %v3955_v43  ;;  %v1549_v37 = vpop.permute.xlu0 %1548 }
 0x300   : > { %v3794_v41 = vsel %vm15322_vm10, %v3793_v62, %v3792_v24  ;;  %vm15323_vm12 = vcmask 244736   ;;  %v3901_v33 = vsel %vm11934_vm0, %v11364_v31, %v3898_v55  ;;  %v4093_v54 = vsub.s32 32, %v4092_v16  ;;  %v15332_v55 = vld [vmem:[#allocation43_spill] sm:$0xff] }
 0x301   : > { %v1758_v40 = vsel %vm15323_vm12, %v11835_v60, %v11458_v15  ;;  %v3975_v3 = vadd.s32 1, %v11971_v13  ;;  %vm15324_vm15 = vmmov %vm15323_vm12  ;;  %v4077_v43 = vadd.s32 %v11802_v59, %v11823_v48  ;;  %v4098_v15 = vadd.s32 127, %v4097_v11  ;;  %v15325_v60 = vld [vmem:[#allocation64_spill] sm:$0xff]  ;;  %v1551_v48 = vpop.permute.xlu1 %1550  ;;  %994 = vrot.lane.b32.xlu1 %v11609_v1, %s7978_s29 }
 0x302   : > { %v1757_v10 = vsel %vm15324_vm15, %v11886_v2, %v11466_v47  ;;  %vm15326_vm6 = vmmov %vm15323_vm12  ;;  %v3797_v47 = vsel %vm11952_vm5, %v11372_v44, %v3794_v41  ;;  %v3972_v2 = vmul.u32 %v3965_v57, %v3956_v49  ;;  %vm3974_vm10 = vc.u32 %v11987_v4, %v11970_v53  ;;  %v15338_v49 = vld [vmem:[#allocation89_spill] sm:$0xff]  ;;  %992 = vrot.lane.b32.xlu0 %v11622_v58, %s7978_s29 }
 0x303   : > { %v1760_v24 = vsel %vm15326_vm6, %v1727_v63, %v15325_v60  ;;  %vm15328_vm3 = vmmov %vm15326_vm6  ;;  %vm15329_vm12 = vcmask 293888   ;;  %7630 = vcosq.f32 %v3901_v33  ;;  %v4099_v42 = vshll.u32 %v4098_v15, 23  ;;  %v15334_v63 = vld [vmem:[#allocation4_spill] sm:$0xff]  ;;  %v15345_v15 = vld [vmem:[#allocation99_spill] sm:$0xff] }
 0x304   : > { %v1759_v7 = vsel %vm15328_vm3, %v1726_v36, %v15327_v51  ;;  %v1791_v59 = vsel %vm15329_vm12, %v1758_v40, %v11500_v0  ;;  %v3976_v17 = vsel %vm3974_vm10, %v3975_v3, %v11971_v13  ;;  %vm15331_vm15 = vmmov %vm15329_vm12  ;;  %7632 = vsinq.f32 %v3901_v33  ;;  %v15336_v13 = vld [vmem:[#allocation75_spill] sm:$0xff]  ;;  %v15340_v33 = vld [vmem:[#allocation90_spill] sm:$0xff] }
 0x305   : > { %v1790_v20 = vsel %vm15331_vm15, %v1757_v10, %v15330_v22  ;;  %v4095_v62 = vshrl.u32 %v4077_v43, %v4093_v54  ;;  %v3977_v6 = vadd.s32 %v3976_v17, %v3972_v2  ;;  %vm15333_vm6 = vmmov %vm15329_vm12  ;;  %7634 = vcosq.f32 %v3797_v47  ;;  %v12047_v3 = vpop.permute.xlu1 %794  ;;  %v15343_v10 = vld [vmem:[#allocation98_spill] sm:$0xff]  ;;  %1086 = vrot.lane.b32.xlu1 %v11498_v46, %s15087_s11 }
 0x306   : > { %v1793_v57 = vsel %vm15333_vm6, %v1760_v24, %v15332_v55  ;;  %v4094_v0 = vshll.u32 %v11907_v12, %v4092_v16  ;;  %vm15335_vm3 = vcmask 343040   ;;  %v4100_v41 = vor.u32 4788187, %v4099_v42  ;;  %v15342_v12 = vld [vmem:[#allocation74_spill] sm:$0xff]  ;;  %1084 = vrot.lane.b32.xlu0 %v11503_v9, %s15087_s11 }
 0x307   : > { %v1824_v39 = vsel %vm15335_vm3, %v1791_v59, %v15334_v63  ;;  %vm15337_vm10 = vmmov %vm15335_vm3  ;;  %v3978_v11 = vadd.s32 536870912, %v3977_v6  ;;  %vm15339_vm12 = vcmask 392192   ;;  %7636 = vsinq.f32 %v3797_v47  ;;  %v15349_v47 = vld [vmem:[#allocation79_spill] sm:$0xff]  ;;  %v15351_v42 = vld [vmem:[#allocation82_spill] sm:$0xff] }
 0x308   : > { %v1823_v36 = vsel %vm15337_vm10, %v1790_v20, %v15336_v13  ;;  %v1857_v40 = vsel %vm15339_vm12, %v1824_v39, %v15338_v49  ;;  %vm15341_vm15 = vmmov %vm15339_vm12  ;;  %v1792_v16 = vsel %vm15333_vm6, %v1759_v7, %v15342_v12  ;;  %vm15344_vm3 = vcmask 441344   ;;  %v15356_v39 = vld [vmem:[#allocation91_spill] sm:$0xff]  ;;  %v15363_v12 = vld [vmem:[#allocation96_spill] sm:$0xff] }
 0x309   : > { %v1856_v54 = vsel %vm15341_vm15, %v1823_v36, %v15340_v33  ;;  %v1890_v43 = vsel %vm15344_vm3, %v1857_v40, %v15343_v10  ;;  %vm15346_vm10 = vmmov %vm15344_vm3  ;;  %v4096_v24 = vor.u32 %v4095_v62, %v4094_v0  ;;  %v12055_v51 = vshrl.u32 %v3978_v11, 30  ;;  %v793_v0 = vpop.permute.xlu0 %792  ;;  %v887_v63 = vpop.permute.xlu1 %886  ;;  %v15358_v36 = vld [vmem:[#allocation94_spill] sm:$0xff]  ;;  %v15361_v49 = vld [vmem:[#allocation95_spill] sm:$0xff]  ;;  %1090 = vrot.lane.b32.xlu1 %v11609_v1, %s15087_s11 }
 0x30a   : > { %v1889_v60 = vsel %vm15346_vm10, %v1856_v54, %v15345_v15  ;;  %vm15347_vm12 = vcmask 490496   ;;  %vm15350_vm6 = vcmask 343040   ;;  %vm15353_vm0 = vcmask 539648   ;;  %v15365_v10 = vld [vmem:[#allocation62_spill] sm:$0xff]  ;;  %1088 = vrot.lane.b32.xlu0 %v11622_v58, %s15087_s11 }
 0x30b   : > { %v1923_v2 = vsel %vm15347_vm12, %v1890_v43, %v11905_v21  ;;  %vm15348_vm15 = vmmov %vm15347_vm12  ;;  %v1826_v7 = vsel %vm15350_vm6, %v1793_v57, %v15349_v47  ;;  %v4101_v21 = vand.u32 2147483647, %v4100_v41  ;;  %v3980_v62 = vshll.u32 %v12055_v51, 30  ;;  %v15359_v41 = vld [vmem:[#allocation92_spill] sm:$0xff]  ;;  %v15367_v43 = vld [vmem:[#allocation58_spill] sm:$0xff] }
 0x30c   : > { %v1922_v59 = vsel %vm15348_vm15, %v1889_v60, %v11912_v28  ;;  %vm15352_vm3 = vmmov %vm15350_vm6  ;;  %v1956_v22 = vsel %vm15353_vm0, %v1923_v2, %v1551_v48  ;;  %v12075_v28 = vld [vmem:[%s14470_s1] ss:$0 sm:$0xff]  ;;  %v12081_v48 = vadd.s32 %v11970_v53, %v11987_v4  ;;  %vm15362_vm15 = vcmask 392192  }
 0x30d   : > { %v1825_v17 = vsel %vm15352_vm3, %v1792_v16, %v15351_v42  ;;  %vm15354_vm10 = vmmov %vm15353_vm0  ;;  %v1995_v55 = vmul.f32 %v12075_v28, %v1956_v22  ;;  %vm15357_vm0 = vcmask 48128   ;;  %v1859_v40 = vsel %vm15362_vm15, %v1826_v7, %v15361_v49  ;;  %v12100_v4 = vpop.eup %7630  ;;  %1182 = vrot.lane.b32.xlu1 %v11498_v46, %s14968_s14 }
 0x30e   : > { %v1955_v20 = vsel %vm15354_vm10, %v1922_v59, %v1549_v37  ;;  %v15355_v37 = vld [vmem:[#allocation93_spill] sm:$0xff]  ;;  %vm15360_vm12 = vmmov %vm15357_vm0  ;;  %v4103_v33 = vcvt.s32.f32 %v4096_v24  ;;  %v12091_v54 = vsub.s32 %v3977_v6, %v3980_v62  ;;  %15366 = vst [vmem:[#allocation64_spill] sm:$0xff] %v12100_v4  ;;  %v1631_v6 = vsel %vm15357_vm0, %v11806_v23, %v11849_v14  ;;  %v12114_v24 = vld [vmem:[%s14471_s2] ss:$0 sm:$0xff]  ;;  %v12121_v59 = vpop.eup %7632  ;;  %v1555_v62 = vpop.permute.xlu1 %1554  ;;  %1180 = vrot.lane.b32.xlu0 %v11503_v9, %s14968_s14 }
 0x30f   : > { %v1994_v57 = vmul.f32 %v12075_v28, %v1955_v20  ;;  %v1630_v13 = vsel %vm15357_vm0, %v15356_v39, %v15355_v37  ;;  %v1629_v11 = vsel %vm15360_vm12, %v15359_v41, %v15358_v36  ;;  %vm15364_vm6 = vmmov %vm15362_vm15  ;;  %v12096_v53 = vadd.f32 %v15365_v10, %v1995_v55  ;;  %15370 = vst [vmem:[#allocation69_spill] sm:$0xff] %v12121_v59 }
 0x310   : > { %v1858_v16 = vsel %vm15364_vm6, %v1825_v17, %v15363_v12  ;;  %vm15368_vm10 = vmmov %vm15357_vm0  ;;  %vm15369_vm12 = vcmask 97280   ;;  %vm15373_vm6 = vcmask 441344   ;;  %v15383_v41 = vsel %vm9678_vm7, 0, %v15302_v34 }
 0x311   : > { %v1632_v15 = vsel %vm15368_vm10, %v11795_v25, %v11839_v38  ;;  %v1663_v60 = vsel %vm15369_vm12, %v1630_v13, %v11866_v35  ;;  %v12117_v2 = vadd.f32 %v12114_v24, %v1994_v57  ;;  %v4104_v25 = vmul.f32 %v4103_v33, %v4101_v21  ;;  %vm15371_vm15 = vmmov %vm15369_vm12  ;;  %v12127_v35 = vpop.eup %7634  ;;  %1186 = vrot.lane.b32.xlu1 %v11609_v1, %s14968_s14 }
 0x312   : > { %v3983_v38 = vsub.s32 0, %v12091_v54  ;;  %v1662_v23 = vsel %vm15371_vm15, %v1629_v11, %v11870_v52  ;;  %v14712_v14 = vand.u32 2147483647, %v12096_v53  ;;  %15372 = vst [vmem:[#allocation77_spill] sm:$0xff] %v12127_v35  ;;  %v1892_v47 = vsel %vm15373_vm6, %v1859_v40, %v11881_v19  ;;  %vm15374_vm10 = vmmov %vm15373_vm6  ;;  %v885_v19 = vpop.permute.xlu0 %884  ;;  %1184 = vrot.lane.b32.xlu0 %v11622_v58, %s14968_s14 }
 0x313   : > { %v1891_v7 = vsel %vm15374_vm10, %v1858_v16, %v11890_v5  ;;  %vm15375_vm0 = vmmov %vm15369_vm12  ;;  %v4232_v17 = vand.u32 2139095040, %v12096_v53  ;;  %vm15377_vm15 = vcmask 146432   ;;  %v12145_v5 = vpop.eup %7636  ;;  %vm15380_vm6 = vcmask 490496  }
 0x314   : > { %v1665_v42 = vsel %vm15375_vm0, %v1632_v15, %v11928_v26  ;;  %v6941_v22 = vmin.u32 %v3983_v38, %v12091_v54  ;;  %vm15376_vm12 = vmmov %vm15375_vm0  ;;  %v1696_v20 = vsel %vm15377_vm15, %v1663_v60, %v11962_v61  ;;  %15379 = vst [vmem:[#allocation43_spill] sm:$0xff] %v12145_v5  ;;  %v1925_v26 = vsel %vm15380_vm6, %v1892_v47, %v11992_v8 }
 0x315   : > { %v1664_v52 = vsel %vm15376_vm12, %v1631_v6, %v11940_v32  ;;  %vm15378_vm3 = vmmov %vm15377_vm15  ;;  %v4233_v55 = vshrl.u32 %v4232_v17, 23  ;;  %v14711_v57 = vand.u32 2147483647, %v12117_v2  ;;  %v4128_v32 = vand.u32 2139095040, %v12117_v2  ;;  %1278 = vrot.lane.b32.xlu1 %v11498_v46, %s7981_s15 }
 0x316   : > { %v1695_v21 = vsel %vm15378_vm3, %v1662_v23, %v11968_v18  ;;  %v4105_v61 = vxor.u32 2147483648, %v4104_v25  ;;  %v3985_v18 = vclz %v6941_v22  ;;  %vm15381_vm3 = vmmov %vm15380_vm6  ;;  %v4236_v39 = vand.u32 8388607, %v14712_v14  ;;  %v1553_v10 = vpop.permute.xlu0 %1552  ;;  %1276 = vrot.lane.b32.xlu0 %v11503_v9, %s7981_s15 }
 0x317   : > { %v1924_v37 = vsel %vm15381_vm3, %v1891_v7, %v12001_v27  ;;  %v6952_v13 = vadd.s32 4294967169, %v4233_v55  ;;  %v4129_v36 = vshrl.u32 %v4128_v32, 23  ;;  %vm15382_vm10 = vcmask 539648   ;;  %vm15384_vm0 = vmmov %vm15377_vm15  ;;  %v15389_v7 = vld [vmem:[#allocation6_spill] sm:$0xff] }
 0x318   : > { %v1958_v8 = vsel %vm15382_vm10, %v1925_v26, %v1555_v62  ;;  %v2450_v11 = vadd.s32 3, %v15383_v41  ;;  %v6942_v49 = vadd.s32 4294967294, %v3985_v18  ;;  %v12164_v40 = vsel %vm15384_vm0, %v1665_v42, %v12047_v3  ;;  %vm15385_vm12 = vmmov %vm15384_vm0 }
 0x319   : > { %v12167_v33 = vsel %vm15385_vm12, %v1664_v52, %v793_v0  ;;  %vm15386_vm15 = vcmask 195584   ;;  %v4239_v12 = vadd.s32 1, %v6952_v13  ;;  %v6948_v16 = vadd.s32 4294967169, %v4129_v36  ;;  %1282 = vrot.lane.b32.xlu1 %v11609_v1, %s7981_s15 }
 0x31a   : > { %v12170_v27 = vsel %vm15386_vm15, %v1696_v20, %v887_v63  ;;  %v12176_v34 = vand.u32 8388607, %v14711_v57  ;;  %vm15387_vm7 = vmmov %vm15386_vm15  ;;  %vm15388_vm6 = vcmp.lt.s32.totalorder %v15367_v43, 0  ;;  %vm6943_vm3 = vcmp.lt.s32.totalorder %v6942_v49, 0  ;;  %1280 = vrot.lane.b32.xlu0 %v11622_v58, %s7981_s15 }
 0x31b   : > { %v12179_v50 = vsel %vm15387_vm7, %v1695_v21, %v885_v19  ;;  %v12185_v3 = vsel %vm15388_vm6, %v4105_v61, %v4104_v25  ;;  %v4237_v0 = vor.u32 8388608, %v4236_v39  ;;  %v1997_v63 = vmul.f32 %v12075_v28, %v1958_v8 }
 0x31c   : > { %v3988_v15 = vsel %vm6943_vm3, 0, %v6942_v49  ;;  %vm4240_vm10 = vcmp.gt.s32.totalorder %v4239_v12, 0  ;;  %v4135_v6 = vadd.s32 1, %v6948_v16  ;;  %v12188_v60 = vand.u32 3, %v2450_v11 }
 0x31d   : > { %v3989_v38 = vsub.s32 32, %v3988_v15  ;;  %v3993_v23 = vsub.s32 4294967266, %v3988_v15  ;;  %v4241_v47 = vsel %vm4240_vm10, %v4239_v12, 0  ;;  %v4133_v17 = vor.u32 8388608, %v12176_v34 }
 0x31e   : > { %v4243_v25 = vand.u32 31, %v4241_v47  ;;  %vm4136_vm0 = vcmp.gt.s32.totalorder %v4135_v6, 0  ;;  %vm15390_vm12 = vcmask 539648   ;;  %v3990_v52 = vshll.u32 %v12091_v54, %v3988_v15 }
 0x31f   : > { %v12195_v22 = vsel %vm15390_vm12, %v1924_v37, %v1553_v10  ;;  %v3994_v20 = vadd.s32 127, %v3993_v23  ;;  %v12200_v21 = vshll.u32 %v4237_v0, 8  ;;  %v12203_v19 = vadd.f32 %v12114_v24, %v1997_v63 }
 0x320   : > { %v3991_v62 = vshrl.u32 %v12081_v48, %v3989_v38  ;;  %v4242_v26 = vshrl.u32 %v4241_v47, 5  ;;  %v4244_v55 = vsub.s32 32, %v4243_v25  ;;  %v4137_v32 = vsel %vm4136_vm0, %v4135_v6, 0 }
 0x321   : > { %v3995_v61 = vshll.u32 %v3994_v20, 23  ;;  %v4246_v18 = vshll.u32 %v14783_v29, %v4243_v25  ;;  %v15391_v37 = vmov 2475754826   ;;  %v15392_v13 = vmov 2131351028  }
 0x322   : > { %v4249_v39 = vshll.u32 %v15391_v37, %v4243_v25  ;;  %v4252_v36 = vshll.u32 %v15392_v13, %v4243_v25  ;;  %v15393_v54 = vand.u32 2147483647, %v15367_v43  ;;  %v15394_v8 = vmov 0 }
 0x323   : > { %v4247_v48 = vshrl.u32 %v15391_v37, %v4244_v55  ;;  %v4250_v41 = vshrl.u32 %v15392_v13, %v4244_v55  ;;  %v15396_v11 = vmov 2102212464   ;;  %v3996_v16 = vor.u32 4788187, %v3995_v61 }
 0x324   : > { %vm12213_vm15 = vcmp.le.f32.partialorder %v15393_v54, 0.7853982  ;;  %v4253_v49 = vshrl.u32 %v15396_v11, %v4244_v55  ;;  %v4255_v12 = vshll.u32 %v15396_v11, %v4243_v25  ;;  %v15397_v0 = vmov 920167782  }
 0x325   : > { %v15395_v8 = vsel %vm12213_vm15, 4294967295, %v15394_v8  ;;  %v4256_v46 = vshrl.u32 %v15397_v0, %v4244_v55  ;;  %v4258_v63 = vshll.u32 %v15397_v0, %v4243_v25  ;;  %v15398_v10 = vmov 1326507024  }
 0x326   : > { %v4259_v15 = vshrl.u32 %v15398_v10, %v4244_v55  ;;  %v3992_v6 = vor.u32 %v3991_v62, %v3990_v52  ;;  %v4248_v38 = vor.u32 %v4247_v48, %v4246_v18  ;;  %v4251_v23 = vor.u32 %v4250_v41, %v4249_v39  ;;  %v12233_v39 = vpop.permute.xlu0 %888 }
 0x327   : > { %v4254_v47 = vor.u32 %v4253_v49, %v4252_v36  ;;  %v4245_v20 = vshrl.u32 %v14783_v29, %v4244_v55  ;;  %v4257_v54 = vor.u32 %v4256_v46, %v4255_v12  ;;  %vm4261_vm7 = vcmp.lt.s32.totalorder %v4242_v26, 1  ;;  %v12231_v55 = vpop.permute.xlu1 %890 }
 0x328   : > { %v4260_v57 = vor.u32 %v4259_v15, %v4258_v63  ;;  %v3997_v9 = vand.u32 2147483647, %v3996_v16  ;;  %vm4263_vm6 = vcmp.lt.s32.totalorder %v4242_v26, 3  ;;  %vm4264_vm3 = vcmp.lt.s32.totalorder %v4242_v26, 4  ;;  %v12241_v63 = vld [vmem:[%s8079_s23 + $0xe8] sm:$0xff] }
 0x329   : > { %v4269_v61 = vsel %vm4261_vm7, %v4248_v38, %v4251_v23  ;;  %v4265_v25 = vsel %vm4261_vm7, %v4245_v20, %v4248_v38  ;;  %v4266_v52 = vsel %vm4264_vm3, %v4254_v47, 2102212464  ;;  %v4270_v62 = vsel %vm4264_vm3, %v4257_v54, 920167782  ;;  %1374 = vrot.lane.b32.xlu1 %v12241_v63, %s7982_s19 }
 0x32a   : > { %v4273_v18 = vsel %vm4261_vm7, %v4251_v23, %v4254_v47  ;;  %vm4262_vm10 = vcmp.lt.s32.totalorder %v4242_v26, 2  ;;  %v4267_v36 = vsel %vm4263_vm6, %v4251_v23, %v4266_v52  ;;  %v4271_v48 = vsel %vm4263_vm6, %v4254_v47, %v4270_v62  ;;  %v12251_v23 = vld [vmem:[%s8079_s23 + $0xe0] sm:$0xff] }
 0x32b   : > { %v4274_v41 = vsel %vm4264_vm3, %v4260_v57, 1326507024  ;;  %v3999_v49 = vcvt.s32.f32 %v3992_v6  ;;  %v4272_v12 = vsel %vm4262_vm10, %v4269_v61, %v4271_v48  ;;  %v12238_v46 = vshrl.u32 %v4137_v32, 5  ;;  %1372 = vrot.lane.b32.xlu0 %v12251_v23, %s7982_s19 }
 0x32c   : > { %v4275_v16 = vsel %vm4263_vm6, %v4257_v54, %v4274_v41  ;;  %v4268_v15 = vsel %vm4262_vm10, %v4265_v25, %v4267_v36  ;;  %v12246_v20 = vmul.u32.u64.low %v12200_v21, %v4272_v12  ;;  %v12247_v42 = vmul.u32.u64.high %v12200_v21, %v4272_v12, %v12246_v20 }
 0x32d   : > { %v4276_v38 = vsel %vm4262_vm10, %v4273_v18, %v4275_v16  ;;  %v12259_v57 = vsel %vm12213_vm15, %v15367_v43, %v12185_v3  ;;  %v4139_v47 = vand.u32 31, %v4137_v32  ;;  %v12265_v54 = vmul.f32 %v3999_v49, %v3997_v9  ;;  %v12277_v18 = vpop.permute.xlu1 %982  ;;  %v12279_v32 = vpop.permute.xlu0 %980  ;;  %1378 = vrot.lane.b32.xlu1 %v11609_v1, %s7982_s19 }
 0x32e   : > { %v12262_v26 = vmul.u32.u64.low %v12200_v21, %v4276_v38  ;;  %v12263_v6 = vmul.u32.u64.high %v12200_v21, %v4276_v38, %v12262_v26  ;;  %v12269_v61 = vshll.u32 %v4133_v17, 8  ;;  %v1996_v52 = vmul.f32 %v12075_v28, %v12195_v22 }
 0x32f   : > { %v4284_v62 = vmul.u32 %v12200_v21, %v4268_v15  ;;  %v4140_v3 = vsub.s32 32, %v4139_v47  ;;  %vm4157_vm0 = vcmp.lt.s32.totalorder %v12238_v46, 1  ;;  %vm4158_vm12 = vcmp.lt.s32.totalorder %v12238_v46, 2  ;;  %1376 = vrot.lane.b32.xlu0 %v11622_v58, %s7982_s19 }
 0x330   : > { %v4287_v34 = vadd.s32 1, %v12247_v42  ;;  %v4142_v17 = vshll.u32 %v14783_v29, %v4139_v47  ;;  %v4145_v28 = vshll.u32 %v15391_v37, %v4139_v47  ;;  %vm4159_vm7 = vcmp.lt.s32.totalorder %v12238_v46, 3 }
 0x331   : > { %vm4286_vm6 = vc.u32 %v12263_v6, %v12246_v20  ;;  %v4143_v22 = vshrl.u32 %v15391_v37, %v4140_v3  ;;  %v4148_v21 = vshll.u32 %v15392_v13, %v4139_v47  ;;  %v4151_v9 = vshll.u32 %v15396_v11, %v4139_v47  ;;  %1470 = vrot.lane.b32.xlu1 %v12241_v63, %s15289_s24 }
 0x332   : > { %v4288_v36 = vsel %vm4286_vm6, %v4287_v34, %v12247_v42  ;;  %v4146_v48 = vshrl.u32 %v15392_v13, %v4140_v3  ;;  %v4149_v41 = vshrl.u32 %v15396_v11, %v4140_v3  ;;  %v4152_v49 = vshrl.u32 %v15397_v0, %v4140_v3 }
 0x333   : > { %v4289_v12 = vadd.s32 %v4288_v36, %v4284_v62  ;;  %v4144_v16 = vor.u32 %v4143_v22, %v4142_v17  ;;  %v4154_v15 = vshll.u32 %v15397_v0, %v4139_v47  ;;  %v4155_v38 = vshrl.u32 %v15398_v10, %v4140_v3  ;;  %1468 = vrot.lane.b32.xlu0 %v12251_v23, %s15289_s24  ;;  %v987_v47 = vpop.permute.xlu1 %986  ;;  %v985_v17 = vpop.permute.xlu0 %984 }
 0x334   : > { %v4141_v26 = vshrl.u32 %v14783_v29, %v4140_v3  ;;  %v4147_v14 = vor.u32 %v4146_v48, %v4145_v28  ;;  %v4150_v25 = vor.u32 %v4149_v41, %v4148_v21  ;;  %v4153_v42 = vor.u32 %v4152_v49, %v4151_v9  ;;  %v15399_v28 = vld [vmem:[#allocation101_spill] sm:$0xff] }
 0x335   : > { %v4290_v34 = vadd.s32 536870912, %v4289_v12  ;;  %v4156_v4 = vor.u32 %v4155_v38, %v4154_v15  ;;  %vm4160_vm3 = vcmp.lt.s32.totalorder %v12238_v46, 4  ;;  %v4440_v62 = vand.u32 2139095040, %v12203_v19  ;;  %1474 = vrot.lane.b32.xlu1 %v11609_v1, %s15289_s24 }
 0x336   : > { %v4162_v22 = vsel %vm4160_vm3, %v4150_v25, 2102212464  ;;  %v4165_v36 = vsel %vm4157_vm0, %v4144_v16, %v4147_v14  ;;  %v4166_v59 = vsel %vm4160_vm3, %v4153_v42, 920167782  ;;  %v4169_v3 = vsel %vm4157_vm0, %v4147_v14, %v4150_v25 }
 0x337   : > { %vm14725_vm10 = vcmp.lt.s32.totalorder %v15399_v28, 0  ;;  %v12312_v21 = vshrl.u32 %v4290_v34, 30  ;;  %v4161_v9 = vsel %vm4157_vm0, %v4141_v26, %v4144_v16  ;;  %v4167_v48 = vsel %vm4159_vm7, %v4150_v25, %v4166_v59  ;;  %1472 = vrot.lane.b32.xlu0 %v11622_v58, %s15289_s24 }
 0x338   : > { %v4170_v41 = vsel %vm4160_vm3, %v4156_v4, 1326507024  ;;  %v4163_v49 = vsel %vm4159_vm7, %v4147_v14, %v4162_v22  ;;  %v4168_v15 = vsel %vm4158_vm12, %v4165_v36, %v4167_v48  ;;  %v4441_v34 = vshrl.u32 %v4440_v62, 23  ;;  %v12348_v22 = vpop.permute.xlu1 %1078  ;;  %v12350_v36 = vpop.permute.xlu0 %1076 }
 0x339   : > { %15400 = vst [vmem:[#allocation4_spill] sm:$0xff] %v12312_v21  ;;  %v4171_v38 = vsel %vm4159_vm7, %v4153_v42, %v4170_v41  ;;  %v4292_v16 = vshll.u32 %v12312_v21, 30  ;;  %v12332_v1 = vmul.u32.u64.low %v12269_v61, %v4168_v15  ;;  %v12333_v59 = vmul.u32.u64.high %v12269_v61, %v4168_v15, %v12332_v1  ;;  %1566 = vrot.lane.b32.xlu1 %v12241_v63, %s14799_s28 }
 0x33a   : > { %v4172_v4 = vsel %vm4158_vm12, %v4169_v3, %v4171_v38  ;;  %v6960_v26 = vadd.s32 4294967169, %v4441_v34  ;;  %v12341_v42 = vadd.f32 %v12114_v24, %v1996_v52  ;;  %7638 = vcosq.f32 %v12259_v57  ;;  %v15401_v3 = vld [vmem:[#allocation32_spill] sm:$0xff]  ;;  %v7848_v34 = vld [vmem:[%s8079_s23 + $0xf8] sm:$0xff] }
 0x33b   : > { %v12337_v14 = vmul.u32.u64.low %v12269_v61, %v4172_v4  ;;  %v12338_v25 = vmul.u32.u64.high %v12269_v61, %v4172_v4, %v12337_v14  ;;  %v12344_v58 = vsub.s32 %v4289_v12, %v4292_v16  ;;  %v4164_v62 = vsel %vm4158_vm12, %v4161_v9, %v4163_v49  ;;  %1564 = vrot.lane.b32.xlu0 %v12251_v23, %s14799_s28  ;;  %v7849_v4 = vld [vmem:[%s8079_s23 + $0xf0] sm:$0xff] }
 0x33c   : > { %v4001_v41 = vxor.u32 2147483648, %v12265_v54  ;;  %v4447_v24 = vadd.s32 1, %v6960_v26  ;;  %vm15402_vm0 = vcmask 244736   ;;  %v4183_v12 = vadd.s32 1, %v12333_v59  ;;  %v12401_v26 = vpop.permute.xlu1 %1082 }
 0x33d   : > { %v12359_v52 = vsel %vm15402_vm0, %v12170_v27, %v12277_v18  ;;  %vm15403_vm12 = vmmov %vm15402_vm0  ;;  %v4295_v63 = vsub.s32 0, %v12344_v58  ;;  %v15404_v9 = vand.u32 2147483647, %v12203_v19  ;;  %vm15405_vm7 = vcmask 195584   ;;  %1570 = vrot.lane.b32.xlu1 %v7848_v34, %s14799_s28 }
 0x33e   : > { %v12364_v46 = vsel %vm15403_vm12, %v12179_v50, %v12279_v32  ;;  %v1731_v27 = vsel %vm15405_vm7, %v12164_v40, %v12231_v55  ;;  %v4180_v18 = vmul.u32 %v12269_v61, %v4164_v62  ;;  %vm4182_vm6 = vc.u32 %v12338_v25, %v12332_v1  ;;  %vm15406_vm0 = vmmov %vm15405_vm7 }
 0x33f   : > { %v4444_v49 = vand.u32 8388607, %v15404_v9  ;;  %vm4448_vm3 = vcmp.gt.s32.totalorder %v4447_v24, 0  ;;  %v4336_v50 = vand.u32 2139095040, %v12341_v42  ;;  %v6953_v23 = vmin.u32 %v4295_v63, %v12344_v58  ;;  %1568 = vrot.lane.b32.xlu0 %v7849_v4, %s14799_s28  ;;  %vm15407_vm7 = vmmov %vm15403_vm12 }
 0x340   : > { %v4184_v32 = vsel %vm4182_vm6, %v4183_v12, %v12333_v59  ;;  %v4449_v15 = vsel %vm4448_vm3, %v4447_v24, 0  ;;  %v1730_v38 = vsel %vm15406_vm0, %v12167_v33, %v12233_v39  ;;  %v12389_v40 = vsel %vm14725_vm10, %v4001_v41, %v12265_v54  ;;  %v12403_v54 = vpop.permute.xlu0 %1080  ;;  %v12424_v30 = vpop.permute.xlu1 %1174 }
 0x341   : > { %v4285_v55 = vadd.s32 %v12246_v20, %v12263_v6  ;;  %v4185_v61 = vadd.s32 %v4184_v32, %v4180_v18  ;;  %v4451_v16 = vand.u32 31, %v4449_v15  ;;  %v4297_v59 = vclz %v6953_v23 }
 0x342   : > { %v4445_v14 = vor.u32 8388608, %v4444_v49  ;;  %v12396_v33 = vsel %vm15403_vm12, %v1731_v27, %v987_v47  ;;  %v12399_v39 = vsel %vm15407_vm7, %v1730_v38, %v985_v17  ;;  %v12405_v41 = vshrl.u32 %v4449_v15, 5 }
 0x343   : > { %v4186_v62 = vadd.s32 536870912, %v4185_v61  ;;  %v4452_v20 = vsub.s32 32, %v4451_v16  ;;  %v4337_v6 = vshrl.u32 %v4336_v50, 23  ;;  %v6954_v24 = vadd.s32 4294967294, %v4297_v59 }
 0x344   : > { %v4454_v63 = vshll.u32 %v14783_v29, %v4451_v16  ;;  %v4457_v12 = vshll.u32 %v15391_v37, %v4451_v16  ;;  %v4460_v47 = vshll.u32 %v15392_v13, %v4451_v16  ;;  %v4463_v27 = vshll.u32 %v15396_v11, %v4451_v16  ;;  %v12415_v18 = vpop.eup %7638  ;;  %v12426_v31 = vpop.permute.xlu0 %1172 }
 0x345   : > { %v12410_v9 = vshrl.u32 %v4186_v62, 30  ;;  %v4455_v17 = vshrl.u32 %v15391_v37, %v4452_v20  ;;  %v4458_v49 = vshrl.u32 %v15392_v13, %v4452_v20  ;;  %vm6955_vm6 = vcmp.lt.s32.totalorder %v6954_v24, 0 }
 0x346   : > { %v4461_v50 = vshrl.u32 %v15396_v11, %v4452_v20  ;;  %v4464_v23 = vshrl.u32 %v15397_v0, %v4452_v20  ;;  %v4467_v32 = vshrl.u32 %v15398_v10, %v4452_v20  ;;  %v4300_v15 = vsel %vm6955_vm6, 0, %v6954_v24 }
 0x347   : > { %v4188_v38 = vshll.u32 %v12410_v9, 30  ;;  %v4456_v34 = vor.u32 %v4455_v17, %v4454_v63  ;;  %v4459_v4 = vor.u32 %v4458_v49, %v4457_v12  ;;  %v4305_v59 = vsub.s32 4294967266, %v4300_v15 }
 0x348   : > { %v4462_v62 = vor.u32 %v4461_v50, %v4460_v47  ;;  %v12421_v48 = vshll.u32 %v4445_v14, 8  ;;  %v14726_v21 = vand.u32 2147483647, %v12341_v42  ;;  %v4301_v35 = vsub.s32 32, %v4300_v15 }
 0x349   : > { %v12428_v5 = vsub.s32 %v4185_v61, %v4188_v38  ;;  %v4465_v45 = vor.u32 %v4464_v23, %v4463_v27  ;;  %v4466_v24 = vshll.u32 %v15397_v0, %v4451_v16  ;;  %v4306_v44 = vadd.s32 127, %v4305_v59  ;;  %v12460_v38 = vpop.permute.xlu1 %1178  ;;  %v12462_v59 = vpop.permute.xlu0 %1176 }
 0x34a   : > { %v4453_v63 = vshrl.u32 %v14783_v29, %v4452_v20  ;;  %vm4469_vm3 = vcmp.lt.s32.totalorder %v12405_v41, 1  ;;  %v6956_v12 = vadd.s32 4294967169, %v4337_v6  ;;  %vm4472_vm0 = vcmp.lt.s32.totalorder %v12405_v41, 4 }
 0x34b   : > { %v4191_v14 = vsub.s32 0, %v12428_v5  ;;  %v4468_v47 = vor.u32 %v4467_v32, %v4466_v24  ;;  %v4477_v17 = vsel %vm4469_vm3, %v4456_v34, %v4459_v4  ;;  %v4307_v49 = vshll.u32 %v4306_v44, 23 }
 0x34c   : > { %vm4471_vm12 = vcmp.lt.s32.totalorder %v12405_v41, 3  ;;  %v4474_v61 = vsel %vm4472_vm0, %v4462_v62, 2102212464  ;;  %v4478_v16 = vsel %vm4472_vm0, %v4465_v45, 920167782  ;;  %v4303_v20 = vshrl.u32 %v4285_v55, %v4301_v35 }
 0x34d   : > { %v6949_v6 = vmin.u32 %v4191_v14, %v12428_v5  ;;  %vm4470_vm7 = vcmp.lt.s32.totalorder %v12405_v41, 2  ;;  %v4479_v27 = vsel %vm4471_vm12, %v4462_v62, %v4478_v16  ;;  %v15408_v50 = vand.u32 2147483647, %v15399_v28 }
 0x34e   : > { %v15409_v44 = vmov 0  ;;  %v4473_v23 = vsel %vm4469_vm3, %v4453_v63, %v4456_v34  ;;  %v4475_v32 = vsel %vm4471_vm12, %v4459_v4, %v4474_v61  ;;  %v4480_v35 = vsel %vm4470_vm7, %v4477_v17, %v4479_v27 }
 0x34f   : > { %vm12448_vm6 = vcmp.le.f32.partialorder %v15408_v50, 0.7853982  ;;  %v4481_v55 = vsel %vm4469_vm3, %v4459_v4, %v4462_v62  ;;  %v4193_v24 = vclz %v6949_v6  ;;  %v4482_v14 = vsel %vm4472_vm0, %v4468_v47, 1326507024 }
 0x350   : > { %v15410_v44 = vsel %vm12448_vm6, 4294967295, %v15409_v44  ;;  %v12467_v16 = vmul.u32.u64.low %v12421_v48, %v4480_v35  ;;  %v12468_v34 = vmul.u32.u64.high %v12421_v48, %v4480_v35, %v12467_v16  ;;  %v4302_v63 = vshll.u32 %v12344_v58, %v4300_v15 }
 0x351   : > { %v4308_v61 = vor.u32 4788187, %v4307_v49  ;;  %v4483_v17 = vsel %vm4471_vm12, %v4465_v45, %v4482_v14  ;;  %v4340_v4 = vand.u32 8388607, %v14726_v21  ;;  %v6950_v62 = vadd.s32 4294967294, %v4193_v24 }
 0x352   : > { %v4484_v6 = vsel %vm4470_vm7, %v4481_v55, %v4483_v17  ;;  %v4343_v27 = vadd.s32 1, %v6956_v12  ;;  %vm15411_vm3 = vcmask 293888   ;;  %v4304_v50 = vor.u32 %v4303_v20, %v4302_v63  ;;  %v12500_v20 = vpop.permute.xlu1 %1270 }
 0x353   : > { %v12481_v47 = vsel %vm15411_vm3, %v12359_v52, %v12348_v22  ;;  %v4476_v58 = vsel %vm4470_vm7, %v4473_v23, %v4475_v32  ;;  %v12486_v15 = vmul.u32.u64.low %v12421_v48, %v4484_v6  ;;  %v12487_v45 = vmul.u32.u64.high %v12421_v48, %v4484_v6, %v12486_v15  ;;  %vm15412_vm10 = vmmov %vm15411_vm3  ;;  %v12502_v23 = vpop.permute.xlu0 %1268 }
 0x354   : > { %vm6951_vm0 = vcmp.lt.s32.totalorder %v6950_v62, 0  ;;  %v4495_v49 = vadd.s32 1, %v12468_v34  ;;  %vm4344_vm12 = vcmp.gt.s32.totalorder %v4343_v27, 0  ;;  %v12493_v12 = vsel %vm15412_vm10, %v12364_v46, %v12350_v36 }
 0x355   : > { %v4309_v35 = vand.u32 2147483647, %v4308_v61  ;;  %v4196_v22 = vsel %vm6951_vm0, 0, %v6950_v62  ;;  %v4345_v52 = vsel %vm4344_vm12, %v4343_v27, 0  ;;  %v12498_v41 = vsel %vm15411_vm3, %v12396_v33, %v12401_v26 }
 0x356   : > { %7640 = vsinq.f32 %v12259_v57  ;;  %v4181_v32 = vadd.s32 %v12332_v1, %v12338_v25  ;;  %v4197_v55 = vsub.s32 32, %v4196_v22  ;;  %v4201_v36 = vsub.s32 4294967266, %v4196_v22 }
 0x357   : > { %v4311_v46 = vcvt.s32.f32 %v4304_v50  ;;  %v4492_v24 = vmul.u32 %v12421_v48, %v4476_v58  ;;  %vm4494_vm10 = vc.u32 %v12487_v45, %v12467_v16  ;;  %v4347_v14 = vand.u32 31, %v4345_v52 }
 0x358   : > { %v12514_v33 = vsel %vm12448_vm6, %v15399_v28, %v12389_v40  ;;  %v4199_v26 = vshrl.u32 %v4181_v32, %v4197_v55  ;;  %v4202_v57 = vadd.s32 127, %v4201_v36  ;;  %v4496_v63 = vsel %vm4494_vm10, %v4495_v49, %v12468_v34  ;;  %v12522_v32 = vpop.permute.xlu1 %510  ;;  %v12524_v34 = vpop.permute.xlu0 %508 }
 0x359   : > { %v4312_v1 = vmul.f32 %v4311_v46, %v4309_v35  ;;  %v4497_v25 = vadd.s32 %v4496_v63, %v4492_v24  ;;  %v4341_v61 = vor.u32 8388608, %v4340_v4  ;;  %v4348_v17 = vsub.s32 32, %v4347_v14 }
 0x35a   : > { %v4198_v48 = vshll.u32 %v12428_v5, %v4196_v22  ;;  %v4203_v62 = vshll.u32 %v4202_v57, 23  ;;  %v4346_v6 = vshrl.u32 %v4345_v52, 5  ;;  %v4350_v27 = vshll.u32 %v14783_v29, %v4347_v14 }
 0x35b   : > { %v4498_v50 = vadd.s32 536870912, %v4497_v25  ;;  %v4351_v58 = vshrl.u32 %v15391_v37, %v4348_v17  ;;  %v4353_v40 = vshll.u32 %v15391_v37, %v4347_v14  ;;  %v4354_v15 = vshrl.u32 %v15392_v13, %v4348_v17  ;;  %v15533_v37 = vld [vmem:[#allocation47_spill] sm:$0xff] }
 0x35c   : > { %v4200_v4 = vor.u32 %v4199_v26, %v4198_v48  ;;  %v4204_v49 = vor.u32 4788187, %v4203_v62  ;;  %v4356_v5 = vshll.u32 %v15392_v13, %v4347_v14  ;;  %v4357_v35 = vshrl.u32 %v15396_v11, %v4348_v17 }
 0x35d   : > { %v12529_v22 = vshrl.u32 %v4498_v50, 30  ;;  %v4352_v52 = vor.u32 %v4351_v58, %v4350_v27  ;;  %v4355_v55 = vor.u32 %v4354_v15, %v4353_v40  ;;  %v12531_v36 = vshll.u32 %v4341_v61, 8 }
 0x35e   : > { %v4205_v46 = vand.u32 2147483647, %v4204_v49  ;;  %v4358_v24 = vor.u32 %v4357_v35, %v4356_v5  ;;  %v4359_v57 = vshll.u32 %v15396_v11, %v4347_v14  ;;  %v4360_v63 = vshrl.u32 %v15397_v0, %v4348_v17  ;;  %v607_v49 = vpop.permute.xlu1 %606  ;;  %v605_v5 = vpop.permute.xlu0 %604 }
 0x35f   : > { %v4313_v21 = vxor.u32 2147483648, %v4312_v1  ;;  %v4500_v26 = vshll.u32 %v12529_v22, 30  ;;  %v4362_v48 = vshll.u32 %v15397_v0, %v4347_v14  ;;  %v4363_v62 = vshrl.u32 %v15398_v10, %v4348_v17 }
 0x360   : > { %v12538_v13 = vpop.eup %7640  ;;  %v4207_v50 = vcvt.s32.f32 %v4200_v4  ;;  %v4349_v27 = vshrl.u32 %v14783_v29, %v4348_v17  ;;  %v4361_v61 = vor.u32 %v4360_v63, %v4359_v57  ;;  %vm4368_vm0 = vcmp.lt.s32.totalorder %v4346_v6, 4 }
 0x361   : > { %v12541_v58 = vsub.s32 %v4497_v25, %v4500_v26  ;;  %v4364_v40 = vor.u32 %v4363_v62, %v4362_v48  ;;  %vm4365_vm12 = vcmp.lt.s32.totalorder %v4346_v6, 1  ;;  %v4370_v15 = vsel %vm4368_vm0, %v4358_v24, 2102212464 }
 0x362   : > { %v4208_v35 = vmul.f32 %v4207_v50, %v4205_v46  ;;  %vm4367_vm3 = vcmp.lt.s32.totalorder %v4346_v6, 3  ;;  %v4373_v14 = vsel %vm4365_vm12, %v4352_v52, %v4355_v55  ;;  %v4374_v10 = vsel %vm4368_vm0, %v4361_v61, 920167782 }
 0x363   : > { %v4503_v0 = vsub.s32 0, %v12541_v58  ;;  %vm4366_vm10 = vcmp.lt.s32.totalorder %v4346_v6, 2  ;;  %v4375_v4 = vsel %vm4367_vm3, %v4358_v24, %v4374_v10  ;;  %v4377_v17 = vsel %vm4365_vm12, %v4355_v55, %v4358_v24 }
 0x364   : > { %v15413_v57 = vand.u32 2147483647, %v12096_v53  ;;  %v4369_v63 = vsel %vm4365_vm12, %v4349_v27, %v4352_v52  ;;  %v4371_v26 = vsel %vm4367_vm3, %v4355_v55, %v4370_v15  ;;  %v4376_v48 = vsel %vm4366_vm10, %v4373_v14, %v4375_v4  ;;  %v15418_v14 = vld [vmem:[#allocation18_spill] sm:$0xff] }
 0x365   : > { %v4378_v46 = vsel %vm4368_vm0, %v4364_v40, 1326507024  ;;  %vm15416_vm5 = vcmp.lt.s32.totalorder %v12096_v53, 0  ;;  %v6961_v10 = vmin.u32 %v4503_v0, %v12541_v58  ;;  %vm15417_vm6 = vcmask 293888   ;;  %v1275_v0 = vpop.permute.xlu1 %1274 }
 0x366   : > { %vm12548_vm7 = vcmp.le.f32.partialorder %v15413_v57, 0.7853982  ;;  %v4314_v62 = vsel %vm15416_vm5, %v4313_v21, %v4312_v1  ;;  %v4379_v24 = vsel %vm4367_vm3, %v4361_v61, %v4378_v46  ;;  %v1796_v50 = vsel %vm15417_vm6, %v12399_v39, %v12403_v54  ;;  %v1273_v61 = vpop.permute.xlu0 %1272 }
 0x367   : > { %v4209_v57 = vxor.u32 2147483648, %v4208_v35  ;;  %v4380_v52 = vsel %vm4366_vm10, %v4377_v17, %v4379_v24  ;;  %v12563_v55 = vmul.u32.u64.low %v12531_v36, %v4376_v48  ;;  %v12564_v27 = vmul.u32.u64.high %v12531_v36, %v4376_v48, %v12563_v55 }
 0x368   : > { %v4505_v40 = vclz %v6961_v10  ;;  %v4372_v15 = vsel %vm4366_vm10, %v4369_v63, %v4371_v26  ;;  %v12568_v21 = vmul.u32.u64.low %v12531_v36, %v4380_v52  ;;  %v12569_v1 = vmul.u32.u64.high %v12531_v36, %v4380_v52, %v12568_v21  ;;  %v15434_v10 = vld [vmem:[#allocation30_spill] sm:$0xff] }
 0x369   : > { %vm15419_vm6 = vcmask 343040   ;;  %vm15423_vm10 = vcmask 392192   ;;  %vm2452_vm15 = vcmp.lt.s32.totalorder %v12188_v60, 2  ;;  %7642 = vcosq.f32 %v12514_v33  ;;  %v15442_v21 = vld [vmem:[#allocation68_spill] sm:$0xff] }
 0x36a   : > { %v1828_v39 = vsel %vm15419_vm6, %v12481_v47, %v12424_v30  ;;  %vm15420_vm0 = vmmov %vm15419_vm6  ;;  %v6962_v17 = vadd.s32 4294967294, %v4505_v40  ;;  %vm15425_vm6 = vcmask 48128   ;;  %v15433_v48 = vxor.u32 2147483648, %v15401_v3 }
 0x36b   : > { %v1827_v54 = vsel %vm15420_vm0, %v12493_v12, %v12426_v31  ;;  %vm15421_vm12 = vmmov %vm15420_vm0  ;;  %v1861_v63 = vsel %vm15423_vm10, %v1828_v39, %v12500_v20  ;;  %v12589_v30 = vsel %vm15425_vm6, %v12522_v32, %v607_v49  ;;  %v4391_v31 = vadd.s32 1, %v12564_v27 }
 0x36c   : > { %v1830_v6 = vsel %vm15421_vm12, %v12498_v41, %v12460_v38  ;;  %vm15422_vm3 = vmmov %vm15420_vm0  ;;  %15426 = vst [vmem:[#allocation75_spill] sm:$0xff] %v12589_v30  ;;  %v4388_v12 = vmul.u32 %v12531_v36, %v4372_v15  ;;  %v2131_v24 = vsub.s32 4, %v15434_v10  ;;  %7644 = vsinq.f32 %v12514_v33 }
 0x36d   : > { %v1829_v4 = vsel %vm15422_vm3, %v1796_v50, %v12462_v59  ;;  %vm15424_vm5 = vmmov %vm15423_vm10  ;;  %vm6963_vm10 = vcmp.lt.s32.totalorder %v6962_v17, 0  ;;  %v15435_v50 = vand.u32 2147483647, %v12117_v2  ;;  %v3393_v29 = vxor.u32 2147483648, %v15533_v37 }
 0x36e   : > { %v1860_v26 = vsel %vm15424_vm5, %v1827_v54, %v12502_v23  ;;  %vm15427_vm0 = vmmov %vm15425_vm6  ;;  %vm2453_vm6 = vcmp.eq.s32.totalorder %v12188_v60, 0  ;;  %v4508_v41 = vsel %vm6963_vm10, 0, %v6962_v17  ;;  %v15431_v23 = vxor.u32 2147483648, %v15389_v7 }
 0x36f   : > { %v12594_v47 = vsel %vm15427_vm0, %v12524_v34, %v605_v5  ;;  %vm15429_vm12 = vmmov %vm15424_vm5  ;;  %v12614_v34 = vsel %vm12548_vm7, %v12096_v53, %v4314_v62  ;;  %vm2456_vm0 = vcmp.eq.s32.totalorder %v12188_v60, 2  ;;  %v4513_v5 = vsub.s32 4294967266, %v4508_v41 }
 0x370   : > { %15428 = vst [vmem:[#allocation89_spill] sm:$0xff] %v12594_v47  ;;  %v12597_v38 = vsel %vm15429_vm12, %v1830_v6, %v1275_v0  ;;  %vm15430_vm3 = vmmov %vm15424_vm5  ;;  %vm4390_vm5 = vc.u32 %v12569_v1, %v12563_v55  ;;  %v2455_v32 = vsel %vm2453_vm6, %v15401_v3, %v15431_v23  ;;  %vm15432_vm12 = vcmp.lt.s32.totalorder %v12117_v2, 0  ;;  %v1365_v0 = vpop.permute.xlu0 %1364  ;;  %v15444_v6 = vld [vmem:[#allocation12_spill] sm:$0xff]  ;;  %v15446_v23 = vld [vmem:[#allocation9_spill] sm:$0xff] }
 0x371   : > { %v12600_v59 = vsel %vm15430_vm3, %v1829_v4, %v1273_v61  ;;  %v4392_v20 = vsel %vm4390_vm5, %v4391_v31, %v12564_v27  ;;  %v4210_v49 = vsel %vm15432_vm12, %v4209_v57, %v4208_v35  ;;  %v2458_v46 = vsel %vm2456_vm0, %v15433_v48, %v15389_v7  ;;  %v15439_v7 = vld [vmem:[#allocation13_spill] sm:$0xff] }
 0x372   : > { %v4393_v36 = vadd.s32 %v4392_v20, %v4388_v12  ;;  %vm12626_vm3 = vcmp.le.f32.partialorder %v15435_v50, 0.7853982  ;;  %v2459_v60 = vsel %vm2452_vm15, %v2455_v32, %v2458_v46  ;;  %v4493_v35 = vadd.s32 %v12467_v16, %v12487_v45  ;;  %v15441_v27 = vld [vmem:[#allocation25_spill] sm:$0xff]  ;;  %v1367_v45 = vpop.permute.xlu1 %1366 }
 0x373   : > { %vm15438_vm10 = vweird.f32 %v15418_v14  ;;  %vm15440_vm5 = vcmp.lt.s32.totalorder %v15439_v7, 0  ;;  %v2235_v33 = vsub.s32 4, %v15441_v27  ;;  %7646 = vcosq.f32 %v12614_v34 }
 0x374   : > { %v4394_v52 = vadd.s32 536870912, %v4393_v36  ;;  %v2460_v57 = vsel %vm15438_vm10, nan, %v2459_v60  ;;  %v2132_v3 = vsel %vm15440_vm5, %v2131_v24, %v15434_v10  ;;  %v12642_v40 = vsel %vm12626_vm3, %v12117_v2, %v4210_v49 }
 0x375   : > { %v5374_v16 = vpack.c.bf16 %v2460_v57, %v15442_v21  ;;  %v4509_v61 = vsub.s32 32, %v4508_v41  ;;  %v4514_v14 = vadd.s32 127, %v4513_v5  ;;  %v2134_v54 = vsel %vm9120_vm11, 0, %v2132_v3  ;;  %v12672_v57 = vpop.eup %7642  ;;  %v15452_v3 = vld [vmem:[#allocation8_spill] sm:$0xff] }
 0x376   : > { %v12644_v15 = vshrl.u32 %v4394_v52, 30  ;;  %vm15445_vm15 = vcmp.lt.s32.totalorder %v15444_v6, 0  ;;  %v4510_v17 = vshll.u32 %v12541_v58, %v4508_v41  ;;  %v12654_v31 = vadd.s32 %v12563_v55, %v12569_v1  ;;  %v15450_v1 = vld [vmem:[#allocation11_spill] sm:$0xff]  ;;  %v15451_v52 = vld [vmem:[#allocation5_spill] sm:$0xff] }
 0x377   : > { %v2236_v4 = vsel %vm15445_vm15, %v2235_v33, %v15441_v27  ;;  %5407 = vrot.lane.b32.xlu1 %v5374_v16, %s15289_s24  ;;  %v2138_v20 = vadd.s32 3, %v2134_v54  ;;  %v2142_v32 = vxor.u32 2147483648, %v15446_v23  ;;  %vm15448_vm11 = vcmask 441344   ;;  %v15453_v27 = vld [vmem:[#allocation7_spill] sm:$0xff] }
 0x378   : > { %v4396_v12 = vshll.u32 %v12644_v15, 30  ;;  %v2238_v5 = vsel %vm9101_vm14, 0, %v2236_v4  ;;  %v12662_v48 = vsel %vm15448_vm11, %v1861_v63, %v1367_v45  ;;  %vm15449_vm6 = vmmov %vm15448_vm11  ;;  %v2145_v41 = vxor.u32 2147483648, %v15450_v1  ;;  %v12681_v45 = vpop.eup %7644 }
 0x379   : > { %v12665_v46 = vsel %vm15449_vm6, %v1860_v26, %v1365_v0  ;;  %v2139_v55 = vand.u32 3, %v2138_v20  ;;  %v2242_v10 = vadd.s32 3, %v2238_v5  ;;  %v4511_v24 = vshrl.u32 %v4493_v35, %v4509_v61  ;;  %v15454_v35 = vld [vmem:[#allocation31_spill] sm:$0xff] }
 0x37a   : > { %v12667_v58 = vsub.s32 %v4393_v36, %v4396_v12  ;;  %v4515_v50 = vshll.u32 %v4514_v14, 23  ;;  %vm2137_vm0 = vweird.f32 %v15439_v7  ;;  %v2755_v60 = vsub.s32 4, %v15451_v52 }
 0x37b   : > { %vm2141_vm14 = vcmp.eq.s32.totalorder %v2139_v55, 0  ;;  %v2246_v26 = vxor.u32 2147483648, %v15452_v3  ;;  %v2249_v36 = vxor.u32 2147483648, %v15453_v27  ;;  %vm2144_vm12 = vcmp.eq.s32.totalorder %v2139_v55, 2 }
 0x37c   : > { %v4399_v63 = vsub.s32 0, %v12667_v58  ;;  %v2143_v33 = vsel %vm2141_vm14, %v15450_v1, %v2142_v32  ;;  %v2243_v21 = vand.u32 3, %v2242_v10  ;;  %vm15455_vm10 = vcmp.lt.s32.totalorder %v15454_v35, 0  ;;  %v15457_v1 = vld [vmem:[#allocation51_spill] sm:$0xff] }
 0x37d   : > { %v2756_v16 = vsel %vm15455_vm10, %v2755_v60, %v15451_v52  ;;  %vm2140_vm5 = vcmp.lt.s32.totalorder %v2139_v55, 2  ;;  %v2146_v61 = vsel %vm2144_vm12, %v2145_v41, %v15446_v23  ;;  %v12687_v54 = vor.u32 %v4511_v24, %v4510_v17  ;;  %v12691_v20 = vpop.eup %7646  ;;  %v15458_v24 = vld [vmem:[#allocation45_spill] sm:$0xff] }
 0x37e   : > { %v6957_v0 = vmin.u32 %v4399_v63, %v12667_v58  ;;  %v2758_v39 = vsel %vm10436_vm9, 0, %v2756_v16  ;;  %v12689_v4 = vor.u32 4788187, %v4515_v50  ;;  %v2147_v12 = vsel %vm2140_vm5, %v2143_v33, %v2146_v61  ;;  %v15459_v63 = vld [vmem:[#allocation66_spill] sm:$0xff] }
 0x37f   : > { %vm2245_vm15 = vcmp.eq.s32.totalorder %v2243_v21, 0  ;;  %vm2244_vm11 = vcmp.lt.s32.totalorder %v2243_v21, 2  ;;  %vm2248_vm6 = vcmp.eq.s32.totalorder %v2243_v21, 2  ;;  %v2148_v5 = vsel %vm2137_vm0, nan, %v2147_v12  ;;  %v15463_v12 = vld [vmem:[#allocation38_spill] sm:$0xff] }
 0x380   : > { %v4401_v32 = vclz %v6957_v0  ;;  %v2247_v49 = vsel %vm2245_vm15, %v15453_v27, %v2246_v26  ;;  %v2250_v23 = vsel %vm2248_vm6, %v2249_v36, %v15452_v3  ;;  %v2762_v55 = vadd.s32 3, %v2758_v39  ;;  %v15460_v26 = vld [vmem:[#allocation22_spill] sm:$0xff] }
 0x381   : > { %v2859_v17 = vsub.s32 4, %v15457_v1  ;;  %vm2241_vm9 = vweird.f32 %v15444_v6  ;;  %v2251_v10 = vsel %vm2244_vm11, %v2247_v49, %v2250_v23  ;;  %v2766_v50 = vxor.u32 2147483648, %v15458_v24 }
 0x382   : > { %v6958_v41 = vadd.s32 4294967294, %v4401_v32  ;;  %v2252_v52 = vsel %vm2241_vm9, nan, %v2251_v10  ;;  %v2763_v60 = vand.u32 3, %v2762_v55  ;;  %v2769_v33 = vxor.u32 2147483648, %v15459_v63  ;;  %v15465_v55 = vld [vmem:[#allocation36_spill] sm:$0xff]  ;;  %v15466_v10 = vld [vmem:[#allocation29_spill] sm:$0xff] }
 0x383   : > { %vm15461_vm14 = vcmp.lt.s32.totalorder %v15460_v26, 0  ;;  %v4519_v27 = vcvt.s32.f32 %v12687_v54  ;;  %v5373_v3 = vpack.c.bf16 %v2252_v52, %v2148_v5  ;;  %v4517_v6 = vand.u32 2147483647, %v12689_v4  ;;  %v15464_v4 = vld [vmem:[#allocation14_spill] sm:$0xff] }
 0x384   : > { %v2860_v7 = vsel %vm15461_vm14, %v2859_v17, %v15457_v1  ;;  %vm6959_vm0 = vcmp.lt.s32.totalorder %v6958_v41, 0  ;;  %vm2761_vm12 = vweird.f32 %v15454_v35  ;;  %vm2765_vm10 = vcmp.eq.s32.totalorder %v2763_v60, 0 }
 0x385   : > { %v2862_v21 = vsel %vm10311_vm8, 0, %v2860_v7  ;;  %v4404_v16 = vsel %vm6959_vm0, 0, %v6958_v41  ;;  %5405 = vrot.lane.b32.xlu0 %v5373_v3, %s15289_s24  ;;  %v2767_v14 = vsel %vm2765_vm10, %v15459_v63, %v2766_v50  ;;  %vm2768_vm5 = vcmp.eq.s32.totalorder %v2763_v60, 2  ;;  %v15477_v63 = vld [vmem:[#allocation39_spill] sm:$0xff] }
 0x386   : > { %v4405_v0 = vsub.s32 32, %v4404_v16  ;;  %v4409_v61 = vsub.s32 4294967266, %v4404_v16  ;;  %vm2764_vm15 = vcmp.lt.s32.totalorder %v2763_v60, 2  ;;  %v2770_v39 = vsel %vm2768_vm5, %v2769_v33, %v15458_v24 }
 0x387   : > { %v2866_v54 = vadd.s32 3, %v2862_v21  ;;  %v2547_v32 = vsub.s32 4, %v15463_v12  ;;  %v2771_v5 = vsel %vm2764_vm15, %v2767_v14, %v2770_v39  ;;  %v2870_v23 = vxor.u32 2147483648, %v15464_v4  ;;  %v15471_v39 = vld [vmem:[#allocation35_spill] sm:$0xff] }
 0x388   : > { %v4410_v49 = vadd.s32 127, %v4409_v61  ;;  %v2873_v1 = vxor.u32 2147483648, %v15465_v55  ;;  %v4406_v17 = vshll.u32 %v12667_v58, %v4404_v16  ;;  %vm2865_vm8 = vweird.f32 %v15460_v26  ;;  %v15469_v58 = vld [vmem:[#allocation40_spill] sm:$0xff]  ;;  %v15470_v16 = vld [vmem:[#allocation33_spill] sm:$0xff] }
 0x389   : > { %v2867_v41 = vand.u32 3, %v2866_v54  ;;  %vm15467_vm11 = vcmp.lt.s32.totalorder %v15466_v10, 0  ;;  %v4407_v24 = vshrl.u32 %v12654_v31, %v4405_v0  ;;  %v2772_v60 = vsel %vm2761_vm12, nan, %v2771_v5  ;;  %v12729_v31 = vpop.permute.xlu1 %514  ;;  %v12737_v5 = vpop.permute.xlu0 %512 }
 0x38a   : > { %v2548_v50 = vsel %vm15467_vm11, %v2547_v32, %v15463_v12  ;;  %v4411_v52 = vshll.u32 %v4410_v49, 23  ;;  %v2558_v3 = vxor.u32 2147483648, %v15469_v58  ;;  %v2561_v61 = vxor.u32 2147483648, %v15470_v16  ;;  %15472 = vst [vmem:[#allocation90_spill] sm:$0xff] %v12737_v5 }
 0x38b   : > { %v2550_v33 = vsel %vm9828_vm2, 0, %v2548_v50  ;;  %vm2869_vm6 = vcmp.eq.s32.totalorder %v2867_v41, 0  ;;  %vm2872_vm9 = vcmp.eq.s32.totalorder %v2867_v41, 2  ;;  %vm2868_vm14 = vcmp.lt.s32.totalorder %v2867_v41, 2 }
 0x38c   : > { %v2554_v7 = vadd.s32 3, %v2550_v33  ;;  %v2871_v36 = vsel %vm2869_vm6, %v15465_v55, %v2870_v23  ;;  %v2874_v21 = vsel %vm2872_vm9, %v2873_v1, %v15464_v4  ;;  %v4412_v0 = vor.u32 4788187, %v4411_v52 }
 0x38d   : > { %v2875_v35 = vsel %vm2868_vm14, %v2871_v36, %v2874_v21  ;;  %v2651_v54 = vsub.s32 4, %v15471_v39  ;;  %7648 = vsinq.f32 %v12614_v34  ;;  %v12733_v12 = vmul.f32 %v4519_v27, %v4517_v6  ;;  %v15473_v34 = vld [vmem:[#allocation24_spill] sm:$0xff]  ;;  %v15481_v21 = vld [vmem:[#allocation71_spill] sm:$0xff] }
 0x38e   : > { %v2555_v14 = vand.u32 3, %v2554_v7  ;;  %v4408_v32 = vor.u32 %v4407_v24, %v4406_v17  ;;  %v2876_v49 = vsel %vm2865_vm8, nan, %v2875_v35  ;;  %7650 = vcosq.f32 %v12642_v40  ;;  %v15476_v17 = vld [vmem:[#allocation16_spill] sm:$0xff]  ;;  %v15478_v7 = vld [vmem:[#allocation23_spill] sm:$0xff] }
 0x38f   : > { %v5376_v4 = vpack.c.bf16 %v2876_v49, %v2772_v60  ;;  %7652 = vsinq.f32 %v12642_v40  ;;  %vm15474_vm12 = vcmp.lt.s32.totalorder %v15473_v34, 0  ;;  %v4413_v6 = vand.u32 2147483647, %v4412_v0  ;;  %v12751_v60 = vpop.permute.xlu1 %610  ;;  %v15484_v49 = vld [vmem:[#allocation49_spill] sm:$0xff] }
 0x390   : > { %vm2557_vm2 = vcmp.eq.s32.totalorder %v2555_v14, 0  ;;  %vm2560_vm0 = vcmp.eq.s32.totalorder %v2555_v14, 2  ;;  %v2652_v27 = vsel %vm15474_vm12, %v2651_v54, %v15471_v39  ;;  %vm2556_vm10 = vcmp.lt.s32.totalorder %v2555_v14, 2  ;;  %v12763_v14 = vpop.permute.xlu0 %608 }
 0x391   : > { %v2559_v23 = vsel %vm2557_vm2, %v15470_v16, %v2558_v3  ;;  %v2562_v55 = vsel %vm2560_vm0, %v2561_v61, %v15469_v58  ;;  %5411 = vrot.lane.b32.xlu1 %v5376_v4, %s15289_s24  ;;  %v2654_v1 = vsel %vm9797_vm1, 0, %v2652_v27  ;;  %v3171_v41 = vsub.s32 4, %v15476_v17  ;;  %v15479_v3 = vld [vmem:[#allocation55_spill] sm:$0xff]  ;;  %15483 = vst [vmem:[#allocation74_spill] sm:$0xff] %v12763_v14 }
 0x392   : > { %v4415_v40 = vcvt.s32.f32 %v4408_v32  ;;  %v2563_v24 = vsel %vm2556_vm10, %v2559_v23, %v2562_v55  ;;  %v2658_v52 = vadd.s32 3, %v2654_v1  ;;  %v2662_v33 = vxor.u32 2147483648, %v15477_v63  ;;  %v15486_v23 = vld [vmem:[#allocation61_spill] sm:$0xff]  ;;  %v15487_v55 = vld [vmem:[#allocation76_spill] sm:$0xff] }
 0x393   : > { %v2665_v58 = vxor.u32 2147483648, %v15478_v7  ;;  %vm15480_vm5 = vcmp.lt.s32.totalorder %v15479_v3, 0  ;;  %v3275_v16 = vsub.s32 4, %v15481_v21  ;;  %vm2553_vm1 = vweird.f32 %v15466_v10 }
 0x394   : > { %v3172_v36 = vsel %vm15480_vm5, %v3171_v41, %v15476_v17  ;;  %vm2657_vm15 = vweird.f32 %v15473_v34  ;;  %v2659_v61 = vand.u32 3, %v2658_v52  ;;  %v12765_v39 = vmul.f32 %v4415_v40, %v4413_v6  ;;  %v15488_v40 = vld [vmem:[#allocation84_spill] sm:$0xff]  ;;  %v15490_v52 = vld [vmem:[#allocation59_spill] sm:$0xff]  ;;  %v15494_v34 = vld [vmem:[#allocation57_spill] sm:$0xff] }
 0x395   : > { %v3174_v35 = vsel %vm11170_vm4, 0, %v3172_v36  ;;  %v2564_v54 = vsel %vm2553_vm1, nan, %v2563_v24  ;;  %vm15485_vm8 = vcmp.lt.s32.totalorder %v15484_v49, 0  ;;  %v3182_v10 = vxor.u32 2147483648, %v15486_v23 }
 0x396   : > { %v3178_v32 = vadd.s32 3, %v3174_v35  ;;  %v3276_v4 = vsel %vm15485_vm8, %v3275_v16, %v15481_v21  ;;  %vm2661_vm11 = vcmp.eq.s32.totalorder %v2659_v61, 0  ;;  %vm2664_vm6 = vcmp.eq.s32.totalorder %v2659_v61, 2  ;;  %v12780_v21 = vpop.permute.xlu1 %702  ;;  %v12791_v35 = vpop.permute.xlu0 %700 }
 0x397   : > { %v3185_v27 = vxor.u32 2147483648, %v15487_v55  ;;  %vm2660_vm9 = vcmp.lt.s32.totalorder %v2659_v61, 2  ;;  %v2663_v26 = vsel %vm2661_vm11, %v15478_v7, %v2662_v33  ;;  %v2666_v1 = vsel %vm2664_vm6, %v2665_v58, %v15477_v63  ;;  %v12774_v6 = vpop.eup %7648  ;;  %15491 = vst [vmem:[#allocation98_spill] sm:$0xff] %v12780_v21  ;;  %15492 = vst [vmem:[#allocation99_spill] sm:$0xff] %v12791_v35  ;;  %v15506_v35 = vld [vmem:[#allocation63_spill] sm:$0xff] }
 0x398   : > { %v3179_v17 = vand.u32 3, %v3178_v32  ;;  %v2667_v41 = vsel %vm2660_vm9, %v2663_v26, %v2666_v1  ;;  %vm3177_vm4 = vweird.f32 %v15479_v3  ;;  %vm15489_vm14 = vnez %v15488_v40  ;;  %v12782_v16 = vpop.eup %7650  ;;  %v15507_v21 = vld [vmem:[#allocation15_spill] sm:$0xff] }
 0x399   : > { %v3278_v24 = vsel %vm15489_vm14, 0, %v3276_v4  ;;  %v2963_v36 = vsub.s32 4, %v15490_v52  ;;  %v2668_v33 = vsel %vm2657_vm15, nan, %v2667_v41  ;;  %v12786_v63 = vpop.eup %7652  ;;  %vm4439_vm10 = vcmp.lt.s32.totalorder %v12203_v19, 0  ;;  %v15493_v4 = vld [vmem:[#allocation42_spill] sm:$0xff] }
 0x39a   : > { %vm3180_vm2 = vcmp.lt.s32.totalorder %v3179_v17, 2  ;;  %vm3181_vm0 = vcmp.eq.s32.totalorder %v3179_v17, 0  ;;  %vm3184_vm12 = vcmp.eq.s32.totalorder %v3179_v17, 2  ;;  %v5375_v7 = vpack.c.bf16 %v2668_v33, %v2564_v54  ;;  %v15495_v41 = vld [vmem:[#allocation34_spill] sm:$0xff]  ;;  %v12818_v5 = vpop.permute.xlu0 %1368 }
 0x39b   : > { %v3183_v58 = vsel %vm3181_vm0, %v15487_v55, %v3182_v10  ;;  %v3186_v61 = vsel %vm3184_vm12, %v3185_v27, %v15486_v23  ;;  %v3282_v0 = vadd.s32 3, %v3278_v24  ;;  %v3286_v26 = vxor.u32 2147483648, %v15493_v4  ;;  %v15497_v10 = vld [vmem:[#allocation41_spill] sm:$0xff]  ;;  %v15499_v55 = vld [vmem:[#allocation50_spill] sm:$0xff] }
 0x39c   : > { %v3187_v32 = vsel %vm3180_vm2, %v3183_v58, %v3186_v61  ;;  %v3289_v1 = vxor.u32 2147483648, %v15494_v34  ;;  %vm15496_vm5 = vcmp.lt.s32.totalorder %v15495_v41, 0  ;;  %5409 = vrot.lane.b32.xlu0 %v5375_v7, %s15289_s24  ;;  %vm3281_vm1 = vweird.f32 %v15484_v49  ;;  %v15500_v33 = vld [vmem:[#allocation46_spill] sm:$0xff]  ;;  %v15501_v61 = vld [vmem:[#allocation37_spill] sm:$0xff]  ;;  %v12810_v7 = vpop.permute.xlu1 %1370 }
 0x39d   : > { %v2964_v17 = vsel %vm15496_vm5, %v2963_v36, %v15490_v52  ;;  %v3283_v54 = vand.u32 3, %v3282_v0  ;;  %vm15498_vm15 = vnez %v15497_v10  ;;  %v3067_v27 = vsub.s32 4, %v15499_v55  ;;  %v15502_v52 = vld [vmem:[#allocation19_spill] sm:$0xff] }
 0x39e   : > { %v2966_v23 = vsel %vm15498_vm15, 0, %v2964_v17  ;;  %v3188_v40 = vsel %vm3177_vm4, nan, %v3187_v32  ;;  %v2974_v58 = vxor.u32 2147483648, %v15500_v33  ;;  %v2977_v50 = vxor.u32 2147483648, %v15501_v61  ;;  %v15504_v32 = vld [vmem:[#allocation27_spill] sm:$0xff] }
 0x39f   : > { %v2970_v24 = vadd.s32 3, %v2966_v23  ;;  %vm3284_vm8 = vcmp.lt.s32.totalorder %v3283_v54, 2  ;;  %vm3285_vm11 = vcmp.eq.s32.totalorder %v3283_v54, 0  ;;  %vm3288_vm6 = vcmp.eq.s32.totalorder %v3283_v54, 2 }
 0x3a0   : > { %vm15503_vm9 = vcmp.lt.s32.totalorder %v15502_v52, 0  ;;  %v3287_v0 = vsel %vm3285_vm11, %v15494_v34, %v3286_v26  ;;  %v3290_v17 = vsel %vm3288_vm6, %v3289_v1, %v15493_v4  ;;  %vm15505_vm4 = vnez %v15504_v32  ;;  %v15513_v32 = vld [vmem:[#allocation86_spill] sm:$0xff] }
 0x3a1   : > { %v3068_v36 = vsel %vm15503_vm9, %v3067_v27, %v15499_v55  ;;  %v2971_v3 = vand.u32 3, %v2970_v24  ;;  %v3291_v23 = vsel %vm3284_vm8, %v3287_v0, %v3290_v17  ;;  %v3078_v30 = vxor.u32 2147483648, %v15506_v35 }
 0x3a2   : > { %v3070_v10 = vsel %vm15505_vm4, 0, %v3068_v36  ;;  %v3081_v54 = vxor.u32 2147483648, %v15507_v21  ;;  %v3292_v55 = vsel %vm3281_vm1, nan, %v3291_v23  ;;  %v15508_v27 = vxor.u32 2147483648, %v12733_v12  ;;  %v15509_v36 = vld [vmem:[#allocation53_spill] sm:$0xff]  ;;  %v12846_v23 = vpop.permute.xlu0 %1460 }
 0x3a3   : > { %v3074_v47 = vadd.s32 3, %v3070_v10  ;;  %vm2972_vm14 = vcmp.lt.s32.totalorder %v2971_v3, 2  ;;  %vm2973_vm2 = vcmp.eq.s32.totalorder %v2971_v3, 0  ;;  %vm2976_vm0 = vcmp.eq.s32.totalorder %v2971_v3, 2 }
 0x3a4   : > { %v5378_v26 = vpack.c.bf16 %v3292_v55, %v3188_v40  ;;  %v2975_v4 = vsel %vm2973_vm2, %v15501_v61, %v2974_v58  ;;  %v2978_v34 = vsel %vm2976_vm0, %v2977_v50, %v15500_v33  ;;  %v12829_v24 = vsel %vm4439_vm10, %v15508_v27, %v12733_v12  ;;  %v15510_v33 = vld [vmem:[#allocation44_spill] sm:$0xff] }
 0x3a5   : > { %v3075_v1 = vand.u32 3, %v3074_v47  ;;  %vm2969_vm12 = vweird.f32 %v15495_v41  ;;  %v2979_v49 = vsel %vm2972_vm14, %v2975_v4, %v2978_v34  ;;  %v3587_v0 = vsub.s32 4, %v15509_v36  ;;  %v12835_v47 = vpop.permute.xlu1 %1462  ;;  %v15515_v4 = vld [vmem:[#allocation56_spill] sm:$0xff]  ;;  %v15517_v34 = vld [vmem:[#allocation78_spill] sm:$0xff] }
 0x3a6   : > { %5415 = vrot.lane.b32.xlu1 %v5378_v26, %s15289_s24  ;;  %v2980_v40 = vsel %vm2969_vm12, nan, %v2979_v49  ;;  %vm15511_vm8 = vcmp.lt.s32.totalorder %v15510_v33, 0  ;;  %vm3073_vm11 = vweird.f32 %v15502_v52  ;;  %v3691_v10 = vsub.s32 4, %v15513_v32  ;;  %v15518_v49 = vld [vmem:[#allocation97_spill] sm:$0xff]  ;;  %v12878_v14 = vpop.permute.xlu0 %704 }
 0x3a7   : > { %vm3077_vm5 = vcmp.eq.s32.totalorder %v3075_v1, 0  ;;  %vm3080_vm1 = vcmp.eq.s32.totalorder %v3075_v1, 2  ;;  %vm3076_vm15 = vcmp.lt.s32.totalorder %v3075_v1, 2  ;;  %v3588_v41 = vsel %vm15511_vm8, %v3587_v0, %v15509_v36  ;;  %v15520_v0 = vld [vmem:[#allocation102_spill] sm:$0xff]  ;;  %15531 = vst [vmem:[#allocation82_spill] sm:$0xff] %v12878_v14  ;;  %v15539_v14 = vld [vmem:[#allocation80_spill] sm:$0xff] }
 0x3a8   : > { %v3079_v50 = vsel %vm3077_vm5, %v15507_v21, %v3078_v30  ;;  %v3082_v12 = vsel %vm3080_vm1, %v3081_v54, %v15506_v35  ;;  %v3590_v3 = vsel %vm11774_vm13, 0, %v3588_v41  ;;  %vm3593_vm6 = vweird.f32 %v15510_v33  ;;  %v15514_v54 = vld [vmem:[#allocation104_spill] sm:$0xff] }
 0x3a9   : > { %v3083_v58 = vsel %vm3076_vm15, %v3079_v50, %v3082_v12  ;;  %v3594_v30 = vadd.s32 3, %v3590_v3  ;;  %v3598_v21 = vxor.u32 2147483648, %v12003_v56  ;;  %v3601_v26 = vxor.u32 2147483648, %v15514_v54  ;;  %v15525_v3 = vld [vmem:[#allocation65_spill] sm:$0xff] }
 0x3aa   : > { %v3084_v55 = vsel %vm3073_vm11, nan, %v3083_v58  ;;  %vm15516_vm9 = vcmp.lt.s32.totalorder %v15515_v4, 0  ;;  %v3379_v1 = vsub.s32 4, %v15517_v34  ;;  %vm15519_vm13 = vnez %v15518_v49  ;;  %v15524_v58 = vld [vmem:[#allocation52_spill] sm:$0xff] }
 0x3ab   : > { %v5377_v35 = vpack.c.bf16 %v3084_v55, %v2980_v40  ;;  %v3692_v52 = vsel %vm15516_vm9, %v3691_v10, %v15513_v32  ;;  %v3595_v27 = vand.u32 3, %v3594_v30  ;;  %vm3697_vm4 = vweird.f32 %v15515_v4  ;;  %v15527_v10 = vld [vmem:[#allocation72_spill] sm:$0xff]  ;;  %v12871_v30 = vpop.permute.xlu1 %706 }
 0x3ac   : > { %v3694_v36 = vsel %vm15519_vm13, 0, %v3692_v52  ;;  %v3702_v50 = vxor.u32 2147483648, %v15520_v0  ;;  %v15521_v12 = vand.u32 2147483647, %v12203_v19  ;;  %v3705_v61 = vxor.u32 2147483648, %v15524_v58  ;;  %15528 = vst [vmem:[#allocation79_spill] sm:$0xff] %v12871_v30 }
 0x3ad   : > { %5413 = vrot.lane.b32.xlu0 %v5377_v35, %s15289_s24  ;;  %v3698_v41 = vadd.s32 3, %v3694_v36  ;;  %vm15526_vm2 = vcmp.lt.s32.totalorder %v15525_v3, 0  ;;  %v3483_v55 = vsub.s32 4, %v15527_v10  ;;  %vm4335_vm0 = vcmp.lt.s32.totalorder %v12341_v42, 0  ;;  %v15529_v52 = vld [vmem:[#allocation88_spill] sm:$0xff] }
 0x3ae   : > { %vm12861_vm14 = vcmp.le.f32.partialorder %v15521_v12, 0.7853982  ;;  %v3380_v32 = vsel %vm15526_vm2, %v3379_v1, %v15517_v34  ;;  %vm3596_vm12 = vcmp.lt.s32.totalorder %v3595_v27, 2  ;;  %vm3597_vm5 = vcmp.eq.s32.totalorder %v3595_v27, 0  ;;  %v15532_v1 = vld [vmem:[#allocation54_spill] sm:$0xff]  ;;  %v15534_v30 = vld [vmem:[#allocation60_spill] sm:$0xff] }
 0x3af   : > { %vm3600_vm1 = vcmp.eq.s32.totalorder %v3595_v27, 2  ;;  %vm15530_vm15 = vnez %v15529_v52  ;;  %v3599_v35 = vsel %vm3597_vm5, %v15514_v54, %v3598_v21  ;;  %v3699_v12 = vand.u32 3, %v3698_v41 }
 0x3b0   : > { %v3382_v49 = vsel %vm15530_vm15, 0, %v3380_v32  ;;  %v3602_v36 = vsel %vm3600_vm1, %v3601_v26, %v12003_v56  ;;  %v3390_v11 = vxor.u32 2147483648, %v15532_v1  ;;  %vm15535_vm8 = vcmp.lt.s32.totalorder %v15534_v30, 0  ;;  %v15536_v26 = vld [vmem:[#allocation87_spill] sm:$0xff] }
 0x3b1   : > { %v3386_v17 = vadd.s32 3, %v3382_v49  ;;  %v3603_v34 = vsel %vm3596_vm12, %v3599_v35, %v3602_v36  ;;  %v3484_v27 = vsel %vm15535_vm8, %v3483_v55, %v15527_v10  ;;  %vm3700_vm11 = vcmp.lt.s32.totalorder %v3699_v12, 2  ;;  %v15538_v35 = vld [vmem:[#allocation81_spill] sm:$0xff]  ;;  %v12893_v55 = vpop.permute.xlu1 %798 }
 0x3b2   : > { %v3604_v32 = vsel %vm3593_vm6, nan, %v3603_v34  ;;  %vm3701_vm9 = vcmp.eq.s32.totalorder %v3699_v12, 0  ;;  %vm3704_vm13 = vcmp.eq.s32.totalorder %v3699_v12, 2  ;;  %vm15537_vm2 = vnez %v15536_v26 }
 0x3b3   : > { %v3703_v56 = vsel %vm3701_vm9, %v15524_v58, %v3702_v50  ;;  %v3706_v21 = vsel %vm3704_vm13, %v3705_v61, %v15520_v0  ;;  %v3387_v54 = vand.u32 3, %v3386_v17  ;;  %v3486_v41 = vsel %vm15537_vm2, 0, %v3484_v27  ;;  %v12899_v61 = vpop.permute.xlu0 %796 }
 0x3b4   : > { %v3707_v52 = vsel %vm3700_vm11, %v3703_v56, %v3706_v21  ;;  %v3490_v49 = vadd.s32 3, %v3486_v41  ;;  %v3494_v36 = vxor.u32 2147483648, %v15538_v35  ;;  %v3497_v10 = vxor.u32 2147483648, %v15539_v14 }
 0x3b5   : > { %v3708_v33 = vsel %vm3697_vm4, nan, %v3707_v52  ;;  %vm3388_vm6 = vcmp.lt.s32.totalorder %v3387_v54, 2  ;;  %vm3389_vm12 = vcmp.eq.s32.totalorder %v3387_v54, 0  ;;  %vm3392_vm5 = vcmp.eq.s32.totalorder %v3387_v54, 2  ;;  %v12926_v21 = vpop.permute.xlu1 %1466 }
 0x3b6   : > { %v5380_v50 = vpack.c.bf16 %v3708_v33, %v3604_v32  ;;  %v3391_v17 = vsel %vm3389_vm12, %v15533_v37, %v3390_v11  ;;  %v3394_v0 = vsel %vm3392_vm5, %v3393_v29, %v15532_v1  ;;  %v3491_v58 = vand.u32 3, %v3490_v49  ;;  %v15543_v32 = vld [vmem:[#allocation20_spill] sm:$0xff] }
 0x3b7   : > { %v12905_v12 = vsel %vm12861_vm14, %v12203_v19, %v12829_v24  ;;  %vm3385_vm1 = vweird.f32 %v15525_v3  ;;  %v3395_v4 = vsel %vm3388_vm6, %v3391_v17, %v3394_v0  ;;  %v4003_v34 = vsub.s32 4, %v12055_v51  ;;  %v12935_v49 = vpop.permute.xlu0 %1464  ;;  %v15547_v17 = vld [vmem:[#allocation73_spill] sm:$0xff] }
 0x3b8   : > { %v15540_v27 = vxor.u32 2147483648, %v12765_v39  ;;  %5419 = vrot.lane.b32.xlu1 %v5380_v50, %s15289_s24  ;;  %v3396_v37 = vsel %vm3385_vm1, nan, %v3395_v4  ;;  %vm3493_vm4 = vcmp.eq.s32.totalorder %v3491_v58, 0  ;;  %vm3496_vm15 = vcmp.eq.s32.totalorder %v3491_v58, 2 }
 0x3b9   : > { %vm3492_vm8 = vcmp.lt.s32.totalorder %v3491_v58, 2  ;;  %v3495_v11 = vsel %vm3493_vm4, %v15539_v14, %v3494_v36  ;;  %v3498_v24 = vsel %vm3496_vm15, %v3497_v10, %v15538_v35  ;;  %vm15541_vm11 = vcmp.lt.s32.totalorder %v15399_v28, 0  ;;  %v15549_v58 = vld [vmem:[#allocation83_spill] sm:$0xff] }
 0x3ba   : > { %v12914_v29 = vsel %vm4335_vm0, %v15540_v27, %v12765_v39  ;;  %v4004_v3 = vsel %vm15541_vm11, %v4003_v34, %v12055_v51  ;;  %vm3489_vm9 = vweird.f32 %v15534_v30  ;;  %v3499_v1 = vsel %vm3492_vm8, %v3495_v11, %v3498_v24  ;;  %v15545_v30 = vld [vmem:[#allocation21_spill] sm:$0xff] }
 0x3bb   : > { %vm15542_vm13 = vnez %v15410_v44  ;;  %v4107_v56 = vsub.s32 4, %v15543_v32  ;;  %v3500_v54 = vsel %vm3489_vm9, nan, %v3499_v1  ;;  %vm4009_vm2 = vweird.f32 %v15399_v28 }
 0x3bc   : > { %v4006_v39 = vsel %vm15542_vm13, 0, %v4004_v3  ;;  %v4014_v26 = vxor.u32 2147483648, %v12681_v45  ;;  %v5379_v41 = vpack.c.bf16 %v3500_v54, %v3396_v37  ;;  %v4017_v52 = vxor.u32 2147483648, %v12672_v57  ;;  %v1559_v3 = vpop.permute.xlu1 %1558 }
 0x3bd   : > { %v4010_v14 = vadd.s32 3, %v4006_v39  ;;  %vm15544_vm6 = vcmp.lt.s32.totalorder %v15367_v43, 0  ;;  %v3795_v44 = vsub.s32 4, %v15545_v30  ;;  %vm15546_vm12 = vnez %v15395_v8  ;;  %v15550_v8 = vld [vmem:[#allocation105_spill] sm:$0xff]  ;;  %v15552_v39 = vld [vmem:[#allocation43_spill] sm:$0xff] }
 0x3be   : > { %v4108_v51 = vsel %vm15544_vm6, %v4107_v56, %v15543_v32  ;;  %vm4113_vm5 = vweird.f32 %v15367_v43  ;;  %v4118_v10 = vxor.u32 2147483648, %v12538_v13  ;;  %5417 = vrot.lane.b32.xlu0 %v5379_v41, %s15289_s24  ;;  %v4121_v50 = vxor.u32 2147483648, %v12415_v18  ;;  %v15553_v56 = vld [vmem:[#allocation77_spill] sm:$0xff] }
 0x3bf   : > { %v4011_v35 = vand.u32 3, %v4010_v14  ;;  %v4110_v36 = vsel %vm15546_vm12, 0, %v4108_v51  ;;  %vm15548_vm1 = vcmp.lt.s32.totalorder %v15547_v17, 0  ;;  %v3899_v4 = vsub.s32 4, %v15549_v58  ;;  %v15554_v14 = vld [vmem:[#allocation48_spill] sm:$0xff] }
 0x3c0   : > { %v4114_v33 = vadd.s32 3, %v4110_v36  ;;  %v3796_v0 = vsel %vm15548_vm1, %v3795_v44, %v15545_v30  ;;  %vm15551_vm11 = vnez %v15550_v8  ;;  %v3806_v32 = vxor.u32 2147483648, %v15552_v39  ;;  %v15556_v30 = vld [vmem:[#allocation103_spill] sm:$0xff] }
 0x3c1   : > { %vm4012_vm4 = vcmp.lt.s32.totalorder %v4011_v35, 2  ;;  %vm4013_vm15 = vcmp.eq.s32.totalorder %v4011_v35, 0  ;;  %vm4016_vm8 = vcmp.eq.s32.totalorder %v4011_v35, 2  ;;  %v3798_v34 = vsel %vm15551_vm11, 0, %v3796_v0 }
 0x3c2   : > { %v4015_v27 = vsel %vm4013_vm15, %v12672_v57, %v4014_v26  ;;  %v4018_v37 = vsel %vm4016_vm8, %v4017_v52, %v12681_v45  ;;  %v4115_v11 = vand.u32 3, %v4114_v33  ;;  %v3802_v24 = vadd.s32 3, %v3798_v34  ;;  %v1557_v57 = vpop.permute.xlu0 %1556  ;;  %v15558_v33 = vld [vmem:[#allocation69_spill] sm:$0xff] }
 0x3c3   : > { %v4019_v1 = vsel %vm4012_vm4, %v4015_v27, %v4018_v37  ;;  %v3809_v54 = vxor.u32 2147483648, %v15553_v56  ;;  %vm15555_vm9 = vcmp.lt.s32.totalorder %v15554_v14, 0  ;;  %vm15557_vm1 = vnez %v15556_v30 }
 0x3c4   : > { %v3900_v41 = vsel %vm15555_vm9, %v3899_v4, %v15549_v58  ;;  %v4020_v51 = vsel %vm4009_vm2, nan, %v4019_v1  ;;  %vm4116_vm13 = vcmp.lt.s32.totalorder %v4115_v11, 2  ;;  %vm4117_vm6 = vcmp.eq.s32.totalorder %v4115_v11, 0  ;;  %v15559_v58 = vld [vmem:[#allocation64_spill] sm:$0xff] }
 0x3c5   : > { %vm4120_vm12 = vcmp.eq.s32.totalorder %v4115_v11, 2  ;;  %v4119_v45 = vsel %vm4117_vm6, %v12415_v18, %v4118_v10  ;;  %v3803_v52 = vand.u32 3, %v3802_v24  ;;  %v3902_v44 = vsel %vm15557_vm1, 0, %v3900_v41 }
 0x3c6   : > { %v4122_v26 = vsel %vm4120_vm12, %v4121_v50, %v12538_v13  ;;  %v3906_v36 = vadd.s32 3, %v3902_v44  ;;  %v3910_v0 = vxor.u32 2147483648, %v15558_v33  ;;  %v3913_v4 = vxor.u32 2147483648, %v15559_v58  ;;  %v12968_v50 = vpop.permute.xlu1 %802  ;;  %v12983_v11 = vpop.permute.xlu0 %800 }
 0x3c7   : > { %v4123_v35 = vsel %vm4116_vm13, %v4119_v45, %v4122_v26  ;;  %vm3804_vm2 = vcmp.lt.s32.totalorder %v3803_v52, 2  ;;  %vm3805_vm4 = vcmp.eq.s32.totalorder %v3803_v52, 0  ;;  %vm3808_vm15 = vcmp.eq.s32.totalorder %v3803_v52, 2 }
 0x3c8   : > { %v4124_v28 = vsel %vm4113_vm5, nan, %v4123_v35  ;;  %v3807_v18 = vsel %vm3805_vm4, %v15553_v56, %v3806_v32  ;;  %v3810_v13 = vsel %vm3808_vm15, %v3809_v54, %v15552_v39  ;;  %v3907_v10 = vand.u32 3, %v3906_v36 }
 0x3c9   : > { %v5382_v8 = vpack.c.bf16 %v4124_v28, %v4020_v51  ;;  %7654 = vcosq.f32 %v12905_v12  ;;  %v15560_v34 = vand.u32 2147483647, %v12341_v42  ;;  %v3811_v43 = vsel %vm3804_vm2, %v3807_v18, %v3810_v13 }
 0x3ca   : > { %vm3801_vm5 = vweird.f32 %v15547_v17  ;;  %vm3909_vm11 = vcmp.eq.s32.totalorder %v3907_v10, 0  ;;  %vm3912_vm9 = vcmp.eq.s32.totalorder %v3907_v10, 2  ;;  %vm3908_vm13 = vcmp.lt.s32.totalorder %v3907_v10, 2  ;;  %v15563_v17 = vld [vmem:[#allocation4_spill] sm:$0xff]  ;;  %v13019_v62 = vpop.permute.xlu0 %892 }
 0x3cb   : > { %vm12973_vm8 = vcmp.le.f32.partialorder %v15560_v34, 0.7853982  ;;  %5423 = vrot.lane.b32.xlu1 %v5382_v8, %s15289_s24  ;;  %v3812_v24 = vsel %vm3801_vm5, nan, %v3811_v43  ;;  %v3911_v1 = vsel %vm3909_vm11, %v15559_v58, %v3910_v0  ;;  %v3914_v39 = vsel %vm3912_vm9, %v3913_v4, %v15558_v33  ;;  %v13038_v4 = vld [vmem:[%s14471_s2] ss:$0 sm:$0xff] }
 0x3cc   : > { %v4421_v37 = vsel %vm12973_vm8, %v12341_v42, %v12914_v29  ;;  %7656 = vsinq.f32 %v12905_v12  ;;  %vm3905_vm6 = vweird.f32 %v15554_v14  ;;  %v3915_v32 = vsel %vm3908_vm13, %v3911_v1, %v3914_v39  ;;  %v13000_v14 = vpop.permute.xlu1 %894 }
 0x3cd   : > { %v4211_v29 = vsub.s32 4, %v12410_v9  ;;  %7658 = vcosq.f32 %v4421_v37  ;;  %v3916_v56 = vsel %vm3905_vm6, nan, %v3915_v32  ;;  %v4315_v54 = vsub.s32 4, %v15563_v17 }
 0x3ce   : > { %v5381_v41 = vpack.c.bf16 %v3916_v56, %v3812_v24  ;;  %vm15564_vm12 = vcmask 441344   ;;  %vm15565_vm1 = vcmask 490496   ;;  %vm15566_vm2 = vcmp.lt.s32.totalorder %v12117_v2, 0  ;;  %v13055_v1 = vpop.permute.xlu0 %1560 }
 0x3cf   : > { %v1896_v51 = vsel %vm15564_vm12, %v12597_v38, %v12810_v7  ;;  %v1927_v45 = vsel %vm15565_vm1, %v12662_v48, %v12835_v47  ;;  %v4212_v12 = vsel %vm15566_vm2, %v4211_v29, %v12410_v9  ;;  %vm15567_vm4 = vmmov %vm15565_vm1  ;;  %vm15568_vm15 = vcmp.lt.s32.totalorder %v12096_v53, 0 }
 0x3d0   : > { %v1926_v26 = vsel %vm15567_vm4, %v12665_v46, %v12846_v23  ;;  %v4214_v52 = vsel %vm12626_vm3, 0, %v4212_v12  ;;  %v4316_v38 = vsel %vm15568_vm15, %v4315_v54, %v15563_v17  ;;  %vm15569_vm5 = vmmov %vm15565_vm1  ;;  %5421 = vrot.lane.b32.xlu0 %v5381_v41, %s15289_s24  ;;  %v4222_v7 = vxor.u32 2147483648, %v12786_v63  ;;  %v13047_v18 = vpop.permute.xlu1 %1562 }
 0x3d1   : > { %v13012_v48 = vsel %vm15569_vm5, %v1896_v51, %v12926_v21  ;;  %v4218_v9 = vadd.s32 3, %v4214_v52  ;;  %v4318_v47 = vsel %vm12548_vm7, 0, %v4316_v38  ;;  %vm15570_vm11 = vcmask 539648   ;;  %v13025_v21 = vld [vmem:[%s14470_s1] ss:$0 sm:$0xff] }
 0x3d2   : > { %v1960_v46 = vsel %vm15570_vm11, %v1927_v45, %v1559_v3  ;;  %v4225_v23 = vxor.u32 2147483648, %v12782_v16  ;;  %v4322_v30 = vadd.s32 3, %v4318_v47  ;;  %vm15571_vm3 = vmmov %vm15570_vm11  ;;  %7660 = vsinq.f32 %v4421_v37  ;;  %v13089_v47 = vpop.permute.xlu0 %896 }
 0x3d3   : > { %v1999_v44 = vmul.f32 %v13025_v21, %v1960_v46  ;;  %v1959_v35 = vsel %vm15571_vm3, %v1926_v26, %v1557_v57  ;;  %v4219_v36 = vand.u32 3, %v4218_v9  ;;  %v4326_v25 = vxor.u32 2147483648, %v12774_v6  ;;  %v13031_v33 = vpop.eup %7654 }
 0x3d4   : > { %v1998_v3 = vmul.f32 %v13025_v21, %v1959_v35  ;;  %vm4217_vm7 = vweird.f32 %v12117_v2  ;;  %v4323_v0 = vand.u32 3, %v4322_v30  ;;  %v4329_v58 = vxor.u32 2147483648, %v12691_v20  ;;  %v13076_v45 = vpop.permute.xlu1 %898 }
 0x3d5   : > { %v13041_v57 = vadd.f32 %v13038_v4, %v1999_v44  ;;  %vm4221_vm9 = vcmp.eq.s32.totalorder %v4219_v36, 0  ;;  %vm4224_vm13 = vcmp.eq.s32.totalorder %v4219_v36, 2  ;;  %v4419_v8 = vsub.s32 4, %v12644_v15 }
 0x3d6   : > { %v13044_v28 = vadd.f32 %v13038_v4, %v1998_v3  ;;  %vm4220_vm6 = vcmp.lt.s32.totalorder %v4219_v36, 2  ;;  %v4223_v13 = vsel %vm4221_vm9, %v12782_v16, %v4222_v7  ;;  %v4226_v10 = vsel %vm4224_vm13, %v4225_v23, %v12786_v63  ;;  %v13051_v34 = vpop.eup %7656 }
 0x3d7   : > { %vm4325_vm12 = vcmp.eq.s32.totalorder %v4323_v0, 0  ;;  %v4227_v43 = vsel %vm4220_vm6, %v4223_v13, %v4226_v10  ;;  %vm4328_vm1 = vcmp.eq.s32.totalorder %v4323_v0, 2  ;;  %v14737_v24 = vand.u32 2147483647, %v13041_v57  ;;  %v13057_v39 = vpop.eup %7658 }
 0x3d8   : > { %v4327_v37 = vsel %vm4325_vm12, %v12691_v20, %v4326_v25  ;;  %v4228_v32 = vsel %vm4217_vm7, nan, %v4227_v43  ;;  %vm4324_vm2 = vcmp.lt.s32.totalorder %v4323_v0, 2  ;;  %v4330_v16 = vsel %vm4328_vm1, %v4329_v58, %v12774_v6 }
 0x3d9   : > { %v4648_v63 = vand.u32 2139095040, %v13041_v57  ;;  %vm4321_vm4 = vweird.f32 %v12096_v53  ;;  %v4331_v29 = vsel %vm4324_vm2, %v4327_v37, %v4330_v16  ;;  %v4652_v20 = vand.u32 8388607, %v14737_v24 }
 0x3da   : > { %v14736_v56 = vand.u32 2147483647, %v13044_v28  ;;  %v4332_v17 = vsel %vm4321_vm4, nan, %v4331_v29  ;;  %v4544_v41 = vand.u32 2139095040, %v13044_v28  ;;  %vm15572_vm15 = vcmask 48128  }
 0x3db   : > { %v4649_v54 = vshrl.u32 %v4648_v63, 23  ;;  %v1636_v2 = vsel %vm15572_vm15, %v12729_v31, %v12751_v60  ;;  %vm15573_vm5 = vcmask 441344   ;;  %v5383_v51 = vpack.c.bf16 %v4332_v17, %v4228_v32  ;;  %v15574_v31 = vld [vmem:[#allocation79_spill] sm:$0xff]  ;;  %v13117_v32 = vpop.permute.xlu0 %988 }
 0x3dc   : > { %v1895_v6 = vsel %vm15573_vm5, %v12600_v59, %v12818_v5  ;;  %v4548_v53 = vand.u32 8388607, %v14736_v56  ;;  %v4545_v26 = vshrl.u32 %v4544_v41, 23  ;;  %v4420_v52 = vsel %vm4335_vm0, %v4419_v8, %v12644_v15  ;;  %v13082_v9 = vpop.eup %7660  ;;  %v13110_v8 = vpop.permute.xlu1 %990 }
 0x3dd   : > { %v6968_v12 = vadd.s32 4294967169, %v4649_v54  ;;  %v4523_v38 = vsub.s32 4, %v12529_v22  ;;  %vm15575_vm11 = vcmask 97280   ;;  %5425 = vrot.lane.b32.xlu0 %v5383_v51, %s15289_s24  ;;  %v4653_v59 = vor.u32 8388608, %v4652_v20 }
 0x3de   : > { %v1669_v60 = vsel %vm15575_vm11, %v1636_v2, %v15574_v31  ;;  %v4549_v5 = vor.u32 8388608, %v4548_v53  ;;  %v4422_v7 = vsel %vm12973_vm8, 0, %v4420_v52  ;;  %v6964_v23 = vadd.s32 4294967169, %v4545_v26 }
 0x3df   : > { %v4655_v46 = vadd.s32 1, %v6968_v12  ;;  %v4426_v30 = vadd.s32 3, %v4422_v7  ;;  %v4524_v15 = vsel %vm4439_vm10, %v4523_v38, %v12529_v22  ;;  %vm15576_vm0 = vcmask 490496  }
 0x3e0   : > { %v13096_v44 = vsel %vm15576_vm0, %v1895_v6, %v12935_v49  ;;  %vm15577_vm3 = vcmask 146432   ;;  %v4526_v27 = vsel %vm12861_vm14, 0, %v4524_v15  ;;  %v4551_v36 = vadd.s32 1, %v6964_v23  ;;  %v13132_v7 = vpop.permute.xlu1 %994 }
 0x3e1   : > { %v13100_v35 = vsel %vm15577_vm3, %v1669_v60, %v12968_v50  ;;  %vm4656_vm8 = vcmp.gt.s32.totalorder %v4655_v46, 0  ;;  %v13104_v25 = vand.u32 3, %v4426_v30  ;;  %v4530_v3 = vadd.s32 3, %v4526_v27 }
 0x3e2   : > { %v4657_v0 = vsel %vm4656_vm8, %v4655_v46, 0  ;;  %v13106_v58 = vshll.u32 %v4653_v59, 8  ;;  %v4430_v22 = vxor.u32 2147483648, %v13082_v9  ;;  %v4433_v49 = vxor.u32 2147483648, %v13057_v39 }
 0x3e3   : > { %v4658_v13 = vshrl.u32 %v4657_v0, 5  ;;  %v4659_v50 = vand.u32 31, %v4657_v0  ;;  %vm4552_vm10 = vcmp.gt.s32.totalorder %v4551_v36, 0  ;;  %v13112_v10 = vshll.u32 %v4549_v5, 8  ;;  %v13136_v0 = vpop.permute.xlu0 %992 }
 0x3e4   : > { %v4553_v40 = vsel %vm4552_vm10, %v4551_v36, 0  ;;  %vm4429_vm14 = vcmp.eq.s32.totalorder %v13104_v25, 0  ;;  %v4534_v43 = vxor.u32 2147483648, %v13051_v34  ;;  %v15578_v63 = vmov 683565275  }
 0x3e5   : > { %v4660_v16 = vsub.s32 32, %v4659_v50  ;;  %v4662_v29 = vshll.u32 %v15578_v63, %v4659_v50  ;;  %v15579_v20 = vmov 2475754826   ;;  %v13121_v54 = vand.u32 3, %v4530_v3 }
 0x3e6   : > { %v4665_v17 = vshll.u32 %v15579_v20, %v4659_v50  ;;  %v15580_v41 = vmov 2131351028   ;;  %v15581_v6 = vmov 2102212464   ;;  %v15582_v53 = vmov 920167782  }
 0x3e7   : > { %v4668_v2 = vshll.u32 %v15580_v41, %v4659_v50  ;;  %v4671_v51 = vshll.u32 %v15581_v6, %v4659_v50  ;;  %v4674_v12 = vshll.u32 %v15582_v53, %v4659_v50  ;;  %vm4677_vm7 = vcmp.lt.s32.totalorder %v4658_v13, 1 }
 0x3e8   : > { %v4663_v26 = vshrl.u32 %v15579_v20, %v4660_v16  ;;  %v4666_v52 = vshrl.u32 %v15580_v41, %v4660_v16  ;;  %v4669_v38 = vshrl.u32 %v15581_v6, %v4660_v16  ;;  %vm4678_vm9 = vcmp.lt.s32.totalorder %v4658_v13, 2 }
 0x3e9   : > { %v4661_v31 = vshrl.u32 %v15578_v63, %v4660_v16  ;;  %v4672_v60 = vshrl.u32 %v15582_v53, %v4660_v16  ;;  %v15583_v59 = vmov 1326507024   ;;  %vm4679_vm13 = vcmp.lt.s32.totalorder %v4658_v13, 3 }
 0x3ea   : > { %v4675_v5 = vshrl.u32 %v15583_v59, %v4660_v16  ;;  %v4664_v46 = vor.u32 %v4663_v26, %v4662_v29  ;;  %v4667_v23 = vor.u32 %v4666_v52, %v4665_v17  ;;  %v4670_v30 = vor.u32 %v4669_v38, %v4668_v2 }
 0x3eb   : > { %vm4680_vm6 = vcmp.lt.s32.totalorder %v4658_v13, 4  ;;  %v4673_v15 = vor.u32 %v4672_v60, %v4671_v51  ;;  %v13134_v36 = vshrl.u32 %v4553_v40, 5  ;;  %v4555_v3 = vand.u32 31, %v4553_v40  ;;  %v13153_v60 = vpop.permute.xlu1 %1086 }
 0x3ec   : > { %v4676_v27 = vor.u32 %v4675_v5, %v4674_v12  ;;  %v4681_v50 = vsel %vm4677_vm7, %v4661_v31, %v4664_v46  ;;  %v4682_v56 = vsel %vm4680_vm6, %v4670_v30, 2102212464  ;;  %v4685_v24 = vsel %vm4677_vm7, %v4664_v46, %v4667_v23 }
 0x3ed   : > { %v4689_v16 = vsel %vm4677_vm7, %v4667_v23, %v4670_v30  ;;  %v4683_v37 = vsel %vm4679_vm13, %v4667_v23, %v4682_v56  ;;  %v4686_v29 = vsel %vm4680_vm6, %v4673_v15, 920167782  ;;  %v4556_v2 = vsub.s32 32, %v4555_v3 }
 0x3ee   : > { %v4690_v17 = vsel %vm4680_vm6, %v4676_v27, 1326507024  ;;  %v4684_v51 = vsel %vm4678_vm9, %v4681_v50, %v4683_v37  ;;  %v4687_v12 = vsel %vm4679_vm13, %v4670_v30, %v4686_v29  ;;  %v4431_v26 = vsel %vm4429_vm14, %v13057_v39, %v4430_v22 }
 0x3ef   : > { %v4691_v40 = vsel %vm4679_vm13, %v4673_v15, %v4690_v17  ;;  %v4688_v52 = vsel %vm4678_vm9, %v4685_v24, %v4687_v12  ;;  %v4700_v31 = vmul.u32 %v13106_v58, %v4684_v51  ;;  %v4558_v56 = vshll.u32 %v15578_v63, %v4555_v3  ;;  %v13168_v15 = vpop.permute.xlu0 %1084 }
 0x3f0   : > { %v4692_v38 = vsel %vm4678_vm9, %v4689_v16, %v4691_v40  ;;  %vm4432_vm12 = vcmp.eq.s32.totalorder %v13104_v25, 2  ;;  %v13160_v46 = vmul.u32.u64.low %v13106_v58, %v4688_v52  ;;  %v13161_v23 = vmul.u32.u64.high %v13106_v58, %v4688_v52, %v13160_v46 }
 0x3f1   : > { %v13156_v37 = vmul.u32.u64.low %v13106_v58, %v4692_v38  ;;  %v13157_v5 = vmul.u32.u64.high %v13106_v58, %v4692_v38, %v13156_v37  ;;  %v4557_v24 = vshrl.u32 %v15578_v63, %v4556_v2  ;;  %v4559_v22 = vshrl.u32 %v15579_v20, %v4556_v2 }
 0x3f2   : > { %v4561_v13 = vshll.u32 %v15579_v20, %v4555_v3  ;;  %v4562_v30 = vshrl.u32 %v15580_v41, %v4556_v2  ;;  %v4564_v27 = vshll.u32 %v15580_v41, %v4555_v3  ;;  %v4565_v50 = vshrl.u32 %v15581_v6, %v4556_v2 }
 0x3f3   : > { %v4567_v16 = vshll.u32 %v15581_v6, %v4555_v3  ;;  %v4568_v58 = vshrl.u32 %v15582_v53, %v4556_v2  ;;  %v4560_v29 = vor.u32 %v4559_v22, %v4558_v56  ;;  %v4570_v51 = vshll.u32 %v15582_v53, %v4555_v3  ;;  %v13183_v56 = vpop.permute.xlu1 %1090 }
 0x3f4   : > { %v4563_v17 = vor.u32 %v4562_v30, %v4561_v13  ;;  %v4571_v12 = vshrl.u32 %v15583_v59, %v4556_v2  ;;  %vm4425_vm1 = vweird.f32 %v12341_v42  ;;  %vm4702_vm2 = vc.u32 %v13157_v5, %v13160_v46 }
 0x3f5   : > { %v4703_v40 = vadd.s32 1, %v13161_v23  ;;  %v4566_v52 = vor.u32 %v4565_v50, %v4564_v27  ;;  %vm4573_vm4 = vcmp.lt.s32.totalorder %v13134_v36, 1  ;;  %v4569_v38 = vor.u32 %v4568_v58, %v4567_v16  ;;  %v13188_v16 = vpop.permute.xlu0 %1088 }
 0x3f6   : > { %v4572_v37 = vor.u32 %v4571_v12, %v4570_v51  ;;  %vm4574_vm15 = vcmp.lt.s32.totalorder %v13134_v36, 2  ;;  %vm4575_vm5 = vcmp.lt.s32.totalorder %v13134_v36, 3  ;;  %vm4576_vm11 = vcmp.lt.s32.totalorder %v13134_v36, 4 }
 0x3f7   : > { %v4704_v3 = vsel %vm4702_vm2, %v4703_v40, %v13161_v23  ;;  %v4577_v2 = vsel %vm4573_vm4, %v4557_v24, %v4560_v29  ;;  %v4581_v22 = vsel %vm4573_vm4, %v4560_v29, %v4563_v17  ;;  %vm4529_vm0 = vweird.f32 %v12203_v19 }
 0x3f8   : > { %v4705_v13 = vadd.s32 %v4704_v3, %v4700_v31  ;;  %v4578_v30 = vsel %vm4576_vm11, %v4566_v52, 2102212464  ;;  %v4582_v27 = vsel %vm4576_vm11, %v4569_v38, 920167782  ;;  %v4585_v50 = vsel %vm4573_vm4, %v4563_v17, %v4566_v52 }
 0x3f9   : > { %v4579_v58 = vsel %vm4575_vm5, %v4563_v17, %v4578_v30  ;;  %v4583_v51 = vsel %vm4575_vm5, %v4566_v52, %v4582_v27  ;;  %v4586_v12 = vsel %vm4576_vm11, %v4572_v37, 1326507024  ;;  %v4434_v23 = vsel %vm4432_vm12, %v4433_v49, %v13082_v9  ;;  %v13235_v30 = vpop.permute.xlu0 %1180 }
 0x3fa   : > { %v4706_v24 = vadd.s32 536870912, %v4705_v13  ;;  %v4584_v31 = vsel %vm4574_vm15, %v4581_v22, %v4583_v51  ;;  %v4587_v29 = vsel %vm4575_vm5, %v4569_v38, %v4586_v12  ;;  %vm4428_vm3 = vcmp.lt.s32.totalorder %v13104_v25, 2  ;;  %v13218_v38 = vpop.permute.xlu1 %1182 }
 0x3fb   : > { %v4580_v17 = vsel %vm4574_vm15, %v4577_v2, %v4579_v58  ;;  %v4588_v40 = vsel %vm4574_vm15, %v4585_v50, %v4587_v29  ;;  %v13209_v39 = vmul.u32.u64.low %v13112_v10, %v4584_v31  ;;  %v13210_v52 = vmul.u32.u64.high %v13112_v10, %v4584_v31, %v13209_v39 }
 0x3fc   : > { %v13212_v9 = vshrl.u32 %v4706_v24, 30  ;;  %v13215_v49 = vmul.u32.u64.low %v13112_v10, %v4588_v40  ;;  %v13216_v37 = vmul.u32.u64.high %v13112_v10, %v4588_v40, %v13215_v49  ;;  %v4435_v3 = vsel %vm4428_vm3, %v4431_v26, %v4434_v23  ;;  %v15588_v40 = vld [vmem:[#allocation74_spill] sm:$0xff] }
 0x3fd   : > { %v4436_v25 = vsel %vm4425_vm1, nan, %v4435_v3  ;;  %vm4532_vm8 = vcmp.lt.s32.totalorder %v13121_v54, 2  ;;  %vm4533_vm10 = vcmp.eq.s32.totalorder %v13121_v54, 0  ;;  %vm4536_vm14 = vcmp.eq.s32.totalorder %v13121_v54, 2  ;;  %v15592_v49 = vld [vmem:[#allocation75_spill] sm:$0xff] }
 0x3fe   : > { %v4708_v36 = vshll.u32 %v13212_v9, 30  ;;  %v4535_v2 = vsel %vm4533_vm10, %v13031_v33, %v4534_v43  ;;  %v15584_v26 = vxor.u32 2147483648, %v13031_v33  ;;  %vm15585_vm7 = vcmask 539648  }
 0x3ff   : > { %v1962_v42 = vsel %vm15585_vm7, %v13012_v48, %v13047_v18  ;;  %v4599_v27 = vadd.s32 1, %v13210_v52  ;;  %vm15586_vm9 = vmmov %vm15585_vm7  ;;  %v4596_v33 = vmul.u32 %v13112_v10, %v4580_v17  ;;  %vm4598_vm13 = vc.u32 %v13216_v37, %v13209_v39  ;;  %v13257_v10 = vpop.permute.xlu1 %1186  ;;  %v13266_v17 = vpop.permute.xlu0 %1184 }
 0x400   : > { %v4538_v22 = vsel %vm4536_vm14, %v15584_v26, %v13051_v34  ;;  %v2001_v54 = vmul.f32 %v13025_v21, %v1962_v42  ;;  %v1961_v58 = vsel %vm15586_vm9, %v13096_v44, %v13055_v1  ;;  %v13242_v43 = vsub.s32 %v4705_v13, %v4708_v36  ;;  %v15595_v36 = vld [vmem:[#allocation89_spill] sm:$0xff] }
 0x401   : > { %v4539_v50 = vsel %vm4532_vm8, %v4535_v2, %v4538_v22  ;;  %v4600_v18 = vsel %vm4598_vm13, %v4599_v27, %v13210_v52  ;;  %v2000_v12 = vmul.f32 %v13025_v21, %v1961_v58  ;;  %vm15587_vm6 = vcmask 195584   ;;  %v15589_v52 = vld [vmem:[#allocation90_spill] sm:$0xff] }
 0x402   : > { %v4540_v48 = vsel %vm4529_vm0, nan, %v4539_v50  ;;  %v13250_v51 = vadd.f32 %v13038_v4, %v2001_v54  ;;  %v4711_v23 = vsub.s32 0, %v13242_v43  ;;  %v4601_v1 = vadd.s32 %v4600_v18, %v4596_v33  ;;  %v15597_v22 = vld [vmem:[#allocation82_spill] sm:$0xff]  ;;  %vm15602_vm0 = vmmov %vm15587_vm6 }
 0x403   : > { %v5384_v34 = vpack.c.bf16 %v4540_v48, %v4436_v25  ;;  %v1735_v44 = vsel %vm15587_vm6, %v13100_v35, %v13076_v45  ;;  %v13263_v24 = vadd.f32 %v13038_v4, %v2000_v12  ;;  %vm15590_vm12 = vcmask 48128   ;;  %v15591_v35 = vld [vmem:[#allocation98_spill] sm:$0xff]  ;;  %v15594_v25 = vld [vmem:[#allocation99_spill] sm:$0xff]  ;;  %vm15603_vm3 = vmmov %vm15602_vm0 }
 0x404   : > { %v14739_v19 = vand.u32 2147483647, %v13250_v51  ;;  %v4856_v13 = vand.u32 2139095040, %v13250_v51  ;;  %v6969_v31 = vmin.u32 %v4711_v23, %v13242_v43  ;;  %v4602_v29 = vadd.s32 536870912, %v4601_v1  ;;  %vm15604_vm14 = vmmov %vm15602_vm0 }
 0x405   : > { %5427 = vrot.lane.b32.xlu1 %v5384_v34, %s15289_s24  ;;  %v1635_v45 = vsel %vm15590_vm12, %v15589_v52, %v15588_v40  ;;  %vm15593_vm1 = vcmask 97280   ;;  %v4752_v54 = vand.u32 2139095040, %v13263_v24  ;;  %vm15599_vm15 = vcmask 146432  }
 0x406   : > { %v1667_v3 = vsel %vm15593_vm1, %v15592_v49, %v15591_v35  ;;  %vm15596_vm2 = vmmov %vm15593_vm1  ;;  %v4857_v26 = vshrl.u32 %v4856_v13, 23  ;;  %v4713_v27 = vclz %v6969_v31  ;;  %v13279_v50 = vshrl.u32 %v4602_v29, 30  ;;  %v13293_v31 = vpop.permute.xlu1 %1278  ;;  %v13305_v35 = vpop.permute.xlu0 %1276 }
 0x407   : > { %v1666_v2 = vsel %vm15596_vm2, %v15595_v36, %v15594_v25  ;;  %vm15598_vm4 = vmmov %vm15593_vm1  ;;  %v1700_v58 = vsel %vm15599_vm15, %v1667_v3, %v12893_v55  ;;  %v4860_v18 = vand.u32 8388607, %v14739_v19  ;;  %v4753_v40 = vshrl.u32 %v4752_v54, 23 }
 0x408   : > { %v1668_v42 = vsel %vm15598_vm4, %v1635_v45, %v15597_v22  ;;  %vm15600_vm5 = vmmov %vm15599_vm15  ;;  %v6976_v48 = vadd.s32 4294967169, %v4857_v26  ;;  %v6970_v34 = vadd.s32 4294967294, %v4713_v27  ;;  %v4604_v12 = vshll.u32 %v13279_v50, 30 }
 0x409   : > { %v1699_v33 = vsel %vm15600_vm5, %v1666_v2, %v12899_v61  ;;  %vm15601_vm11 = vmmov %vm15600_vm5  ;;  %v1733_v13 = vsel %vm15602_vm0, %v1700_v58, %v13000_v14  ;;  %v14738_v61 = vand.u32 2147483647, %v13263_v24  ;;  %v4701_v52 = vadd.s32 %v13160_v46, %v13157_v5 }
 0x40a   : > { %v1701_v23 = vsel %vm15601_vm11, %v1668_v42, %v12983_v11  ;;  %v1732_v55 = vsel %vm15603_vm3, %v1699_v33, %v13019_v62  ;;  %v4863_v29 = vadd.s32 1, %v6976_v48  ;;  %vm6971_vm8 = vcmp.lt.s32.totalorder %v6970_v34, 0  ;;  %v13322_v42 = vpop.permute.xlu1 %1282 }
 0x40b   : > { %v13301_v45 = vadd.s32 %v13209_v39, %v13216_v37  ;;  %v13303_v11 = vsub.s32 %v4601_v1, %v4604_v12  ;;  %v4716_v14 = vsel %vm6971_vm8, 0, %v6970_v34  ;;  %v4861_v49 = vor.u32 8388608, %v4860_v18  ;;  %v13338_v18 = vpop.permute.xlu0 %1280 }
 0x40c   : > { %vm4864_vm10 = vcmp.gt.s32.totalorder %v4863_v29, 0  ;;  %v1734_v62 = vsel %vm15604_vm14, %v1701_v23, %v13089_v47  ;;  %v4717_v3 = vsub.s32 32, %v4716_v14  ;;  %v4721_v25 = vsub.s32 4294967266, %v4716_v14 }
 0x40d   : > { %v4607_v36 = vsub.s32 0, %v13303_v11  ;;  %vm15605_vm7 = vcmask 244736   ;;  %v4865_v46 = vsel %vm4864_vm10, %v4863_v29, 0  ;;  %v6972_v39 = vadd.s32 4294967169, %v4753_v40 }
 0x40e   : > { %v1766_v5 = vsel %vm15605_vm7, %v1733_v13, %v13110_v8  ;;  %v13314_v37 = vand.u32 8388607, %v14738_v61  ;;  %vm15606_vm9 = vmmov %vm15605_vm7  ;;  %v4718_v2 = vshll.u32 %v13242_v43, %v4716_v14  ;;  %v4719_v47 = vshrl.u32 %v4701_v52, %v4717_v3  ;;  %v13351_v3 = vpop.permute.xlu1 %1374 }
 0x40f   : > { %v13318_v1 = vsel %vm15606_vm9, %v1732_v55, %v13117_v32  ;;  %v4722_v26 = vadd.s32 127, %v4721_v25  ;;  %v6965_v22 = vmin.u32 %v4607_v36, %v13303_v11  ;;  %v4867_v27 = vand.u32 31, %v4865_v46  ;;  %vm15607_vm13 = vmmov %vm15605_vm7  ;;  %v7547_v36 = vld [vmem:[%s14472_s3 + $0x28] sm:$0xff]  }
 0x410   : > { %v13324_v8 = vshll.u32 %v4861_v49, 8  ;;  %v13328_v54 = vsel %vm15607_vm13, %v1735_v44, %v13132_v7  ;;  %vm15608_vm6 = vmmov %vm15605_vm7  ;;  %v4720_v32 = vor.u32 %v4719_v47, %v4718_v2  ;;  %vm15609_vm12 = vcmask 293888  }
 0x411   : > { %v13332_v58 = vsel %vm15608_vm6, %v1734_v62, %v13136_v0  ;;  %v4723_v33 = vshll.u32 %v4722_v26, 23  ;;  %v4609_v43 = vclz %v6965_v22  ;;  %v13336_v48 = vsel %vm15609_vm12, %v1766_v5, %v13153_v60  ;;  %vm15613_vm8 = vmmov %vm15609_vm12 }
 0x412   : > { %v13340_v34 = vshrl.u32 %v4865_v46, 5  ;;  %v4868_v12 = vsub.s32 32, %v4867_v27  ;;  %v4757_v23 = vor.u32 8388608, %v13314_v37  ;;  %v4759_v7 = vadd.s32 1, %v6972_v39  ;;  %vm15614_vm10 = vmmov %vm15613_vm8 }
 0x413   : > { %vm4647_vm1 = vcmp.lt.s32.totalorder %v13041_v57, 0  ;;  %v4724_v44 = vor.u32 4788187, %v4723_v33  ;;  %v6966_v0 = vadd.s32 4294967294, %v4609_v43  ;;  %v4870_v13 = vshll.u32 %v15578_v63, %v4867_v27  ;;  %v13360_v33 = vpop.permute.xlu0 %1372  ;;  %vm15615_vm14 = vmmov %vm15613_vm8 }
 0x414   : > { %v4873_v55 = vshll.u32 %v15579_v20, %v4867_v27  ;;  %v4871_v29 = vshrl.u32 %v15579_v20, %v4868_v12  ;;  %v4874_v60 = vshrl.u32 %v15580_v41, %v4868_v12  ;;  %v4876_v40 = vshll.u32 %v15580_v41, %v4867_v27 }
 0x415   : > { %v4877_v52 = vshrl.u32 %v15581_v6, %v4868_v12  ;;  %v4725_v14 = vand.u32 2147483647, %v4724_v44  ;;  %v4727_v49 = vcvt.s32.f32 %v4720_v32  ;;  %vm6967_vm2 = vcmp.lt.s32.totalorder %v6966_v0, 0 }
 0x416   : > { %v4880_v62 = vshrl.u32 %v15582_v53, %v4868_v12  ;;  %v15610_v25 = vand.u32 2147483647, %v13041_v57  ;;  %v4612_v5 = vsel %vm6967_vm2, 0, %v6966_v0  ;;  %v4872_v46 = vor.u32 %v4871_v29, %v4870_v13 }
 0x417   : > { %v4878_v39 = vor.u32 %v4877_v52, %v4876_v40  ;;  %v4879_v2 = vshll.u32 %v15581_v6, %v4867_v27  ;;  %v4728_v47 = vmul.f32 %v4727_v49, %v4725_v14  ;;  %v4613_v26 = vsub.s32 32, %v4612_v5  ;;  %v13374_v52 = vpop.permute.xlu1 %1378 }
 0x418   : > { %vm13355_vm4 = vcmp.le.f32.partialorder %v15610_v25, 0.7853982  ;;  %v4617_v22 = vsub.s32 4294967266, %v4612_v5  ;;  %v4875_v32 = vor.u32 %v4874_v60, %v4873_v55  ;;  %v4882_v44 = vshll.u32 %v15582_v53, %v4867_v27 }
 0x419   : > { %v4881_v43 = vor.u32 %v4880_v62, %v4879_v2  ;;  %v4883_v61 = vshrl.u32 %v15583_v59, %v4868_v12  ;;  %vm4760_vm15 = vcmp.gt.s32.totalorder %v4759_v7, 0  ;;  %v4729_v25 = vxor.u32 2147483648, %v4728_v47  ;;  %v13385_v62 = vpop.permute.xlu0 %1376 }
 0x41a   : > { %v4618_v19 = vadd.s32 127, %v4617_v22  ;;  %vm4885_vm5 = vcmp.lt.s32.totalorder %v13340_v34, 1  ;;  %vm4888_vm11 = vcmp.lt.s32.totalorder %v13340_v34, 4  ;;  %v4615_v0 = vshrl.u32 %v13301_v45, %v4613_v26 }
 0x41b   : > { %v4869_v13 = vshrl.u32 %v15578_v63, %v4868_v12  ;;  %v4884_v29 = vor.u32 %v4883_v61, %v4882_v44  ;;  %v4890_v55 = vsel %vm4888_vm11, %v4878_v39, 2102212464  ;;  %v4614_v60 = vshll.u32 %v13303_v11, %v4612_v5 }
 0x41c   : > { %v4619_v27 = vshll.u32 %v4618_v19, 23  ;;  %vm4886_vm0 = vcmp.lt.s32.totalorder %v13340_v34, 2  ;;  %v4893_v40 = vsel %vm4885_vm5, %v4872_v46, %v4875_v32  ;;  %v4730_v14 = vsel %vm4647_vm1, %v4729_v25, %v4728_v47 }
 0x41d   : > { %vm4887_vm3 = vcmp.lt.s32.totalorder %v13340_v34, 3  ;;  %v4889_v61 = vsel %vm4885_vm5, %v4869_v13, %v4872_v46  ;;  %v4894_v45 = vsel %vm4888_vm11, %v4881_v43, 920167782  ;;  %v4897_v49 = vsel %vm4885_vm5, %v4875_v32, %v4878_v39 }
 0x41e   : > { %v4620_v11 = vor.u32 4788187, %v4619_v27  ;;  %v4891_v19 = vsel %vm4887_vm3, %v4875_v32, %v4890_v55  ;;  %v4895_v12 = vsel %vm4887_vm3, %v4878_v39, %v4894_v45  ;;  %v4616_v5 = vor.u32 %v4615_v0, %v4614_v60  ;;  %v13420_v55 = vpop.permute.xlu1 %1470 }
 0x41f   : > { %v4896_v2 = vsel %vm4886_vm0, %v4893_v40, %v4895_v12  ;;  %v4898_v47 = vsel %vm4888_vm11, %v4884_v29, 1326507024  ;;  %v1798_v46 = vsel %vm15613_vm8, %v13318_v1, %v13168_v15  ;;  %v13397_v26 = vsel %vm13355_vm4, %v13041_v57, %v4730_v14 }
 0x420   : > { %v4899_v22 = vsel %vm4887_vm3, %v4881_v43, %v4898_v47  ;;  %v13400_v39 = vmul.u32.u64.low %v13324_v8, %v4896_v2  ;;  %v13401_v32 = vmul.u32.u64.high %v13324_v8, %v4896_v2, %v13400_v39  ;;  %v4621_v44 = vand.u32 2147483647, %v4620_v11 }
 0x421   : > { %v4892_v25 = vsel %vm4886_vm0, %v4889_v61, %v4891_v19  ;;  %v4900_v0 = vsel %vm4886_vm0, %v4897_v49, %v4899_v22  ;;  %v4761_v15 = vsel %vm4760_vm15, %v4759_v7, 0  ;;  %v13415_v43 = vshll.u32 %v4757_v23, 8 }
 0x422   : > { %v13410_v1 = vmul.u32.u64.low %v13324_v8, %v4900_v0  ;;  %v13411_v13 = vmul.u32.u64.high %v13324_v8, %v4900_v0, %v13410_v1  ;;  %v1801_v29 = vsel %vm15614_vm10, %v13328_v54, %v13183_v56  ;;  %v4623_v60 = vcvt.s32.f32 %v4616_v5  ;;  %v13435_v54 = vpop.permute.xlu0 %1468  ;;  %v1475_v49 = vpop.permute.xlu1 %1474 }
 0x423   : > { %v4763_v27 = vand.u32 31, %v4761_v15  ;;  %v13425_v34 = vsel %vm15615_vm14, %v13332_v58, %v13188_v16  ;;  %vm15616_vm7 = vcmask 343040   ;;  %7662 = vcosq.f32 %v13397_v26 }
 0x424   : > { %v1832_v7 = vsel %vm15616_vm7, %v13336_v48, %v13218_v38  ;;  %v4908_v37 = vmul.u32 %v13324_v8, %v4892_v25  ;;  %v4911_v23 = vadd.s32 1, %v13401_v32  ;;  %vm15617_vm9 = vmmov %vm15616_vm7  ;;  %v13437_v40 = vmul.f32 %v4623_v60, %v4621_v44 }
 0x425   : > { %v1831_v56 = vsel %vm15617_vm9, %v1798_v46, %v13235_v30  ;;  %v4762_v14 = vshrl.u32 %v4761_v15, 5  ;;  %v4764_v16 = vsub.s32 32, %v4763_v27  ;;  %vm15618_vm13 = vmmov %vm15616_vm7  ;;  %vm4910_vm6 = vc.u32 %v13411_v13, %v13400_v39 }
 0x426   : > { %v1834_v58 = vsel %vm15618_vm13, %v1801_v29, %v13257_v10  ;;  %vm15619_vm12 = vcmask 392192   ;;  %v4912_v48 = vsel %vm4910_vm6, %v4911_v23, %v13401_v32  ;;  %v4766_v61 = vshll.u32 %v15578_v63, %v4763_v27  ;;  %v13460_v44 = vpop.permute.xlu0 %1472 }
 0x427   : > { %v1865_v38 = vsel %vm15619_vm12, %v1832_v7, %v13293_v31  ;;  %vm15620_vm2 = vmmov %vm15619_vm12  ;;  %v4767_v45 = vshrl.u32 %v15579_v20, %v4764_v16  ;;  %v4769_v10 = vshll.u32 %v15579_v20, %v4763_v27  ;;  %v4913_v11 = vadd.s32 %v4912_v48, %v4908_v37 }
 0x428   : > { %v1864_v8 = vsel %vm15620_vm2, %v1831_v56, %v13305_v35  ;;  %vm15621_vm15 = vmmov %vm15620_vm2  ;;  %v4770_v19 = vshrl.u32 %v15580_v41, %v4764_v16  ;;  %v4772_v12 = vshll.u32 %v15580_v41, %v4763_v27  ;;  %v4773_v31 = vshrl.u32 %v15581_v6, %v4764_v16 }
 0x429   : > { %v1867_v30 = vsel %vm15621_vm15, %v1834_v58, %v13322_v42  ;;  %v4768_v35 = vor.u32 %v4767_v45, %v4766_v61  ;;  %v4775_v5 = vshll.u32 %v15581_v6, %v4763_v27  ;;  %v4776_v42 = vshrl.u32 %v15582_v53, %v4764_v16  ;;  %v1567_v61 = vpop.permute.xlu1 %1566 }
 0x42a   : > { %v4778_v2 = vshll.u32 %v15582_v53, %v4763_v27  ;;  %v4914_v47 = vadd.s32 536870912, %v4913_v11  ;;  %v4771_v46 = vor.u32 %v4770_v19, %v4769_v10  ;;  %v4774_v22 = vor.u32 %v4773_v31, %v4772_v12 }
 0x42b   : > { %v4779_v32 = vshrl.u32 %v15583_v59, %v4764_v16  ;;  %v4625_v25 = vxor.u32 2147483648, %v13437_v40  ;;  %v4777_v0 = vor.u32 %v4776_v42, %v4775_v5  ;;  %vm4781_vm5 = vcmp.lt.s32.totalorder %v4762_v14, 1 }
 0x42c   : > { %vm4784_vm11 = vcmp.lt.s32.totalorder %v4762_v14, 4  ;;  %vm4543_vm0 = vcmp.lt.s32.totalorder %v13044_v28, 0  ;;  %v13464_v15 = vshrl.u32 %v4914_v47, 30  ;;  %v4789_v60 = vsel %vm4781_vm5, %v4768_v35, %v4771_v46 }
 0x42d   : > { %v4780_v1 = vor.u32 %v4779_v32, %v4778_v2  ;;  %v4786_v29 = vsel %vm4784_vm11, %v4774_v22, 2102212464  ;;  %v4765_v27 = vshrl.u32 %v15578_v63, %v4764_v16  ;;  %vm4783_vm3 = vcmp.lt.s32.totalorder %v4762_v14, 3  ;;  %v13469_v23 = vpop.eup %7662 }
 0x42e   : > { %v4790_v7 = vsel %vm4784_vm11, %v4777_v0, 920167782  ;;  %v4793_v37 = vsel %vm4781_vm5, %v4771_v46, %v4774_v22  ;;  %v4916_v56 = vshll.u32 %v13464_v15, 30  ;;  %vm4782_vm8 = vcmp.lt.s32.totalorder %v4762_v14, 2 }
 0x42f   : > { %v4791_v58 = vsel %vm4783_vm3, %v4774_v22, %v4790_v7  ;;  %v4794_v48 = vsel %vm4784_vm11, %v4780_v1, 1326507024  ;;  %v4785_v45 = vsel %vm4781_vm5, %v4765_v27, %v4768_v35  ;;  %v4787_v10 = vsel %vm4783_vm3, %v4771_v46, %v4786_v29  ;;  %v1565_v35 = vpop.permute.xlu0 %1564  ;;  %v1571_v7 = vpop.permute.xlu1 %1570 }
 0x430   : > { %v4792_v19 = vsel %vm4782_vm8, %v4789_v60, %v4791_v58  ;;  %v4795_v12 = vsel %vm4783_vm3, %v4777_v0, %v4794_v48  ;;  %v15622_v16 = vand.u32 2147483647, %v13044_v28  ;;  %v13480_v5 = vsub.s32 %v4913_v11, %v4916_v56 }
 0x431   : > { %v4796_v42 = vsel %vm4782_vm8, %v4793_v37, %v4795_v12  ;;  %v13484_v2 = vmul.u32.u64.low %v13415_v43, %v4792_v19  ;;  %v13485_v47 = vmul.u32.u64.high %v13415_v43, %v4792_v19, %v13484_v2  ;;  %vm15625_vm14 = vcmask 441344  }
 0x432   : > { %vm13476_vm10 = vcmp.le.f32.partialorder %v15622_v16, 0.7853982  ;;  %v13489_v46 = vmul.u32.u64.low %v13415_v43, %v4796_v42  ;;  %v13490_v22 = vmul.u32.u64.high %v13415_v43, %v4796_v42, %v13489_v46  ;;  %v1898_v32 = vsel %vm15625_vm14, %v1865_v38, %v13351_v3  ;;  %vm15626_vm7 = vmmov %vm15625_vm14 }
 0x433   : > { %v1897_v0 = vsel %vm15626_vm7, %v1864_v8, %v13360_v33  ;;  %v4919_v11 = vsub.s32 0, %v13480_v5  ;;  %v4788_v1 = vsel %vm4782_vm8, %v4785_v45, %v4787_v10  ;;  %vm15627_vm9 = vcmask 490496   ;;  %vm15629_vm6 = vmmov %vm15626_vm7  ;;  %v1569_v16 = vpop.permute.xlu0 %1568 }
 0x434   : > { %v1931_v29 = vsel %vm15627_vm9, %v1898_v32, %v13420_v55  ;;  %vm15628_vm13 = vmmov %vm15627_vm9  ;;  %7664 = vsinq.f32 %v13397_v26  ;;  %v1900_v27 = vsel %vm15629_vm6, %v1867_v30, %v13374_v52  ;;  %vm15630_vm12 = vcmask 539648  }
 0x435   : > { %v1930_v60 = vsel %vm15628_vm13, %v1897_v0, %v13435_v54  ;;  %v1964_v3 = vsel %vm15630_vm12, %v1931_v29, %v1567_v61  ;;  %vm15631_vm2 = vmmov %vm15630_vm12  ;;  %v6977_v33 = vmin.u32 %v4919_v11, %v13480_v5  ;;  %v4807_v14 = vadd.s32 1, %v13485_v47 }
 0x436   : > { %v1963_v38 = vsel %vm15631_vm2, %v1930_v60, %v1565_v35  ;;  %v2003_v8 = vmul.f32 %v13025_v21, %v1964_v3  ;;  %v4626_v26 = vsel %vm4543_vm0, %v4625_v25, %v13437_v40  ;;  %v4804_v54 = vmul.u32 %v13415_v43, %v4788_v1  ;;  %vm15632_vm5 = vmmov %vm15627_vm9 }
 0x437   : > { %v2002_v55 = vmul.f32 %v13025_v21, %v1963_v38  ;;  %vm4806_vm15 = vc.u32 %v13490_v22, %v13484_v2  ;;  %v1933_v52 = vsel %vm15632_vm5, %v1900_v27, %v1475_v49  ;;  %v4921_v30 = vclz %v6977_v33  ;;  %vm15634_vm3 = vmmov %vm15631_vm2 }
 0x438   : > { %v4808_v37 = vsel %vm4806_vm15, %v4807_v14, %v13485_v47  ;;  %v13520_v56 = vadd.f32 %v13038_v4, %v2003_v8  ;;  %v4909_v48 = vadd.s32 %v13400_v39, %v13411_v13  ;;  %vm15633_vm11 = vcmask 343040   ;;  %vm15636_vm14 = vmmov %vm15629_vm6 }
 0x439   : > { %v13523_v58 = vadd.f32 %v13038_v4, %v2002_v55  ;;  %v4809_v40 = vadd.s32 %v4808_v37, %v4804_v54  ;;  %v1833_v43 = vsel %vm15633_vm11, %v13425_v34, %v13266_v17  ;;  %v1966_v25 = vsel %vm15634_vm3, %v1933_v52, %v1571_v7  ;;  %vm15637_vm9 = vmmov %vm15632_vm5 }
 0x43a   : > { %v6978_v49 = vadd.s32 4294967294, %v4921_v30  ;;  %vm15635_vm8 = vcmask 392192   ;;  %v14745_v45 = vand.u32 2147483647, %v13520_v56  ;;  %v5064_v10 = vand.u32 2139095040, %v13520_v56  ;;  %vm15638_vm13 = vmmov %vm15631_vm2 }
 0x43b   : > { %v1866_v61 = vsel %vm15635_vm8, %v1833_v43, %v13338_v18  ;;  %v4629_v19 = vsel %vm13476_vm10, %v13044_v28, %v4626_v26  ;;  %v4810_v39 = vadd.s32 536870912, %v4809_v40  ;;  %v4960_v17 = vand.u32 2139095040, %v13523_v58 }
 0x43c   : > { %v1899_v13 = vsel %vm15636_vm14, %v1866_v61, %v13385_v62  ;;  %vm6979_vm7 = vcmp.lt.s32.totalorder %v6978_v49, 0  ;;  %v5065_v34 = vshrl.u32 %v5064_v10, 23  ;;  %v14742_v12 = vand.u32 2147483647, %v13523_v58 }
 0x43d   : > { %v2005_v18 = vmul.f32 %v13025_v21, %v1966_v25  ;;  %v4924_v42 = vsel %vm6979_vm7, 0, %v6978_v49  ;;  %v13543_v47 = vshrl.u32 %v4810_v39, 30  ;;  %v5068_v35 = vand.u32 8388607, %v14745_v45  ;;  %v13574_v25 = vld [vmem:[%s8079_s23 + $0x10] sm:$0xff] }
 0x43e   : > { %v4961_v46 = vshrl.u32 %v4960_v17, 23  ;;  %v4925_v32 = vsub.s32 32, %v4924_v42  ;;  %v4929_v0 = vsub.s32 4294967266, %v4924_v42  ;;  %v1932_v62 = vsel %vm15637_vm9, %v1899_v13, %v13460_v44  ;;  %v13549_v1 = vpop.eup %7664 }
 0x43f   : > { %v6984_v11 = vadd.s32 4294967169, %v5065_v34  ;;  %7666 = vcosq.f32 %v4629_v19  ;;  %v4812_v29 = vshll.u32 %v13543_v47, 30  ;;  %v1965_v27 = vsel %vm15638_vm13, %v1932_v62, %v1569_v16 }
 0x440   : > { %v6980_v60 = vadd.s32 4294967169, %v4961_v46  ;;  %v4926_v3 = vshll.u32 %v13480_v5, %v4924_v42  ;;  %v4927_v38 = vshrl.u32 %v4909_v48, %v4925_v32  ;;  %v4930_v33 = vadd.s32 127, %v4929_v0 }
 0x441   : > { %v5071_v14 = vadd.s32 1, %v6984_v11  ;;  %v13554_v8 = vsub.s32 %v4809_v40, %v4812_v29  ;;  %v5069_v55 = vor.u32 8388608, %v5068_v35  ;;  %v13558_v44 = vand.u32 8388607, %v14742_v12 }
 0x442   : > { %v13561_v7 = vadd.f32 %v13038_v4, %v2005_v18  ;;  %v4928_v26 = vor.u32 %v4927_v38, %v4926_v3  ;;  %v4931_v54 = vshll.u32 %v4930_v33, 23  ;;  %v4967_v52 = vadd.s32 1, %v6980_v60  ;;  %v13571_v4 = vld [vmem:[%s8079_s23 + $0x18] sm:$0xff] }
 0x443   : > { %vm5072_vm6 = vcmp.gt.s32.totalorder %v5071_v14, 0  ;;  %7668 = vsinq.f32 %v4629_v19  ;;  %v4805_v5 = vadd.s32 %v13484_v2, %v13490_v22  ;;  %v4815_v30 = vsub.s32 0, %v13554_v8 }
 0x444   : > { %v5073_v37 = vsel %vm5072_vm6, %v5071_v14, 0  ;;  %vm14746_vm12 = vcmp.lt.s32.totalorder %v13250_v51, 0  ;;  %v4932_v48 = vor.u32 4788187, %v4931_v54  ;;  %v13568_v43 = vmul.f32 %v13025_v21, %v1965_v27 }
 0x445   : > { %v5075_v40 = vand.u32 31, %v5073_v37  ;;  %v388_v49 = vpack.c.bf16 %v13571_v4, %v13574_v25  ;;  %v6973_v61 = vmin.u32 %v4815_v30, %v13554_v8  ;;  %v13579_v2 = vshll.u32 %v5069_v55, 8  ;;  %v7542_v30 = vld [vmem:[%s14472_s3] sm:$0xff]  }
 0x446   : > { %v4965_v22 = vor.u32 8388608, %v13558_v44  ;;  %v14741_v10 = vand.u32 2147483647, %v13561_v7  ;;  %v4933_v19 = vand.u32 2147483647, %v4932_v48  ;;  %v4935_v39 = vcvt.s32.f32 %v4928_v26  ;;  %7147 = vmatprep.subr.bf16.mxu0 %v7542_v30  ;;  %7291 = vmatprep.subr.bf16.mxu1 %v7542_v30 }
 0x447   : > { %v5076_v13 = vsub.s32 32, %v5075_v40  ;;  %vm4968_vm2 = vcmp.gt.s32.totalorder %v4967_v52, 0  ;;  %v4817_v21 = vclz %v6973_v61  ;;  %v13583_v17 = vshrl.u32 %v5073_v37, 5  ;;  %v7543_v37 = vld [vmem:[%s14472_s3 + $0x8] sm:$0xff]   ;;  %7148 = vmatpush3.bf16.msra.mxu0 %v7542_v30  ;;  %7299 = vmatpush3.bf16.msra.mxu1 %v7542_v30 }
 0x448   : > { %v5078_v34 = vshll.u32 %v15578_v63, %v5075_v40  ;;  %v5081_v18 = vshll.u32 %v15579_v20, %v5075_v40  ;;  %v4936_v16 = vmul.f32 %v4935_v39, %v4933_v19  ;;  %v5084_v46 = vshll.u32 %v15580_v41, %v5075_v40  ;;  %7149 = vmatprep.subr.bf16.mxu0 %v7543_v37 }
 0x449   : > { %v5079_v42 = vshrl.u32 %v15579_v20, %v5076_v13  ;;  %v5082_v35 = vshrl.u32 %v15580_v41, %v5076_v13  ;;  %v13590_v32 = vpop.eup %7666  ;;  %v15639_v0 = vand.u32 2147483647, %v13250_v51  ;;  %v6974_v11 = vadd.s32 4294967294, %v4817_v21  ;;  %7292 = vmatprep.subr.bf16.mxu1 %v7543_v37 }
 0x44a   : > { %v5085_v29 = vshrl.u32 %v15581_v6, %v5076_v13  ;;  %v5088_v60 = vshrl.u32 %v15582_v53, %v5076_v13  ;;  %v5091_v27 = vshrl.u32 %v15583_v59, %v5076_v13  ;;  %v4937_v3 = vxor.u32 2147483648, %v4936_v16 }
 0x44b   : > { %vm13594_vm15 = vcmp.le.f32.partialorder %v15639_v0, 0.7853982  ;;  %v5080_v38 = vor.u32 %v5079_v42, %v5078_v34  ;;  %v5087_v33 = vshll.u32 %v15581_v6, %v5075_v40  ;;  %v5090_v14 = vshll.u32 %v15582_v53, %v5075_v40  ;;  %7150 = vmatpush3.bf16.msra.mxu0 %v7543_v37  ;;  %7300 = vmatpush3.bf16.msra.mxu1 %v7543_v37 }
 0x44c   : > { %vm6975_vm5 = vcmp.lt.s32.totalorder %v6974_v11, 0  ;;  %v5083_v55 = vor.u32 %v5082_v35, %v5081_v18  ;;  %v5086_v26 = vor.u32 %v5085_v29, %v5084_v46  ;;  %v4969_v54 = vsel %vm4968_vm2, %v4967_v52, 0 }
 0x44d   : > { %v4820_v48 = vsel %vm6975_vm5, 0, %v6974_v11  ;;  %v5077_v61 = vshrl.u32 %v15578_v63, %v5076_v13  ;;  %v5089_v19 = vor.u32 %v5088_v60, %v5087_v33  ;;  %v5092_v39 = vor.u32 %v5091_v27, %v5090_v14  ;;  %v13611_v21 = vpop.eup %7668 }
 0x44e   : > { %v4938_v40 = vsel %vm14746_vm12, %v4937_v3, %v4936_v16  ;;  %v4821_v34 = vsub.s32 32, %v4820_v48  ;;  %v4825_v52 = vsub.s32 4294967266, %v4820_v48  ;;  %vm5093_vm11 = vcmp.lt.s32.totalorder %v13583_v17, 1 }
 0x44f   : > { %v4822_v18 = vshll.u32 %v13554_v8, %v4820_v48  ;;  %vm5095_vm3 = vcmp.lt.s32.totalorder %v13583_v17, 3  ;;  %vm5096_vm8 = vcmp.lt.s32.totalorder %v13583_v17, 4  ;;  %v5097_v13 = vsel %vm5093_vm11, %v5077_v61, %v5080_v38  ;;  %v7544_v8 = vld [vmem:[%s14472_s3 + $0x10] sm:$0xff]  }
 0x450   : > { %v4823_v42 = vshrl.u32 %v4805_v5, %v4821_v34  ;;  %v4826_v35 = vadd.s32 127, %v4825_v52  ;;  %v5098_v16 = vsel %vm5096_vm8, %v5086_v26, 2102212464  ;;  %v5101_v46 = vsel %vm5093_vm11, %v5080_v38, %v5083_v55  ;;  %7151 = vmatprep.subr.bf16.mxu0 %v7544_v8  ;;  %7293 = vmatprep.subr.bf16.mxu1 %v7544_v8 }
 0x451   : > { %v5099_v0 = vsel %vm5095_vm3, %v5083_v55, %v5098_v16  ;;  %v5102_v11 = vsel %vm5096_vm8, %v5089_v19, 920167782  ;;  %v5105_v29 = vsel %vm5093_vm11, %v5083_v55, %v5086_v26  ;;  %v5106_v60 = vsel %vm5096_vm8, %v5092_v39, 1326507024  ;;  %7152 = vmatpush3.bf16.msra.mxu0 %v7544_v8  ;;  %7301 = vmatpush3.bf16.msra.mxu1 %v7544_v8 }
 0x452   : > { %v4824_v5 = vor.u32 %v4823_v42, %v4822_v18  ;;  %v4827_v27 = vshll.u32 %v4826_v35, 23  ;;  %vm5094_vm14 = vcmp.lt.s32.totalorder %v13583_v17, 2  ;;  %v5103_v3 = vsel %vm5095_vm3, %v5086_v26, %v5102_v11  ;;  %v7545_v26 = vld [vmem:[%s14472_s3 + $0x18] sm:$0xff]   ;;  %v7546_v11 = vld [vmem:[%s14472_s3 + $0x20] sm:$0xff]  }
 0x453   : > { %v4941_v38 = vsel %vm13594_vm15, %v13250_v51, %v4938_v40  ;;  %v5104_v33 = vsel %vm5094_vm14, %v5101_v46, %v5103_v3  ;;  %v5107_v14 = vsel %vm5095_vm3, %v5089_v19, %v5106_v60  ;;  %v13640_v30 = vshll.u32 %v4965_v22, 8  ;;  %7153 = vmatprep.subr.bf16.mxu0 %v7545_v26  ;;  %7294 = vmatprep.subr.bf16.mxu1 %v7545_v26 }
 0x454   : > { %v4828_v55 = vor.u32 4788187, %v4827_v27  ;;  %v5100_v48 = vsel %vm5094_vm14, %v5097_v13, %v5099_v0  ;;  %v5108_v61 = vsel %vm5094_vm14, %v5105_v29, %v5107_v14  ;;  %v4971_v39 = vand.u32 31, %v4969_v54 }
 0x455   : > { %v13646_v40 = vmul.u32.u64.low %v13579_v2, %v5108_v61  ;;  %v13647_v17 = vmul.u32.u64.high %v13579_v2, %v5108_v61, %v13646_v40  ;;  %v13650_v44 = vmul.u32.u64.low %v13579_v2, %v5104_v33  ;;  %v13651_v22 = vmul.u32.u64.high %v13579_v2, %v5104_v33, %v13650_v44  ;;  %7154 = vmatpush3.bf16.msra.mxu0 %v7545_v26  ;;  %7302 = vmatpush3.bf16.msra.mxu1 %v7545_v26 }
 0x456   : > { %7670 = vcosq.f32 %v4941_v38  ;;  %v4829_v37 = vand.u32 2147483647, %v4828_v55  ;;  %v4831_v19 = vcvt.s32.f32 %v4824_v5  ;;  %v4972_v34 = vsub.s32 32, %v4971_v39  ;;  %7155 = vmatprep.subr.bf16.mxu0 %v7546_v11  ;;  %7295 = vmatprep.subr.bf16.mxu1 %v7546_v11 }
 0x457   : > { %vm14750_vm7 = vcmp.lt.s32.totalorder %v13263_v24, 0  ;;  %v5116_v52 = vmul.u32 %v13579_v2, %v5100_v48  ;;  %v4970_v18 = vshrl.u32 %v4969_v54, 5  ;;  %v4974_v13 = vshll.u32 %v15578_v63, %v4971_v39 }
 0x458   : > { %v4977_v42 = vshll.u32 %v15579_v20, %v4971_v39  ;;  %v4832_v35 = vmul.f32 %v4831_v19, %v4829_v37  ;;  %v4975_v16 = vshrl.u32 %v15579_v20, %v4972_v34  ;;  %v4978_v46 = vshrl.u32 %v15580_v41, %v4972_v34 }
 0x459   : > { %v4980_v0 = vshll.u32 %v15580_v41, %v4971_v39  ;;  %vm5118_vm9 = vc.u32 %v13647_v17, %v13650_v44  ;;  %v5119_v2 = vadd.s32 1, %v13651_v22  ;;  %v4981_v54 = vshrl.u32 %v15581_v6, %v4972_v34  ;;  %7156 = vmatpush3.bf16.msra.mxu0 %v7546_v11  ;;  %7303 = vmatpush3.bf16.msra.mxu1 %v7546_v11 }
 0x45a   : > { %v4983_v8 = vshll.u32 %v15581_v6, %v4971_v39  ;;  %v4976_v29 = vor.u32 %v4975_v16, %v4974_v13  ;;  %v4979_v60 = vor.u32 %v4978_v46, %v4977_v42  ;;  %v4984_v5 = vshrl.u32 %v15582_v53, %v4972_v34  ;;  %7157 = vmatprep.subr.bf16.mxu0 %v7547_v36 }
 0x45b   : > { %v4986_v27 = vshll.u32 %v15582_v53, %v4971_v39  ;;  %7672 = vsinq.f32 %v4941_v38  ;;  %v5120_v3 = vsel %vm5118_vm9, %v5119_v2, %v13651_v22  ;;  %v4982_v33 = vor.u32 %v4981_v54, %v4980_v0  ;;  %7296 = vmatprep.subr.bf16.mxu1 %v7547_v36 }
 0x45c   : > { %v4987_v14 = vshrl.u32 %v15583_v59, %v4972_v34  ;;  %v15642_v55 = vand.u32 2147483647, %v13263_v24  ;;  %v4833_v61 = vxor.u32 2147483648, %v4832_v35  ;;  %v5121_v40 = vadd.s32 %v5120_v3, %v5116_v52 }
 0x45d   : > { %v4973_v37 = vshrl.u32 %v15578_v63, %v4972_v34  ;;  %v4985_v19 = vor.u32 %v4984_v5, %v4983_v8  ;;  %vm4989_vm6 = vcmp.lt.s32.totalorder %v4970_v18, 1  ;;  %vm4991_vm2 = vcmp.lt.s32.totalorder %v4970_v18, 3  ;;  %v5408_v8 = vpop.permute.xlu1 %5407  ;;  %7158 = vmatpush3.bf16.msra.mxu0 %v7547_v36  ;;  %7304 = vmatpush3.bf16.msra.mxu1 %v7547_v36 }
 0x45e   : > { %vm13675_vm13 = vcmp.le.f32.partialorder %v15642_v55, 0.7853982  ;;  %v4988_v38 = vor.u32 %v4987_v14, %v4986_v27  ;;  %vm4992_vm5 = vcmp.lt.s32.totalorder %v4970_v18, 4  ;;  %v5122_v39 = vadd.s32 536870912, %v5121_v40 }
 0x45f   : > { %v4993_v22 = vsel %vm4989_vm6, %v4973_v37, %v4976_v29  ;;  %v4994_v26 = vsel %vm4992_vm5, %v4982_v33, 2102212464  ;;  %v4997_v13 = vsel %vm4989_vm6, %v4976_v29, %v4979_v60  ;;  %vm4990_vm11 = vcmp.lt.s32.totalorder %v4970_v18, 2  ;;  %v7854_v18 = vld [vmem:[%s14471_s2] ss:$0 sm:$0xff] }
 0x460   : > { %v4995_v42 = vsel %vm4991_vm2, %v4979_v60, %v4994_v26  ;;  %v4998_v16 = vsel %vm4992_vm5, %v4985_v19, 920167782  ;;  %v5001_v46 = vsel %vm4989_vm6, %v4979_v60, %v4982_v33  ;;  %v13681_v52 = vpop.eup %7670  ;;  %v4834_v34 = vsel %vm14750_vm7, %v4833_v61, %v4832_v35 }
 0x461   : > { %v13685_v0 = vshrl.u32 %v5122_v39, 30  ;;  %v4999_v2 = vsel %vm4991_vm2, %v4982_v33, %v4998_v16  ;;  %v5002_v54 = vsel %vm4992_vm5, %v4988_v38, 1326507024  ;;  %v4996_v29 = vsel %vm4990_vm11, %v4993_v22, %v4995_v42  ;;  %v5406_v16 = vpop.permute.xlu0 %5405 }
 0x462   : > { %v5000_v5 = vsel %vm4990_vm11, %v4997_v13, %v4999_v2  ;;  %v5003_v27 = vsel %vm4991_vm2, %v4985_v19, %v5002_v54  ;;  %v5272_v60 = vand.u32 2139095040, %v13561_v7  ;;  %v5276_v37 = vand.u32 8388607, %v14741_v10 }
 0x463   : > { %v5124_v11 = vshll.u32 %v13685_v0, 30  ;;  %v5004_v3 = vsel %vm4990_vm11, %v5001_v46, %v5003_v27  ;;  %v13695_v35 = vmul.u32.u64.low %v13640_v30, %v5000_v5  ;;  %v13696_v14 = vmul.u32.u64.high %v13640_v30, %v5000_v5, %v13695_v35  ;;  %v5412_v46 = vpop.permute.xlu1 %5411 }
 0x464   : > { %v13700_v33 = vmul.u32.u64.low %v13640_v30, %v5004_v3  ;;  %v13701_v55 = vmul.u32.u64.high %v13640_v30, %v5004_v3, %v13700_v33  ;;  %v5273_v61 = vshrl.u32 %v5272_v60, 23  ;;  %v13711_v38 = vadd.f32 %v7854_v18, %v13568_v43  ;;  %v7858_v3 = vld [vmem:[%s8079_s23 + $0x30] sm:$0xff] }
 0x465   : > { %v13705_v19 = vsub.s32 %v5121_v40, %v5124_v11  ;;  %vm403_vm3 = vcmask 269312   ;;  %vm5453_vm8 = vcmask 859400   ;;  %v13713_v39 = vpop.eup %7672  ;;  %v4837_v22 = vsel %vm13675_vm13, %v13263_v24, %v4834_v34  ;;  %v7857_v11 = vld [vmem:[%s8079_s23 + $0x38] sm:$0xff] }
 0x466   : > { %15645 = vst [vmem:[#allocation93_spill] sm:$0xff] %v13711_v38  ;;  %v6992_v26 = vadd.s32 4294967169, %v5273_v61  ;;  %405 = vst.msk [vmem:[#allocation2 + $0x8] sm:$0xff] %vm403_vm3, %v388_v49  ;;  %vm5470_vm14 = vcmask 1048392   ;;  %v13724_v40 = vadd.s32 %v13650_v44, %v13647_v17  ;;  %v5015_v13 = vadd.s32 1, %v13696_v14 }
 0x467   : > { %v5127_v43 = vsub.s32 0, %v13705_v19  ;;  %v14740_v42 = vand.u32 2147483647, %v13711_v38  ;;  %5455 = vst.msk [vmem:[#allocation2 + $0x8] sm:$0xff] %vm5453_vm8, %v5408_v8  ;;  %v5012_v4 = vmul.u32 %v13640_v30, %v4996_v29  ;;  %vm5014_vm9 = vc.u32 %v13701_v55, %v13695_v35  ;;  %v7855_v8 = vld [vmem:[%s8079_s23] sm:$0xff]  ;;  %v7856_v29 = vld [vmem:[%s8079_s23 + $0x8] sm:$0xff] }
 0x468   : > { %v5277_v25 = vor.u32 8388608, %v5276_v37  ;;  %v5279_v49 = vadd.s32 1, %v6992_v26  ;;  %v14743_v17 = vmov 0   ;;  %7674 = vcosq.f32 %v4837_v22 }
 0x469   : > { %5472 = vst.msk [vmem:[#allocation2 + $0x8] sm:$0xff] %vm5470_vm14, %v14743_v17  ;;  %v6985_v44 = vmin.u32 %v5127_v43, %v13705_v19  ;;  %v5016_v34 = vsel %vm5014_vm9, %v5015_v13, %v13696_v14  ;;  %v5168_v2 = vand.u32 2139095040, %v13711_v38  ;;  %v13740_v30 = vand.u32 8388607, %v14740_v42  ;;  %v7860_v13 = vld [vmem:[%s8079_s23 + $0x20] sm:$0xff] }
 0x46a   : > { %v5017_v54 = vadd.s32 %v5016_v34, %v5012_v4  ;;  %vm5280_vm6 = vcmp.gt.s32.totalorder %v5279_v49, 0  ;;  %v387_v5 = vpack.c.bf16 %v7856_v29, %v7855_v8  ;;  %7676 = vsinq.f32 %v4837_v22  ;;  %v7859_v22 = vld [vmem:[%s8079_s23 + $0x28] sm:$0xff]  ;;  %v7862_v34 = vld [vmem:[%s8079_s23 + $0x50] sm:$0xff]  ;;  %v5416_v29 = vpop.permute.xlu1 %5415 }
 0x46b   : > { %v5129_v27 = vclz %v6985_v44  ;;  %v5281_v60 = vsel %vm5280_vm6, %v5279_v49, 0  ;;  %v390_v14 = vpack.c.bf16 %v7857_v11, %v7858_v3  ;;  %v13746_v37 = vshll.u32 %v5277_v25, 8  ;;  %v5410_v49 = vpop.permute.xlu0 %5409  ;;  %v7861_v44 = vld [vmem:[%s8079_s23 + $0x58] sm:$0xff] }
 0x46c   : > { %v5018_v33 = vadd.s32 536870912, %v5017_v54  ;;  %v5283_v61 = vand.u32 31, %v5281_v60  ;;  %v5169_v18 = vshrl.u32 %v5168_v2, 23  ;;  %404 = vst.msk [vmem:[#allocation2] sm:$0xff] %vm403_vm3, %v387_v5  ;;  %v13749_v43 = vshrl.u32 %v5281_v60, 5 }
 0x46d   : > { %v6986_v26 = vadd.s32 4294967294, %v5129_v27  ;;  %5454 = vst.msk [vmem:[#allocation2] sm:$0xff] %vm5453_vm8, %v5406_v16  ;;  %v389_v4 = vpack.c.bf16 %v7859_v22, %v7860_v13  ;;  %v392_v8 = vpack.c.bf16 %v7861_v44, %v7862_v34  ;;  %vm14749_vm5 = vcmp.lt.s32.totalorder %v13520_v56, 0 }
 0x46e   : > { %407 = vst.msk [vmem:[#allocation2 + $0x18] sm:$0xff] %vm403_vm3, %v390_v14  ;;  %v13757_v25 = vshrl.u32 %v5018_v33, 30  ;;  %v5284_v2 = vsub.s32 32, %v5283_v61  ;;  %v5286_v5 = vshll.u32 %v15578_v63, %v5283_v61  ;;  %v5289_v16 = vshll.u32 %v15579_v20, %v5283_v61 }
 0x46f   : > { %5471 = vst.msk [vmem:[#allocation2] sm:$0xff] %vm5470_vm14, %v14743_v17  ;;  %vm6987_vm2 = vcmp.lt.s32.totalorder %v6986_v26, 0  ;;  %v5292_v60 = vshll.u32 %v15580_v41, %v5283_v61  ;;  %v5295_v11 = vshll.u32 %v15581_v6, %v5283_v61  ;;  %vm5301_vm11 = vcmp.lt.s32.totalorder %v13749_v43, 1 }
 0x470   : > { %5457 = vst.msk [vmem:[#allocation2 + $0x18] sm:$0xff] %vm5453_vm8, %v5412_v46  ;;  %v5132_v3 = vsel %vm6987_vm2, 0, %v6986_v26  ;;  %v5020_v14 = vshll.u32 %v13757_v25, 30  ;;  %v5287_v33 = vshrl.u32 %v15579_v20, %v5284_v2  ;;  %v5298_v46 = vshll.u32 %v15582_v53, %v5283_v61 }
 0x471   : > { %5474 = vst.msk [vmem:[#allocation2 + $0x18] sm:$0xff] %vm5470_vm14, %v14743_v17  ;;  %v5133_v22 = vsub.s32 32, %v5132_v3  ;;  %v5134_v13 = vshll.u32 %v13705_v19, %v5132_v3  ;;  %v5137_v44 = vsub.s32 4294967266, %v5132_v3  ;;  %v5290_v34 = vshrl.u32 %v15580_v41, %v5284_v2 }
 0x472   : > { %406 = vst.msk [vmem:[#allocation2 + $0x10] sm:$0xff] %vm403_vm3, %v389_v4  ;;  %409 = vst.msk [vmem:[#allocation2 + $0x28] sm:$0xff] %vm403_vm3, %v392_v8  ;;  %v13782_v26 = vsub.s32 %v5017_v54, %v5020_v14  ;;  %v5288_v4 = vor.u32 %v5287_v33, %v5286_v5  ;;  %v5293_v61 = vshrl.u32 %v15581_v6, %v5284_v2  ;;  %v13786_v8 = vpop.eup %7674  ;;  %vm5302_vm9 = vcmp.lt.s32.totalorder %v13749_v43, 2 }
 0x473   : > { %5456 = vst.msk [vmem:[#allocation2 + $0x10] sm:$0xff] %vm5453_vm8, %v5410_v49  ;;  %5459 = vst.msk [vmem:[#allocation2 + $0x28] sm:$0xff] %vm5453_vm8, %v5416_v29  ;;  %v5296_v49 = vshrl.u32 %v15582_v53, %v5284_v2  ;;  %v5135_v19 = vshrl.u32 %v13724_v40, %v5133_v22  ;;  %v5138_v29 = vadd.s32 127, %v5137_v44  ;;  %v5291_v3 = vor.u32 %v5290_v34, %v5289_v16 }
 0x474   : > { %5473 = vst.msk [vmem:[#allocation2 + $0x10] sm:$0xff] %vm5470_vm14, %v14743_v17  ;;  %5476 = vst.msk [vmem:[#allocation2 + $0x28] sm:$0xff] %vm5470_vm14, %v14743_v17  ;;  %v5299_v42 = vshrl.u32 %v15583_v59, %v5284_v2  ;;  %v5023_v10 = vsub.s32 0, %v13782_v26  ;;  %v5294_v12 = vor.u32 %v5293_v61, %v5292_v60  ;;  %v6988_v17 = vadd.s32 4294967169, %v5169_v18  ;;  %v13791_v54 = vpop.eup %7676 }
 0x475   : > { %v5297_v27 = vor.u32 %v5296_v49, %v5295_v11  ;;  %v5136_v5 = vor.u32 %v5135_v19, %v5134_v13  ;;  %v5139_v14 = vshll.u32 %v5138_v29, 23  ;;  %v5285_v33 = vshrl.u32 %v15578_v63, %v5284_v2 }
 0x476   : > { %v5300_v45 = vor.u32 %v5299_v42, %v5298_v46  ;;  %v6981_v40 = vmin.u32 %v5023_v10, %v13782_v26  ;;  %vm5304_vm6 = vcmp.lt.s32.totalorder %v13749_v43, 4  ;;  %vm5303_vm2 = vcmp.lt.s32.totalorder %v13749_v43, 3  ;;  %v7865_v43 = vld [vmem:[%s8079_s23 + $0x78] sm:$0xff] }
 0x477   : > { %v5140_v16 = vor.u32 4788187, %v5139_v14  ;;  %v5306_v18 = vsel %vm5304_vm6, %v5294_v12, 2102212464  ;;  %v5309_v60 = vsel %vm5301_vm11, %v5288_v4, %v5291_v3  ;;  %v15646_v11 = vand.u32 2147483647, %v13520_v56 }
 0x478   : > { %v5025_v42 = vclz %v6981_v40  ;;  %v5305_v46 = vsel %vm5301_vm11, %v5285_v33, %v5288_v4  ;;  %v5310_v10 = vsel %vm5304_vm6, %v5297_v27, 920167782  ;;  %v5313_v22 = vsel %vm5301_vm11, %v5291_v3, %v5294_v12 }
 0x479   : > { %vm13802_vm12 = vcmp.le.f32.partialorder %v15646_v11, 0.7853982  ;;  %v5141_v13 = vand.u32 2147483647, %v5140_v16  ;;  %v5143_v44 = vcvt.s32.f32 %v5136_v5  ;;  %v5311_v34 = vsel %vm5303_vm2, %v5294_v12, %v5310_v10  ;;  %v7863_v16 = vld [vmem:[%s8079_s23 + $0x48] sm:$0xff] }
 0x47a   : > { %v5314_v61 = vsel %vm5304_vm6, %v5300_v45, 1326507024  ;;  %v6982_v49 = vadd.s32 4294967294, %v5025_v42  ;;  %v5307_v19 = vsel %vm5303_vm2, %v5291_v3, %v5306_v18  ;;  %v5312_v29 = vsel %vm5302_vm9, %v5309_v60, %v5311_v34  ;;  %v7864_v18 = vld [vmem:[%s8079_s23 + $0x40] sm:$0xff]  ;;  %v5414_v42 = vpop.permute.xlu0 %5413 }
 0x47b   : > { %v5315_v14 = vsel %vm5303_vm2, %v5297_v27, %v5314_v61  ;;  %v5144_v11 = vmul.f32 %v5143_v44, %v5141_v13  ;;  %v13811_v4 = vmul.u32.u64.low %v13746_v37, %v5312_v29  ;;  %v13812_v33 = vmul.u32.u64.high %v13746_v37, %v5312_v29, %v13811_v4  ;;  %v5420_v61 = vpop.permute.xlu1 %5419 }
 0x47c   : > { %v5316_v38 = vsel %vm5302_vm9, %v5313_v22, %v5315_v14  ;;  %vm6983_vm11 = vcmp.lt.s32.totalorder %v6982_v49, 0  ;;  %v5175_v45 = vadd.s32 1, %v6988_v17  ;;  %v5308_v27 = vsel %vm5302_vm9, %v5305_v46, %v5307_v19  ;;  %v7866_v46 = vld [vmem:[%s8079_s23 + $0x70] sm:$0xff] }
 0x47d   : > { %v13816_v12 = vmul.u32.u64.low %v13746_v37, %v5316_v38  ;;  %v13817_v5 = vmul.u32.u64.high %v13746_v37, %v5316_v38, %v13816_v12  ;;  %v5145_v3 = vxor.u32 2147483648, %v5144_v11  ;;  %v5028_v40 = vsel %vm6983_vm11, 0, %v6982_v49 }
 0x47e   : > { %v391_v60 = vpack.c.bf16 %v7863_v16, %v7864_v18  ;;  %v5013_v10 = vadd.s32 %v13695_v35, %v13701_v55  ;;  %v5029_v22 = vsub.s32 32, %v5028_v40  ;;  %v5033_v13 = vsub.s32 4294967266, %v5028_v40 }
 0x47f   : > { %vm5176_vm6 = vcmp.gt.s32.totalorder %v5175_v45, 0  ;;  %v5146_v38 = vsel %vm14749_vm5, %v5145_v3, %v5144_v11  ;;  %v5327_v17 = vadd.s32 1, %v13812_v33  ;;  %v394_v34 = vpack.c.bf16 %v7865_v43, %v7866_v46 }
 0x480   : > { %v5177_v44 = vsel %vm5176_vm6, %v5175_v45, 0  ;;  %408 = vst.msk [vmem:[#allocation2 + $0x20] sm:$0xff] %vm403_vm3, %v391_v60  ;;  %v5030_v49 = vshll.u32 %v13782_v26, %v5028_v40  ;;  %v5031_v19 = vshrl.u32 %v5013_v10, %v5029_v22  ;;  %v5034_v29 = vadd.s32 127, %v5033_v13 }
 0x481   : > { %v5324_v35 = vmul.u32 %v13746_v37, %v5308_v27  ;;  %5458 = vst.msk [vmem:[#allocation2 + $0x20] sm:$0xff] %vm5453_vm8, %v5414_v42  ;;  %v5149_v55 = vsel %vm13802_vm12, %v13520_v56, %v5146_v38  ;;  %vm5326_vm9 = vc.u32 %v13817_v5, %v13811_v4  ;;  %v5179_v14 = vand.u32 31, %v5177_v44 }
 0x482   : > { %v15649_v11 = vor.u32 8388608, %v13740_v30  ;;  %v15650_v45 = vmov 0   ;;  %411 = vst.msk [vmem:[#allocation2 + $0x38] sm:$0xff] %vm403_vm3, %v394_v34  ;;  %v5032_v37 = vor.u32 %v5031_v19, %v5030_v49  ;;  %v5035_v26 = vshll.u32 %v5034_v29, 23 }
 0x483   : > { %5475 = vst.msk [vmem:[#allocation2 + $0x20] sm:$0xff] %vm5470_vm14, %v15650_v45  ;;  %v5328_v3 = vsel %vm5326_vm9, %v5327_v17, %v13812_v33  ;;  %v5178_v40 = vshrl.u32 %v5177_v44, 5  ;;  %vm4959_vm2 = vcmp.lt.s32.totalorder %v13523_v58, 0  ;;  %v5180_v16 = vsub.s32 32, %v5179_v14 }
 0x484   : > { %v13841_v12 = vshll.u32 %v15649_v11, 8  ;;  %5461 = vst.msk [vmem:[#allocation2 + $0x38] sm:$0xff] %vm5453_vm8, %v5420_v61  ;;  %v5329_v27 = vadd.s32 %v5328_v3, %v5324_v35  ;;  %v5182_v30 = vshll.u32 %v15578_v63, %v5179_v14  ;;  %v5185_v18 = vshll.u32 %v15579_v20, %v5179_v14 }
 0x485   : > { %5478 = vst.msk [vmem:[#allocation2 + $0x38] sm:$0xff] %vm5470_vm14, %v15650_v45  ;;  %v15651_v60 = vand.u32 2147483647, %v13523_v58  ;;  %v5036_v33 = vor.u32 4788187, %v5035_v26  ;;  %v5039_v10 = vcvt.s32.f32 %v5032_v37  ;;  %v5188_v22 = vshll.u32 %v15580_v41, %v5179_v14 }
 0x486   : > { %v5191_v13 = vshll.u32 %v15581_v6, %v5179_v14  ;;  %v5330_v38 = vadd.s32 536870912, %v5329_v27  ;;  %v5181_v17 = vshrl.u32 %v15578_v63, %v5180_v16  ;;  %v5183_v44 = vshrl.u32 %v15579_v20, %v5180_v16 }
 0x487   : > { %vm13855_vm11 = vcmp.le.f32.partialorder %v15651_v60, 0.7853982  ;;  %v5186_v43 = vshrl.u32 %v15580_v41, %v5180_v16  ;;  %v5037_v46 = vand.u32 2147483647, %v5036_v33  ;;  %v5189_v34 = vshrl.u32 %v15581_v6, %v5180_v16 }
 0x488   : > { %v5192_v61 = vshrl.u32 %v15582_v53, %v5180_v16  ;;  %v5194_v49 = vshll.u32 %v15582_v53, %v5179_v14  ;;  %v13867_v19 = vshrl.u32 %v5330_v38, 30  ;;  %v5184_v29 = vor.u32 %v5183_v44, %v5182_v30 }
 0x489   : > { %v5187_v35 = vor.u32 %v5186_v43, %v5185_v18  ;;  %v5195_v11 = vshrl.u32 %v15583_v59, %v5180_v16  ;;  %v5040_v37 = vmul.f32 %v5039_v10, %v5037_v46  ;;  %v5190_v26 = vor.u32 %v5189_v34, %v5188_v22 }
 0x48a   : > { %v5193_v63 = vor.u32 %v5192_v61, %v5191_v13  ;;  %vm5197_vm6 = vcmp.lt.s32.totalorder %v5178_v40, 1  ;;  %v5332_v20 = vshll.u32 %v13867_v19, 30  ;;  %vm5198_vm9 = vcmp.lt.s32.totalorder %v5178_v40, 2 }
 0x48b   : > { %v5196_v41 = vor.u32 %v5195_v11, %v5194_v49  ;;  %vm5199_vm5 = vcmp.lt.s32.totalorder %v5178_v40, 3  ;;  %v5041_v6 = vxor.u32 2147483648, %v5040_v37  ;;  %vm5200_vm7 = vcmp.lt.s32.totalorder %v5178_v40, 4 }
 0x48c   : > { %v5201_v3 = vsel %vm5197_vm6, %v5181_v17, %v5184_v29  ;;  %v5205_v60 = vsel %vm5197_vm6, %v5184_v29, %v5187_v35  ;;  %v13871_v53 = vsub.s32 %v5329_v27, %v5332_v20  ;;  %v5202_v14 = vsel %vm5200_vm7, %v5190_v26, 2102212464 }
 0x48d   : > { %v5206_v30 = vsel %vm5200_vm7, %v5193_v63, 920167782  ;;  %v5209_v18 = vsel %vm5197_vm6, %v5187_v35, %v5190_v26  ;;  %v5042_v59 = vsel %vm4959_vm2, %v5041_v6, %v5040_v37  ;;  %v5203_v16 = vsel %vm5199_vm5, %v5187_v35, %v5202_v14  ;;  %v7867_v14 = vld [vmem:[%s8079_s23 + $0x68] sm:$0xff] }
 0x48e   : > { %v5207_v33 = vsel %vm5199_vm5, %v5190_v26, %v5206_v30  ;;  %v5210_v10 = vsel %vm5200_vm7, %v5196_v41, 1326507024  ;;  %7678 = vcosq.f32 %v5149_v55  ;;  %v5045_v22 = vsel %vm13855_vm11, %v13523_v58, %v5042_v59  ;;  %v7868_v30 = vld [vmem:[%s8079_s23 + $0x60] sm:$0xff] }
 0x48f   : > { %v5335_v13 = vsub.s32 0, %v13871_v53  ;;  %v5208_v27 = vsel %vm5198_vm9, %v5205_v60, %v5207_v33  ;;  %v5204_v38 = vsel %vm5198_vm9, %v5201_v3, %v5203_v16  ;;  %v5211_v17 = vsel %vm5199_vm5, %v5193_v63, %v5210_v10  ;;  %v7869_v10 = vld [vmem:[%s8079_s23 + $0x98] sm:$0xff] }
 0x490   : > { %v13885_v44 = vmul.u32.u64.low %v13841_v12, %v5208_v27  ;;  %v13886_v43 = vmul.u32.u64.high %v13841_v12, %v5208_v27, %v13885_v44  ;;  %7680 = vsinq.f32 %v5149_v55  ;;  %v5325_v46 = vadd.s32 %v13811_v4, %v13817_v5  ;;  %v5424_v27 = vpop.permute.xlu1 %5423 }
 0x491   : > { %v6993_v34 = vmin.u32 %v5335_v13, %v13871_v53  ;;  %v5212_v61 = vsel %vm5198_vm9, %v5209_v18, %v5211_v17  ;;  %7682 = vcosq.f32 %v5045_v22  ;;  %v4627_v35 = vsub.s32 4, %v13279_v50  ;;  %v5418_v18 = vpop.permute.xlu0 %5417 }
 0x492   : > { %v13894_v49 = vmul.u32.u64.low %v13841_v12, %v5212_v61  ;;  %v13895_v29 = vmul.u32.u64.high %v13841_v12, %v5212_v61, %v13894_v49  ;;  %7684 = vsinq.f32 %v5045_v22  ;;  %v5220_v37 = vmul.u32 %v13841_v12, %v5204_v38  ;;  %v7870_v22 = vld [vmem:[%s8079_s23 + $0x90] sm:$0xff] }
 0x493   : > { %v5337_v11 = vclz %v6993_v34  ;;  %v4731_v55 = vsub.s32 4, %v13212_v9  ;;  %v5223_v4 = vadd.s32 1, %v13886_v43  ;;  %v4628_v5 = vsel %vm4543_vm0, %v4627_v35, %v13279_v50  ;;  %v7548_v38 = vld [vmem:[%s14472_s3 + $0x30] sm:$0xff]  }
 0x494   : > { %v4638_v40 = vxor.u32 2147483648, %v13611_v21  ;;  %v4641_v26 = vxor.u32 2147483648, %v13590_v32  ;;  %v4630_v20 = vsel %vm13476_vm10, 0, %v4628_v5  ;;  %v4742_v41 = vxor.u32 2147483648, %v13549_v1  ;;  %7159 = vmatprep.subr.bf16.mxu0 %v7548_v38  ;;  %7297 = vmatprep.subr.bf16.mxu1 %v7548_v38 }
 0x495   : > { %v6994_v63 = vadd.s32 4294967294, %v5337_v11  ;;  %v4732_v12 = vsel %vm4647_vm1, %v4731_v55, %v13212_v9  ;;  %vm5222_vm7 = vc.u32 %v13895_v29, %v13885_v44  ;;  %v4634_v50 = vadd.s32 3, %v4630_v20  ;;  %7160 = vmatpush3.bf16.msra.mxu0 %v7548_v38  ;;  %7305 = vmatpush3.bf16.msra.mxu1 %v7548_v38 }
 0x496   : > { %v4734_v6 = vsel %vm13355_vm4, 0, %v4732_v12  ;;  %v4745_v3 = vxor.u32 2147483648, %v13469_v23  ;;  %v5224_v31 = vsel %vm5222_vm7, %v5223_v4, %v13886_v43  ;;  %v393_v9 = vpack.c.bf16 %v7867_v14, %v7868_v30  ;;  %v5422_v14 = vpop.permute.xlu0 %5421 }
 0x497   : > { %vm6995_vm0 = vcmp.lt.s32.totalorder %v6994_v63, 0  ;;  %v4738_v60 = vadd.s32 3, %v4734_v6  ;;  %v5225_v16 = vadd.s32 %v5224_v31, %v5220_v37  ;;  %v4635_v33 = vand.u32 3, %v4634_v50  ;;  %v7871_v6 = vld [vmem:[%s8079_s23 + $0x88] sm:$0xff]  ;;  %v7872_v31 = vld [vmem:[%s8079_s23 + $0x80] sm:$0xff] }
 0x498   : > { %v5340_v59 = vsel %vm6995_vm0, 0, %v6994_v63  ;;  %v396_v13 = vpack.c.bf16 %v7869_v10, %v7870_v22  ;;  %v13928_v17 = vpop.eup %7678  ;;  %410 = vst.msk [vmem:[#allocation2 + $0x30] sm:$0xff] %vm403_vm3, %v393_v9  ;;  %vm4633_vm5 = vweird.f32 %v13044_v28  ;;  %v13956_v20 = vadd.s32 %v13885_v44, %v13895_v29 }
 0x499   : > { %v5341_v43 = vsub.s32 32, %v5340_v59  ;;  %v5342_v34 = vshll.u32 %v13871_v53, %v5340_v59  ;;  %v5345_v61 = vsub.s32 4294967266, %v5340_v59  ;;  %v4739_v49 = vand.u32 3, %v4738_v60  ;;  %5460 = vst.msk [vmem:[#allocation2 + $0x30] sm:$0xff] %vm5453_vm8, %v5418_v18 }
 0x49a   : > { %v5226_v35 = vadd.s32 536870912, %v5225_v16  ;;  %vm4636_vm1 = vcmp.lt.s32.totalorder %v4635_v33, 2  ;;  %vm4637_vm4 = vcmp.eq.s32.totalorder %v4635_v33, 0  ;;  %vm4640_vm10 = vcmp.eq.s32.totalorder %v4635_v33, 2  ;;  %413 = vst.msk [vmem:[#allocation2 + $0x48] sm:$0xff] %vm403_vm3, %v396_v13  ;;  %v13934_v11 = vpop.eup %7680 }
 0x49b   : > { %v5343_v37 = vshrl.u32 %v5325_v46, %v5341_v43  ;;  %v5346_v55 = vadd.s32 127, %v5345_v61  ;;  %v4639_v53 = vsel %vm4637_vm4, %v13590_v32, %v4638_v40  ;;  %v4642_v4 = vsel %vm4640_vm10, %v4641_v26, %v13611_v21  ;;  %5477 = vst.msk [vmem:[#allocation2 + $0x30] sm:$0xff] %vm5470_vm14, %v15650_v45  ;;  %v13941_v5 = vpop.eup %7682  ;;  %v7549_v32 = vld [vmem:[%s14472_s3 + $0x38] sm:$0xff]   ;;  %v7874_v61 = vld [vmem:[%s8079_s23 + $0xa0] sm:$0xff] }
 0x49c   : > { %5463 = vst.msk [vmem:[#allocation2 + $0x48] sm:$0xff] %vm5453_vm8, %v5424_v27  ;;  %v13943_v63 = vshrl.u32 %v5226_v35, 30  ;;  %v4643_v46 = vsel %vm4636_vm1, %v4639_v53, %v4642_v4  ;;  %vm4741_vm6 = vcmp.eq.s32.totalorder %v4739_v49, 0  ;;  %v13952_v21 = vpop.eup %7684  ;;  %vm5271_vm9 = vcmp.lt.s32.totalorder %v13561_v7, 0  ;;  %7161 = vmatprep.subr.bf16.mxu0 %v7549_v32  ;;  %7298 = vmatprep.subr.bf16.mxu1 %v7549_v32  ;;  %v5426_v35 = vpop.permute.xlu0 %5425  ;;  %v7875_v53 = vld [vmem:[%s8079_s23 + $0xb8] sm:$0xff]  ;;  %v7876_v4 = vld [vmem:[%s8079_s23 + $0xb0] sm:$0xff] }
 0x49d   : > { %5480 = vst.msk [vmem:[#allocation2 + $0x48] sm:$0xff] %vm5470_vm14, %v15650_v45  ;;  %v5344_v40 = vor.u32 %v5343_v37, %v5342_v34  ;;  %v5347_v26 = vshll.u32 %v5346_v55, 23  ;;  %v4743_v12 = vsel %vm4741_vm6, %v13469_v23, %v4742_v41  ;;  %vm4744_vm7 = vcmp.eq.s32.totalorder %v4739_v49, 2  ;;  %7162 = vmatpush3.bf16.msra.mxu0 %v7549_v32  ;;  %7306 = vmatpush3.bf16.msra.mxu1 %v7549_v32  ;;  %v7873_v34 = vld [vmem:[%s8079_s23 + $0xa8] sm:$0xff]  ;;  %v5428_v32 = vpop.permute.xlu1 %5427 }
 0x49e   : > { %v5228_v50 = vshll.u32 %v13943_v63, 30  ;;  %v395_v60 = vpack.c.bf16 %v7871_v6, %v7872_v31  ;;  %v4835_v30 = vsub.s32 4, %v13543_v47  ;;  %v4644_v18 = vsel %vm4633_vm5, nan, %v4643_v46 }
 0x49f   : > { %v5348_v9 = vor.u32 4788187, %v5347_v26  ;;  %vm4740_vm0 = vcmp.lt.s32.totalorder %v4739_v49, 2  ;;  %v4746_v44 = vsel %vm4744_vm7, %v4745_v3, %v13549_v1  ;;  %vm4737_vm1 = vweird.f32 %v13041_v57 }
 0x4a0   : > { %v13969_v29 = vsub.s32 %v5225_v16, %v5228_v50  ;;  %v4747_v41 = vsel %vm4740_vm0, %v4743_v12, %v4746_v44  ;;  %412 = vst.msk [vmem:[#allocation2 + $0x40] sm:$0xff] %vm403_vm3, %v395_v60  ;;  %vm15654_vm4 = vcmp.lt.s32.totalorder %v13263_v24, 0  ;;  %v15655_v28 = vand.u32 2147483647, %v13561_v7  ;;  %v5488_v12 = vld [vmem:[#allocation2 + $0x8] sm:$0xff]  ;;  %v5489_v50 = vld [vmem:[#allocation2 + $0x10] sm:$0xff] }
 0x4a1   : > { %v4836_v59 = vsel %vm15654_vm4, %v4835_v30, %v13543_v47  ;;  %v5349_v1 = vand.u32 2147483647, %v5348_v9  ;;  %v5351_v3 = vcvt.s32.f32 %v5344_v40  ;;  %v4748_v16 = vsel %vm4737_vm1, nan, %v4747_v41  ;;  %5462 = vst.msk [vmem:[#allocation2 + $0x40] sm:$0xff] %vm5453_vm8, %v5422_v14 }
 0x4a2   : > { %vm13978_vm10 = vcmp.le.f32.partialorder %v15655_v28, 0.7853982  ;;  %v4838_v57 = vsel %vm13675_vm13, 0, %v4836_v59  ;;  %v5231_v33 = vsub.s32 0, %v13969_v29  ;;  %v5385_v47 = vpack.c.bf16 %v4748_v16, %v4644_v18  ;;  %5479 = vst.msk [vmem:[#allocation2 + $0x40] sm:$0xff] %vm5470_vm14, %v15650_v45 }
 0x4a3   : > { %v4842_v10 = vadd.s32 3, %v4838_v57  ;;  %v4939_v22 = vsub.s32 4, %v13464_v15  ;;  %v5352_v13 = vmul.f32 %v5351_v3, %v5349_v1  ;;  %vm4841_vm5 = vweird.f32 %v13263_v24 }
 0x4a4   : > { %v4846_v27 = vxor.u32 2147483648, %v13791_v54  ;;  %v4849_v48 = vxor.u32 2147483648, %v13786_v8  ;;  %v6989_v36 = vmin.u32 %v5231_v33, %v13969_v29  ;;  %5429 = vrot.lane.b32.xlu0 %v5385_v47, %s15289_s24  ;;  %vm15658_vm13 = vcmp.lt.s32.totalorder %v13250_v51, 0 }
 0x4a5   : > { %v4843_v38 = vand.u32 3, %v4842_v10  ;;  %v4940_v43 = vsel %vm15658_vm13, %v4939_v22, %v13464_v15  ;;  %v397_v49 = vpack.c.bf16 %v7873_v34, %v7874_v61  ;;  %v5353_v37 = vxor.u32 2147483648, %v5352_v13  ;;  %v5487_v15 = vld [vmem:[#allocation2] sm:$0xff] }
 0x4a6   : > { %v4942_v55 = vsel %vm13594_vm15, 0, %v4940_v43  ;;  %v398_v46 = vpack.c.bf16 %v7875_v53, %v7876_v4  ;;  %v5043_v40 = vsub.s32 4, %v13757_v25  ;;  %v5233_v26 = vclz %v6989_v36  ;;  %7163 = vmatprep.mubr.bf16.mxu0 %v5487_v15  ;;  %v5491_v43 = vld [vmem:[#allocation2 + $0x20] sm:$0xff] }
 0x4a7   : > { %vm4844_vm6 = vcmp.lt.s32.totalorder %v4843_v38, 2  ;;  %vm4845_vm7 = vcmp.eq.s32.totalorder %v4843_v38, 0  ;;  %vm4848_vm0 = vcmp.eq.s32.totalorder %v4843_v38, 2  ;;  %414 = vst.msk [vmem:[#allocation2 + $0x50] sm:$0xff] %vm403_vm3, %v397_v49  ;;  %v5354_v6 = vsel %vm5271_vm9, %v5353_v37, %v5352_v13  ;;  %7164 = vmatmul.mubr.bf16.vlgmr.msra.gmra.mrb[0].mxu0 %v5488_v12  ;;  %v5490_v13 = vld [vmem:[#allocation2 + $0x18] sm:$0xff] }
 0x4a8   : > { %v4847_v62 = vsel %vm4845_vm7, %v13786_v8, %v4846_v27  ;;  %v4850_v31 = vsel %vm4848_vm0, %v4849_v48, %v13791_v54  ;;  %v4946_v60 = vadd.s32 3, %v4942_v55  ;;  %5464 = vst.msk [vmem:[#allocation2 + $0x50] sm:$0xff] %vm5453_vm8, %v5426_v35  ;;  %v6990_v14 = vadd.s32 4294967294, %v5233_v26  ;;  %v5496_v54 = vld [vmem:[#allocation2 + $0x48] sm:$0xff]  ;;  %7167 = vmatprep.mubr.bf16.mxu0 %v5489_v50 }
 0x4a9   : > { %415 = vst.msk [vmem:[#allocation2 + $0x58] sm:$0xff] %vm403_vm3, %v398_v46  ;;  %v4851_v30 = vsel %vm4844_vm6, %v4847_v62, %v4850_v31  ;;  %v4950_v9 = vxor.u32 2147483648, %v13713_v39  ;;  %v5044_v8 = vsel %vm4959_vm2, %v5043_v40, %v13757_v25  ;;  %vm4945_vm15 = vweird.f32 %v13250_v51  ;;  %v5495_v59 = vld [vmem:[#allocation2 + $0x40] sm:$0xff]  ;;  %v15660_v40 = vld [vmem:[#allocation93_spill] sm:$0xff] }
 0x4aa   : > { %5481 = vst.msk [vmem:[#allocation2 + $0x50] sm:$0xff] %vm5470_vm14, %v15650_v45  ;;  %v4947_v18 = vand.u32 3, %v4946_v60  ;;  %v4953_v44 = vxor.u32 2147483648, %v13681_v52  ;;  %v5046_v41 = vsel %vm13855_vm11, 0, %v5044_v8  ;;  %v5357_v28 = vsel %vm13978_vm10, %v13561_v7, %v5354_v6  ;;  %7179 = vmatprep.mubr.bf16.mxu1 %v5495_v59  ;;  %v5492_v50 = vld [vmem:[#allocation2 + $0x28] sm:$0xff]  ;;  %v7878_v60 = vld [vmem:[%s8079_s23 + $0xc0] sm:$0xff] }
 0x4ab   : > { %5465 = vst.msk [vmem:[#allocation2 + $0x58] sm:$0xff] %vm5453_vm8, %v5428_v32  ;;  %vm6991_vm2 = vcmp.lt.s32.totalorder %v6990_v14, 0  ;;  %v4852_v25 = vsel %vm4841_vm5, nan, %v4851_v30  ;;  %v5050_v1 = vadd.s32 3, %v5046_v41  ;;  %7180 = vmatmul.mubr.bf16.vlgmr.msra.gmra.mrb[0].mxu1 %v5496_v54  ;;  %v5054_v22 = vxor.u32 2147483648, %v13952_v21  ;;  %v7877_v31 = vld [vmem:[%s8079_s23 + $0xc8] sm:$0xff] }
 0x4ac   : > { %5482 = vst.msk [vmem:[#allocation2 + $0x58] sm:$0xff] %vm5470_vm14, %v15650_v45  ;;  %v5236_v3 = vsel %vm6991_vm2, 0, %v6990_v14  ;;  %vm4948_vm1 = vcmp.lt.s32.totalorder %v4947_v18, 2  ;;  %vm4949_vm4 = vcmp.eq.s32.totalorder %v4947_v18, 0  ;;  %vm4952_vm13 = vcmp.eq.s32.totalorder %v4947_v18, 2  ;;  %v5493_v30 = vld [vmem:[#allocation2 + $0x30] sm:$0xff] }
 0x4ad   : > { %v5237_v16 = vsub.s32 32, %v5236_v3  ;;  %v5238_v42 = vshll.u32 %v13969_v29, %v5236_v3  ;;  %v5241_v57 = vsub.s32 4294967266, %v5236_v3  ;;  %v4951_v33 = vsel %vm4949_vm4, %v13681_v52, %v4950_v9  ;;  %v7879_v41 = vld [vmem:[%s8079_s23 + $0xd8] sm:$0xff]  ;;  %v7880_v59 = vld [vmem:[%s8079_s23 + $0xd0] sm:$0xff] }
 0x4ae   : > { %v4954_v47 = vsel %vm4952_vm13, %v4953_v44, %v13713_v39  ;;  %v5051_v10 = vand.u32 3, %v5050_v1  ;;  %v5057_v24 = vxor.u32 2147483648, %v13941_v5  ;;  %v5147_v38 = vsub.s32 4, %v13685_v0  ;;  %v7883_v3 = vld [vmem:[%s8079_s23 + $0xf8] sm:$0xff] }
 0x4af   : > { %v5239_v27 = vshrl.u32 %v13956_v20, %v5237_v16  ;;  %v5242_v48 = vadd.s32 127, %v5241_v57  ;;  %v4955_v36 = vsel %vm4948_vm1, %v4951_v33, %v4954_v47  ;;  %7168 = vmatmul.mubr.bf16.gmra.mrb[4].mxu0 %v5490_v13  ;;  %7686 = vcosq.f32 %v5357_v28  ;;  %v7884_v16 = vld [vmem:[%s8079_s23 + $0xf0] sm:$0xff] }
 0x4b0   : > { %v4956_v29 = vsel %vm4945_vm15, nan, %v4955_v36  ;;  %vm5053_vm11 = vcmp.eq.s32.totalorder %v5051_v10, 0  ;;  %vm5056_vm5 = vcmp.eq.s32.totalorder %v5051_v10, 2  ;;  %vm15659_vm6 = vcmp.lt.s32.totalorder %v13520_v56, 0  ;;  %7171 = vmatprep.mubr.bf16.mxu0 %v5491_v43 }
 0x4b1   : > { %v5497_v52 = vld [vmem:[#allocation2 + $0x50] sm:$0xff]  ;;  %v5240_v34 = vor.u32 %v5239_v27, %v5238_v42  ;;  %v5243_v39 = vshll.u32 %v5242_v48, 23  ;;  %v5386_v61 = vpack.c.bf16 %v4956_v29, %v4852_v25  ;;  %v5055_v20 = vsel %vm5053_vm11, %v13941_v5, %v5054_v22  ;;  %v7882_v25 = vld [vmem:[%s8079_s23 + $0xe0] sm:$0xff]  ;;  %v5494_v22 = vld [vmem:[#allocation2 + $0x38] sm:$0xff] }
 0x4b2   : > { %7183 = vmatprep.mubr.bf16.mxu1 %v5497_v52  ;;  %v5058_v35 = vsel %vm5056_vm5, %v5057_v24, %v13952_v21  ;;  %v5148_v37 = vsel %vm15659_vm6, %v5147_v38, %v13685_v0  ;;  %7688 = vsinq.f32 %v5357_v28  ;;  %vm5052_vm7 = vcmp.lt.s32.totalorder %v5051_v10, 2  ;;  %v7881_v28 = vld [vmem:[%s8079_s23 + $0xe8] sm:$0xff] }
 0x4b3   : > { %v5498_v49 = vld [vmem:[#allocation2 + $0x58] sm:$0xff]  ;;  %v5244_v51 = vor.u32 4788187, %v5243_v39  ;;  %5431 = vrot.lane.b32.xlu1 %v5386_v61, %s15289_s24  ;;  %v5150_v55 = vsel %vm13802_vm12, 0, %v5148_v37  ;;  %v5247_v53 = vcvt.s32.f32 %v5240_v34  ;;  %v5158_v5 = vxor.u32 2147483648, %v13934_v11 }
 0x4b4   : > { %v5154_v4 = vadd.s32 3, %v5150_v55  ;;  %7184 = vmatmul.mubr.bf16.gmra.mrb[4].mxu1 %v5498_v49  ;;  %v5059_v46 = vsel %vm5052_vm7, %v5055_v20, %v5058_v35  ;;  %v5161_v0 = vxor.u32 2147483648, %v13928_v17  ;;  %v5355_v32 = vsub.s32 4, %v13867_v19  ;;  %v7551_v55 = vld [vmem:[%s14474_s5 + $0x8] sm:$0xff]  }
 0x4b5   : > { %v5245_v21 = vand.u32 2147483647, %v5244_v51  ;;  %v15661_v26 = vand.u32 2147483647, %v15660_v40  ;;  %vm5167_vm12 = vcmp.lt.s32.totalorder %v15660_v40, 0  ;;  %v5251_v12 = vsub.s32 4, %v13943_v63 }
 0x4b6   : > { %v5155_v2 = vand.u32 3, %v5154_v4  ;;  %vm5049_vm15 = vweird.f32 %v13523_v58  ;;  %v5356_v62 = vsel %vm5271_vm9, %v5355_v32, %v13867_v19  ;;  %v399_v14 = vpack.c.bf16 %v7877_v31, %v7878_v60  ;;  %v7550_v51 = vld [vmem:[%s14474_s5] sm:$0xff]   ;;  %v7557_v32 = vld [vmem:[%s14474_s5 + $0x38] sm:$0xff]  }
 0x4b7   : > { %vm14051_vm0 = vcmp.le.f32.partialorder %v15661_v26, 0.7853982  ;;  %v5248_v6 = vmul.f32 %v5247_v53, %v5245_v21  ;;  %v5060_v9 = vsel %vm5049_vm15, nan, %v5059_v46  ;;  %v5358_v19 = vsel %vm13978_vm10, 0, %v5356_v62  ;;  %7172 = vmatmul.mubr.bf16.gmra.mrb[8].mxu0 %v5492_v50  ;;  %7195 = vmatprep.subr.bf16.mxu1 %v7550_v51  ;;  %v7554_v21 = vld [vmem:[%s14474_s5 + $0x20] sm:$0xff]   ;;  %v7555_v46 = vld [vmem:[%s14474_s5 + $0x28] sm:$0xff]  }
 0x4b8   : > { %vm5156_vm2 = vcmp.lt.s32.totalorder %v5155_v2, 2  ;;  %vm5157_vm1 = vcmp.eq.s32.totalorder %v5155_v2, 0  ;;  %vm5160_vm4 = vcmp.eq.s32.totalorder %v5155_v2, 2  ;;  %416 = vst.msk [vmem:[#allocation2 + $0x60] sm:$0xff] %vm403_vm3, %v399_v14  ;;  %vm5153_vm9 = vweird.f32 %v13520_v56  ;;  %7175 = vmatprep.mubr.bf16.mxu0 %v5493_v30  ;;  %7196 = vmatpush3.bf16.msra.mxu1 %v7550_v51  ;;  %v14131_v31 = vld [vmem:[%s14473_s4] ss:$0 sm:$0xff] }
 0x4b9   : > { %v5249_v8 = vxor.u32 2147483648, %v5248_v6  ;;  %v5159_v54 = vsel %vm5157_vm1, %v13928_v17, %v5158_v5  ;;  %v5162_v58 = vsel %vm5160_vm4, %v5161_v0, %v13934_v11  ;;  %v5252_v44 = vsel %vm5167_vm12, %v5251_v12, %v13943_v63  ;;  %v7687_v56 = vpop.eup %7686  ;;  %7197 = vmatprep.subr.bf16.mxu1 %v7551_v55  ;;  %v7553_v5 = vld [vmem:[%s14474_s5 + $0x18] sm:$0xff]   ;;  %v7556_v0 = vld [vmem:[%s14474_s5 + $0x30] sm:$0xff]  }
 0x4ba   : > { %v5163_v18 = vsel %vm5156_vm2, %v5159_v54, %v5162_v58  ;;  %v400_v17 = vpack.c.bf16 %v7879_v41, %v7880_v59  ;;  %v401_v1 = vpack.c.bf16 %v7881_v28, %v7882_v25  ;;  %v402_v42 = vpack.c.bf16 %v7883_v3, %v7884_v16 }
 0x4bb   : > { %v5250_v11 = vsel %vm5167_vm12, %v5249_v8, %v5248_v6  ;;  %v5164_v23 = vsel %vm5153_vm9, nan, %v5163_v18  ;;  %v5362_v33 = vadd.s32 3, %v5358_v19  ;;  %v5254_v10 = vsel %vm14051_vm0, 0, %v5252_v44 }
 0x4bc   : > { %v5253_v57 = vsel %vm14051_vm0, %v15660_v40, %v5250_v11  ;;  %v5387_v63 = vpack.c.bf16 %v5164_v23, %v5060_v9  ;;  %417 = vst.msk [vmem:[#allocation2 + $0x68] sm:$0xff] %vm403_vm3, %v400_v17  ;;  %v7689_v47 = vpop.eup %7688  ;;  %418 = vst.msk [vmem:[#allocation2 + $0x70] sm:$0xff] %vm403_vm3, %v401_v1  ;;  %v5258_v13 = vadd.s32 3, %v5254_v10  ;;  %v5369_v48 = vxor.u32 2147483648, %v7687_v56  ;;  %7198 = vmatpush3.bf16.msra.mxu1 %v7551_v55 }
 0x4bd   : > { %7690 = vcosq.f32 %v5253_v57  ;;  %419 = vst.msk [vmem:[#allocation2 + $0x78] sm:$0xff] %vm403_vm3, %v402_v42  ;;  %v5363_v24 = vand.u32 3, %v5362_v33  ;;  %v5366_v27 = vxor.u32 2147483648, %v7689_v47  ;;  %vm5361_vm6 = vweird.f32 %v13561_v7  ;;  %v7552_v7 = vld [vmem:[%s14474_s5 + $0x10] sm:$0xff]  }
 0x4be   : > { %7692 = vsinq.f32 %v5253_v57  ;;  %5433 = vrot.lane.b32.xlu0 %v5387_v63, %s15289_s24  ;;  %v5259_v36 = vand.u32 3, %v5258_v13  ;;  %vm5257_vm0 = vweird.f32 %v15660_v40  ;;  %7199 = vmatprep.subr.bf16.mxu1 %v7552_v7 }
 0x4bf   : > { %7176 = vmatmul.mubr.bf16.gmra.mrb[12].mxu0 %v5494_v22  ;;  %vm5365_vm10 = vcmp.eq.s32.totalorder %v5363_v24, 0  ;;  %vm5368_vm13 = vcmp.eq.s32.totalorder %v5363_v24, 2  ;;  %vm5364_vm11 = vcmp.lt.s32.totalorder %v5363_v24, 2 }
 0x4c0   : > { %v5367_v38 = vsel %vm5365_vm10, %v7687_v56, %v5366_v27  ;;  %v5370_v43 = vsel %vm5368_vm13, %v5369_v48, %v7689_v47  ;;  %vm5264_vm3 = vcmp.eq.s32.totalorder %v5259_v36, 2  ;;  %vm5261_vm5 = vcmp.eq.s32.totalorder %v5259_v36, 0  ;;  %7200 = vmatpush3.bf16.msra.mxu1 %v7552_v7 }
 0x4c1   : > { %v5371_v39 = vsel %vm5364_vm11, %v5367_v38, %v5370_v43  ;;  %vm5260_vm7 = vcmp.lt.s32.totalorder %v5259_v36, 2  ;;  %7201 = vmatprep.subr.bf16.mxu1 %v7553_v5 }
 0x4c2   : > { %v5372_v35 = vsel %vm5361_vm6, nan, %v5371_v39 }
 0x4c4   : > { %7202 = vmatpush3.bf16.msra.mxu1 %v7553_v5 }
 0x4c5   : > { %7203 = vmatprep.subr.bf16.mxu1 %v7554_v21 }
 0x4c7   : > { %v7691_v29 = vpop.eup %7690 }
 0x4c8   : > { %v7693_v52 = vpop.eup %7692  ;;  %v5265_v34 = vxor.u32 2147483648, %v7691_v29  ;;  %7204 = vmatpush3.bf16.msra.mxu1 %v7554_v21 }
 0x4c9   : > { %v5262_v61 = vxor.u32 2147483648, %v7693_v52  ;;  %7205 = vmatprep.subr.bf16.mxu1 %v7555_v46 }
 0x4ca   : > { %v5266_v49 = vsel %vm5264_vm3, %v5265_v34, %v7693_v52 }
 0x4cb   : > { %v5263_v20 = vsel %vm5261_vm5, %v7691_v29, %v5262_v61 }
 0x4cc   : > { %v5267_v37 = vsel %vm5260_vm7, %v5263_v20, %v5266_v49  ;;  %7206 = vmatpush3.bf16.msra.mxu1 %v7555_v46 }
 0x4cd   : > { %v5268_v53 = vsel %vm5257_vm0, nan, %v5267_v37  ;;  %7207 = vmatprep.subr.bf16.mxu1 %v7556_v0 }
 0x4ce   : > { %v5388_v4 = vpack.c.bf16 %v5372_v35, %v5268_v53 }
 0x4d0   : > { %5435 = vrot.lane.b32.xlu1 %v5388_v4, %s15289_s24  ;;  %7208 = vmatpush3.bf16.msra.mxu1 %v7556_v0  ;;  %s332_s24 = sand.u32 1, %s7931_s30  }
 0x4d1   : > { %7209 = vmatprep.subr.bf16.mxu1 %v7557_v32  ;;  %s6863_s22 = sshll.u32 %s332_s24, 8 }
 0x4d2   : > { %s14248_s30 = scalar_lea.vmem [#allocation3], %s6863_s22  }
 0x4d4   : > { %7210 = vmatpush3.bf16.msra.mxu1 %v7557_v32 }
 0x516   : > { %v5430_v40 = vpop.permute.xlu0 %5429 }
 0x517   : > { %5466 = vst.msk [vmem:[#allocation2 + $0x60] sm:$0xff] %vm5453_vm8, %v5430_v40 }
 0x518   : > { %5483 = vst.msk [vmem:[#allocation2 + $0x60] sm:$0xff] %vm5470_vm14, %v15650_v45 }
 0x51f   : > { %v5499_v26 = vld [vmem:[#allocation2 + $0x60] sm:$0xff] }
 0x520   : > { %7187 = vmatprep.mubr.bf16.mxu1 %v5499_v26 }
 0x525   : > { %v5432_v15 = vpop.permute.xlu1 %5431 }
 0x526   : > { %5467 = vst.msk [vmem:[#allocation2 + $0x68] sm:$0xff] %vm5453_vm8, %v5432_v15 }
 0x527   : > { %5484 = vst.msk [vmem:[#allocation2 + $0x68] sm:$0xff] %vm5470_vm14, %v15650_v45 }
 0x52e   : > { %v5500_v2 = vld [vmem:[#allocation2 + $0x68] sm:$0xff] }
 0x52f   : > { %7188 = vmatmul.mubr.bf16.gmra.mrb[8].mxu1 %v5500_v2 }
 0x530   : > { %v5434_v12 = vpop.permute.xlu0 %5433 }
 0x531   : > { %5468 = vst.msk [vmem:[#allocation2 + $0x70] sm:$0xff] %vm5453_vm8, %v5434_v12 }
 0x532   : > { %5485 = vst.msk [vmem:[#allocation2 + $0x70] sm:$0xff] %vm5470_vm14, %v15650_v45 }
 0x539   : > { %v5501_v50 = vld [vmem:[#allocation2 + $0x70] sm:$0xff] }
 0x53a   : > { %7191 = vmatprep.mubr.bf16.mxu1 %v5501_v50 }
 0x542   : > { %v5436_v6 = vpop.permute.xlu1 %5435 }
 0x543   : > { %5469 = vst.msk [vmem:[#allocation2 + $0x78] sm:$0xff] %vm5453_vm8, %v5436_v6  ;;  %vm6487_vm8 = vcmask 23552  }
 0x544   : > { %5486 = vst.msk [vmem:[#allocation2 + $0x78] sm:$0xff] %vm5470_vm14, %v15650_v45 }
 0x54b   : > { %v5502_v62 = vld [vmem:[#allocation2 + $0x78] sm:$0xff] }
 0x54c   : > { %7192 = vmatmul.mubr.bf16.gmra.mrb[12].mxu1 %v5502_v62 }
 0x57a   : > { %v7165_v60 = vpop.f32.mrb[0].mxu0 }
 0x57b   : > { %v5617_v14 = vadd.f32 %v7165_v60, %v14131_v31  ;;  %v5608_v30 = vpop.f32.mrb[1].mxu0 }
 0x57c   : > { %v5609_v9 = vadd.f32 %v14131_v31, %v5608_v30  ;;  %v7166_v8 = vpop.f32.mrb[2].mxu0 }
 0x57d   : > { %v5737_v54 = vmax.f32 %v5617_v14, 0.0  ;;  %v5620_v58 = vadd.f32 %v7166_v8, %v14131_v31  ;;  %v5611_v19 = vpop.f32.mrb[3].mxu0 }
 0x57e   : > { %v7181_v18 = vpop.f32.mrb[0].mxu1  ;;  %v5735_v45 = vmax.f32 %v5609_v9, 0.0  ;;  %v5612_v44 = vadd.f32 %v14131_v31, %v5611_v19 }
 0x57f   : > { %v5681_v41 = vadd.f32 %v7181_v18, %v14131_v31  ;;  %v5672_v59 = vpop.f32.mrb[1].mxu1  ;;  %v5738_v17 = vmax.f32 %v5620_v58, 0.0 }
 0x580   : > { %v5673_v11 = vadd.f32 %v14131_v31, %v5672_v59  ;;  %v7182_v23 = vpop.f32.mrb[2].mxu1  ;;  %v5736_v28 = vmax.f32 %v5612_v44, 0.0 }
 0x581   : > { %v5753_v25 = vmax.f32 %v5681_v41, 0.0  ;;  %v5684_v1 = vadd.f32 %v7182_v23, %v14131_v31  ;;  %v5675_v3 = vpop.f32.mrb[3].mxu1  ;;  %v5768_v16 = vpack.c.bf16 %v5738_v17, %v5737_v54 }
 0x582   : > { %v5751_v42 = vmax.f32 %v5673_v11, 0.0  ;;  %v5676_v56 = vadd.f32 %v14131_v31, %v5675_v3  ;;  %v5767_v57 = vpack.c.bf16 %v5736_v28, %v5735_v45  ;;  %v7169_v63 = vpop.f32.mrb[4].mxu0 }
 0x583   : > { %v5754_v33 = vmax.f32 %v5684_v1, 0.0  ;;  %v5633_v47 = vadd.f32 %v7169_v63, %v14131_v31  ;;  %v5624_v10 = vpop.f32.mrb[5].mxu0  ;;  %v7561_v63 = vld [vmem:[%s14476_s7 + $0x18] sm:$0xff]  }
 0x584   : > { %v5752_v22 = vmax.f32 %v5676_v56, 0.0  ;;  %v5625_v24 = vadd.f32 %v14131_v31, %v5624_v10  ;;  %v7170_v13 = vpop.f32.mrb[6].mxu0  ;;  %7211 = vmatprep.mubr.bf16.mxu1 %v5767_v57  ;;  %v7559_v56 = vld [vmem:[%s14476_s7 + $0x8] sm:$0xff]   ;;  %v7560_v57 = vld [vmem:[%s14476_s7 + $0x10] sm:$0xff]  }
 0x585   : > { %v5776_v27 = vpack.c.bf16 %v5754_v33, %v5753_v25  ;;  %v5741_v48 = vmax.f32 %v5633_v47, 0.0  ;;  %v5636_v36 = vadd.f32 %v7170_v13, %v14131_v31  ;;  %v5627_v38 = vpop.f32.mrb[7].mxu0  ;;  %7212 = vmatmul.mubr.bf16.vlgmr.msra.gmra.mrb[16].mxu1 %v5768_v16  ;;  %v7562_v33 = vld [vmem:[%s14476_s7 + $0x20] sm:$0xff]   ;;  %v7563_v47 = vld [vmem:[%s14476_s7 + $0x28] sm:$0xff]   ;;  %v7564_v10 = vld [vmem:[%s14476_s7 + $0x30] sm:$0xff]  }
 0x586   : > { %v5775_v43 = vpack.c.bf16 %v5752_v22, %v5751_v42  ;;  %v5739_v52 = vmax.f32 %v5625_v24, 0.0  ;;  %v5628_v34 = vadd.f32 %v14131_v31, %v5627_v38  ;;  %v7558_v42 = vld [vmem:[%s14476_s7] sm:$0xff]   ;;  %v7565_v22 = vld [vmem:[%s14476_s7 + $0x38] sm:$0xff]  }
 0x587   : > { %v7185_v29 = vpop.f32.mrb[4].mxu1  ;;  %v5742_v49 = vmax.f32 %v5636_v36, 0.0  ;;  %7243 = vmatprep.subr.bf16.mxu0 %v7558_v42 }
 0x588   : > { %v5697_v39 = vadd.f32 %v7185_v29, %v14131_v31  ;;  %v5688_v61 = vpop.f32.mrb[5].mxu1  ;;  %v5740_v37 = vmax.f32 %v5628_v34, 0.0  ;;  %7244 = vmatpush3.bf16.msra.mxu0 %v7558_v42 }
 0x589   : > { %v5689_v20 = vadd.f32 %v14131_v31, %v5688_v61  ;;  %v7186_v35 = vpop.f32.mrb[6].mxu1  ;;  %v5770_v4 = vpack.c.bf16 %v5742_v49, %v5741_v48  ;;  %7245 = vmatprep.subr.bf16.mxu0 %v7559_v56 }
 0x58a   : > { %v5757_v51 = vmax.f32 %v5697_v39, 0.0  ;;  %v5700_v55 = vadd.f32 %v7186_v35, %v14131_v31  ;;  %v5691_v53 = vpop.f32.mrb[7].mxu1  ;;  %v5769_v21 = vpack.c.bf16 %v5740_v37, %v5739_v52  ;;  %v7173_v46 = vpop.f32.mrb[8].mxu0 }
 0x58b   : > { %v5755_v7 = vmax.f32 %v5689_v20, 0.0  ;;  %v5692_v5 = vadd.f32 %v14131_v31, %v5691_v53  ;;  %v5649_v32 = vadd.f32 %v7173_v46, %v14131_v31  ;;  %v5640_v40 = vpop.f32.mrb[9].mxu0 }
 0x58c   : > { %v5758_v0 = vmax.f32 %v5700_v55, 0.0  ;;  %v5641_v15 = vadd.f32 %v14131_v31, %v5640_v40  ;;  %v7174_v2 = vpop.f32.mrb[10].mxu0  ;;  %7215 = vmatprep.mubr.bf16.mxu1 %v5769_v21  ;;  %7246 = vmatpush3.bf16.msra.mxu0 %v7559_v56 }
 0x58d   : > { %v5756_v26 = vmax.f32 %v5692_v5, 0.0  ;;  %v5745_v50 = vmax.f32 %v5649_v32, 0.0  ;;  %v5652_v6 = vadd.f32 %v7174_v2, %v14131_v31  ;;  %v5643_v62 = vpop.f32.mrb[11].mxu0  ;;  %7216 = vmatmul.mubr.bf16.gmra.mrb[20].mxu1 %v5770_v4  ;;  %7247 = vmatprep.subr.bf16.mxu0 %v7560_v57 }
 0x58e   : > { %v5778_v12 = vpack.c.bf16 %v5758_v0, %v5757_v51  ;;  %v5743_v14 = vmax.f32 %v5641_v15, 0.0  ;;  %v5644_v30 = vadd.f32 %v14131_v31, %v5643_v62  ;;  %v14192_v15 = vld [vmem:[%s14475_s6] ss:$0 sm:$0xff] }
 0x58f   : > { %v5777_v60 = vpack.c.bf16 %v5756_v26, %v5755_v7  ;;  %v5746_v9 = vmax.f32 %v5652_v6, 0.0 }
 0x590   : > { %v5744_v8 = vmax.f32 %v5644_v30, 0.0  ;;  %7248 = vmatpush3.bf16.msra.mxu0 %v7560_v57 }
 0x591   : > { %v5772_v54 = vpack.c.bf16 %v5746_v9, %v5745_v50  ;;  %7249 = vmatprep.subr.bf16.mxu0 %v7561_v63 }
 0x592   : > { %v5771_v58 = vpack.c.bf16 %v5744_v8, %v5743_v14  ;;  %v7177_v19 = vpop.f32.mrb[12].mxu0 }
 0x593   : > { %v5665_v18 = vadd.f32 %v7177_v19, %v14131_v31  ;;  %v5656_v45 = vpop.f32.mrb[13].mxu0 }
 0x594   : > { %v5657_v44 = vadd.f32 %v14131_v31, %v5656_v45  ;;  %v7178_v41 = vpop.f32.mrb[14].mxu0  ;;  %7219 = vmatprep.mubr.bf16.mxu1 %v5771_v58  ;;  %7250 = vmatpush3.bf16.msra.mxu0 %v7561_v63 }
 0x595   : > { %v5749_v59 = vmax.f32 %v5665_v18, 0.0  ;;  %v5668_v17 = vadd.f32 %v7178_v41, %v14131_v31  ;;  %v5659_v11 = vpop.f32.mrb[15].mxu0  ;;  %7220 = vmatmul.mubr.bf16.gmra.mrb[24].mxu1 %v5772_v54  ;;  %7251 = vmatprep.subr.bf16.mxu0 %v7562_v33 }
 0x596   : > { %v5747_v23 = vmax.f32 %v5657_v44, 0.0  ;;  %v5660_v28 = vadd.f32 %v14131_v31, %v5659_v11 }
 0x597   : > { %v5750_v25 = vmax.f32 %v5668_v17, 0.0 }
 0x598   : > { %v5748_v1 = vmax.f32 %v5660_v28, 0.0  ;;  %7252 = vmatpush3.bf16.msra.mxu0 %v7562_v33 }
 0x599   : > { %v5774_v3 = vpack.c.bf16 %v5750_v25, %v5749_v59  ;;  %7253 = vmatprep.subr.bf16.mxu0 %v7563_v47 }
 0x59a   : > { %v5773_v16 = vpack.c.bf16 %v5748_v1, %v5747_v23 }
 0x59c   : > { %7223 = vmatprep.mubr.bf16.mxu1 %v5773_v16  ;;  %7254 = vmatpush3.bf16.msra.mxu0 %v7563_v47 }
 0x59d   : > { %7224 = vmatmul.mubr.bf16.gmra.mrb[28].mxu1 %v5774_v3  ;;  %7255 = vmatprep.subr.bf16.mxu0 %v7564_v10 }
 0x59e   : > { %7227 = vmatprep.mubr.bf16.mxu1 %v5775_v43 }
 0x5a0   : > { %7256 = vmatpush3.bf16.msra.mxu0 %v7564_v10 }
 0x5a1   : > { %7257 = vmatprep.subr.bf16.mxu0 %v7565_v22 }
 0x5a4   : > { %7258 = vmatpush3.bf16.msra.mxu0 %v7565_v22 }
 0x5a5   : > { %7228 = vmatmul.mubr.bf16.gmra.mrb[32].mxu1 %v5776_v27 }
 0x5a6   : > { %7231 = vmatprep.mubr.bf16.mxu1 %v5777_v60 }
 0x5ad   : > { %7232 = vmatmul.mubr.bf16.gmra.mrb[36].mxu1 %v5778_v12 }
 0x602   : > { %v7189_v24 = vpop.f32.mrb[8].mxu1 }
 0x603   : > { %v5713_v13 = vadd.f32 %v7189_v24, %v14131_v31  ;;  %v5704_v27 = vpop.f32.mrb[9].mxu1 }
 0x604   : > { %v5705_v48 = vadd.f32 %v14131_v31, %v5704_v27  ;;  %v7190_v36 = vpop.f32.mrb[10].mxu1 }
 0x605   : > { %v5761_v38 = vmax.f32 %v5713_v13, 0.0  ;;  %v5716_v43 = vadd.f32 %v7190_v36, %v14131_v31  ;;  %v5707_v29 = vpop.f32.mrb[11].mxu1 }
 0x606   : > { %v5759_v52 = vmax.f32 %v5705_v48, 0.0  ;;  %v5708_v34 = vadd.f32 %v14131_v31, %v5707_v29 }
 0x607   : > { %v5762_v39 = vmax.f32 %v5716_v43, 0.0 }
 0x608   : > { %v5760_v61 = vmax.f32 %v5708_v34, 0.0 }
 0x609   : > { %v5780_v49 = vpack.c.bf16 %v5762_v39, %v5761_v38 }
 0x60a   : > { %v5779_v20 = vpack.c.bf16 %v5760_v61, %v5759_v52 }
 0x60c   : > { %7235 = vmatprep.mubr.bf16.mxu1 %v5779_v20 }
 0x60d   : > { %7236 = vmatmul.mubr.bf16.gmra.mrb[40].mxu1 %v5780_v49 }
 0x61f   : > { %v7193_v35 = vpop.f32.mrb[12].mxu1 }
 0x620   : > { %v5729_v37 = vadd.f32 %v7193_v35, %v14131_v31  ;;  %v5720_v51 = vpop.f32.mrb[13].mxu1 }
 0x621   : > { %v5721_v55 = vadd.f32 %v14131_v31, %v5720_v51  ;;  %v7194_v53 = vpop.f32.mrb[14].mxu1 }
 0x622   : > { %v5732_v4 = vadd.f32 %v7194_v53, %v14131_v31  ;;  %v5723_v7 = vpop.f32.mrb[15].mxu1  ;;  %v5765_v21 = vmax.f32 %v5729_v37, 0.0 }
 0x623   : > { %v5724_v5 = vadd.f32 %v14131_v31, %v5723_v7  ;;  %v5763_v0 = vmax.f32 %v5721_v55, 0.0 }
 0x624   : > { %v5766_v46 = vmax.f32 %v5732_v4, 0.0 }
 0x625   : > { %v5764_v32 = vmax.f32 %v5724_v5, 0.0 }
 0x626   : > { %v5782_v40 = vpack.c.bf16 %v5766_v46, %v5765_v21 }
 0x627   : > { %v5781_v26 = vpack.c.bf16 %v5764_v32, %v5763_v0 }
 0x629   : > { %7239 = vmatprep.mubr.bf16.mxu1 %v5781_v26 }
 0x62a   : > { %7240 = vmatmul.mubr.bf16.gmra.mrb[44].mxu1 %v5782_v40 }
 0x658   : > { %v7213_v2 = vpop.f32.mrb[16].mxu1 }
 0x659   : > { %v5897_v12 = vadd.f32 %v7213_v2, %v14192_v15  ;;  %v5888_v50 = vpop.f32.mrb[17].mxu1 }
 0x65a   : > { %v5889_v6 = vadd.f32 %v14192_v15, %v5888_v50  ;;  %v7214_v31 = vpop.f32.mrb[18].mxu1 }
 0x65b   : > { %v6017_v62 = vmax.f32 %v5897_v12, 0.0  ;;  %v5900_v60 = vadd.f32 %v7214_v31, %v14192_v15  ;;  %v5891_v14 = vpop.f32.mrb[19].mxu1 }
 0x65c   : > { %v6015_v30 = vmax.f32 %v5889_v6, 0.0  ;;  %v5892_v9 = vadd.f32 %v14192_v15, %v5891_v14 }
 0x65d   : > { %v6018_v8 = vmax.f32 %v5900_v60, 0.0 }
 0x65e   : > { %v6016_v54 = vmax.f32 %v5892_v9, 0.0 }
 0x65f   : > { %v6048_v58 = vpack.c.bf16 %v6018_v8, %v6017_v62 }
 0x660   : > { %v6047_v19 = vpack.c.bf16 %v6016_v54, %v6015_v30  ;;  %v7217_v18 = vpop.f32.mrb[20].mxu1 }
 0x661   : > { %v5913_v45 = vadd.f32 %v7217_v18, %v14192_v15  ;;  %v5904_v44 = vpop.f32.mrb[21].mxu1 }
 0x662   : > { %v5905_v41 = vadd.f32 %v14192_v15, %v5904_v44  ;;  %v7218_v59 = vpop.f32.mrb[22].mxu1  ;;  %7259 = vmatprep.mubr.bf16.mxu0 %v6047_v19 }
 0x663   : > { %v6021_v17 = vmax.f32 %v5913_v45, 0.0  ;;  %v5916_v11 = vadd.f32 %v7218_v59, %v14192_v15  ;;  %v5907_v23 = vpop.f32.mrb[23].mxu1  ;;  %7260 = vmatmul.mubr.bf16.vlgmr.msra.gmra.mrb[16].mxu0 %v6048_v58 }
 0x664   : > { %v6019_v28 = vmax.f32 %v5905_v41, 0.0  ;;  %v5908_v25 = vadd.f32 %v14192_v15, %v5907_v23 }
 0x665   : > { %v6022_v1 = vmax.f32 %v5916_v11, 0.0 }
 0x666   : > { %v6020_v3 = vmax.f32 %v5908_v25, 0.0 }
 0x667   : > { %v6050_v16 = vpack.c.bf16 %v6022_v1, %v6021_v17 }
 0x668   : > { %v6049_v42 = vpack.c.bf16 %v6020_v3, %v6019_v28  ;;  %v7221_v56 = vpop.f32.mrb[24].mxu1 }
 0x669   : > { %v5929_v57 = vadd.f32 %v7221_v56, %v14192_v15  ;;  %v5920_v63 = vpop.f32.mrb[25].mxu1 }
 0x66a   : > { %v5921_v33 = vadd.f32 %v14192_v15, %v5920_v63  ;;  %v7222_v47 = vpop.f32.mrb[26].mxu1  ;;  %7263 = vmatprep.mubr.bf16.mxu0 %v6049_v42 }
 0x66b   : > { %v6025_v10 = vmax.f32 %v5929_v57, 0.0  ;;  %v5932_v22 = vadd.f32 %v7222_v47, %v14192_v15  ;;  %v5923_v24 = vpop.f32.mrb[27].mxu1  ;;  %7264 = vmatmul.mubr.bf16.gmra.mrb[20].mxu0 %v6050_v16 }
 0x66c   : > { %v6023_v13 = vmax.f32 %v5921_v33, 0.0  ;;  %v5924_v27 = vadd.f32 %v14192_v15, %v5923_v24 }
 0x66d   : > { %v6026_v48 = vmax.f32 %v5932_v22, 0.0 }
 0x66e   : > { %v6024_v36 = vmax.f32 %v5924_v27, 0.0 }
 0x66f   : > { %v6052_v38 = vpack.c.bf16 %v6026_v48, %v6025_v10 }
 0x670   : > { %v6051_v43 = vpack.c.bf16 %v6024_v36, %v6023_v13  ;;  %v7225_v29 = vpop.f32.mrb[28].mxu1 }
 0x671   : > { %v5945_v52 = vadd.f32 %v7225_v29, %v14192_v15  ;;  %v5936_v34 = vpop.f32.mrb[29].mxu1 }
 0x672   : > { %v5937_v39 = vadd.f32 %v14192_v15, %v5936_v34  ;;  %v7226_v61 = vpop.f32.mrb[30].mxu1  ;;  %7267 = vmatprep.mubr.bf16.mxu0 %v6051_v43 }
 0x673   : > { %v6029_v49 = vmax.f32 %v5945_v52, 0.0  ;;  %v5948_v20 = vadd.f32 %v7226_v61, %v14192_v15  ;;  %v5939_v35 = vpop.f32.mrb[31].mxu1  ;;  %7268 = vmatmul.mubr.bf16.gmra.mrb[24].mxu0 %v6052_v38 }
 0x674   : > { %v6027_v37 = vmax.f32 %v5937_v39, 0.0  ;;  %v5940_v51 = vadd.f32 %v14192_v15, %v5939_v35  ;;  %v14229_v35 = vld [vmem:[%s14477_s8] ss:$0 sm:$0xff] }
 0x675   : > { %v6030_v55 = vmax.f32 %v5948_v20, 0.0 }
 0x676   : > { %v6028_v53 = vmax.f32 %v5940_v51, 0.0 }
 0x677   : > { %v6054_v4 = vpack.c.bf16 %v6030_v55, %v6029_v49 }
 0x678   : > { %v6053_v7 = vpack.c.bf16 %v6028_v53, %v6027_v37  ;;  %v7229_v5 = vpop.f32.mrb[32].mxu1 }
 0x679   : > { %v5961_v21 = vadd.f32 %v7229_v5, %v14192_v15  ;;  %v5952_v46 = vpop.f32.mrb[33].mxu1 }
 0x67a   : > { %v5953_v0 = vadd.f32 %v14192_v15, %v5952_v46  ;;  %v7230_v32 = vpop.f32.mrb[34].mxu1  ;;  %7271 = vmatprep.mubr.bf16.mxu0 %v6053_v7 }
 0x67b   : > { %v6033_v40 = vmax.f32 %v5961_v21, 0.0  ;;  %v5964_v26 = vadd.f32 %v7230_v32, %v14192_v15  ;;  %v5955_v2 = vpop.f32.mrb[35].mxu1  ;;  %7272 = vmatmul.mubr.bf16.gmra.mrb[28].mxu0 %v6054_v4 }
 0x67c   : > { %v6031_v12 = vmax.f32 %v5953_v0, 0.0  ;;  %v5956_v50 = vadd.f32 %v14192_v15, %v5955_v2 }
 0x67d   : > { %v6034_v6 = vmax.f32 %v5964_v26, 0.0 }
 0x67e   : > { %v6032_v31 = vmax.f32 %v5956_v50, 0.0 }
 0x67f   : > { %v6056_v62 = vpack.c.bf16 %v6034_v6, %v6033_v40 }
 0x680   : > { %v6055_v60 = vpack.c.bf16 %v6032_v31, %v6031_v12  ;;  %v7233_v14 = vpop.f32.mrb[36].mxu1 }
 0x681   : > { %v5977_v30 = vadd.f32 %v7233_v14, %v14192_v15  ;;  %v5968_v9 = vpop.f32.mrb[37].mxu1 }
 0x682   : > { %v5969_v8 = vadd.f32 %v14192_v15, %v5968_v9  ;;  %v7234_v54 = vpop.f32.mrb[38].mxu1  ;;  %7275 = vmatprep.mubr.bf16.mxu0 %v6055_v60 }
 0x683   : > { %v6037_v58 = vmax.f32 %v5977_v30, 0.0  ;;  %v5980_v19 = vadd.f32 %v7234_v54, %v14192_v15  ;;  %v5971_v18 = vpop.f32.mrb[39].mxu1  ;;  %7276 = vmatmul.mubr.bf16.gmra.mrb[32].mxu0 %v6056_v62 }
 0x684   : > { %v6035_v45 = vmax.f32 %v5969_v8, 0.0  ;;  %v5972_v44 = vadd.f32 %v14192_v15, %v5971_v18 }
 0x685   : > { %v6038_v41 = vmax.f32 %v5980_v19, 0.0 }
 0x686   : > { %v6036_v59 = vmax.f32 %v5972_v44, 0.0 }
 0x687   : > { %v6058_v17 = vpack.c.bf16 %v6038_v41, %v6037_v58 }
 0x688   : > { %v6057_v11 = vpack.c.bf16 %v6036_v59, %v6035_v45 }
 0x68a   : > { %7279 = vmatprep.mubr.bf16.mxu0 %v6057_v11 }
 0x68b   : > { %7280 = vmatmul.mubr.bf16.gmra.mrb[36].mxu0 %v6058_v17 }
 0x6e0   : > { %v7237_v23 = vpop.f32.mrb[40].mxu1 }
 0x6e1   : > { %v5993_v28 = vadd.f32 %v7237_v23, %v14192_v15  ;;  %v5984_v25 = vpop.f32.mrb[41].mxu1 }
 0x6e2   : > { %v5985_v1 = vadd.f32 %v14192_v15, %v5984_v25  ;;  %v7238_v3 = vpop.f32.mrb[42].mxu1 }
 0x6e3   : > { %v6041_v16 = vmax.f32 %v5993_v28, 0.0  ;;  %v5996_v42 = vadd.f32 %v7238_v3, %v14192_v15  ;;  %v5987_v56 = vpop.f32.mrb[43].mxu1 }
 0x6e4   : > { %v6039_v57 = vmax.f32 %v5985_v1, 0.0  ;;  %v5988_v63 = vadd.f32 %v14192_v15, %v5987_v56 }
 0x6e5   : > { %v6042_v33 = vmax.f32 %v5996_v42, 0.0 }
 0x6e6   : > { %v6040_v47 = vmax.f32 %v5988_v63, 0.0 }
 0x6e7   : > { %v6060_v10 = vpack.c.bf16 %v6042_v33, %v6041_v16 }
 0x6e8   : > { %v6059_v22 = vpack.c.bf16 %v6040_v47, %v6039_v57 }
 0x6ea   : > { %7283 = vmatprep.mubr.bf16.mxu0 %v6059_v22 }
 0x6eb   : > { %7284 = vmatmul.mubr.bf16.gmra.mrb[40].mxu0 %v6060_v10 }
 0x6fd   : > { %v7241_v24 = vpop.f32.mrb[44].mxu1 }
 0x6fe   : > { %v6009_v13 = vadd.f32 %v7241_v24, %v14192_v15  ;;  %v6000_v27 = vpop.f32.mrb[45].mxu1 }
 0x6ff   : > { %v6001_v48 = vadd.f32 %v14192_v15, %v6000_v27  ;;  %v7242_v36 = vpop.f32.mrb[46].mxu1 }
 0x700   : > { %v6012_v38 = vadd.f32 %v7242_v36, %v14192_v15  ;;  %v6003_v43 = vpop.f32.mrb[47].mxu1  ;;  %v6045_v52 = vmax.f32 %v6009_v13, 0.0 }
 0x701   : > { %v6004_v29 = vadd.f32 %v14192_v15, %v6003_v43  ;;  %v6043_v39 = vmax.f32 %v6001_v48, 0.0 }
 0x702   : > { %v6046_v34 = vmax.f32 %v6012_v38, 0.0 }
 0x703   : > { %v6044_v61 = vmax.f32 %v6004_v29, 0.0 }
 0x704   : > { %v6062_v49 = vpack.c.bf16 %v6046_v34, %v6045_v52 }
 0x705   : > { %v6061_v20 = vpack.c.bf16 %v6044_v61, %v6043_v39 }
 0x707   : > { %7287 = vmatprep.mubr.bf16.mxu0 %v6061_v20 }
 0x708   : > { %7288 = vmatmul.mubr.bf16.gmra.mrb[44].mxu0 %v6062_v49 }
 0x736   : > { %v7261_v37 = vpop.f32.mrb[16].mxu0 }
 0x737   : > { %v6177_v51 = vadd.f32 %v7261_v37, %v14229_v35  ;;  %v6168_v55 = vpop.f32.mrb[17].mxu0 }
 0x738   : > { %v6169_v53 = vadd.f32 %v14229_v35, %v6168_v55  ;;  %v7262_v15 = vpop.f32.mrb[18].mxu0 }
 0x739   : > { %v7025_v4 = vmul.f32 -1.442695, %v6177_v51  ;;  %v6180_v7 = vadd.f32 %v7262_v15, %v14229_v35  ;;  %v6171_v5 = vpop.f32.mrb[19].mxu0 }
 0x73a   : > { %v7023_v21 = vmul.f32 -1.442695, %v6169_v53  ;;  %v6172_v46 = vadd.f32 %v14229_v35, %v6171_v5 }
 0x73b   : > { %7694 = vpow2.f32 %v7025_v4  ;;  %v7026_v0 = vmul.f32 -1.442695, %v6180_v7 }
 0x73c   : > { %7696 = vpow2.f32 %v7023_v21  ;;  %v7024_v32 = vmul.f32 -1.442695, %v6172_v46 }
 0x73d   : > { %7698 = vpow2.f32 %v7026_v0 }
 0x73e   : > { %7700 = vpow2.f32 %v7024_v32  ;;  %v7265_v40 = vpop.f32.mrb[20].mxu0 }
 0x73f   : > { %v6193_v26 = vadd.f32 %v7265_v40, %v14229_v35  ;;  %v6184_v2 = vpop.f32.mrb[21].mxu0 }
 0x740   : > { %v6185_v12 = vadd.f32 %v14229_v35, %v6184_v2  ;;  %v7266_v50 = vpop.f32.mrb[22].mxu0 }
 0x741   : > { %v7029_v6 = vmul.f32 -1.442695, %v6193_v26  ;;  %v6196_v31 = vadd.f32 %v7266_v50, %v14229_v35  ;;  %v6187_v62 = vpop.f32.mrb[23].mxu0 }
 0x742   : > { %v7027_v60 = vmul.f32 -1.442695, %v6185_v12  ;;  %v6188_v14 = vadd.f32 %v14229_v35, %v6187_v62 }
 0x743   : > { %7702 = vpow2.f32 %v7029_v6  ;;  %v7030_v30 = vmul.f32 -1.442695, %v6196_v31 }
 0x744   : > { %7704 = vpow2.f32 %v7027_v60  ;;  %v7028_v9 = vmul.f32 -1.442695, %v6188_v14 }
 0x745   : > { %v7695_v8 = vpop.eup %7694  ;;  %7706 = vpow2.f32 %v7030_v30 }
 0x746   : > { %v7697_v54 = vpop.eup %7696  ;;  %v6393_v58 = vadd.f32 1.0, %v7695_v8  ;;  %7708 = vpow2.f32 %v7028_v9  ;;  %v7269_v19 = vpop.f32.mrb[24].mxu0 }
 0x747   : > { %v7699_v18 = vpop.eup %7698  ;;  %v6391_v45 = vadd.f32 1.0, %v7697_v54  ;;  %v6209_v44 = vadd.f32 %v7269_v19, %v14229_v35  ;;  %v6200_v41 = vpop.f32.mrb[25].mxu0 }
 0x748   : > { %v7701_v59 = vpop.eup %7700  ;;  %7710 = vrcp.f32 %v6393_v58  ;;  %v6394_v17 = vadd.f32 1.0, %v7699_v18  ;;  %v6201_v11 = vadd.f32 %v14229_v35, %v6200_v41  ;;  %v7270_v23 = vpop.f32.mrb[26].mxu0 }
 0x749   : > { %7712 = vrcp.f32 %v6391_v45  ;;  %v6392_v28 = vadd.f32 1.0, %v7701_v59  ;;  %v7033_v25 = vmul.f32 -1.442695, %v6209_v44  ;;  %v6212_v1 = vadd.f32 %v7270_v23, %v14229_v35  ;;  %v6203_v3 = vpop.f32.mrb[27].mxu0 }
 0x74a   : > { %7714 = vrcp.f32 %v6394_v17  ;;  %v7031_v16 = vmul.f32 -1.442695, %v6201_v11  ;;  %v6204_v42 = vadd.f32 %v14229_v35, %v6203_v3 }
 0x74b   : > { %7716 = vrcp.f32 %v6392_v28  ;;  %v7034_v56 = vmul.f32 -1.442695, %v6212_v1 }
 0x74c   : > { %7718 = vpow2.f32 %v7033_v25  ;;  %v7032_v57 = vmul.f32 -1.442695, %v6204_v42 }
 0x74d   : > { %v7703_v63 = vpop.eup %7702  ;;  %7720 = vpow2.f32 %v7031_v16 }
 0x74e   : > { %v7705_v33 = vpop.eup %7704  ;;  %v6397_v47 = vadd.f32 1.0, %v7703_v63  ;;  %7722 = vpow2.f32 %v7034_v56  ;;  %v7273_v10 = vpop.f32.mrb[28].mxu0 }
 0x74f   : > { %v7707_v22 = vpop.eup %7706  ;;  %v6395_v24 = vadd.f32 1.0, %v7705_v33  ;;  %7724 = vpow2.f32 %v7032_v57  ;;  %v6225_v13 = vadd.f32 %v7273_v10, %v14229_v35  ;;  %v6216_v27 = vpop.f32.mrb[29].mxu0 }
 0x750   : > { %v7709_v48 = vpop.eup %7708  ;;  %7726 = vrcp.f32 %v6397_v47  ;;  %v6398_v36 = vadd.f32 1.0, %v7707_v22  ;;  %v6217_v38 = vadd.f32 %v14229_v35, %v6216_v27  ;;  %v7274_v43 = vpop.f32.mrb[30].mxu0 }
 0x751   : > { %7728 = vrcp.f32 %v6395_v24  ;;  %v6396_v29 = vadd.f32 1.0, %v7709_v48  ;;  %v7037_v52 = vmul.f32 -1.442695, %v6225_v13  ;;  %v6228_v34 = vadd.f32 %v7274_v43, %v14229_v35  ;;  %v6219_v39 = vpop.f32.mrb[31].mxu0 }
 0x752   : > { %v7711_v61 = vpop.eup %7710  ;;  %7730 = vrcp.f32 %v6398_v36  ;;  %v7035_v49 = vmul.f32 -1.442695, %v6217_v38  ;;  %v6220_v20 = vadd.f32 %v14229_v35, %v6219_v39 }
 0x753   : > { %v7713_v37 = vpop.eup %7712  ;;  %6490 = vst.msk [vmem:[%s14248_s30 + $0x10] sm:$0xff] %vm6487_vm8, %v7711_v61  ;;  %7732 = vrcp.f32 %v6396_v29  ;;  %v7038_v51 = vmul.f32 -1.442695, %v6228_v34 }
 0x754   : > { %v7715_v55 = vpop.eup %7714  ;;  %6488 = vst.msk [vmem:[%s14248_s30] sm:$0xff] %vm6487_vm8, %v7713_v37  ;;  %7734 = vpow2.f32 %v7037_v52  ;;  %v7036_v53 = vmul.f32 -1.442695, %v6220_v20 }
 0x755   : > { %v7717_v15 = vpop.eup %7716  ;;  %6491 = vst.msk [vmem:[%s14248_s30 + $0x18] sm:$0xff] %vm6487_vm8, %v7715_v55  ;;  %7736 = vpow2.f32 %v7035_v49 }
 0x756   : > { %v7719_v4 = vpop.eup %7718  ;;  %6489 = vst.msk [vmem:[%s14248_s30 + $0x8] sm:$0xff] %vm6487_vm8, %v7717_v15  ;;  %7738 = vpow2.f32 %v7038_v51  ;;  %v7277_v7 = vpop.f32.mrb[32].mxu0 }
 0x757   : > { %v7721_v5 = vpop.eup %7720  ;;  %v6401_v21 = vadd.f32 1.0, %v7719_v4  ;;  %7740 = vpow2.f32 %v7036_v53  ;;  %v6241_v46 = vadd.f32 %v7277_v7, %v14229_v35  ;;  %v6232_v0 = vpop.f32.mrb[33].mxu0 }
 0x758   : > { %v7723_v32 = vpop.eup %7722  ;;  %v6399_v40 = vadd.f32 1.0, %v7721_v5  ;;  %v6233_v26 = vadd.f32 %v14229_v35, %v6232_v0  ;;  %v7278_v2 = vpop.f32.mrb[34].mxu0 }
 0x759   : > { %v7725_v12 = vpop.eup %7724  ;;  %7742 = vrcp.f32 %v6401_v21  ;;  %v6402_v50 = vadd.f32 1.0, %v7723_v32  ;;  %v7041_v6 = vmul.f32 -1.442695, %v6241_v46  ;;  %v6244_v31 = vadd.f32 %v7278_v2, %v14229_v35  ;;  %v6235_v62 = vpop.f32.mrb[35].mxu0 }
 0x75a   : > { %v7727_v60 = vpop.eup %7726  ;;  %7744 = vrcp.f32 %v6399_v40  ;;  %v6400_v14 = vadd.f32 1.0, %v7725_v12  ;;  %v7039_v30 = vmul.f32 -1.442695, %v6233_v26  ;;  %v6236_v9 = vadd.f32 %v14229_v35, %v6235_v62 }
 0x75b   : > { %v7729_v8 = vpop.eup %7728  ;;  %6494 = vst.msk [vmem:[%s14248_s30 + $0x30] sm:$0xff] %vm6487_vm8, %v7727_v60  ;;  %7746 = vrcp.f32 %v6402_v50  ;;  %v7042_v54 = vmul.f32 -1.442695, %v6244_v31 }
 0x75c   : > { %v7731_v58 = vpop.eup %7730  ;;  %6492 = vst.msk [vmem:[%s14248_s30 + $0x20] sm:$0xff] %vm6487_vm8, %v7729_v8  ;;  %7748 = vrcp.f32 %v6400_v14  ;;  %v7040_v19 = vmul.f32 -1.442695, %v6236_v9 }
 0x75d   : > { %v7733_v18 = vpop.eup %7732  ;;  %6495 = vst.msk [vmem:[%s14248_s30 + $0x38] sm:$0xff] %vm6487_vm8, %v7731_v58  ;;  %7750 = vpow2.f32 %v7041_v6 }
 0x75e   : > { %v7735_v45 = vpop.eup %7734  ;;  %6493 = vst.msk [vmem:[%s14248_s30 + $0x28] sm:$0xff] %vm6487_vm8, %v7733_v18  ;;  %7752 = vpow2.f32 %v7039_v30  ;;  %v7281_v44 = vpop.f32.mrb[36].mxu0 }
 0x75f   : > { %v7737_v41 = vpop.eup %7736  ;;  %v6405_v59 = vadd.f32 1.0, %v7735_v45  ;;  %7754 = vpow2.f32 %v7042_v54  ;;  %v6257_v17 = vadd.f32 %v7281_v44, %v14229_v35  ;;  %v6248_v11 = vpop.f32.mrb[37].mxu0 }
 0x760   : > { %v7739_v23 = vpop.eup %7738  ;;  %v6403_v28 = vadd.f32 1.0, %v7737_v41  ;;  %7756 = vpow2.f32 %v7040_v19  ;;  %v6249_v25 = vadd.f32 %v14229_v35, %v6248_v11  ;;  %v7282_v1 = vpop.f32.mrb[38].mxu0 }
 0x761   : > { %v7741_v3 = vpop.eup %7740  ;;  %7758 = vrcp.f32 %v6405_v59  ;;  %v6406_v16 = vadd.f32 1.0, %v7739_v23  ;;  %v7045_v42 = vmul.f32 -1.442695, %v6257_v17  ;;  %v6260_v56 = vadd.f32 %v7282_v1, %v14229_v35  ;;  %v6251_v57 = vpop.f32.mrb[39].mxu0 }
 0x762   : > { %7760 = vrcp.f32 %v6403_v28  ;;  %v6404_v63 = vadd.f32 1.0, %v7741_v3  ;;  %v7043_v33 = vmul.f32 -1.442695, %v6249_v25  ;;  %v6252_v47 = vadd.f32 %v14229_v35, %v6251_v57 }
 0x763   : > { %v7743_v10 = vpop.eup %7742  ;;  %7762 = vrcp.f32 %v6406_v16  ;;  %v7046_v22 = vmul.f32 -1.442695, %v6260_v56 }
 0x764   : > { %v7745_v24 = vpop.eup %7744  ;;  %6498 = vst.msk [vmem:[%s14248_s30 + $0x50] sm:$0xff] %vm6487_vm8, %v7743_v10  ;;  %7764 = vrcp.f32 %v6404_v63  ;;  %v7044_v13 = vmul.f32 -1.442695, %v6252_v47 }
 0x765   : > { %v7747_v27 = vpop.eup %7746  ;;  %6496 = vst.msk [vmem:[%s14248_s30 + $0x40] sm:$0xff] %vm6487_vm8, %v7745_v24  ;;  %7766 = vpow2.f32 %v7045_v42 }
 0x766   : > { %v7749_v48 = vpop.eup %7748  ;;  %6499 = vst.msk [vmem:[%s14248_s30 + $0x58] sm:$0xff] %vm6487_vm8, %v7747_v27  ;;  %7768 = vpow2.f32 %v7043_v33 }
 0x767   : > { %v7751_v36 = vpop.eup %7750  ;;  %6497 = vst.msk [vmem:[%s14248_s30 + $0x48] sm:$0xff] %vm6487_vm8, %v7749_v48  ;;  %7770 = vpow2.f32 %v7046_v22 }
 0x768   : > { %v7753_v38 = vpop.eup %7752  ;;  %v6409_v43 = vadd.f32 1.0, %v7751_v36  ;;  %7772 = vpow2.f32 %v7044_v13 }
 0x769   : > { %v7755_v29 = vpop.eup %7754  ;;  %v6407_v52 = vadd.f32 1.0, %v7753_v38 }
 0x76a   : > { %v7757_v34 = vpop.eup %7756  ;;  %7774 = vrcp.f32 %v6409_v43  ;;  %v6410_v39 = vadd.f32 1.0, %v7755_v29 }
 0x76b   : > { %v7759_v61 = vpop.eup %7758  ;;  %7776 = vrcp.f32 %v6407_v52  ;;  %v6408_v49 = vadd.f32 1.0, %v7757_v34 }
 0x76c   : > { %v7761_v20 = vpop.eup %7760  ;;  %6502 = vst.msk [vmem:[%s14248_s30 + $0x70] sm:$0xff] %vm6487_vm8, %v7759_v61  ;;  %7778 = vrcp.f32 %v6410_v39 }
 0x76d   : > { %v7763_v37 = vpop.eup %7762  ;;  %6500 = vst.msk [vmem:[%s14248_s30 + $0x60] sm:$0xff] %vm6487_vm8, %v7761_v20  ;;  %7780 = vrcp.f32 %v6408_v49 }
 0x76e   : > { %v7765_v51 = vpop.eup %7764  ;;  %6503 = vst.msk [vmem:[%s14248_s30 + $0x78] sm:$0xff] %vm6487_vm8, %v7763_v37 }
 0x76f   : > { %v7767_v55 = vpop.eup %7766  ;;  %6501 = vst.msk [vmem:[%s14248_s30 + $0x68] sm:$0xff] %vm6487_vm8, %v7765_v51 }
 0x770   : > { %v7769_v53 = vpop.eup %7768  ;;  %v6413_v15 = vadd.f32 1.0, %v7767_v55 }
 0x771   : > { %v7771_v4 = vpop.eup %7770  ;;  %v6411_v7 = vadd.f32 1.0, %v7769_v53 }
 0x772   : > { %v7773_v5 = vpop.eup %7772  ;;  %7782 = vrcp.f32 %v6413_v15  ;;  %v6414_v21 = vadd.f32 1.0, %v7771_v4 }
 0x773   : > { %7784 = vrcp.f32 %v6411_v7  ;;  %v6412_v46 = vadd.f32 1.0, %v7773_v5 }
 0x774   : > { %v7775_v0 = vpop.eup %7774  ;;  %7786 = vrcp.f32 %v6414_v21 }
 0x775   : > { %v7777_v32 = vpop.eup %7776  ;;  %6506 = vst.msk [vmem:[%s14248_s30 + $0x90] sm:$0xff] %vm6487_vm8, %v7775_v0  ;;  %7788 = vrcp.f32 %v6412_v46 }
 0x776   : > { %v7779_v40 = vpop.eup %7778  ;;  %6504 = vst.msk [vmem:[%s14248_s30 + $0x80] sm:$0xff] %vm6487_vm8, %v7777_v32 }
 0x777   : > { %v7781_v26 = vpop.eup %7780  ;;  %6507 = vst.msk [vmem:[%s14248_s30 + $0x98] sm:$0xff] %vm6487_vm8, %v7779_v40 }
 0x778   : > { %6505 = vst.msk [vmem:[%s14248_s30 + $0x88] sm:$0xff] %vm6487_vm8, %v7781_v26 }
 0x77c   : > { %v7783_v2 = vpop.eup %7782 }
 0x77d   : > { %v7785_v12 = vpop.eup %7784  ;;  %6510 = vst.msk [vmem:[%s14248_s30 + $0xb0] sm:$0xff] %vm6487_vm8, %v7783_v2 }
 0x77e   : > { %v7787_v50 = vpop.eup %7786  ;;  %6508 = vst.msk [vmem:[%s14248_s30 + $0xa0] sm:$0xff] %vm6487_vm8, %v7785_v12 }
 0x77f   : > { %v7789_v6 = vpop.eup %7788  ;;  %6511 = vst.msk [vmem:[%s14248_s30 + $0xb8] sm:$0xff] %vm6487_vm8, %v7787_v50 }
 0x780   : > { %6509 = vst.msk [vmem:[%s14248_s30 + $0xa8] sm:$0xff] %vm6487_vm8, %v7789_v6 }
 0x7be   : > { %v7285_v31 = vpop.f32.mrb[40].mxu0 }
 0x7bf   : > { %v6273_v62 = vadd.f32 %v7285_v31, %v14229_v35  ;;  %v6264_v60 = vpop.f32.mrb[41].mxu0 }
 0x7c0   : > { %v6265_v14 = vadd.f32 %v14229_v35, %v6264_v60  ;;  %v7286_v30 = vpop.f32.mrb[42].mxu0 }
 0x7c1   : > { %v7049_v9 = vmul.f32 -1.442695, %v6273_v62  ;;  %v6276_v8 = vadd.f32 %v7286_v30, %v14229_v35  ;;  %v6267_v54 = vpop.f32.mrb[43].mxu0 }
 0x7c2   : > { %v7047_v58 = vmul.f32 -1.442695, %v6265_v14  ;;  %v6268_v19 = vadd.f32 %v14229_v35, %v6267_v54 }
 0x7c3   : > { %7790 = vpow2.f32 %v7049_v9  ;;  %v7050_v18 = vmul.f32 -1.442695, %v6276_v8 }
 0x7c4   : > { %7792 = vpow2.f32 %v7047_v58  ;;  %v7048_v45 = vmul.f32 -1.442695, %v6268_v19 }
 0x7c5   : > { %7794 = vpow2.f32 %v7050_v18 }
 0x7c6   : > { %7796 = vpow2.f32 %v7048_v45 }
 0x7cd   : > { %v7791_v44 = vpop.eup %7790 }
 0x7ce   : > { %v7793_v41 = vpop.eup %7792  ;;  %v6417_v59 = vadd.f32 1.0, %v7791_v44 }
 0x7cf   : > { %v7795_v17 = vpop.eup %7794  ;;  %v6415_v11 = vadd.f32 1.0, %v7793_v41 }
 0x7d0   : > { %v7797_v23 = vpop.eup %7796  ;;  %7798 = vrcp.f32 %v6417_v59  ;;  %v6418_v28 = vadd.f32 1.0, %v7795_v17 }
 0x7d1   : > { %7800 = vrcp.f32 %v6415_v11  ;;  %v6416_v25 = vadd.f32 1.0, %v7797_v23 }
 0x7d2   : > { %7802 = vrcp.f32 %v6418_v28 }
 0x7d3   : > { %7804 = vrcp.f32 %v6416_v25 }
 0x7da   : > { %v7799_v1 = vpop.eup %7798 }
 0x7db   : > { %v7801_v3 = vpop.eup %7800  ;;  %6514 = vst.msk [vmem:[%s14248_s30 + $0xd0] sm:$0xff] %vm6487_vm8, %v7799_v1  ;;  %v7289_v16 = vpop.f32.mrb[44].mxu0 }
 0x7dc   : > { %v7803_v42 = vpop.eup %7802  ;;  %6512 = vst.msk [vmem:[%s14248_s30 + $0xc0] sm:$0xff] %vm6487_vm8, %v7801_v3  ;;  %v6289_v56 = vadd.f32 %v7289_v16, %v14229_v35  ;;  %v6280_v57 = vpop.f32.mrb[45].mxu0 }
 0x7dd   : > { %v7805_v63 = vpop.eup %7804  ;;  %6515 = vst.msk [vmem:[%s14248_s30 + $0xd8] sm:$0xff] %vm6487_vm8, %v7803_v42  ;;  %v6281_v33 = vadd.f32 %v14229_v35, %v6280_v57  ;;  %v7290_v47 = vpop.f32.mrb[46].mxu0 }
 0x7de   : > { %6513 = vst.msk [vmem:[%s14248_s30 + $0xc8] sm:$0xff] %vm6487_vm8, %v7805_v63  ;;  %v7053_v10 = vmul.f32 -1.442695, %v6289_v56  ;;  %v6292_v22 = vadd.f32 %v7290_v47, %v14229_v35  ;;  %v6283_v24 = vpop.f32.mrb[47].mxu0 }
 0x7df   : > { %v7051_v13 = vmul.f32 -1.442695, %v6281_v33  ;;  %v6284_v27 = vadd.f32 %v14229_v35, %v6283_v24 }
 0x7e0   : > { %7806 = vpow2.f32 %v7053_v10  ;;  %v7054_v48 = vmul.f32 -1.442695, %v6292_v22 }
 0x7e1   : > { %7808 = vpow2.f32 %v7051_v13  ;;  %v7052_v36 = vmul.f32 -1.442695, %v6284_v27 }
 0x7e2   : > { %7810 = vpow2.f32 %v7054_v48 }
 0x7e3   : > { %7812 = vpow2.f32 %v7052_v36 }
 0x7ea   : > { %v7807_v38 = vpop.eup %7806 }
 0x7eb   : > { %v7809_v43 = vpop.eup %7808  ;;  %v6421_v29 = vadd.f32 1.0, %v7807_v38 }
 0x7ec   : > { %v7811_v52 = vpop.eup %7810  ;;  %v6419_v34 = vadd.f32 1.0, %v7809_v43 }
 0x7ed   : > { %v7813_v39 = vpop.eup %7812  ;;  %7814 = vrcp.f32 %v6421_v29  ;;  %v6422_v61 = vadd.f32 1.0, %v7811_v52 }
 0x7ee   : > { %7816 = vrcp.f32 %v6419_v34  ;;  %v6420_v35 = vadd.f32 1.0, %v7813_v39 }
 0x7ef   : > { %7818 = vrcp.f32 %v6422_v61 }
 0x7f0   : > { %7820 = vrcp.f32 %v6420_v35 }
 0x7f5   : > { %6526 = sbr.rel (!%p8067_p4) target bundleno = 2100 (0x834), region = 60 }
 0x7f7   : > { %v7815_v49 = vpop.eup %7814 }
 0x7f8   : > { %v7817_v20 = vpop.eup %7816  ;;  %6518 = vst.msk [vmem:[%s14248_s30 + $0xf0] sm:$0xff] %vm6487_vm8, %v7815_v49 }
 0x7f9   : > { %v7819_v37 = vpop.eup %7818  ;;  %6516 = vst.msk [vmem:[%s14248_s30 + $0xe0] sm:$0xff] %vm6487_vm8, %v7817_v20 }
 0x7fa   : > { %v7821_v51 = vpop.eup %7820  ;;  %6519 = vst.msk [vmem:[%s14248_s30 + $0xf8] sm:$0xff] %vm6487_vm8, %v7819_v37 }
 0x7fb   : > { %6517 = vst.msk [vmem:[%s14248_s30 + $0xe8] sm:$0xff] %vm6487_vm8, %v7821_v51 }
 0x7fc   : > { %s15673_s25 = smov (!%p6529_p8, %s6528_s25), 32 }
 0x7fd   : > { %s7057_s15 = sshll.u32 %s15673_s25, 7 }
 0x7fe   : > { %p7060_p9 = scmp.eq.s32.totalorder %s7057_s15, 0 }
 0x7ff   : > { %s14343_s19 = sshrl.u32 (!%p7060_p9), %s15673_s25, 5 }
 0x800   : > { %6537 = sbr.rel (%p7060_p9) target bundleno = 2100 (0x834), region = 64  ;;  %p7061_p10 = scmp.le.s32.totalorder (!%p7060_p9), %s14343_s19, 0 }
 0x807   : > { %6815 = sbr.rel (%p7061_p10) target bundleno = 2079 (0x81f), region = 140  ;;  %s15664_s12 = smov (!%p7061_p10), %s14337_s27 }
 0x808   : > { %s15665_s17 = smov (!%p7061_p10), %s14248_s30  ;;  %s14352_s18 = smov (!%p7061_p10), 0  }
 0x809   : > { %s14354_s28 = smov (!%p7061_p10), 0  }
 0x80e LB: >> { %v6661_v55 = vld [vmem:[%s7947_s17] sm:$0xff]  ;;  %v6663_v53 = vld [vmem:[%s7947_s17 + $0x8] sm:$0xff]  ;;  %v6665_v15 = vld [vmem:[%s7947_s17 + $0x10] sm:$0xff]  ;;  %s6725_s21 = sadd.s32 1, %s7951_s18  ;;  %s6655_s28 = sadd.s32 1, %s7955_s28   ;;  %s7955_s28 = sphi %s14354_s28, %s6655_s28   ;;  %s7951_s18 = sphi %s14352_s18, %s15668_s18   ;;  %s7947_s17 = sphi %s15665_s17, %s15667_s17   ;;  %s7943_s12 = sphi %s15664_s12, %s15666_s12  }
 0x80f   : >> { %6662 = vst [vmem:[%s7943_s12] sm:$0xff] %v6661_v55  ;;  %6664 = vst [vmem:[%s7943_s12 + $0x8] sm:$0xff] %v6663_v53  ;;  %v6667_v4 = vld [vmem:[%s7947_s17 + $0x18] sm:$0xff]  ;;  %v6669_v7 = vld [vmem:[%s7947_s17 + $0x20] sm:$0xff]  ;;  %p6726_p11 = scmp.ge.s32.totalorder %s6725_s21, %s14343_s19  ;;  %p6654_p12 = scmp.ge.s32.totalorder %s6655_s28, %s14343_s19 }
 0x810   : >> { %6666 = vst [vmem:[%s7943_s12 + $0x10] sm:$0xff] %v6665_v15  ;;  %v6671_v5 = vld [vmem:[%s7947_s17 + $0x28] sm:$0xff]  ;;  %6668 = vst [vmem:[%s7943_s12 + $0x18] sm:$0xff] %v6667_v4  ;;  %v6673_v21 = vld [vmem:[%s7947_s17 + $0x30] sm:$0xff] }
 0x811   : >> { %6670 = vst [vmem:[%s7943_s12 + $0x20] sm:$0xff] %v6669_v7  ;;  %6672 = vst [vmem:[%s7943_s12 + $0x28] sm:$0xff] %v6671_v5  ;;  %v6675_v46 = vld [vmem:[%s7947_s17 + $0x38] sm:$0xff]  ;;  %v6677_v0 = vld [vmem:[%s7947_s17 + $0x40] sm:$0xff]  ;;  %s15675_s21 = smov (%p6726_p11, %s6725_s21), 0 }
 0x812   : >> { %6674 = vst [vmem:[%s7943_s12 + $0x30] sm:$0xff] %v6673_v21  ;;  %6676 = vst [vmem:[%s7943_s12 + $0x38] sm:$0xff] %v6675_v46  ;;  %v6679_v32 = vld [vmem:[%s7947_s17 + $0x48] sm:$0xff]  ;;  %v6681_v40 = vld [vmem:[%s7947_s17 + $0x50] sm:$0xff]  ;;  %s7062_s14 = sshll.u32 %s15675_s21, 8  ;;  %s15668_s18 = smov %s15675_s21 }
 0x813   : >> { %6678 = vst [vmem:[%s7943_s12 + $0x40] sm:$0xff] %v6677_v0  ;;  %v6683_v26 = vld [vmem:[%s7947_s17 + $0x58] sm:$0xff]  ;;  %6680 = vst [vmem:[%s7943_s12 + $0x48] sm:$0xff] %v6679_v32  ;;  %v6685_v2 = vld [vmem:[%s7947_s17 + $0x60] sm:$0xff]  ;;  %s14410_s11 = scalar_lea.vmem %s14248_s30, %s7062_s14 [#allocation3]   ;;  %s6731_s20 = scalar_lea.vmem %s14337_s27, %s7062_s14  }
 0x814   : >> { %6682 = vst [vmem:[%s7943_s12 + $0x50] sm:$0xff] %v6681_v40  ;;  %6684 = vst [vmem:[%s7943_s12 + $0x58] sm:$0xff] %v6683_v26  ;;  %v6687_v12 = vld [vmem:[%s7947_s17 + $0x68] sm:$0xff]  ;;  %v6689_v50 = vld [vmem:[%s7947_s17 + $0x70] sm:$0xff] }
 0x815   : >> { %6686 = vst [vmem:[%s7943_s12 + $0x60] sm:$0xff] %v6685_v2  ;;  %6688 = vst [vmem:[%s7943_s12 + $0x68] sm:$0xff] %v6687_v12  ;;  %v6691_v6 = vld [vmem:[%s7947_s17 + $0x78] sm:$0xff]  ;;  %v6693_v31 = vld [vmem:[%s7947_s17 + $0x80] sm:$0xff] }
 0x816   : >> { %6690 = vst [vmem:[%s7943_s12 + $0x70] sm:$0xff] %v6689_v50  ;;  %v6695_v62 = vld [vmem:[%s7947_s17 + $0x88] sm:$0xff]  ;;  %6692 = vst [vmem:[%s7943_s12 + $0x78] sm:$0xff] %v6691_v6  ;;  %v6697_v60 = vld [vmem:[%s7947_s17 + $0x90] sm:$0xff] }
 0x817   : >> { %6694 = vst [vmem:[%s7943_s12 + $0x80] sm:$0xff] %v6693_v31  ;;  %6696 = vst [vmem:[%s7943_s12 + $0x88] sm:$0xff] %v6695_v62  ;;  %v6699_v14 = vld [vmem:[%s7947_s17 + $0x98] sm:$0xff]  ;;  %v6701_v30 = vld [vmem:[%s7947_s17 + $0xa0] sm:$0xff] }
 0x818   : >> { %6698 = vst [vmem:[%s7943_s12 + $0x90] sm:$0xff] %v6697_v60  ;;  %6700 = vst [vmem:[%s7943_s12 + $0x98] sm:$0xff] %v6699_v14  ;;  %v6703_v9 = vld [vmem:[%s7947_s17 + $0xa8] sm:$0xff]  ;;  %v6705_v8 = vld [vmem:[%s7947_s17 + $0xb0] sm:$0xff]  ;;  %6657 = sbr.rel (!%p6654_p12) target bundleno = 2062 (0x80e), region = 146 }
 0x819   : >> { %6702 = vst [vmem:[%s7943_s12 + $0xa0] sm:$0xff] %v6701_v30  ;;  %v6707_v54 = vld [vmem:[%s7947_s17 + $0xb8] sm:$0xff]  ;;  %6704 = vst [vmem:[%s7943_s12 + $0xa8] sm:$0xff] %v6703_v9  ;;  %v6709_v58 = vld [vmem:[%s7947_s17 + $0xc0] sm:$0xff] }
 0x81a   : >> { %6706 = vst [vmem:[%s7943_s12 + $0xb0] sm:$0xff] %v6705_v8  ;;  %6708 = vst [vmem:[%s7943_s12 + $0xb8] sm:$0xff] %v6707_v54  ;;  %v6711_v19 = vld [vmem:[%s7947_s17 + $0xc8] sm:$0xff]  ;;  %v6713_v18 = vld [vmem:[%s7947_s17 + $0xd0] sm:$0xff] }
 0x81b   : >> { %6710 = vst [vmem:[%s7943_s12 + $0xc0] sm:$0xff] %v6709_v58  ;;  %6712 = vst [vmem:[%s7943_s12 + $0xc8] sm:$0xff] %v6711_v19  ;;  %v6715_v45 = vld [vmem:[%s7947_s17 + $0xd8] sm:$0xff]  ;;  %v6717_v44 = vld [vmem:[%s7947_s17 + $0xe0] sm:$0xff] }
 0x81c   : >> { %6714 = vst [vmem:[%s7943_s12 + $0xd0] sm:$0xff] %v6713_v18  ;;  %v6719_v41 = vld [vmem:[%s7947_s17 + $0xe8] sm:$0xff]  ;;  %6716 = vst [vmem:[%s7943_s12 + $0xd8] sm:$0xff] %v6715_v45  ;;  %v6721_v59 = vld [vmem:[%s7947_s17 + $0xf0] sm:$0xff] }
 0x81d   : >> { %6718 = vst [vmem:[%s7943_s12 + $0xe0] sm:$0xff] %v6717_v44  ;;  %6720 = vst [vmem:[%s7943_s12 + $0xe8] sm:$0xff] %v6719_v41  ;;  %v6723_v17 = vld [vmem:[%s7947_s17 + $0xf8] sm:$0xff]  ;;  %s15667_s17 = smov %s14410_s11 }
 0x81e   : >> { %6722 = vst [vmem:[%s7943_s12 + $0xf0] sm:$0xff] %v6721_v59  ;;  %6724 = vst [vmem:[%s7943_s12 + $0xf8] sm:$0xff] %v6723_v17  ;;  %s15666_s12 = smov %s6731_s20 }
 0x81f PF: > { %s14451_s24 = sand.u32 31, %s15673_s25   ;;  %s7073_s22 = sshll.u32 %s14343_s19, 8 }
 0x820   : > { %s6736_s26 = scalar_lea.vmem %s14248_s30, %s7073_s22 [#allocation3]   ;;  %s6738_s23 = scalar_lea.vmem %s14337_s27, %s7073_s22  }
 0x821   : > { %p7067_p13 = scmp.le.s32.totalorder %s14451_s24, 0 }
 0x822   : > { %s7957_s29 = smov (!%p7067_p13), %s6738_s23   ;;  %s7961_s15 = smov (!%p7067_p13), %s6736_s26  }
 0x823   : > { %6829 = sbr.rel (%p7067_p13) target bundleno = 2100 (0x834), region = 151  ;;  %s7965_s14 = smov (!%p7067_p13), 0  }
 0x824   : > { %s7969_s21 = smov (!%p7067_p13), 0  }
 0x82a LB: >> { %v6748_v11 = vld [vmem:[%s7963_s15] sm:$0xff]  ;;  %s6750_s25 = sadd.s32 1, %s7967_s14  ;;  %s6742_s21 = sadd.s32 1, %s7971_s21   ;;  %s7971_s21 = sphi %s7969_s21, %s6742_s21   ;;  %s7967_s14 = sphi %s7965_s14, %s7966_s14   ;;  %s7963_s15 = sphi %s7961_s15, %s6755_s15   ;;  %s7959_s29 = sphi %s7957_s29, %s6756_s29  }
 0x82b   : >> { %6749 = vst [vmem:[%s7959_s29] sm:$0xff] %v6748_v11  ;;  %p6751_p0 = scmp.ge.s32.totalorder %s6750_s25, %s14451_s24  ;;  %p6741_p1 = scmp.ge.s32.totalorder %s6742_s21, %s14451_s24 }
 0x82d   : >> { %s15677_s25 = smov (%p6751_p0, %s6750_s25), 0  ;;  %6744 = sbr.rel (!%p6741_p1) target bundleno = 2090 (0x82a), region = 157 }
 0x82e   : >> { %s7068_s30 = sshll.u32 %s15677_s25, 3  ;;  %s7966_s14 = smov %s15677_s25  }
 0x82f   : >> { %s6755_s15 = scalar_lea.vmem %s6736_s26, %s7068_s30 [#allocation3]   ;;  %s6756_s29 = scalar_lea.vmem %s6738_s23, %s7068_s30  }
 0x834 PF: > { %p16_p2 = scmp.ge.s32.totalorder %s8057_s13, 6   ;;  %s15669_s30 = smov %s7935_s10 }
 0x835   : > { %s15670_s10 = smov %s8065_s16  ;;  %s15671_s11 = smov %s8057_s13 }
 0x836   :  { %18 = sbr.rel (!%p16_p2) target bundleno = 2 (0x2), region = 168 }

</bundles_post_ra>
